<compile_context>
chip_gen: v5e
topology: v5e:2x2
jax: 0.10.0
libtpu: 0.0.40
codegen_flags: <defaults>
</compile_context>

<pallas_src>
import math

import jax
import jax.numpy as jnp
from jax.experimental import pallas as pl
from jax.experimental.pallas import tpu as pltpu

THRESHOLD = 1.25
CURRENT_DECAY = 0.25
VOLTAGE_DECAY = 0.03


def _round_up(x, m):
    return ((x + m - 1) // m) * m


# ----------------------------------------------------------------------------
# Fused GEMM (bf16 in, f32 accumulate) + CUBA neuron kernel.
# Grid = (row_tiles, T, K_tiles).  CUBA state lives in VMEM scratch across T.
# ----------------------------------------------------------------------------
def _gemm_cuba_kernel(a_ref, b_ref, s_ref, acc_ref, i_ref, v_ref):
    t = pl.program_id(1)
    kk = pl.program_id(2)

    @pl.when(jnp.logical_and(t == 0, kk == 0))
    def _():
        i_ref[...] = jnp.zeros_like(i_ref)
        v_ref[...] = jnp.zeros_like(v_ref)

    @pl.when(kk == 0)
    def _():
        acc_ref[...] = jnp.zeros_like(acc_ref)

    acc_ref[...] += jnp.dot(a_ref[0], b_ref[...],
                            preferred_element_type=jnp.float32)

    @pl.when(kk == pl.num_programs(2) - 1)
    def _():
        cur = (1.0 - CURRENT_DECAY) * i_ref[...] + acc_ref[...]
        vol = (1.0 - VOLTAGE_DECAY) * v_ref[...] + cur
        spk = (vol >= THRESHOLD).astype(jnp.float32)
        i_ref[...] = cur
        v_ref[...] = vol * (1.0 - spk)
        s_ref[0] = spk.astype(s_ref.dtype)


def _pick_tm(M):
    m8 = _round_up(M, 8)
    if m8 >= 1024:
        return 512
    if m8 >= 128:
        return max(8, _round_up(m8 // 2, 8))   # >=2 row tiles for megacore
    return m8


def gemm_cuba(a, b):
    """a: [T, M, K] synapse input rows (time-major), b: [K, Nout] weights.

    Returns bf16 spikes [T, M, Nout] after applying the CUBA neuron per output
    element with the recurrence carried over the T axis.
    """
    T, M, K = a.shape
    K2, Nc = b.shape
    assert K == K2

    tm = _pick_tm(M)
    tk = K if K <= 1024 else 512
    Mp = _round_up(M, tm)
    Kp = _round_up(K, tk)
    Ncp = _round_up(Nc, 128)          # lane-dense output stores

    a = a.astype(jnp.bfloat16)
    b = b.astype(jnp.bfloat16)
    if (Mp, Kp) != (M, K):
        a = jnp.pad(a, ((0, 0), (0, Mp - M), (0, Kp - K)))
    if (Kp, Ncp) != (K, Nc):
        b = jnp.pad(b, ((0, 0), (0, Ncp - Nc))) if Kp == K else \
            jnp.pad(b, ((0, Kp - K), (0, Ncp - Nc)))

    out = pl.pallas_call(
        _gemm_cuba_kernel,
        out_shape=jax.ShapeDtypeStruct((T, Mp, Ncp), jnp.bfloat16),
        grid_spec=pltpu.PrefetchScalarGridSpec(
            num_scalar_prefetch=0,
            grid=(Mp // tm, T, Kp // tk),
            in_specs=[
                pl.BlockSpec((1, tm, tk), lambda i, t, kk: (t, i, kk)),
                pl.BlockSpec((tk, Ncp), lambda i, t, kk: (kk, 0)),
            ],
            out_specs=pl.BlockSpec((1, tm, Ncp), lambda i, t, kk: (t, i, 0)),
            scratch_shapes=[
                pltpu.VMEM((tm, Ncp), jnp.float32),  # GEMM accumulator (= z)
                pltpu.VMEM((tm, Ncp), jnp.float32),  # CUBA current state
                pltpu.VMEM((tm, Ncp), jnp.float32),  # CUBA voltage state
            ],
        ),
        compiler_params=pltpu.CompilerParams(
            dimension_semantics=("parallel", "arbitrary", "arbitrary"),
        ),
    )(a, b)
    return out[:, :M, :Nc]


# ----------------------------------------------------------------------------
# Standalone CUBA kernel (used after the VPU sum-pooling).
# Grid = (feature_tiles, T); state in VMEM scratch per feature tile.
# ----------------------------------------------------------------------------
def _cuba_kernel(z_ref, s_ref, i_ref, v_ref):
    t = pl.program_id(1)

    @pl.when(t == 0)
    def _():
        i_ref[...] = jnp.zeros_like(i_ref)
        v_ref[...] = jnp.zeros_like(v_ref)

    z = z_ref[0].astype(jnp.float32)
    cur = (1.0 - CURRENT_DECAY) * i_ref[...] + z
    vol = (1.0 - VOLTAGE_DECAY) * v_ref[...] + cur
    spk = (vol >= THRESHOLD).astype(jnp.float32)
    i_ref[...] = cur
    v_ref[...] = vol * (1.0 - spk)
    s_ref[0] = spk.astype(s_ref.dtype)


def cuba_neuron(z):
    """z: [T, ...features...] synaptic input -> bf16 spikes of the same shape."""
    shape = z.shape
    T = shape[0]
    F = math.prod(shape[1:])
    PT = 16                              # sublane tile of the feature axis
    P = (F + 127) // 128
    P_pad = _round_up(max(P, 1), PT)
    F_pad = P_pad * 128

    zf = z.reshape(T, F).astype(jnp.bfloat16)
    if F_pad != F:
        # Padded lanes have z == 0 and never spike since THRESHOLD > 0.
        zf = jnp.pad(zf, ((0, 0), (0, F_pad - F)))
    zf = zf.reshape(T, P_pad, 128)

    spikes = pl.pallas_call(
        _cuba_kernel,
        out_shape=jax.ShapeDtypeStruct((T, P_pad, 128), jnp.bfloat16),
        grid_spec=pltpu.PrefetchScalarGridSpec(
            num_scalar_prefetch=0,
            grid=(P_pad // PT, T),
            in_specs=[pl.BlockSpec((1, PT, 128), lambda f, t: (t, f, 0))],
            out_specs=pl.BlockSpec((1, PT, 128), lambda f, t: (t, f, 0)),
            scratch_shapes=[
                pltpu.VMEM((PT, 128), jnp.float32),  # current state
                pltpu.VMEM((PT, 128), jnp.float32),  # voltage state
            ],
        ),
        compiler_params=pltpu.CompilerParams(
            dimension_semantics=("parallel", "arbitrary"),
        ),
    )(zf)

    return spikes.reshape(T, F_pad)[:, :F].reshape(shape)


# ----------------------------------------------------------------------------
# Block-level glue (layout only; all MACs and LIF recurrences are in Pallas,
# the pool window sum is a cheap VPU reduction as per reviewer guidance).
# ----------------------------------------------------------------------------
def sum_pool_block(x, k):
    """slayer.block.cuba.Pool(k): sum-pool (unit weights) + CUBA neuron.

    x: [T, N, H, W, C] bf16 spikes.
    """
    T, N, H, W, C = x.shape
    Ho, Wo = H // k, W // k
    # VPU window reduction; spike counts <= k*k are exact in bf16.
    z = x.reshape(T, N, Ho, k, Wo, k, C).sum(axis=(3, 5))
    return cuba_neuron(z)


def conv_block(x, w, k, pad):
    """slayer.block.cuba.Conv: 2D conv (per timestep) + CUBA neuron, fused GEMM+LIF.

    x: [T, N, H, W, Cin] bf16 spikes; w: [Cout, Cin, k, k] float32.
    weight_norm(g=||v||) is identity at init and therefore skipped.
    """
    T, N, H, W, Cin = x.shape
    Cout = w.shape[0]
    Ho = H + 2 * pad - k + 1
    Wo = W + 2 * pad - k + 1
    xp = jnp.pad(x, ((0, 0), (0, 0), (pad, pad), (pad, pad), (0, 0)))
    # im2col with reduction order (Cin, kh, kw) matching w.reshape(Cout, Cin*k*k).
    cols = jnp.stack(
        [xp[:, :, di:di + Ho, dj:dj + Wo, :] for di in range(k) for dj in range(k)],
        axis=-1,
    )  # [T, N, Ho, Wo, Cin, k*k]
    cols = cols.reshape(T, N * Ho * Wo, Cin * k * k)
    wm = w.reshape(Cout, Cin * k * k).T  # [K, Cout]
    spikes = gemm_cuba(cols, wm)         # [T, N*Ho*Wo, Cout] bf16
    return spikes.reshape(T, N, Ho, Wo, Cout)


def dense_block(x, w):
    """slayer.block.cuba.Dense: matmul (per timestep) + CUBA neuron, fused GEMM+LIF.

    x: [T, N, F] bf16 spikes; w: [Out, F] float32.
    """
    return gemm_cuba(x, w.T)             # [T, N, Out] bf16


def init_params(key, num_classes=10):
    num_logits = 1 if num_classes == 2 else num_classes
    ks = jax.random.split(key, 5)

    def init(k, shape):
        fan_in = math.prod(shape[1:])
        return jax.random.normal(k, shape, jnp.float32) / math.sqrt(fan_in)

    return {
        "conv1": init(ks[0], (16, 2, 5, 5)),
        "conv2": init(ks[1], (32, 16, 3, 3)),
        "conv3": init(ks[2], (64, 32, 3, 3)),
        "fc1": init(ks[3], (512, 4096)),
        "fc2": init(ks[4], (num_logits, 512)),
    }


def network_forward(spike, params):
    # spike: [N, C, H, W, T] (lava-dl NCHWT) -> internal time-major [T, N, H, W, C] bf16.
    x = jnp.transpose(spike, (4, 0, 2, 3, 1)).astype(jnp.bfloat16)

    x = sum_pool_block(x, 4)                     # Pool(4)
    x = conv_block(x, params["conv1"], 5, 1)     # Conv(2 -> 16, k=5, pad=1)  (delay=0 => identity)
    x = sum_pool_block(x, 2)                     # Pool(2)
    x = conv_block(x, params["conv2"], 3, 1)     # Conv(16 -> 32, k=3, pad=1)
    x = sum_pool_block(x, 2)                     # Pool(2)
    x = conv_block(x, params["conv3"], 3, 1)     # Conv(32 -> 64, k=3, pad=1)

    T, N, H, W, C = x.shape
    x = x.transpose(0, 1, 4, 2, 3).reshape(T, N, C * H * W)   # Flatten in (C, H, W) order

    x = dense_block(x, params["fc1"])            # Dense(4096 -> 512)
    x = dense_block(x, params["fc2"])            # Dense(512 -> num_logits)

    # back to lava-dl layout [N, num_logits, T]; spikes are 0/1 so f32 cast is exact.
    return jnp.transpose(x, (1, 2, 0)).astype(jnp.float32)


if __name__ == "__main__":
    key = jax.random.PRNGKey(0)
    k_in, k_par = jax.random.split(key)

    # Spatial size 136 so that after Pool(4)/Conv5p1/Pool2/Conv3p1/Pool2/Conv3p1
    # the flattened feature count is exactly 64*8*8 = 4096 as Dense(4096, 512) requires.
    N, C, H, W, T = 2, 2, 136, 136, 8
    spike = (jax.random.uniform(k_in, (N, C, H, W, T)) < 0.3).astype(jnp.float32)

    params = init_params(k_par, num_classes=10)

    out = jax.jit(network_forward)(spike, params)
    out = jax.block_until_ready(out)

    assert out.shape == (N, 10, T), out.shape
    assert out.dtype == jnp.float32
    print("KERNEL_OK")
</pallas_src>

<mosaic_0001>
module attributes {stable_mosaic.version = 11 : i64} {
  func.func @_cuba_kernel(%arg0: i32, %arg1: i32, %arg2: memref<1x16x128xbf16, #tpu.memory_space<vmem>>, %arg3: memref<1x16x128xbf16, #tpu.memory_space<vmem>>, %arg4: memref<16x128xf32, #tpu.memory_space<vmem>>, %arg5: memref<16x128xf32, #tpu.memory_space<vmem>>) attributes {dimension_semantics = [#tpu.dimension_semantics<parallel>, #tpu.dimension_semantics<arbitrary>], iteration_bounds = array<i64: 3, 8>, scalar_prefetch = 0 : i64, scratch_operands = 2 : i64, tpu.core_type = #tpu.core_type<tc>, window_params = [{transform_indices = @transform_0, window_bounds = array<i64: 1, 16, 128>}, {transform_indices = @transform_1, window_bounds = array<i64: 1, 16, 128>}]} {
    %c0_i32 = arith.constant 0 : i32
    %0 = arith.cmpi eq, %arg1, %c0_i32 : i32
    %1 = arith.extui %0 : i1 to i32
    %c0_i32_0 = arith.constant 0 : i32
    %2 = arith.cmpi ne, %1, %c0_i32_0 : i32
    scf.if %2 {
      %cst_17 = arith.constant 0.000000e+00 : f32
      %27 = vector.broadcast %cst_17 : f32 to vector<16x128xf32>
      %c0_18 = arith.constant 0 : index
      %c0_19 = arith.constant 0 : index
      %28 = vector.load %arg4[%c0_18, %c0_19] : memref<16x128xf32, #tpu.memory_space<vmem>>, vector<16x128xf32>
      tpu.vector_store %arg4[%c0_18, %c0_19], %27 {strides = array<i32>} : memref<16x128xf32, #tpu.memory_space<vmem>>, vector<16x128xf32>,
      %cst_20 = arith.constant 0.000000e+00 : f32
      %29 = vector.broadcast %cst_20 : f32 to vector<16x128xf32>
      %c0_21 = arith.constant 0 : index
      %c0_22 = arith.constant 0 : index
      %30 = vector.load %arg5[%c0_21, %c0_22] : memref<16x128xf32, #tpu.memory_space<vmem>>, vector<16x128xf32>
      tpu.vector_store %arg5[%c0_21, %c0_22], %29 {strides = array<i32>} : memref<16x128xf32, #tpu.memory_space<vmem>>, vector<16x128xf32>,
    } else {
    }
    %c0 = arith.constant 0 : index
    %c0_1 = arith.constant 0 : index
    %c0_2 = arith.constant 0 : index
    %3 = vector.load %arg2[%c0, %c0_1, %c0_2] : memref<1x16x128xbf16, #tpu.memory_space<vmem>>, vector<1x16x128xbf16>
    %4 = vector.shape_cast %3 : vector<1x16x128xbf16> to vector<16x128xbf16>
    %5 = arith.extf %4 : vector<16x128xbf16> to vector<16x128xf32>
    %c0_3 = arith.constant 0 : index
    %c0_4 = arith.constant 0 : index
    %6 = vector.load %arg4[%c0_3, %c0_4] : memref<16x128xf32, #tpu.memory_space<vmem>>, vector<16x128xf32>
    %cst = arith.constant 7.500000e-01 : f32
    %7 = vector.broadcast %cst : f32 to vector<16x128xf32>
    %8 = arith.mulf %7, %6 : vector<16x128xf32>
    %9 = arith.addf %8, %5 : vector<16x128xf32>
    %c0_5 = arith.constant 0 : index
    %c0_6 = arith.constant 0 : index
    %10 = vector.load %arg5[%c0_5, %c0_6] : memref<16x128xf32, #tpu.memory_space<vmem>>, vector<16x128xf32>
    %cst_7 = arith.constant 9.700000e-01 : f32
    %11 = vector.broadcast %cst_7 : f32 to vector<16x128xf32>
    %12 = arith.mulf %11, %10 : vector<16x128xf32>
    %13 = arith.addf %12, %9 : vector<16x128xf32>
    %cst_8 = arith.constant 1.250000e+00 : f32
    %14 = vector.broadcast %cst_8 : f32 to vector<16x128xf32>
    %15 = arith.cmpf oge, %13, %14 : vector<16x128xf32>
    %16 = arith.extui %15 : vector<16x128xi1> to vector<16x128xi32>
    %17 = arith.sitofp %16 : vector<16x128xi32> to vector<16x128xf32>
    %c0_9 = arith.constant 0 : index
    %c0_10 = arith.constant 0 : index
    %18 = vector.load %arg4[%c0_9, %c0_10] : memref<16x128xf32, #tpu.memory_space<vmem>>, vector<16x128xf32>
    tpu.vector_store %arg4[%c0_9, %c0_10], %9 {strides = array<i32>} : memref<16x128xf32, #tpu.memory_space<vmem>>, vector<16x128xf32>,
    %cst_11 = arith.constant 1.000000e+00 : f32
    %19 = vector.broadcast %cst_11 : f32 to vector<16x128xf32>
    %20 = arith.subf %19, %17 : vector<16x128xf32>
    %21 = arith.mulf %13, %20 : vector<16x128xf32>
    %c0_12 = arith.constant 0 : index
    %c0_13 = arith.constant 0 : index
    %22 = vector.load %arg5[%c0_12, %c0_13] : memref<16x128xf32, #tpu.memory_space<vmem>>, vector<16x128xf32>
    tpu.vector_store %arg5[%c0_12, %c0_13], %21 {strides = array<i32>} : memref<16x128xf32, #tpu.memory_space<vmem>>, vector<16x128xf32>,
    %23 = arith.truncf %17 : vector<16x128xf32> to vector<16x128xbf16>
    %c0_14 = arith.constant 0 : index
    %c0_15 = arith.constant 0 : index
    %c0_16 = arith.constant 0 : index
    %24 = vector.load %arg3[%c0_14, %c0_15, %c0_16] : memref<1x16x128xbf16, #tpu.memory_space<vmem>>, vector<1x16x128xbf16>
    %25 = vector.shape_cast %24 : vector<1x16x128xbf16> to vector<16x128xbf16>
    %26 = vector.shape_cast %23 : vector<16x128xbf16> to vector<1x16x128xbf16>
    tpu.vector_store %arg3[%c0_14, %c0_15, %c0_16], %26 {strides = array<i32>} : memref<1x16x128xbf16, #tpu.memory_space<vmem>>, vector<1x16x128xbf16>,
    return
  }
  func.func @transform_0(%arg0: i32, %arg1: i32) -> (i32, i32, i32) {
    %c0_i32 = arith.constant 0 : i32
    %c0_i32_0 = arith.constant 0 : i32
    return %arg1, %arg0, %c0_i32 : i32, i32, i32
  }
  func.func @transform_1(%arg0: i32, %arg1: i32) -> (i32, i32, i32) {
    %c0_i32 = arith.constant 0 : i32
    %c0_i32_0 = arith.constant 0 : i32
    return %arg1, %arg0, %c0_i32 : i32, i32, i32
  }
}

module attributes {stable_mosaic.version = 11 : i64} {
  func.func @_gemm_cuba_kernel(%arg0: i32, %arg1: i32, %arg2: i32, %arg3: memref<1x512x50xbf16, #tpu.memory_space<vmem>>, %arg4: memref<50x128xbf16, #tpu.memory_space<vmem>>, %arg5: memref<1x512x128xbf16, #tpu.memory_space<vmem>>, %arg6: memref<512x128xf32, #tpu.memory_space<vmem>>, %arg7: memref<512x128xf32, #tpu.memory_space<vmem>>, %arg8: memref<512x128xf32, #tpu.memory_space<vmem>>) attributes {dimension_semantics = [#tpu.dimension_semantics<parallel>, #tpu.dimension_semantics<arbitrary>, #tpu.dimension_semantics<arbitrary>], iteration_bounds = array<i64: 4, 8, 1>, scalar_prefetch = 0 : i64, scratch_operands = 3 : i64, tpu.core_type = #tpu.core_type<tc>, window_params = [{transform_indices = @transform_0, window_bounds = array<i64: 1, 512, 50>}, {transform_indices = @transform_1, window_bounds = array<i64: 50, 128>}, {transform_indices = @transform_2, window_bounds = array<i64: 1, 512, 128>}]} {
    %c0_i32 = arith.constant 0 : i32
    %0 = arith.cmpi eq, %arg1, %c0_i32 : i32
    %c0_i32_0 = arith.constant 0 : i32
    %1 = arith.cmpi eq, %arg2, %c0_i32_0 : i32
    %2 = arith.andi %0, %1 : i1
    %3 = arith.extui %2 : i1 to i32
    %c0_i32_1 = arith.constant 0 : i32
    %4 = arith.cmpi ne, %3, %c0_i32_1 : i32
    scf.if %4 {
      %cst_14 = arith.constant 0.000000e+00 : f32
      %18 = vector.broadcast %cst_14 : f32 to vector<512x128xf32>
      %c0_15 = arith.constant 0 : index
      %c0_16 = arith.constant 0 : index
      %19 = vector.load %arg7[%c0_15, %c0_16] : memref<512x128xf32, #tpu.memory_space<vmem>>, vector<512x128xf32>
      tpu.vector_store %arg7[%c0_15, %c0_16], %18 {strides = array<i32>} : memref<512x128xf32, #tpu.memory_space<vmem>>, vector<512x128xf32>,
      %cst_17 = arith.constant 0.000000e+00 : f32
      %20 = vector.broadcast %cst_17 : f32 to vector<512x128xf32>
      %c0_18 = arith.constant 0 : index
      %c0_19 = arith.constant 0 : index
      %21 = vector.load %arg8[%c0_18, %c0_19] : memref<512x128xf32, #tpu.memory_space<vmem>>, vector<512x128xf32>
      tpu.vector_store %arg8[%c0_18, %c0_19], %20 {strides = array<i32>} : memref<512x128xf32, #tpu.memory_space<vmem>>, vector<512x128xf32>,
    } else {
    }
    %c0_i32_2 = arith.constant 0 : i32
    %5 = arith.cmpi eq, %arg2, %c0_i32_2 : i32
    %6 = arith.extui %5 : i1 to i32
    %c0_i32_3 = arith.constant 0 : i32
    %7 = arith.cmpi ne, %6, %c0_i32_3 : i32
    scf.if %7 {
      %cst_14 = arith.constant 0.000000e+00 : f32
      %18 = vector.broadcast %cst_14 : f32 to vector<512x128xf32>
      %c0_15 = arith.constant 0 : index
      %c0_16 = arith.constant 0 : index
      %19 = vector.load %arg6[%c0_15, %c0_16] : memref<512x128xf32, #tpu.memory_space<vmem>>, vector<512x128xf32>
      tpu.vector_store %arg6[%c0_15, %c0_16], %18 {strides = array<i32>} : memref<512x128xf32, #tpu.memory_space<vmem>>, vector<512x128xf32>,
    } else {
    }
    %c0 = arith.constant 0 : index
    %c0_4 = arith.constant 0 : index
    %8 = vector.load %arg6[%c0, %c0_4] : memref<512x128xf32, #tpu.memory_space<vmem>>, vector<512x128xf32>
    %c0_5 = arith.constant 0 : index
    %c0_6 = arith.constant 0 : index
    %c0_7 = arith.constant 0 : index
    %9 = vector.load %arg3[%c0_5, %c0_6, %c0_7] : memref<1x512x50xbf16, #tpu.memory_space<vmem>>, vector<1x512x50xbf16>
    %10 = vector.shape_cast %9 : vector<1x512x50xbf16> to vector<512x50xbf16>
    %c0_8 = arith.constant 0 : index
    %c0_9 = arith.constant 0 : index
    %11 = vector.load %arg4[%c0_8, %c0_9] : memref<50x128xbf16, #tpu.memory_space<vmem>>, vector<50x128xbf16>
    %cst = arith.constant dense<0.000000e+00> : vector<512x128xf32>
    %12 = tpu.matmul %10, %11, %cst {dimension_numbers = #tpu.dot_dimension_numbers<[1], [0], [0], [1], [0, 0, 1, 1], [], []>} : vector<512x50xbf16>, vector<50x128xbf16>, vector<512x128xf32> -> vector<512x128xf32>
    %13 = arith.addf %8, %12 : vector<512x128xf32>
    %c0_10 = arith.constant 0 : index
    %c0_11 = arith.constant 0 : index
    %14 = vector.load %arg6[%c0_10, %c0_11] : memref<512x128xf32, #tpu.memory_space<vmem>>, vector<512x128xf32>
    tpu.vector_store %arg6[%c0_10, %c0_11], %13 {strides = array<i32>} : memref<512x128xf32, #tpu.memory_space<vmem>>, vector<512x128xf32>,
    %c0_i32_12 = arith.constant 0 : i32
    %15 = arith.cmpi eq, %arg2, %c0_i32_12 : i32
    %16 = arith.extui %15 : i1 to i32
    %c0_i32_13 = arith.constant 0 : i32
    %17 = arith.cmpi ne, %16, %c0_i32_13 : i32
    scf.if %17 {
      %c0_14 = arith.constant 0 : index
      %c0_15 = arith.constant 0 : index
      %18 = vector.load %arg7[%c0_14, %c0_15] : memref<512x128xf32, #tpu.memory_space<vmem>>, vector<512x128xf32>
      %cst_16 = arith.constant 7.500000e-01 : f32
      %19 = vector.broadcast %cst_16 : f32 to vector<512x128xf32>
      %20 = arith.mulf %19, %18 : vector<512x128xf32>
      %c0_17 = arith.constant 0 : index
      %c0_18 = arith.constant 0 : index
      %21 = vector.load %arg6[%c0_17, %c0_18] : memref<512x128xf32, #tpu.memory_space<vmem>>, vector<512x128xf32>
      %22 = arith.addf %20, %21 : vector<512x128xf32>
      %c0_19 = arith.constant 0 : index
      %c0_20 = arith.constant 0 : index
      %23 = vector.load %arg8[%c0_19, %c0_20] : memref<512x128xf32, #tpu.memory_space<vmem>>, vector<512x128xf32>
      %cst_21 = arith.constant 9.700000e-01 : f32
      %24 = vector.broadcast %cst_21 : f32 to vector<512x128xf32>
      %25 = arith.mulf %24, %23 : vector<512x128xf32>
      %26 = arith.addf %25, %22 : vector<512x128xf32>
      %cst_22 = arith.constant 1.250000e+00 : f32
      %27 = vector.broadcast %cst_22 : f32 to vector<512x128xf32>
      %28 = arith.cmpf oge, %26, %27 : vector<512x128xf32>
      %29 = arith.extui %28 : vector<512x128xi1> to vector<512x128xi32>
      %30 = arith.sitofp %29 : vector<512x128xi32> to vector<512x128xf32>
      %c0_23 = arith.constant 0 : index
      %c0_24 = arith.constant 0 : index
      %31 = vector.load %arg7[%c0_23, %c0_24] : memref<512x128xf32, #tpu.memory_space<vmem>>, vector<512x128xf32>
      tpu.vector_store %arg7[%c0_23, %c0_24], %22 {strides = array<i32>} : memref<512x128xf32, #tpu.memory_space<vmem>>, vector<512x128xf32>,
      %cst_25 = arith.constant 1.000000e+00 : f32
      %32 = vector.broadcast %cst_25 : f32 to vector<512x128xf32>
      %33 = arith.subf %32, %30 : vector<512x128xf32>
      %34 = arith.mulf %26, %33 : vector<512x128xf32>
      %c0_26 = arith.constant 0 : index
      %c0_27 = arith.constant 0 : index
      %35 = vector.load %arg8[%c0_26, %c0_27] : memref<512x128xf32, #tpu.memory_space<vmem>>, vector<512x128xf32>
      tpu.vector_store %arg8[%c0_26, %c0_27], %34 {strides = array<i32>} : memref<512x128xf32, #tpu.memory_space<vmem>>, vector<512x128xf32>,
      %36 = arith.truncf %30 : vector<512x128xf32> to vector<512x128xbf16>
      %c0_28 = arith.constant 0 : index
      %c0_29 = arith.constant 0 : index
      %c0_30 = arith.constant 0 : index
      %37 = vector.load %arg5[%c0_28, %c0_29, %c0_30] : memref<1x512x128xbf16, #tpu.memory_space<vmem>>, vector<1x512x128xbf16>
      %38 = vector.shape_cast %37 : vector<1x512x128xbf16> to vector<512x128xbf16>
      %39 = vector.shape_cast %36 : vector<512x128xbf16> to vector<1x512x128xbf16>
      tpu.vector_store %arg5[%c0_28, %c0_29, %c0_30], %39 {strides = array<i32>} : memref<1x512x128xbf16, #tpu.memory_space<vmem>>, vector<1x512x128xbf16>,
    } else {
    }
    return
  }
  func.func @transform_0(%arg0: i32, %arg1: i32, %arg2: i32) -> (i32, i32, i32) {
    %c0_i32 = arith.constant 0 : i32
    return %arg1, %arg0, %arg2 : i32, i32, i32
  }
  func.func @transform_1(%arg0: i32, %arg1: i32, %arg2: i32) -> (i32, i32) {
    %c0_i32 = arith.constant 0 : i32
    %c0_i32_0 = arith.constant 0 : i32
    return %arg2, %c0_i32 : i32, i32
  }
  func.func @transform_2(%arg0: i32, %arg1: i32, %arg2: i32) -> (i32, i32, i32) {
    %c0_i32 = arith.constant 0 : i32
    %c0_i32_0 = arith.constant 0 : i32
    return %arg1, %arg0, %c0_i32 : i32, i32, i32
  }
}

module attributes {stable_mosaic.version = 11 : i64} {
  func.func @_cuba_kernel(%arg0: i32, %arg1: i32, %arg2: memref<1x16x128xbf16, #tpu.memory_space<vmem>>, %arg3: memref<1x16x128xbf16, #tpu.memory_space<vmem>>, %arg4: memref<16x128xf32, #tpu.memory_space<vmem>>, %arg5: memref<16x128xf32, #tpu.memory_space<vmem>>) attributes {dimension_semantics = [#tpu.dimension_semantics<parallel>, #tpu.dimension_semantics<arbitrary>], iteration_bounds = array<i64: 4, 8>, scalar_prefetch = 0 : i64, scratch_operands = 2 : i64, tpu.core_type = #tpu.core_type<tc>, window_params = [{transform_indices = @transform_0, window_bounds = array<i64: 1, 16, 128>}, {transform_indices = @transform_1, window_bounds = array<i64: 1, 16, 128>}]} {
    %c0_i32 = arith.constant 0 : i32
    %0 = arith.cmpi eq, %arg1, %c0_i32 : i32
    %1 = arith.extui %0 : i1 to i32
    %c0_i32_0 = arith.constant 0 : i32
    %2 = arith.cmpi ne, %1, %c0_i32_0 : i32
    scf.if %2 {
      %cst_17 = arith.constant 0.000000e+00 : f32
      %27 = vector.broadcast %cst_17 : f32 to vector<16x128xf32>
      %c0_18 = arith.constant 0 : index
      %c0_19 = arith.constant 0 : index
      %28 = vector.load %arg4[%c0_18, %c0_19] : memref<16x128xf32, #tpu.memory_space<vmem>>, vector<16x128xf32>
      tpu.vector_store %arg4[%c0_18, %c0_19], %27 {strides = array<i32>} : memref<16x128xf32, #tpu.memory_space<vmem>>, vector<16x128xf32>,
      %cst_20 = arith.constant 0.000000e+00 : f32
      %29 = vector.broadcast %cst_20 : f32 to vector<16x128xf32>
      %c0_21 = arith.constant 0 : index
      %c0_22 = arith.constant 0 : index
      %30 = vector.load %arg5[%c0_21, %c0_22] : memref<16x128xf32, #tpu.memory_space<vmem>>, vector<16x128xf32>
      tpu.vector_store %arg5[%c0_21, %c0_22], %29 {strides = array<i32>} : memref<16x128xf32, #tpu.memory_space<vmem>>, vector<16x128xf32>,
    } else {
    }
    %c0 = arith.constant 0 : index
    %c0_1 = arith.constant 0 : index
    %c0_2 = arith.constant 0 : index
    %3 = vector.load %arg2[%c0, %c0_1, %c0_2] : memref<1x16x128xbf16, #tpu.memory_space<vmem>>, vector<1x16x128xbf16>
    %4 = vector.shape_cast %3 : vector<1x16x128xbf16> to vector<16x128xbf16>
    %5 = arith.extf %4 : vector<16x128xbf16> to vector<16x128xf32>
    %c0_3 = arith.constant 0 : index
    %c0_4 = arith.constant 0 : index
    %6 = vector.load %arg4[%c0_3, %c0_4] : memref<16x128xf32, #tpu.memory_space<vmem>>, vector<16x128xf32>
    %cst = arith.constant 7.500000e-01 : f32
    %7 = vector.broadcast %cst : f32 to vector<16x128xf32>
    %8 = arith.mulf %7, %6 : vector<16x128xf32>
    %9 = arith.addf %8, %5 : vector<16x128xf32>
    %c0_5 = arith.constant 0 : index
    %c0_6 = arith.constant 0 : index
    %10 = vector.load %arg5[%c0_5, %c0_6] : memref<16x128xf32, #tpu.memory_space<vmem>>, vector<16x128xf32>
    %cst_7 = arith.constant 9.700000e-01 : f32
    %11 = vector.broadcast %cst_7 : f32 to vector<16x128xf32>
    %12 = arith.mulf %11, %10 : vector<16x128xf32>
    %13 = arith.addf %12, %9 : vector<16x128xf32>
    %cst_8 = arith.constant 1.250000e+00 : f32
    %14 = vector.broadcast %cst_8 : f32 to vector<16x128xf32>
    %15 = arith.cmpf oge, %13, %14 : vector<16x128xf32>
    %16 = arith.extui %15 : vector<16x128xi1> to vector<16x128xi32>
    %17 = arith.sitofp %16 : vector<16x128xi32> to vector<16x128xf32>
    %c0_9 = arith.constant 0 : index
    %c0_10 = arith.constant 0 : index
    %18 = vector.load %arg4[%c0_9, %c0_10] : memref<16x128xf32, #tpu.memory_space<vmem>>, vector<16x128xf32>
    tpu.vector_store %arg4[%c0_9, %c0_10], %9 {strides = array<i32>} : memref<16x128xf32, #tpu.memory_space<vmem>>, vector<16x128xf32>,
    %cst_11 = arith.constant 1.000000e+00 : f32
    %19 = vector.broadcast %cst_11 : f32 to vector<16x128xf32>
    %20 = arith.subf %19, %17 : vector<16x128xf32>
    %21 = arith.mulf %13, %20 : vector<16x128xf32>
    %c0_12 = arith.constant 0 : index
    %c0_13 = arith.constant 0 : index
    %22 = vector.load %arg5[%c0_12, %c0_13] : memref<16x128xf32, #tpu.memory_space<vmem>>, vector<16x128xf32>
    tpu.vector_store %arg5[%c0_12, %c0_13], %21 {strides = array<i32>} : memref<16x128xf32, #tpu.memory_space<vmem>>, vector<16x128xf32>,
    %23 = arith.truncf %17 : vector<16x128xf32> to vector<16x128xbf16>
    %c0_14 = arith.constant 0 : index
    %c0_15 = arith.constant 0 : index
    %c0_16 = arith.constant 0 : index
    %24 = vector.load %arg3[%c0_14, %c0_15, %c0_16] : memref<1x16x128xbf16, #tpu.memory_space<vmem>>, vector<1x16x128xbf16>
    %25 = vector.shape_cast %24 : vector<1x16x128xbf16> to vector<16x128xbf16>
    %26 = vector.shape_cast %23 : vector<16x128xbf16> to vector<1x16x128xbf16>
    tpu.vector_store %arg3[%c0_14, %c0_15, %c0_16], %26 {strides = array<i32>} : memref<1x16x128xbf16, #tpu.memory_space<vmem>>, vector<1x16x128xbf16>,
    return
  }
  func.func @transform_0(%arg0: i32, %arg1: i32) -> (i32, i32, i32) {
    %c0_i32 = arith.constant 0 : i32
    %c0_i32_0 = arith.constant 0 : i32
    return %arg1, %arg0, %c0_i32 : i32, i32, i32
  }
  func.func @transform_1(%arg0: i32, %arg1: i32) -> (i32, i32, i32) {
    %c0_i32 = arith.constant 0 : i32
    %c0_i32_0 = arith.constant 0 : i32
    return %arg1, %arg0, %c0_i32 : i32, i32, i32
  }
}

module attributes {stable_mosaic.version = 11 : i64} {
  func.func @_gemm_cuba_kernel(%arg0: i32, %arg1: i32, %arg2: i32, %arg3: memref<1x256x144xbf16, #tpu.memory_space<vmem>>, %arg4: memref<144x128xbf16, #tpu.memory_space<vmem>>, %arg5: memref<1x256x128xbf16, #tpu.memory_space<vmem>>, %arg6: memref<256x128xf32, #tpu.memory_space<vmem>>, %arg7: memref<256x128xf32, #tpu.memory_space<vmem>>, %arg8: memref<256x128xf32, #tpu.memory_space<vmem>>) attributes {dimension_semantics = [#tpu.dimension_semantics<parallel>, #tpu.dimension_semantics<arbitrary>, #tpu.dimension_semantics<arbitrary>], iteration_bounds = array<i64: 2, 8, 1>, scalar_prefetch = 0 : i64, scratch_operands = 3 : i64, tpu.core_type = #tpu.core_type<tc>, window_params = [{transform_indices = @transform_0, window_bounds = array<i64: 1, 256, 144>}, {transform_indices = @transform_1, window_bounds = array<i64: 144, 128>}, {transform_indices = @transform_2, window_bounds = array<i64: 1, 256, 128>}]} {
    %c0_i32 = arith.constant 0 : i32
    %0 = arith.cmpi eq, %arg1, %c0_i32 : i32
    %c0_i32_0 = arith.constant 0 : i32
    %1 = arith.cmpi eq, %arg2, %c0_i32_0 : i32
    %2 = arith.andi %0, %1 : i1
    %3 = arith.extui %2 : i1 to i32
    %c0_i32_1 = arith.constant 0 : i32
    %4 = arith.cmpi ne, %3, %c0_i32_1 : i32
    scf.if %4 {
      %cst_14 = arith.constant 0.000000e+00 : f32
      %18 = vector.broadcast %cst_14 : f32 to vector<256x128xf32>
      %c0_15 = arith.constant 0 : index
      %c0_16 = arith.constant 0 : index
      %19 = vector.load %arg7[%c0_15, %c0_16] : memref<256x128xf32, #tpu.memory_space<vmem>>, vector<256x128xf32>
      tpu.vector_store %arg7[%c0_15, %c0_16], %18 {strides = array<i32>} : memref<256x128xf32, #tpu.memory_space<vmem>>, vector<256x128xf32>,
      %cst_17 = arith.constant 0.000000e+00 : f32
      %20 = vector.broadcast %cst_17 : f32 to vector<256x128xf32>
      %c0_18 = arith.constant 0 : index
      %c0_19 = arith.constant 0 : index
      %21 = vector.load %arg8[%c0_18, %c0_19] : memref<256x128xf32, #tpu.memory_space<vmem>>, vector<256x128xf32>
      tpu.vector_store %arg8[%c0_18, %c0_19], %20 {strides = array<i32>} : memref<256x128xf32, #tpu.memory_space<vmem>>, vector<256x128xf32>,
    } else {
    }
    %c0_i32_2 = arith.constant 0 : i32
    %5 = arith.cmpi eq, %arg2, %c0_i32_2 : i32
    %6 = arith.extui %5 : i1 to i32
    %c0_i32_3 = arith.constant 0 : i32
    %7 = arith.cmpi ne, %6, %c0_i32_3 : i32
    scf.if %7 {
      %cst_14 = arith.constant 0.000000e+00 : f32
      %18 = vector.broadcast %cst_14 : f32 to vector<256x128xf32>
      %c0_15 = arith.constant 0 : index
      %c0_16 = arith.constant 0 : index
      %19 = vector.load %arg6[%c0_15, %c0_16] : memref<256x128xf32, #tpu.memory_space<vmem>>, vector<256x128xf32>
      tpu.vector_store %arg6[%c0_15, %c0_16], %18 {strides = array<i32>} : memref<256x128xf32, #tpu.memory_space<vmem>>, vector<256x128xf32>,
    } else {
    }
    %c0 = arith.constant 0 : index
    %c0_4 = arith.constant 0 : index
    %8 = vector.load %arg6[%c0, %c0_4] : memref<256x128xf32, #tpu.memory_space<vmem>>, vector<256x128xf32>
    %c0_5 = arith.constant 0 : index
    %c0_6 = arith.constant 0 : index
    %c0_7 = arith.constant 0 : index
    %9 = vector.load %arg3[%c0_5, %c0_6, %c0_7] : memref<1x256x144xbf16, #tpu.memory_space<vmem>>, vector<1x256x144xbf16>
    %10 = vector.shape_cast %9 : vector<1x256x144xbf16> to vector<256x144xbf16>
    %c0_8 = arith.constant 0 : index
    %c0_9 = arith.constant 0 : index
    %11 = vector.load %arg4[%c0_8, %c0_9] : memref<144x128xbf16, #tpu.memory_space<vmem>>, vector<144x128xbf16>
    %cst = arith.constant dense<0.000000e+00> : vector<256x128xf32>
    %12 = tpu.matmul %10, %11, %cst {dimension_numbers = #tpu.dot_dimension_numbers<[1], [0], [0], [1], [0, 0, 1, 1], [], []>} : vector<256x144xbf16>, vector<144x128xbf16>, vector<256x128xf32> -> vector<256x128xf32>
    %13 = arith.addf %8, %12 : vector<256x128xf32>
    %c0_10 = arith.constant 0 : index
    %c0_11 = arith.constant 0 : index
    %14 = vector.load %arg6[%c0_10, %c0_11] : memref<256x128xf32, #tpu.memory_space<vmem>>, vector<256x128xf32>
    tpu.vector_store %arg6[%c0_10, %c0_11], %13 {strides = array<i32>} : memref<256x128xf32, #tpu.memory_space<vmem>>, vector<256x128xf32>,
    %c0_i32_12 = arith.constant 0 : i32
    %15 = arith.cmpi eq, %arg2, %c0_i32_12 : i32
    %16 = arith.extui %15 : i1 to i32
    %c0_i32_13 = arith.constant 0 : i32
    %17 = arith.cmpi ne, %16, %c0_i32_13 : i32
    scf.if %17 {
      %c0_14 = arith.constant 0 : index
      %c0_15 = arith.constant 0 : index
      %18 = vector.load %arg7[%c0_14, %c0_15] : memref<256x128xf32, #tpu.memory_space<vmem>>, vector<256x128xf32>
      %cst_16 = arith.constant 7.500000e-01 : f32
      %19 = vector.broadcast %cst_16 : f32 to vector<256x128xf32>
      %20 = arith.mulf %19, %18 : vector<256x128xf32>
      %c0_17 = arith.constant 0 : index
      %c0_18 = arith.constant 0 : index
      %21 = vector.load %arg6[%c0_17, %c0_18] : memref<256x128xf32, #tpu.memory_space<vmem>>, vector<256x128xf32>
      %22 = arith.addf %20, %21 : vector<256x128xf32>
      %c0_19 = arith.constant 0 : index
      %c0_20 = arith.constant 0 : index
      %23 = vector.load %arg8[%c0_19, %c0_20] : memref<256x128xf32, #tpu.memory_space<vmem>>, vector<256x128xf32>
      %cst_21 = arith.constant 9.700000e-01 : f32
      %24 = vector.broadcast %cst_21 : f32 to vector<256x128xf32>
      %25 = arith.mulf %24, %23 : vector<256x128xf32>
      %26 = arith.addf %25, %22 : vector<256x128xf32>
      %cst_22 = arith.constant 1.250000e+00 : f32
      %27 = vector.broadcast %cst_22 : f32 to vector<256x128xf32>
      %28 = arith.cmpf oge, %26, %27 : vector<256x128xf32>
      %29 = arith.extui %28 : vector<256x128xi1> to vector<256x128xi32>
      %30 = arith.sitofp %29 : vector<256x128xi32> to vector<256x128xf32>
      %c0_23 = arith.constant 0 : index
      %c0_24 = arith.constant 0 : index
      %31 = vector.load %arg7[%c0_23, %c0_24] : memref<256x128xf32, #tpu.memory_space<vmem>>, vector<256x128xf32>
      tpu.vector_store %arg7[%c0_23, %c0_24], %22 {strides = array<i32>} : memref<256x128xf32, #tpu.memory_space<vmem>>, vector<256x128xf32>,
      %cst_25 = arith.constant 1.000000e+00 : f32
      %32 = vector.broadcast %cst_25 : f32 to vector<256x128xf32>
      %33 = arith.subf %32, %30 : vector<256x128xf32>
      %34 = arith.mulf %26, %33 : vector<256x128xf32>
      %c0_26 = arith.constant 0 : index
      %c0_27 = arith.constant 0 : index
      %35 = vector.load %arg8[%c0_26, %c0_27] : memref<256x128xf32, #tpu.memory_space<vmem>>, vector<256x128xf32>
      tpu.vector_store %arg8[%c0_26, %c0_27], %34 {strides = array<i32>} : memref<256x128xf32, #tpu.memory_space<vmem>>, vector<256x128xf32>,
      %36 = arith.truncf %30 : vector<256x128xf32> to vector<256x128xbf16>
      %c0_28 = arith.constant 0 : index
      %c0_29 = arith.constant 0 : index
      %c0_30 = arith.constant 0 : index
      %37 = vector.load %arg5[%c0_28, %c0_29, %c0_30] : memref<1x256x128xbf16, #tpu.memory_space<vmem>>, vector<1x256x128xbf16>
      %38 = vector.shape_cast %37 : vector<1x256x128xbf16> to vector<256x128xbf16>
      %39 = vector.shape_cast %36 : vector<256x128xbf16> to vector<1x256x128xbf16>
      tpu.vector_store %arg5[%c0_28, %c0_29, %c0_30], %39 {strides = array<i32>} : memref<1x256x128xbf16, #tpu.memory_space<vmem>>, vector<1x256x128xbf16>,
    } else {
    }
    return
  }
  func.func @transform_0(%arg0: i32, %arg1: i32, %arg2: i32) -> (i32, i32, i32) {
    %c0_i32 = arith.constant 0 : i32
    return %arg1, %arg0, %arg2 : i32, i32, i32
  }
  func.func @transform_1(%arg0: i32, %arg1: i32, %arg2: i32) -> (i32, i32) {
    %c0_i32 = arith.constant 0 : i32
    %c0_i32_0 = arith.constant 0 : i32
    return %arg2, %c0_i32 : i32, i32
  }
  func.func @transform_2(%arg0: i32, %arg1: i32, %arg2: i32) -> (i32, i32, i32) {
    %c0_i32 = arith.constant 0 : i32
    %c0_i32_0 = arith.constant 0 : i32
    return %arg1, %arg0, %c0_i32 : i32, i32, i32
  }
}

module attributes {stable_mosaic.version = 11 : i64} {
  func.func @_cuba_kernel(%arg0: i32, %arg1: i32, %arg2: memref<1x16x128xbf16, #tpu.memory_space<vmem>>, %arg3: memref<1x16x128xbf16, #tpu.memory_space<vmem>>, %arg4: memref<16x128xf32, #tpu.memory_space<vmem>>, %arg5: memref<16x128xf32, #tpu.memory_space<vmem>>) attributes {dimension_semantics = [#tpu.dimension_semantics<parallel>, #tpu.dimension_semantics<arbitrary>], iteration_bounds = array<i64: 2, 8>, scalar_prefetch = 0 : i64, scratch_operands = 2 : i64, tpu.core_type = #tpu.core_type<tc>, window_params = [{transform_indices = @transform_0, window_bounds = array<i64: 1, 16, 128>}, {transform_indices = @transform_1, window_bounds = array<i64: 1, 16, 128>}]} {
    %c0_i32 = arith.constant 0 : i32
    %0 = arith.cmpi eq, %arg1, %c0_i32 : i32
    %1 = arith.extui %0 : i1 to i32
    %c0_i32_0 = arith.constant 0 : i32
    %2 = arith.cmpi ne, %1, %c0_i32_0 : i32
    scf.if %2 {
      %cst_17 = arith.constant 0.000000e+00 : f32
      %27 = vector.broadcast %cst_17 : f32 to vector<16x128xf32>
      %c0_18 = arith.constant 0 : index
      %c0_19 = arith.constant 0 : index
      %28 = vector.load %arg4[%c0_18, %c0_19] : memref<16x128xf32, #tpu.memory_space<vmem>>, vector<16x128xf32>
      tpu.vector_store %arg4[%c0_18, %c0_19], %27 {strides = array<i32>} : memref<16x128xf32, #tpu.memory_space<vmem>>, vector<16x128xf32>,
      %cst_20 = arith.constant 0.000000e+00 : f32
      %29 = vector.broadcast %cst_20 : f32 to vector<16x128xf32>
      %c0_21 = arith.constant 0 : index
      %c0_22 = arith.constant 0 : index
      %30 = vector.load %arg5[%c0_21, %c0_22] : memref<16x128xf32, #tpu.memory_space<vmem>>, vector<16x128xf32>
      tpu.vector_store %arg5[%c0_21, %c0_22], %29 {strides = array<i32>} : memref<16x128xf32, #tpu.memory_space<vmem>>, vector<16x128xf32>,
    } else {
    }
    %c0 = arith.constant 0 : index
    %c0_1 = arith.constant 0 : index
    %c0_2 = arith.constant 0 : index
    %3 = vector.load %arg2[%c0, %c0_1, %c0_2] : memref<1x16x128xbf16, #tpu.memory_space<vmem>>, vector<1x16x128xbf16>
    %4 = vector.shape_cast %3 : vector<1x16x128xbf16> to vector<16x128xbf16>
    %5 = arith.extf %4 : vector<16x128xbf16> to vector<16x128xf32>
    %c0_3 = arith.constant 0 : index
    %c0_4 = arith.constant 0 : index
    %6 = vector.load %arg4[%c0_3, %c0_4] : memref<16x128xf32, #tpu.memory_space<vmem>>, vector<16x128xf32>
    %cst = arith.constant 7.500000e-01 : f32
    %7 = vector.broadcast %cst : f32 to vector<16x128xf32>
    %8 = arith.mulf %7, %6 : vector<16x128xf32>
    %9 = arith.addf %8, %5 : vector<16x128xf32>
    %c0_5 = arith.constant 0 : index
    %c0_6 = arith.constant 0 : index
    %10 = vector.load %arg5[%c0_5, %c0_6] : memref<16x128xf32, #tpu.memory_space<vmem>>, vector<16x128xf32>
    %cst_7 = arith.constant 9.700000e-01 : f32
    %11 = vector.broadcast %cst_7 : f32 to vector<16x128xf32>
    %12 = arith.mulf %11, %10 : vector<16x128xf32>
    %13 = arith.addf %12, %9 : vector<16x128xf32>
    %cst_8 = arith.constant 1.250000e+00 : f32
    %14 = vector.broadcast %cst_8 : f32 to vector<16x128xf32>
    %15 = arith.cmpf oge, %13, %14 : vector<16x128xf32>
    %16 = arith.extui %15 : vector<16x128xi1> to vector<16x128xi32>
    %17 = arith.sitofp %16 : vector<16x128xi32> to vector<16x128xf32>
    %c0_9 = arith.constant 0 : index
    %c0_10 = arith.constant 0 : index
    %18 = vector.load %arg4[%c0_9, %c0_10] : memref<16x128xf32, #tpu.memory_space<vmem>>, vector<16x128xf32>
    tpu.vector_store %arg4[%c0_9, %c0_10], %9 {strides = array<i32>} : memref<16x128xf32, #tpu.memory_space<vmem>>, vector<16x128xf32>,
    %cst_11 = arith.constant 1.000000e+00 : f32
    %19 = vector.broadcast %cst_11 : f32 to vector<16x128xf32>
    %20 = arith.subf %19, %17 : vector<16x128xf32>
    %21 = arith.mulf %13, %20 : vector<16x128xf32>
    %c0_12 = arith.constant 0 : index
    %c0_13 = arith.constant 0 : index
    %22 = vector.load %arg5[%c0_12, %c0_13] : memref<16x128xf32, #tpu.memory_space<vmem>>, vector<16x128xf32>
    tpu.vector_store %arg5[%c0_12, %c0_13], %21 {strides = array<i32>} : memref<16x128xf32, #tpu.memory_space<vmem>>, vector<16x128xf32>,
    %23 = arith.truncf %17 : vector<16x128xf32> to vector<16x128xbf16>
    %c0_14 = arith.constant 0 : index
    %c0_15 = arith.constant 0 : index
    %c0_16 = arith.constant 0 : index
    %24 = vector.load %arg3[%c0_14, %c0_15, %c0_16] : memref<1x16x128xbf16, #tpu.memory_space<vmem>>, vector<1x16x128xbf16>
    %25 = vector.shape_cast %24 : vector<1x16x128xbf16> to vector<16x128xbf16>
    %26 = vector.shape_cast %23 : vector<16x128xbf16> to vector<1x16x128xbf16>
    tpu.vector_store %arg3[%c0_14, %c0_15, %c0_16], %26 {strides = array<i32>} : memref<1x16x128xbf16, #tpu.memory_space<vmem>>, vector<1x16x128xbf16>,
    return
  }
  func.func @transform_0(%arg0: i32, %arg1: i32) -> (i32, i32, i32) {
    %c0_i32 = arith.constant 0 : i32
    %c0_i32_0 = arith.constant 0 : i32
    return %arg1, %arg0, %c0_i32 : i32, i32, i32
  }
  func.func @transform_1(%arg0: i32, %arg1: i32) -> (i32, i32, i32) {
    %c0_i32 = arith.constant 0 : i32
    %c0_i32_0 = arith.constant 0 : i32
    return %arg1, %arg0, %c0_i32 : i32, i32, i32
  }
}

module attributes {stable_mosaic.version = 11 : i64} {
  func.func @_gemm_cuba_kernel(%arg0: i32, %arg1: i32, %arg2: i32, %arg3: memref<1x64x288xbf16, #tpu.memory_space<vmem>>, %arg4: memref<288x128xbf16, #tpu.memory_space<vmem>>, %arg5: memref<1x64x128xbf16, #tpu.memory_space<vmem>>, %arg6: memref<64x128xf32, #tpu.memory_space<vmem>>, %arg7: memref<64x128xf32, #tpu.memory_space<vmem>>, %arg8: memref<64x128xf32, #tpu.memory_space<vmem>>) attributes {dimension_semantics = [#tpu.dimension_semantics<parallel>, #tpu.dimension_semantics<arbitrary>, #tpu.dimension_semantics<arbitrary>], iteration_bounds = array<i64: 2, 8, 1>, scalar_prefetch = 0 : i64, scratch_operands = 3 : i64, tpu.core_type = #tpu.core_type<tc>, window_params = [{transform_indices = @transform_0, window_bounds = array<i64: 1, 64, 288>}, {transform_indices = @transform_1, window_bounds = array<i64: 288, 128>}, {transform_indices = @transform_2, window_bounds = array<i64: 1, 64, 128>}]} {
    %c0_i32 = arith.constant 0 : i32
    %0 = arith.cmpi eq, %arg1, %c0_i32 : i32
    %c0_i32_0 = arith.constant 0 : i32
    %1 = arith.cmpi eq, %arg2, %c0_i32_0 : i32
    %2 = arith.andi %0, %1 : i1
    %3 = arith.extui %2 : i1 to i32
    %c0_i32_1 = arith.constant 0 : i32
    %4 = arith.cmpi ne, %3, %c0_i32_1 : i32
    scf.if %4 {
      %cst_14 = arith.constant 0.000000e+00 : f32
      %18 = vector.broadcast %cst_14 : f32 to vector<64x128xf32>
      %c0_15 = arith.constant 0 : index
      %c0_16 = arith.constant 0 : index
      %19 = vector.load %arg7[%c0_15, %c0_16] : memref<64x128xf32, #tpu.memory_space<vmem>>, vector<64x128xf32>
      tpu.vector_store %arg7[%c0_15, %c0_16], %18 {strides = array<i32>} : memref<64x128xf32, #tpu.memory_space<vmem>>, vector<64x128xf32>,
      %cst_17 = arith.constant 0.000000e+00 : f32
      %20 = vector.broadcast %cst_17 : f32 to vector<64x128xf32>
      %c0_18 = arith.constant 0 : index
      %c0_19 = arith.constant 0 : index
      %21 = vector.load %arg8[%c0_18, %c0_19] : memref<64x128xf32, #tpu.memory_space<vmem>>, vector<64x128xf32>
      tpu.vector_store %arg8[%c0_18, %c0_19], %20 {strides = array<i32>} : memref<64x128xf32, #tpu.memory_space<vmem>>, vector<64x128xf32>,
    } else {
    }
    %c0_i32_2 = arith.constant 0 : i32
    %5 = arith.cmpi eq, %arg2, %c0_i32_2 : i32
    %6 = arith.extui %5 : i1 to i32
    %c0_i32_3 = arith.constant 0 : i32
    %7 = arith.cmpi ne, %6, %c0_i32_3 : i32
    scf.if %7 {
      %cst_14 = arith.constant 0.000000e+00 : f32
      %18 = vector.broadcast %cst_14 : f32 to vector<64x128xf32>
      %c0_15 = arith.constant 0 : index
      %c0_16 = arith.constant 0 : index
      %19 = vector.load %arg6[%c0_15, %c0_16] : memref<64x128xf32, #tpu.memory_space<vmem>>, vector<64x128xf32>
      tpu.vector_store %arg6[%c0_15, %c0_16], %18 {strides = array<i32>} : memref<64x128xf32, #tpu.memory_space<vmem>>, vector<64x128xf32>,
    } else {
    }
    %c0 = arith.constant 0 : index
    %c0_4 = arith.constant 0 : index
    %8 = vector.load %arg6[%c0, %c0_4] : memref<64x128xf32, #tpu.memory_space<vmem>>, vector<64x128xf32>
    %c0_5 = arith.constant 0 : index
    %c0_6 = arith.constant 0 : index
    %c0_7 = arith.constant 0 : index
    %9 = vector.load %arg3[%c0_5, %c0_6, %c0_7] : memref<1x64x288xbf16, #tpu.memory_space<vmem>>, vector<1x64x288xbf16>
    %10 = vector.shape_cast %9 : vector<1x64x288xbf16> to vector<64x288xbf16>
    %c0_8 = arith.constant 0 : index
    %c0_9 = arith.constant 0 : index
    %11 = vector.load %arg4[%c0_8, %c0_9] : memref<288x128xbf16, #tpu.memory_space<vmem>>, vector<288x128xbf16>
    %cst = arith.constant dense<0.000000e+00> : vector<64x128xf32>
    %12 = tpu.matmul %10, %11, %cst {dimension_numbers = #tpu.dot_dimension_numbers<[1], [0], [0], [1], [0, 0, 1, 1], [], []>} : vector<64x288xbf16>, vector<288x128xbf16>, vector<64x128xf32> -> vector<64x128xf32>
    %13 = arith.addf %8, %12 : vector<64x128xf32>
    %c0_10 = arith.constant 0 : index
    %c0_11 = arith.constant 0 : index
    %14 = vector.load %arg6[%c0_10, %c0_11] : memref<64x128xf32, #tpu.memory_space<vmem>>, vector<64x128xf32>
    tpu.vector_store %arg6[%c0_10, %c0_11], %13 {strides = array<i32>} : memref<64x128xf32, #tpu.memory_space<vmem>>, vector<64x128xf32>,
    %c0_i32_12 = arith.constant 0 : i32
    %15 = arith.cmpi eq, %arg2, %c0_i32_12 : i32
    %16 = arith.extui %15 : i1 to i32
    %c0_i32_13 = arith.constant 0 : i32
    %17 = arith.cmpi ne, %16, %c0_i32_13 : i32
    scf.if %17 {
      %c0_14 = arith.constant 0 : index
      %c0_15 = arith.constant 0 : index
      %18 = vector.load %arg7[%c0_14, %c0_15] : memref<64x128xf32, #tpu.memory_space<vmem>>, vector<64x128xf32>
      %cst_16 = arith.constant 7.500000e-01 : f32
      %19 = vector.broadcast %cst_16 : f32 to vector<64x128xf32>
      %20 = arith.mulf %19, %18 : vector<64x128xf32>
      %c0_17 = arith.constant 0 : index
      %c0_18 = arith.constant 0 : index
      %21 = vector.load %arg6[%c0_17, %c0_18] : memref<64x128xf32, #tpu.memory_space<vmem>>, vector<64x128xf32>
      %22 = arith.addf %20, %21 : vector<64x128xf32>
      %c0_19 = arith.constant 0 : index
      %c0_20 = arith.constant 0 : index
      %23 = vector.load %arg8[%c0_19, %c0_20] : memref<64x128xf32, #tpu.memory_space<vmem>>, vector<64x128xf32>
      %cst_21 = arith.constant 9.700000e-01 : f32
      %24 = vector.broadcast %cst_21 : f32 to vector<64x128xf32>
      %25 = arith.mulf %24, %23 : vector<64x128xf32>
      %26 = arith.addf %25, %22 : vector<64x128xf32>
      %cst_22 = arith.constant 1.250000e+00 : f32
      %27 = vector.broadcast %cst_22 : f32 to vector<64x128xf32>
      %28 = arith.cmpf oge, %26, %27 : vector<64x128xf32>
      %29 = arith.extui %28 : vector<64x128xi1> to vector<64x128xi32>
      %30 = arith.sitofp %29 : vector<64x128xi32> to vector<64x128xf32>
      %c0_23 = arith.constant 0 : index
      %c0_24 = arith.constant 0 : index
      %31 = vector.load %arg7[%c0_23, %c0_24] : memref<64x128xf32, #tpu.memory_space<vmem>>, vector<64x128xf32>
      tpu.vector_store %arg7[%c0_23, %c0_24], %22 {strides = array<i32>} : memref<64x128xf32, #tpu.memory_space<vmem>>, vector<64x128xf32>,
      %cst_25 = arith.constant 1.000000e+00 : f32
      %32 = vector.broadcast %cst_25 : f32 to vector<64x128xf32>
      %33 = arith.subf %32, %30 : vector<64x128xf32>
      %34 = arith.mulf %26, %33 : vector<64x128xf32>
      %c0_26 = arith.constant 0 : index
      %c0_27 = arith.constant 0 : index
      %35 = vector.load %arg8[%c0_26, %c0_27] : memref<64x128xf32, #tpu.memory_space<vmem>>, vector<64x128xf32>
      tpu.vector_store %arg8[%c0_26, %c0_27], %34 {strides = array<i32>} : memref<64x128xf32, #tpu.memory_space<vmem>>, vector<64x128xf32>,
      %36 = arith.truncf %30 : vector<64x128xf32> to vector<64x128xbf16>
      %c0_28 = arith.constant 0 : index
      %c0_29 = arith.constant 0 : index
      %c0_30 = arith.constant 0 : index
      %37 = vector.load %arg5[%c0_28, %c0_29, %c0_30] : memref<1x64x128xbf16, #tpu.memory_space<vmem>>, vector<1x64x128xbf16>
      %38 = vector.shape_cast %37 : vector<1x64x128xbf16> to vector<64x128xbf16>
      %39 = vector.shape_cast %36 : vector<64x128xbf16> to vector<1x64x128xbf16>
      tpu.vector_store %arg5[%c0_28, %c0_29, %c0_30], %39 {strides = array<i32>} : memref<1x64x128xbf16, #tpu.memory_space<vmem>>, vector<1x64x128xbf16>,
    } else {
    }
    return
  }
  func.func @transform_0(%arg0: i32, %arg1: i32, %arg2: i32) -> (i32, i32, i32) {
    %c0_i32 = arith.constant 0 : i32
    return %arg1, %arg0, %arg2 : i32, i32, i32
  }
  func.func @transform_1(%arg0: i32, %arg1: i32, %arg2: i32) -> (i32, i32) {
    %c0_i32 = arith.constant 0 : i32
    %c0_i32_0 = arith.constant 0 : i32
    return %arg2, %c0_i32 : i32, i32
  }
  func.func @transform_2(%arg0: i32, %arg1: i32, %arg2: i32) -> (i32, i32, i32) {
    %c0_i32 = arith.constant 0 : i32
    %c0_i32_0 = arith.constant 0 : i32
    return %arg1, %arg0, %c0_i32 : i32, i32, i32
  }
}

module attributes {stable_mosaic.version = 11 : i64} {
  func.func @_gemm_cuba_kernel(%arg0: i32, %arg1: i32, %arg2: i32, %arg3: memref<1x8x512xbf16, #tpu.memory_space<vmem>>, %arg4: memref<512x512xbf16, #tpu.memory_space<vmem>>, %arg5: memref<1x8x512xbf16, #tpu.memory_space<vmem>>, %arg6: memref<8x512xf32, #tpu.memory_space<vmem>>, %arg7: memref<8x512xf32, #tpu.memory_space<vmem>>, %arg8: memref<8x512xf32, #tpu.memory_space<vmem>>) attributes {dimension_semantics = [#tpu.dimension_semantics<parallel>, #tpu.dimension_semantics<arbitrary>, #tpu.dimension_semantics<arbitrary>], iteration_bounds = array<i64: 1, 8, 8>, scalar_prefetch = 0 : i64, scratch_operands = 3 : i64, tpu.core_type = #tpu.core_type<tc>, window_params = [{transform_indices = @transform_0, window_bounds = array<i64: 1, 8, 512>}, {transform_indices = @transform_1, window_bounds = array<i64: 512, 512>}, {transform_indices = @transform_2, window_bounds = array<i64: 1, 8, 512>}]} {
    %c0_i32 = arith.constant 0 : i32
    %0 = arith.cmpi eq, %arg1, %c0_i32 : i32
    %c0_i32_0 = arith.constant 0 : i32
    %1 = arith.cmpi eq, %arg2, %c0_i32_0 : i32
    %2 = arith.andi %0, %1 : i1
    %3 = arith.extui %2 : i1 to i32
    %c0_i32_1 = arith.constant 0 : i32
    %4 = arith.cmpi ne, %3, %c0_i32_1 : i32
    scf.if %4 {
      %cst_13 = arith.constant 0.000000e+00 : f32
      %18 = vector.broadcast %cst_13 : f32 to vector<8x512xf32>
      %c0_14 = arith.constant 0 : index
      %c0_15 = arith.constant 0 : index
      %19 = vector.load %arg7[%c0_14, %c0_15] : memref<8x512xf32, #tpu.memory_space<vmem>>, vector<8x512xf32>
      tpu.vector_store %arg7[%c0_14, %c0_15], %18 {strides = array<i32>} : memref<8x512xf32, #tpu.memory_space<vmem>>, vector<8x512xf32>,
      %cst_16 = arith.constant 0.000000e+00 : f32
      %20 = vector.broadcast %cst_16 : f32 to vector<8x512xf32>
      %c0_17 = arith.constant 0 : index
      %c0_18 = arith.constant 0 : index
      %21 = vector.load %arg8[%c0_17, %c0_18] : memref<8x512xf32, #tpu.memory_space<vmem>>, vector<8x512xf32>
      tpu.vector_store %arg8[%c0_17, %c0_18], %20 {strides = array<i32>} : memref<8x512xf32, #tpu.memory_space<vmem>>, vector<8x512xf32>,
    } else {
    }
    %c0_i32_2 = arith.constant 0 : i32
    %5 = arith.cmpi eq, %arg2, %c0_i32_2 : i32
    %6 = arith.extui %5 : i1 to i32
    %c0_i32_3 = arith.constant 0 : i32
    %7 = arith.cmpi ne, %6, %c0_i32_3 : i32
    scf.if %7 {
      %cst_13 = arith.constant 0.000000e+00 : f32
      %18 = vector.broadcast %cst_13 : f32 to vector<8x512xf32>
      %c0_14 = arith.constant 0 : index
      %c0_15 = arith.constant 0 : index
      %19 = vector.load %arg6[%c0_14, %c0_15] : memref<8x512xf32, #tpu.memory_space<vmem>>, vector<8x512xf32>
      tpu.vector_store %arg6[%c0_14, %c0_15], %18 {strides = array<i32>} : memref<8x512xf32, #tpu.memory_space<vmem>>, vector<8x512xf32>,
    } else {
    }
    %c0 = arith.constant 0 : index
    %c0_4 = arith.constant 0 : index
    %8 = vector.load %arg6[%c0, %c0_4] : memref<8x512xf32, #tpu.memory_space<vmem>>, vector<8x512xf32>
    %c0_5 = arith.constant 0 : index
    %c0_6 = arith.constant 0 : index
    %c0_7 = arith.constant 0 : index
    %9 = vector.load %arg3[%c0_5, %c0_6, %c0_7] : memref<1x8x512xbf16, #tpu.memory_space<vmem>>, vector<1x8x512xbf16>
    %10 = vector.shape_cast %9 : vector<1x8x512xbf16> to vector<8x512xbf16>
    %c0_8 = arith.constant 0 : index
    %c0_9 = arith.constant 0 : index
    %11 = vector.load %arg4[%c0_8, %c0_9] : memref<512x512xbf16, #tpu.memory_space<vmem>>, vector<512x512xbf16>
    %cst = arith.constant dense<0.000000e+00> : vector<8x512xf32>
    %12 = tpu.matmul %10, %11, %cst {dimension_numbers = #tpu.dot_dimension_numbers<[1], [0], [0], [1], [0, 0, 1, 1], [], []>} : vector<8x512xbf16>, vector<512x512xbf16>, vector<8x512xf32> -> vector<8x512xf32>
    %13 = arith.addf %8, %12 : vector<8x512xf32>
    %c0_10 = arith.constant 0 : index
    %c0_11 = arith.constant 0 : index
    %14 = vector.load %arg6[%c0_10, %c0_11] : memref<8x512xf32, #tpu.memory_space<vmem>>, vector<8x512xf32>
    tpu.vector_store %arg6[%c0_10, %c0_11], %13 {strides = array<i32>} : memref<8x512xf32, #tpu.memory_space<vmem>>, vector<8x512xf32>,
    %c7_i32 = arith.constant 7 : i32
    %15 = arith.cmpi eq, %arg2, %c7_i32 : i32
    %16 = arith.extui %15 : i1 to i32
    %c0_i32_12 = arith.constant 0 : i32
    %17 = arith.cmpi ne, %16, %c0_i32_12 : i32
    scf.if %17 {
      %c0_13 = arith.constant 0 : index
      %c0_14 = arith.constant 0 : index
      %18 = vector.load %arg7[%c0_13, %c0_14] : memref<8x512xf32, #tpu.memory_space<vmem>>, vector<8x512xf32>
      %cst_15 = arith.constant 7.500000e-01 : f32
      %19 = vector.broadcast %cst_15 : f32 to vector<8x512xf32>
      %20 = arith.mulf %19, %18 : vector<8x512xf32>
      %c0_16 = arith.constant 0 : index
      %c0_17 = arith.constant 0 : index
      %21 = vector.load %arg6[%c0_16, %c0_17] : memref<8x512xf32, #tpu.memory_space<vmem>>, vector<8x512xf32>
      %22 = arith.addf %20, %21 : vector<8x512xf32>
      %c0_18 = arith.constant 0 : index
      %c0_19 = arith.constant 0 : index
      %23 = vector.load %arg8[%c0_18, %c0_19] : memref<8x512xf32, #tpu.memory_space<vmem>>, vector<8x512xf32>
      %cst_20 = arith.constant 9.700000e-01 : f32
      %24 = vector.broadcast %cst_20 : f32 to vector<8x512xf32>
      %25 = arith.mulf %24, %23 : vector<8x512xf32>
      %26 = arith.addf %25, %22 : vector<8x512xf32>
      %cst_21 = arith.constant 1.250000e+00 : f32
      %27 = vector.broadcast %cst_21 : f32 to vector<8x512xf32>
      %28 = arith.cmpf oge, %26, %27 : vector<8x512xf32>
      %29 = arith.extui %28 : vector<8x512xi1> to vector<8x512xi32>
      %30 = arith.sitofp %29 : vector<8x512xi32> to vector<8x512xf32>
      %c0_22 = arith.constant 0 : index
      %c0_23 = arith.constant 0 : index
      %31 = vector.load %arg7[%c0_22, %c0_23] : memref<8x512xf32, #tpu.memory_space<vmem>>, vector<8x512xf32>
      tpu.vector_store %arg7[%c0_22, %c0_23], %22 {strides = array<i32>} : memref<8x512xf32, #tpu.memory_space<vmem>>, vector<8x512xf32>,
      %cst_24 = arith.constant 1.000000e+00 : f32
      %32 = vector.broadcast %cst_24 : f32 to vector<8x512xf32>
      %33 = arith.subf %32, %30 : vector<8x512xf32>
      %34 = arith.mulf %26, %33 : vector<8x512xf32>
      %c0_25 = arith.constant 0 : index
      %c0_26 = arith.constant 0 : index
      %35 = vector.load %arg8[%c0_25, %c0_26] : memref<8x512xf32, #tpu.memory_space<vmem>>, vector<8x512xf32>
      tpu.vector_store %arg8[%c0_25, %c0_26], %34 {strides = array<i32>} : memref<8x512xf32, #tpu.memory_space<vmem>>, vector<8x512xf32>,
      %36 = arith.truncf %30 : vector<8x512xf32> to vector<8x512xbf16>
      %c0_27 = arith.constant 0 : index
      %c0_28 = arith.constant 0 : index
      %c0_29 = arith.constant 0 : index
      %37 = vector.load %arg5[%c0_27, %c0_28, %c0_29] : memref<1x8x512xbf16, #tpu.memory_space<vmem>>, vector<1x8x512xbf16>
      %38 = vector.shape_cast %37 : vector<1x8x512xbf16> to vector<8x512xbf16>
      %39 = vector.shape_cast %36 : vector<8x512xbf16> to vector<1x8x512xbf16>
      tpu.vector_store %arg5[%c0_27, %c0_28, %c0_29], %39 {strides = array<i32>} : memref<1x8x512xbf16, #tpu.memory_space<vmem>>, vector<1x8x512xbf16>,
    } else {
    }
    return
  }
  func.func @transform_0(%arg0: i32, %arg1: i32, %arg2: i32) -> (i32, i32, i32) {
    %c0_i32 = arith.constant 0 : i32
    return %arg1, %arg0, %arg2 : i32, i32, i32
  }
  func.func @transform_1(%arg0: i32, %arg1: i32, %arg2: i32) -> (i32, i32) {
    %c0_i32 = arith.constant 0 : i32
    %c0_i32_0 = arith.constant 0 : i32
    return %arg2, %c0_i32 : i32, i32
  }
  func.func @transform_2(%arg0: i32, %arg1: i32, %arg2: i32) -> (i32, i32, i32) {
    %c0_i32 = arith.constant 0 : i32
    %c0_i32_0 = arith.constant 0 : i32
    return %arg1, %arg0, %c0_i32 : i32, i32, i32
  }
}

module attributes {stable_mosaic.version = 11 : i64} {
  func.func @_gemm_cuba_kernel(%arg0: i32, %arg1: i32, %arg2: i32, %arg3: memref<1x8x512xbf16, #tpu.memory_space<vmem>>, %arg4: memref<512x128xbf16, #tpu.memory_space<vmem>>, %arg5: memref<1x8x128xbf16, #tpu.memory_space<vmem>>, %arg6: memref<8x128xf32, #tpu.memory_space<vmem>>, %arg7: memref<8x128xf32, #tpu.memory_space<vmem>>, %arg8: memref<8x128xf32, #tpu.memory_space<vmem>>) attributes {dimension_semantics = [#tpu.dimension_semantics<parallel>, #tpu.dimension_semantics<arbitrary>, #tpu.dimension_semantics<arbitrary>], iteration_bounds = array<i64: 1, 8, 1>, scalar_prefetch = 0 : i64, scratch_operands = 3 : i64, tpu.core_type = #tpu.core_type<tc>, window_params = [{transform_indices = @transform_0, window_bounds = array<i64: 1, 8, 512>}, {transform_indices = @transform_1, window_bounds = array<i64: 512, 128>}, {transform_indices = @transform_2, window_bounds = array<i64: 1, 8, 128>}]} {
    %c0_i32 = arith.constant 0 : i32
    %0 = arith.cmpi eq, %arg1, %c0_i32 : i32
    %c0_i32_0 = arith.constant 0 : i32
    %1 = arith.cmpi eq, %arg2, %c0_i32_0 : i32
    %2 = arith.andi %0, %1 : i1
    %3 = arith.extui %2 : i1 to i32
    %c0_i32_1 = arith.constant 0 : i32
    %4 = arith.cmpi ne, %3, %c0_i32_1 : i32
    scf.if %4 {
      %cst_14 = arith.constant 0.000000e+00 : f32
      %18 = vector.broadcast %cst_14 : f32 to vector<8x128xf32>
      %c0_15 = arith.constant 0 : index
      %c0_16 = arith.constant 0 : index
      %19 = vector.load %arg7[%c0_15, %c0_16] : memref<8x128xf32, #tpu.memory_space<vmem>>, vector<8x128xf32>
      tpu.vector_store %arg7[%c0_15, %c0_16], %18 {strides = array<i32>} : memref<8x128xf32, #tpu.memory_space<vmem>>, vector<8x128xf32>,
      %cst_17 = arith.constant 0.000000e+00 : f32
      %20 = vector.broadcast %cst_17 : f32 to vector<8x128xf32>
      %c0_18 = arith.constant 0 : index
      %c0_19 = arith.constant 0 : index
      %21 = vector.load %arg8[%c0_18, %c0_19] : memref<8x128xf32, #tpu.memory_space<vmem>>, vector<8x128xf32>
      tpu.vector_store %arg8[%c0_18, %c0_19], %20 {strides = array<i32>} : memref<8x128xf32, #tpu.memory_space<vmem>>, vector<8x128xf32>,
    } else {
    }
    %c0_i32_2 = arith.constant 0 : i32
    %5 = arith.cmpi eq, %arg2, %c0_i32_2 : i32
    %6 = arith.extui %5 : i1 to i32
    %c0_i32_3 = arith.constant 0 : i32
    %7 = arith.cmpi ne, %6, %c0_i32_3 : i32
    scf.if %7 {
      %cst_14 = arith.constant 0.000000e+00 : f32
      %18 = vector.broadcast %cst_14 : f32 to vector<8x128xf32>
      %c0_15 = arith.constant 0 : index
      %c0_16 = arith.constant 0 : index
      %19 = vector.load %arg6[%c0_15, %c0_16] : memref<8x128xf32, #tpu.memory_space<vmem>>, vector<8x128xf32>
      tpu.vector_store %arg6[%c0_15, %c0_16], %18 {strides = array<i32>} : memref<8x128xf32, #tpu.memory_space<vmem>>, vector<8x128xf32>,
    } else {
    }
    %c0 = arith.constant 0 : index
    %c0_4 = arith.constant 0 : index
    %8 = vector.load %arg6[%c0, %c0_4] : memref<8x128xf32, #tpu.memory_space<vmem>>, vector<8x128xf32>
    %c0_5 = arith.constant 0 : index
    %c0_6 = arith.constant 0 : index
    %c0_7 = arith.constant 0 : index
    %9 = vector.load %arg3[%c0_5, %c0_6, %c0_7] : memref<1x8x512xbf16, #tpu.memory_space<vmem>>, vector<1x8x512xbf16>
    %10 = vector.shape_cast %9 : vector<1x8x512xbf16> to vector<8x512xbf16>
    %c0_8 = arith.constant 0 : index
    %c0_9 = arith.constant 0 : index
    %11 = vector.load %arg4[%c0_8, %c0_9] : memref<512x128xbf16, #tpu.memory_space<vmem>>, vector<512x128xbf16>
    %cst = arith.constant dense<0.000000e+00> : vector<8x128xf32>
    %12 = tpu.matmul %10, %11, %cst {dimension_numbers = #tpu.dot_dimension_numbers<[1], [0], [0], [1], [0, 0, 1, 1], [], []>} : vector<8x512xbf16>, vector<512x128xbf16>, vector<8x128xf32> -> vector<8x128xf32>
    %13 = arith.addf %8, %12 : vector<8x128xf32>
    %c0_10 = arith.constant 0 : index
    %c0_11 = arith.constant 0 : index
    %14 = vector.load %arg6[%c0_10, %c0_11] : memref<8x128xf32, #tpu.memory_space<vmem>>, vector<8x128xf32>
    tpu.vector_store %arg6[%c0_10, %c0_11], %13 {strides = array<i32>} : memref<8x128xf32, #tpu.memory_space<vmem>>, vector<8x128xf32>,
    %c0_i32_12 = arith.constant 0 : i32
    %15 = arith.cmpi eq, %arg2, %c0_i32_12 : i32
    %16 = arith.extui %15 : i1 to i32
    %c0_i32_13 = arith.constant 0 : i32
    %17 = arith.cmpi ne, %16, %c0_i32_13 : i32
    scf.if %17 {
      %c0_14 = arith.constant 0 : index
      %c0_15 = arith.constant 0 : index
      %18 = vector.load %arg7[%c0_14, %c0_15] : memref<8x128xf32, #tpu.memory_space<vmem>>, vector<8x128xf32>
      %cst_16 = arith.constant 7.500000e-01 : f32
      %19 = vector.broadcast %cst_16 : f32 to vector<8x128xf32>
      %20 = arith.mulf %19, %18 : vector<8x128xf32>
      %c0_17 = arith.constant 0 : index
      %c0_18 = arith.constant 0 : index
      %21 = vector.load %arg6[%c0_17, %c0_18] : memref<8x128xf32, #tpu.memory_space<vmem>>, vector<8x128xf32>
      %22 = arith.addf %20, %21 : vector<8x128xf32>
      %c0_19 = arith.constant 0 : index
      %c0_20 = arith.constant 0 : index
      %23 = vector.load %arg8[%c0_19, %c0_20] : memref<8x128xf32, #tpu.memory_space<vmem>>, vector<8x128xf32>
      %cst_21 = arith.constant 9.700000e-01 : f32
      %24 = vector.broadcast %cst_21 : f32 to vector<8x128xf32>
      %25 = arith.mulf %24, %23 : vector<8x128xf32>
      %26 = arith.addf %25, %22 : vector<8x128xf32>
      %cst_22 = arith.constant 1.250000e+00 : f32
      %27 = vector.broadcast %cst_22 : f32 to vector<8x128xf32>
      %28 = arith.cmpf oge, %26, %27 : vector<8x128xf32>
      %29 = arith.extui %28 : vector<8x128xi1> to vector<8x128xi32>
      %30 = arith.sitofp %29 : vector<8x128xi32> to vector<8x128xf32>
      %c0_23 = arith.constant 0 : index
      %c0_24 = arith.constant 0 : index
      %31 = vector.load %arg7[%c0_23, %c0_24] : memref<8x128xf32, #tpu.memory_space<vmem>>, vector<8x128xf32>
      tpu.vector_store %arg7[%c0_23, %c0_24], %22 {strides = array<i32>} : memref<8x128xf32, #tpu.memory_space<vmem>>, vector<8x128xf32>,
      %cst_25 = arith.constant 1.000000e+00 : f32
      %32 = vector.broadcast %cst_25 : f32 to vector<8x128xf32>
      %33 = arith.subf %32, %30 : vector<8x128xf32>
      %34 = arith.mulf %26, %33 : vector<8x128xf32>
      %c0_26 = arith.constant 0 : index
      %c0_27 = arith.constant 0 : index
      %35 = vector.load %arg8[%c0_26, %c0_27] : memref<8x128xf32, #tpu.memory_space<vmem>>, vector<8x128xf32>
      tpu.vector_store %arg8[%c0_26, %c0_27], %34 {strides = array<i32>} : memref<8x128xf32, #tpu.memory_space<vmem>>, vector<8x128xf32>,
      %36 = arith.truncf %30 : vector<8x128xf32> to vector<8x128xbf16>
      %c0_28 = arith.constant 0 : index
      %c0_29 = arith.constant 0 : index
      %c0_30 = arith.constant 0 : index
      %37 = vector.load %arg5[%c0_28, %c0_29, %c0_30] : memref<1x8x128xbf16, #tpu.memory_space<vmem>>, vector<1x8x128xbf16>
      %38 = vector.shape_cast %37 : vector<1x8x128xbf16> to vector<8x128xbf16>
      %39 = vector.shape_cast %36 : vector<8x128xbf16> to vector<1x8x128xbf16>
      tpu.vector_store %arg5[%c0_28, %c0_29, %c0_30], %39 {strides = array<i32>} : memref<1x8x128xbf16, #tpu.memory_space<vmem>>, vector<1x8x128xbf16>,
    } else {
    }
    return
  }
  func.func @transform_0(%arg0: i32, %arg1: i32, %arg2: i32) -> (i32, i32, i32) {
    %c0_i32 = arith.constant 0 : i32
    return %arg1, %arg0, %arg2 : i32, i32, i32
  }
  func.func @transform_1(%arg0: i32, %arg1: i32, %arg2: i32) -> (i32, i32) {
    %c0_i32 = arith.constant 0 : i32
    %c0_i32_0 = arith.constant 0 : i32
    return %arg2, %c0_i32 : i32, i32
  }
  func.func @transform_2(%arg0: i32, %arg1: i32, %arg2: i32) -> (i32, i32, i32) {
    %c0_i32 = arith.constant 0 : i32
    %c0_i32_0 = arith.constant 0 : i32
    return %arg1, %arg0, %c0_i32 : i32, i32, i32
  }
}

</mosaic_0001>

<bundles_post_ra>
// kernel: network_forward.8
= control target key start
LH: loop header
LB: loop body
LE: loop exit
PB: predicated region body
PF: predicated region fallthrough
CT: control target
= control target key end

     0   :  { %s404_s6 = smov 0   ;;  %s406_s7 = smov 0   ;;  %s458_s0 = inlined_call_operand.vmem [shape: bf16[8,48,128], index: 0, kind: input, shape index: {}]   ;;  %s459_s1 = inlined_call_operand.vmem [shape: bf16[8,48,128], index: 1, kind: output, shape index: {}]  }
   0x1   :  { %s408_s8 = smov 0   ;;  %s410_s9 = smov 0  }
   0x2   :  { %s412_s10 = smov 0  }
   0x3 LB: > { %s20_s11 = sadd.s32 1, %s382_s8  ;;  %s23_s12 = sadd.s32 1, %s386_s9  ;;  %s390_s10 = sphi %s412_s10, %s11_s10   ;;  %s386_s9 = sphi %s410_s9, %s463_s9   ;;  %s382_s8 = sphi %s408_s8, %s462_s8   ;;  %s378_s7 = sphi %s406_s7, %s461_s7   ;;  %s374_s6 = sphi %s404_s6, %s460_s6  }
   0x4   : > { %p21_p0 = scmp.ge.s32.totalorder %s20_s11, 8  ;;  %p292_p1 = scmp.ge.s32.totalorder %s390_s10, 1 }
   0x5   : > { %p108_p2 = scmp.lt.s32.totalorder %s390_s10, 25 }
   0x6   : > { %s465_s11 = smov (%p21_p0, %s20_s11), 0  ;;  %s467_s12 = smov (!%p21_p0, %s23_s12), %s386_s9 }
   0x7   : > { %p109_p3 = pnand %p292_p1, %p108_p2  ;;  %p25_p4 = scmp.ge.s32.totalorder %s467_s12, 3 }
   0x8   : > { %s293_s13 = sshll.u32 (!%p109_p3), %s378_s7, 1  ;;  %p137_p5 = scmp.lt.s32.totalorder (!%p109_p3), %s374_s6, 7 }
   0x9   : > { %s469_s12 = smov (%p25_p4, %s467_s12), 0  ;;  %112 = sbr.rel (%p109_p3) target bundleno = 45 (0x2d), region = 24 }
   0xa   : > { %p139_p6 = scmp.lt.s32.totalorder (!%p109_p3), %s293_s13, 5  ;;  %p297_p7 = scmp.ne.s32.totalorder (!%p109_p3), %s374_s6, 0 }
   0xe   : > { %s138_s14 = scalar_select %p137_p5, %s374_s6, 7 }
   0xf   : > { %s471_s13 = smov (!%p139_p6, %s293_s13), 5 }
  0x10   : > { %s309_s15 = smul.u32 6, %s138_s14 }
  0x11   : > { %159 = sbr.rel (%p297_p7) target bundleno = 27 (0x1b), region = 28 }
  0x12   : > { %s142_s16 = sadd.s32 %s309_s15, %s471_s13 }
  0x13   : > { %s294_s17 = sshll.u32 %s142_s16, 2 }
  0x14   : > { %s144_s20 = scalar_lea.vmem %s458_s0, %s294_s17  ;;  %s440_s23 = scalar_lea.vmem %s459_s1, %s294_s17 }
  0x16   : > { %v392_v0 = vmov 0.0  }
  0x17   : > { %160 = vst [vmem:[#allocation2] sm:$0xff] %v392_v0 }
  0x18   : > { %161 = vst [vmem:[#allocation2 + $0x8] sm:$0xff] %v392_v0 }
  0x19   : > { %162 = vst [vmem:[#allocation3 + $0x8] sm:$0xff] %v392_v0 }
  0x1a   : > { %163 = vst [vmem:[#allocation3] sm:$0xff] %v392_v0 }
  0x1b PF: > { %v303_v1 = vld [vmem:[%s144_s20] sm:$0xff]   ;;  %v393_v16 = vmov 0.0  }
  0x1c   : > { %v304_v4 = vunpack.c.l.bf16 %v303_v1  ;;  %v305_v6 = vunpack.c.h.bf16 %v303_v1 }
  0x1e   : > { %v168_v2 = vld [vmem:[#allocation2] sm:$0xff] }
  0x1f   : > { %v169_v3 = vld [vmem:[#allocation2 + $0x8] sm:$0xff]  ;;  %v170_v5 = vmul.f32 0.75, %v168_v2 }
  0x20   : > { %v171_v7 = vmul.f32 0.75, %v169_v3  ;;  %v174_v8 = vld [vmem:[#allocation3 + $0x8] sm:$0xff] }
  0x21   : > { %v175_v9 = vld [vmem:[#allocation3] sm:$0xff]  ;;  %v176_v10 = vmul.f32 0.97, %v174_v8  ;;  %v172_v12 = vadd.f32 %v304_v4, %v170_v5 }
  0x22   : > { %v177_v11 = vmul.f32 0.97, %v175_v9  ;;  %v173_v13 = vadd.f32 %v305_v6, %v171_v7 }
  0x23   : > { %186 = vst [vmem:[#allocation2] sm:$0xff] %v172_v12  ;;  %v178_v14 = vadd.f32 %v176_v10, %v172_v12 }
  0x24   : > { %v179_v15 = vadd.f32 %v177_v11, %v173_v13  ;;  %187 = vst [vmem:[#allocation2 + $0x8] sm:$0xff] %v173_v13 }
  0x25   : > { %vm180_vm0 = vcmp.ge.f32.partialorder %v178_v14, 1.25 }
  0x26   : > { %vm181_vm1 = vcmp.ge.f32.partialorder %v179_v15, 1.25  ;;  %v298_v17 = vsel %vm180_vm0, 1.0, %v393_v16 }
  0x27   : > { %v299_v18 = vsel %vm181_vm1, 1.0, %v393_v16  ;;  %v188_v19 = vsub.f32 1.0, %v298_v17 }
  0x28   : > { %v189_v20 = vsub.f32 1.0, %v299_v18  ;;  %v307_v21 = vpack.c.bf16 %v299_v18, %v298_v17 }
  0x29   : > { %v190_v22 = vmul.f32 %v188_v19, %v178_v14 }
  0x2a   : > { %v191_v23 = vmul.f32 %v189_v20, %v179_v15  ;;  %308 = vst [vmem:[%s440_s23] sm:$0xff] %v307_v21  }
  0x2b   : > { %192 = vst [vmem:[#allocation3 + $0x8] sm:$0xff] %v190_v22 }
  0x2c   : > { %193 = vst [vmem:[#allocation3] sm:$0xff] %v191_v23 }
  0x2d PF: > { %s11_s10 = sadd.s32 1, %s390_s10   ;;  %s460_s6 = smov %s382_s8 }
  0x2e   : > { %p8_p8 = scmp.ge.s32.totalorder %s11_s10, 26   ;;  %s461_s7 = smov %s386_s9 }
  0x2f   : > { %s462_s8 = smov %s465_s11  ;;  %s463_s9 = smov %s469_s12 }
  0x30   :  { %10 = sbr.rel (!%p8_p8) target bundleno = 3 (0x3), region = 58 }

// kernel: network_forward.9
= control target key start
LH: loop header
LB: loop body
LE: loop exit
PB: predicated region body
PF: predicated region fallthrough
CT: control target
= control target key end

     0   :  { %s2802_s9 = smov 0   ;;  %s2804_s10 = smov 0   ;;  %s3793_s0 = inlined_call_operand.vmem [shape: bf16[8,2048,50], index: 0, kind: input, shape index: {}]   ;;  %s3794_s1 = inlined_call_operand.vmem [shape: bf16[50,128], index: 1, kind: input, shape index: {}]   ;;  %s3795_s2 = inlined_call_operand.vmem [shape: bf16[8,2048,128], index: 2, kind: output, shape index: {}]  }
   0x1   :  { %s2806_s11 = smov 0   ;;  %s2808_s12 = smov 0  }
   0x2   :  { %s2810_s13 = smov 0  }
   0x3 LB: > { %s27_s14 = sadd.s32 1, %s2775_s11  ;;  %s31_s15 = sadd.s32 1, %s2779_s12  ;;  %s2783_s13 = sphi %s2810_s13, %s12_s13   ;;  %s2779_s12 = sphi %s2808_s12, %s3799_s12   ;;  %s2775_s11 = sphi %s2806_s11, %s3798_s11   ;;  %s2771_s10 = sphi %s2804_s10, %s3797_s10   ;;  %s2767_s9 = sphi %s2802_s9, %s3796_s9  }
   0x4   : > { %p29_p0 = scmp.ge.s32.totalorder %s27_s14, 8  ;;  %p2282_p1 = scmp.ge.s32.totalorder %s2783_s13, 1 }
   0x5   : > { %p156_p2 = scmp.lt.s32.totalorder %s2783_s13, 33 }
   0x6   : > { %s3801_s14 = smov (%p29_p0, %s27_s14), 0  ;;  %s3803_s15 = smov (!%p29_p0, %s31_s15), %s2779_s12 }
   0x7   : > { %p157_p3 = pnand %p2282_p1, %p156_p2  ;;  %p33_p4 = scmp.ge.s32.totalorder %s3803_s15, 4 }
   0x8   : > { %s2283_s16 = sshll.u32 (!%p157_p3), %s2771_s10, 6  ;;  %p195_p5 = scmp.lt.s32.totalorder (!%p157_p3), %s2767_s9, 7 }
   0x9   : > { %s3805_s15 = smov (%p33_p4, %s3803_s15), 0  ;;  %160 = sbr.rel (%p157_p3) target bundleno = 458 (0x1ca), region = 28 }
   0xa   : > { %p197_p6 = scmp.lt.s32.totalorder (!%p157_p3), %s2283_s16, 255  ;;  %p224_p7 = scmp.eq.s32.totalorder (!%p157_p3), %s2767_s9, 0 }
   0xe   : > { %s3807_s9 = smov (!%p195_p5, %s2767_s9), 7  ;;  %s3809_s16 = smov (!%p197_p6, %s2283_s16), 255  ;;  %v2785_v0 = vmov (%p224_p7), 0.0  }
   0xf   : > { %s2284_s17 = sshll.u32 %s3807_s9, 8  ;;  %229 = sbr.rel (!%p224_p7) target bundleno = 143 (0x8f), region = 32  ;;  %230 = vst [vmem:[#allocation3 + $0xb0] sm:$0xff] (%p224_p7), %v2785_v0 }
  0x10   : > { %s203_s18 = sadd.s32 %s2284_s17, %s3809_s16  ;;  %231 = vst [vmem:[#allocation3 + $0x1b0] sm:$0xff] (%p224_p7), %v2785_v0 }
  0x11   : > { %s2285_s19 = sshll.u32 %s203_s18, 2  ;;  %232 = vst [vmem:[#allocation3 + $0xd8] sm:$0xff] (%p224_p7), %v2785_v0 }
  0x12   : > { %s2835_s22 = scalar_lea.vmem %s3793_s0, %s2285_s19  ;;  %s2840_s25 = scalar_lea.vmem %s3795_s2, %s2285_s19  ;;  %233 = vst [vmem:[#allocation3 + $0x18] sm:$0xff] (%p224_p7), %v2785_v0 }
  0x13   : > { %234 = vst [vmem:[#allocation3 + $0x50] sm:$0xff] (%p224_p7), %v2785_v0 }
  0x14   : > { %235 = vst [vmem:[#allocation3 + $0x168] sm:$0xff] %v2785_v0 }
  0x15   : > { %236 = vst [vmem:[#allocation3 + $0x130] sm:$0xff] %v2785_v0 }
  0x16   : > { %237 = vst [vmem:[#allocation3 + $0x48] sm:$0xff] %v2785_v0 }
  0x17   : > { %238 = vst [vmem:[#allocation3 + $0x180] sm:$0xff] %v2785_v0 }
  0x18   : > { %239 = vst [vmem:[#allocation3 + $0x110] sm:$0xff] %v2785_v0 }
  0x19   : > { %240 = vst [vmem:[#allocation3 + $0x118] sm:$0xff] %v2785_v0 }
  0x1a   : > { %241 = vst [vmem:[#allocation3 + $0x98] sm:$0xff] %v2785_v0 }
  0x1b   : > { %242 = vst [vmem:[#allocation3 + $0x120] sm:$0xff] %v2785_v0 }
  0x1c   : > { %243 = vst [vmem:[#allocation3 + $0x150] sm:$0xff] %v2785_v0 }
  0x1d   : > { %244 = vst [vmem:[#allocation3 + $0x108] sm:$0xff] %v2785_v0 }
  0x1e   : > { %245 = vst [vmem:[#allocation3 + $0x60] sm:$0xff] %v2785_v0 }
  0x1f   : > { %246 = vst [vmem:[#allocation3 + $0xe0] sm:$0xff] %v2785_v0 }
  0x20   : > { %247 = vst [vmem:[#allocation3 + $0x188] sm:$0xff] %v2785_v0 }
  0x21   : > { %248 = vst [vmem:[#allocation3 + $0x138] sm:$0xff] %v2785_v0 }
  0x22   : > { %249 = vst [vmem:[#allocation3 + $0x140] sm:$0xff] %v2785_v0 }
  0x23   : > { %250 = vst [vmem:[#allocation3 + $0x80] sm:$0xff] %v2785_v0 }
  0x24   : > { %251 = vst [vmem:[#allocation3 + $0x1a8] sm:$0xff] %v2785_v0 }
  0x25   : > { %252 = vst [vmem:[#allocation3 + $0x1b8] sm:$0xff] %v2785_v0 }
  0x26   : > { %253 = vst [vmem:[#allocation3 + $0x28] sm:$0xff] %v2785_v0 }
  0x27   : > { %254 = vst [vmem:[#allocation3 + $0x1e8] sm:$0xff] %v2785_v0 }
  0x28   : > { %255 = vst [vmem:[#allocation3 + $0xf8] sm:$0xff] %v2785_v0 }
  0x29   : > { %256 = vst [vmem:[#allocation3 + $0x160] sm:$0xff] %v2785_v0 }
  0x2a   : > { %257 = vst [vmem:[#allocation3 + $0x30] sm:$0xff] %v2785_v0 }
  0x2b   : > { %258 = vst [vmem:[#allocation3 + $0x1e0] sm:$0xff] %v2785_v0 }
  0x2c   : > { %259 = vst [vmem:[#allocation3] sm:$0xff] %v2785_v0 }
  0x2d   : > { %260 = vst [vmem:[#allocation3 + $0xf0] sm:$0xff] %v2785_v0 }
  0x2e   : > { %261 = vst [vmem:[#allocation3 + $0x8] sm:$0xff] %v2785_v0 }
  0x2f   : > { %262 = vst [vmem:[#allocation3 + $0x148] sm:$0xff] %v2785_v0 }
  0x30   : > { %263 = vst [vmem:[#allocation3 + $0x1d0] sm:$0xff] %v2785_v0 }
  0x31   : > { %264 = vst [vmem:[#allocation3 + $0x100] sm:$0xff] %v2785_v0 }
  0x32   : > { %265 = vst [vmem:[#allocation3 + $0xc8] sm:$0xff] %v2785_v0 }
  0x33   : > { %266 = vst [vmem:[#allocation3 + $0x40] sm:$0xff] %v2785_v0 }
  0x34   : > { %267 = vst [vmem:[#allocation3 + $0x1f8] sm:$0xff] %v2785_v0 }
  0x35   : > { %268 = vst [vmem:[#allocation3 + $0x20] sm:$0xff] %v2785_v0 }
  0x36   : > { %269 = vst [vmem:[#allocation3 + $0x128] sm:$0xff] %v2785_v0 }
  0x37   : > { %270 = vst [vmem:[#allocation3 + $0x1a0] sm:$0xff] %v2785_v0 }
  0x38   : > { %271 = vst [vmem:[#allocation3 + $0x1f0] sm:$0xff] %v2785_v0 }
  0x39   : > { %272 = vst [vmem:[#allocation3 + $0xe8] sm:$0xff] %v2785_v0 }
  0x3a   : > { %273 = vst [vmem:[#allocation3 + $0x78] sm:$0xff] %v2785_v0 }
  0x3b   : > { %274 = vst [vmem:[#allocation3 + $0x70] sm:$0xff] %v2785_v0 }
  0x3c   : > { %275 = vst [vmem:[#allocation3 + $0x90] sm:$0xff] %v2785_v0 }
  0x3d   : > { %276 = vst [vmem:[#allocation3 + $0x1d8] sm:$0xff] %v2785_v0 }
  0x3e   : > { %277 = vst [vmem:[#allocation3 + $0xd0] sm:$0xff] %v2785_v0 }
  0x3f   : > { %278 = vst [vmem:[#allocation3 + $0xb8] sm:$0xff] %v2785_v0 }
  0x40   : > { %279 = vst [vmem:[#allocation3 + $0x88] sm:$0xff] %v2785_v0 }
  0x41   : > { %280 = vst [vmem:[#allocation3 + $0xa8] sm:$0xff] %v2785_v0 }
  0x42   : > { %281 = vst [vmem:[#allocation3 + $0x1c8] sm:$0xff] %v2785_v0 }
  0x43   : > { %282 = vst [vmem:[#allocation3 + $0x170] sm:$0xff] %v2785_v0 }
  0x44   : > { %283 = vst [vmem:[#allocation3 + $0x178] sm:$0xff] %v2785_v0 }
  0x45   : > { %284 = vst [vmem:[#allocation3 + $0x68] sm:$0xff] %v2785_v0 }
  0x46   : > { %285 = vst [vmem:[#allocation3 + $0x190] sm:$0xff] %v2785_v0 }
  0x47   : > { %286 = vst [vmem:[#allocation3 + $0x198] sm:$0xff] %v2785_v0 }
  0x48   : > { %287 = vst [vmem:[#allocation3 + $0x38] sm:$0xff] %v2785_v0 }
  0x49   : > { %288 = vst [vmem:[#allocation3 + $0xc0] sm:$0xff] %v2785_v0 }
  0x4a   : > { %289 = vst [vmem:[#allocation3 + $0x1c0] sm:$0xff] %v2785_v0 }
  0x4b   : > { %290 = vst [vmem:[#allocation3 + $0x158] sm:$0xff] %v2785_v0 }
  0x4c   : > { %291 = vst [vmem:[#allocation3 + $0x10] sm:$0xff] %v2785_v0 }
  0x4d   : > { %292 = vst [vmem:[#allocation3 + $0x58] sm:$0xff] %v2785_v0 }
  0x4e   : > { %293 = vst [vmem:[#allocation3 + $0xa0] sm:$0xff] %v2785_v0 }
  0x4f   : > { %294 = vst [vmem:[#allocation4 + $0x68] sm:$0xff] %v2785_v0 }
  0x50   : > { %295 = vst [vmem:[#allocation4 + $0x150] sm:$0xff] %v2785_v0 }
  0x51   : > { %296 = vst [vmem:[#allocation4 + $0x70] sm:$0xff] %v2785_v0 }
  0x52   : > { %297 = vst [vmem:[#allocation4 + $0x160] sm:$0xff] %v2785_v0 }
  0x53   : > { %298 = vst [vmem:[#allocation4 + $0xd0] sm:$0xff] %v2785_v0 }
  0x54   : > { %299 = vst [vmem:[#allocation4 + $0xd8] sm:$0xff] %v2785_v0 }
  0x55   : > { %300 = vst [vmem:[#allocation4 + $0x1e0] sm:$0xff] %v2785_v0 }
  0x56   : > { %301 = vst [vmem:[#allocation4 + $0x30] sm:$0xff] %v2785_v0 }
  0x57   : > { %302 = vst [vmem:[#allocation4 + $0x148] sm:$0xff] %v2785_v0 }
  0x58   : > { %303 = vst [vmem:[#allocation4 + $0x50] sm:$0xff] %v2785_v0 }
  0x59   : > { %304 = vst [vmem:[#allocation4 + $0x1f0] sm:$0xff] %v2785_v0 }
  0x5a   : > { %305 = vst [vmem:[#allocation4 + $0x130] sm:$0xff] %v2785_v0 }
  0x5b   : > { %306 = vst [vmem:[#allocation4 + $0x190] sm:$0xff] %v2785_v0 }
  0x5c   : > { %307 = vst [vmem:[#allocation4 + $0x8] sm:$0xff] %v2785_v0 }
  0x5d   : > { %308 = vst [vmem:[#allocation4 + $0x88] sm:$0xff] %v2785_v0 }
  0x5e   : > { %309 = vst [vmem:[#allocation4 + $0x38] sm:$0xff] %v2785_v0 }
  0x5f   : > { %310 = vst [vmem:[#allocation4 + $0xe0] sm:$0xff] %v2785_v0 }
  0x60   : > { %311 = vst [vmem:[#allocation4 + $0x10] sm:$0xff] %v2785_v0 }
  0x61   : > { %312 = vst [vmem:[#allocation4 + $0x1a8] sm:$0xff] %v2785_v0 }
  0x62   : > { %313 = vst [vmem:[#allocation4 + $0xa0] sm:$0xff] %v2785_v0 }
  0x63   : > { %314 = vst [vmem:[#allocation4 + $0x1c0] sm:$0xff] %v2785_v0 }
  0x64   : > { %315 = vst [vmem:[#allocation4 + $0x78] sm:$0xff] %v2785_v0 }
  0x65   : > { %316 = vst [vmem:[#allocation4 + $0x108] sm:$0xff] %v2785_v0 }
  0x66   : > { %317 = vst [vmem:[#allocation4 + $0x80] sm:$0xff] %v2785_v0 }
  0x67   : > { %318 = vst [vmem:[#allocation4 + $0x58] sm:$0xff] %v2785_v0 }
  0x68   : > { %319 = vst [vmem:[#allocation4 + $0x48] sm:$0xff] %v2785_v0 }
  0x69   : > { %320 = vst [vmem:[#allocation4 + $0x40] sm:$0xff] %v2785_v0 }
  0x6a   : > { %321 = vst [vmem:[#allocation4 + $0x1a0] sm:$0xff] %v2785_v0 }
  0x6b   : > { %322 = vst [vmem:[#allocation4 + $0x198] sm:$0xff] %v2785_v0 }
  0x6c   : > { %323 = vst [vmem:[#allocation4 + $0xe8] sm:$0xff] %v2785_v0 }
  0x6d   : > { %324 = vst [vmem:[#allocation4 + $0x168] sm:$0xff] %v2785_v0 }
  0x6e   : > { %325 = vst [vmem:[#allocation4 + $0x158] sm:$0xff] %v2785_v0 }
  0x6f   : > { %326 = vst [vmem:[#allocation4 + $0x1d8] sm:$0xff] %v2785_v0 }
  0x70   : > { %327 = vst [vmem:[#allocation4 + $0x28] sm:$0xff] %v2785_v0 }
  0x71   : > { %328 = vst [vmem:[#allocation4] sm:$0xff] %v2785_v0 }
  0x72   : > { %329 = vst [vmem:[#allocation4 + $0x1c8] sm:$0xff] %v2785_v0 }
  0x73   : > { %330 = vst [vmem:[#allocation4 + $0x1e8] sm:$0xff] %v2785_v0 }
  0x74   : > { %331 = vst [vmem:[#allocation4 + $0x140] sm:$0xff] %v2785_v0 }
  0x75   : > { %332 = vst [vmem:[#allocation4 + $0x60] sm:$0xff] %v2785_v0 }
  0x76   : > { %333 = vst [vmem:[#allocation4 + $0x98] sm:$0xff] %v2785_v0 }
  0x77   : > { %334 = vst [vmem:[#allocation4 + $0x1b8] sm:$0xff] %v2785_v0 }
  0x78   : > { %335 = vst [vmem:[#allocation4 + $0x100] sm:$0xff] %v2785_v0 }
  0x79   : > { %336 = vst [vmem:[#allocation4 + $0xc8] sm:$0xff] %v2785_v0 }
  0x7a   : > { %337 = vst [vmem:[#allocation4 + $0xf8] sm:$0xff] %v2785_v0 }
  0x7b   : > { %338 = vst [vmem:[#allocation4 + $0x178] sm:$0xff] %v2785_v0 }
  0x7c   : > { %339 = vst [vmem:[#allocation4 + $0x180] sm:$0xff] %v2785_v0 }
  0x7d   : > { %340 = vst [vmem:[#allocation4 + $0xb0] sm:$0xff] %v2785_v0 }
  0x7e   : > { %341 = vst [vmem:[#allocation4 + $0x110] sm:$0xff] %v2785_v0 }
  0x7f   : > { %342 = vst [vmem:[#allocation4 + $0x20] sm:$0xff] %v2785_v0 }
  0x80   : > { %343 = vst [vmem:[#allocation4 + $0xb8] sm:$0xff] %v2785_v0 }
  0x81   : > { %344 = vst [vmem:[#allocation4 + $0x120] sm:$0xff] %v2785_v0 }
  0x82   : > { %345 = vst [vmem:[#allocation4 + $0x90] sm:$0xff] %v2785_v0 }
  0x83   : > { %346 = vst [vmem:[#allocation4 + $0xa8] sm:$0xff] %v2785_v0 }
  0x84   : > { %347 = vst [vmem:[#allocation4 + $0xc0] sm:$0xff] %v2785_v0 }
  0x85   : > { %348 = vst [vmem:[#allocation4 + $0x138] sm:$0xff] %v2785_v0 }
  0x86   : > { %349 = vst [vmem:[#allocation4 + $0x188] sm:$0xff] %v2785_v0 }
  0x87   : > { %350 = vst [vmem:[#allocation4 + $0x1b0] sm:$0xff] %v2785_v0 }
  0x88   : > { %351 = vst [vmem:[#allocation4 + $0x18] sm:$0xff] %v2785_v0 }
  0x89   : > { %352 = vst [vmem:[#allocation4 + $0xf0] sm:$0xff] %v2785_v0 }
  0x8a   : > { %353 = vst [vmem:[#allocation4 + $0x128] sm:$0xff] %v2785_v0 }
  0x8b   : > { %354 = vst [vmem:[#allocation4 + $0x1f8] sm:$0xff] %v2785_v0 }
  0x8c   : > { %355 = vst [vmem:[#allocation4 + $0x170] sm:$0xff] %v2785_v0 }
  0x8d   : > { %356 = vst [vmem:[#allocation4 + $0x1d0] sm:$0xff] %v2785_v0 }
  0x8e   : > { %357 = vst [vmem:[#allocation4 + $0x118] sm:$0xff] %v2785_v0 }
  0x8f PF: > { %v559_v1 = vld [vmem:[%s3794_s1 + $0x18] sm:$0x1]  ;;  %vm838_vm0 = vcmask 1040384   ;;  %v2563_v5 = vld [vmem:[%s3794_s1 + $0x10] sm:$0xff]  ;;  %v2562_v6 = vld [vmem:[%s3794_s1 + $0x8] sm:$0xff]  ;;  %vm741_vm1 = vcmask 408576  }
  0x90   : > { %v733_v2 = vunpack.c.l.b16 %v559_v1  ;;  %v2561_v7 = vld [vmem:[%s3794_s1] sm:$0xff]  ;;  %v2530_v12 = vld [vmem:[%s2835_s22 + $0x8] sm:$0xff]  ;;  %v2531_v16 = vld [vmem:[%s2835_s22 + $0x10] sm:$0xff] }
  0x91   : > { %v2529_v8 = vld [vmem:[%s2835_s22] sm:$0xff]  ;;  %v2538_v13 = vld [vmem:[%s2835_s22 + $0x48] sm:$0xff]  ;;  %v2539_v17 = vld [vmem:[%s2835_s22 + $0x50] sm:$0xff] }
  0x92   : > { %v737_v3 = vpack.c.b16 %v733_v2, %v733_v2  ;;  %v2537_v9 = vld [vmem:[%s2835_s22 + $0x40] sm:$0xff]  ;;  %v2546_v14 = vld [vmem:[%s2835_s22 + $0x88] sm:$0xff]  ;;  %v2547_v18 = vld [vmem:[%s2835_s22 + $0x90] sm:$0xff] }
  0x93   : > { %v2545_v10 = vld [vmem:[%s2835_s22 + $0x80] sm:$0xff]  ;;  %v2554_v15 = vld [vmem:[%s2835_s22 + $0xc8] sm:$0xff]  ;;  %v2555_v19 = vld [vmem:[%s2835_s22 + $0xd0] sm:$0xff] }
  0x94   : > { %v840_v4 = vsel %vm838_vm0, %v737_v3, 0  ;;  %v2553_v11 = vld [vmem:[%s2835_s22 + $0xc0] sm:$0xff]  ;;  %v2532_v20 = vld [vmem:[%s2835_s22 + $0x18] sm:$0xff]  ;;  %v2534_v28 = vld [vmem:[%s2835_s22 + $0x28] sm:$0xff] }
  0x95   : > { %846 = vmatpush.bf16.msra.mxu0 %v840_v4  ;;  %2691 = vmatpush.bf16.msra.mxu1 %v840_v4  ;;  %v2540_v21 = vld [vmem:[%s2835_s22 + $0x58] sm:$0xff]  ;;  %v2533_v24 = vld [vmem:[%s2835_s22 + $0x20] sm:$0xff]  ;;  %v2542_v29 = vld [vmem:[%s2835_s22 + $0x68] sm:$0xff] }
  0x96   : > { %2692 = vmatpush.bf16.msra.mxu2 %v840_v4  ;;  %2693 = vmatpush.bf16.msra.mxu3 %v840_v4  ;;  %v2548_v22 = vld [vmem:[%s2835_s22 + $0x98] sm:$0xff]  ;;  %v2541_v25 = vld [vmem:[%s2835_s22 + $0x60] sm:$0xff]  ;;  %v2550_v30 = vld [vmem:[%s2835_s22 + $0xa8] sm:$0xff] }
  0x97   : > { %v2556_v23 = vld [vmem:[%s2835_s22 + $0xd8] sm:$0xff]  ;;  %v2549_v26 = vld [vmem:[%s2835_s22 + $0xa0] sm:$0xff]  ;;  %v2558_v31 = vld [vmem:[%s2835_s22 + $0xe8] sm:$0xff] }
  0x98   : > { %v2557_v27 = vld [vmem:[%s2835_s22 + $0xe0] sm:$0xff]  ;;  %v2535_v32 = vld [vmem:[%s2835_s22 + $0x30] sm:$0xff]  ;;  %v2536_v36 = vld [vmem:[%s2835_s22 + $0x38] sm:$0xff] }
  0x99   : > { %847 = vmatpush.bf16.msra.mxu0 %v2563_v5  ;;  %2694 = vmatpush.bf16.msra.mxu1 %v2563_v5  ;;  %v2543_v33 = vld [vmem:[%s2835_s22 + $0x70] sm:$0xff]  ;;  %v2544_v37 = vld [vmem:[%s2835_s22 + $0x78] sm:$0xff]  ;;  %v1158_v41 = vld [vmem:[#allocation3 + $0xe0] sm:$0xff] }
  0x9a   : > { %2695 = vmatpush.bf16.msra.mxu2 %v2563_v5  ;;  %2696 = vmatpush.bf16.msra.mxu3 %v2563_v5  ;;  %v2551_v34 = vld [vmem:[%s2835_s22 + $0xb0] sm:$0xff]  ;;  %v2552_v38 = vld [vmem:[%s2835_s22 + $0xb8] sm:$0xff]  ;;  %v1398_v42 = vld [vmem:[#allocation4 + $0x68] sm:$0xff]  ;;  %v1222_v45 = vmul.f32 0.75, %v1158_v41 }
  0x9b   : > { %v2559_v35 = vld [vmem:[%s2835_s22 + $0xf0] sm:$0xff]  ;;  %v2560_v39 = vld [vmem:[%s2835_s22 + $0xf8] sm:$0xff]  ;;  %v1414_v43 = vld [vmem:[#allocation4 + $0xe0] sm:$0xff]  ;;  %v1462_v46 = vmul.f32 0.97, %v1398_v42 }
  0x9c   : > { %v1142_v40 = vld [vmem:[#allocation3 + $0xb0] sm:$0xff]  ;;  %v1478_v47 = vmul.f32 0.97, %v1414_v43  ;;  %v1174_v48 = vld [vmem:[#allocation3 + $0x148] sm:$0xff]  ;;  %v1430_v49 = vld [vmem:[#allocation4 + $0x1d8] sm:$0xff] }
  0x9d   : > { %848 = vmatpush.bf16.msra.mxu0 %v2562_v6  ;;  %2697 = vmatpush.bf16.msra.mxu1 %v2562_v6  ;;  %v1206_v44 = vmul.f32 0.75, %v1142_v40  ;;  %v1190_v50 = vld [vmem:[#allocation3 + $0xb8] sm:$0xff]  ;;  %v1446_v53 = vld [vmem:[#allocation4 + $0x20] sm:$0xff]  ;;  %v1143_v54 = vld [vmem:[#allocation3 + $0x1b0] sm:$0xff]  ;;  %v1238_v59 = vmul.f32 0.75, %v1174_v48 }
  0x9e   : > { %2698 = vmatpush.bf16.msra.mxu2 %v2562_v6  ;;  %2699 = vmatpush.bf16.msra.mxu3 %v2562_v6  ;;  %v1399_v57 = vld [vmem:[#allocation4 + $0x150] sm:$0xff]  ;;  %v1494_v60 = vmul.f32 0.97, %v1430_v49  ;;  %v1254_v61 = vmul.f32 0.75, %v1190_v50  ;;  %v1159_v62 = vld [vmem:[#allocation3 + $0x188] sm:$0xff]  ;;  %v1207_v3 = vmul.f32 0.75, %v1143_v54 }
  0x9f   : > { %v1415_v58 = vld [vmem:[#allocation4 + $0x10] sm:$0xff]  ;;  %v1510_v2 = vmul.f32 0.97, %v1446_v53  ;;  %v1431_v4 = vld [vmem:[#allocation4 + $0x28] sm:$0xff]  ;;  %v1463_v6 = vmul.f32 0.97, %v1399_v57 }
  0xa0   : > { %v1175_v63 = vld [vmem:[#allocation3 + $0x1d0] sm:$0xff]  ;;  %v1191_v5 = vld [vmem:[#allocation3 + $0x88] sm:$0xff] }
  0xa1   : > { %849 = vmatpush.bf16.msra.mxu0 %v2561_v7  ;;  %2700 = vmatpush.bf16.msra.mxu1 %v2561_v7 }
  0xa2   : > { %2701 = vmatpush.bf16.msra.mxu2 %v2561_v7  ;;  %2702 = vmatpush.bf16.msra.mxu3 %v2561_v7  ;;  %v1479_v7 = vmul.f32 0.97, %v1415_v58 }
  0xa4   : > { %2430 = vmatmul.msk.bf16.vlgmr.msra.gmra.mxu0 %vm741_vm1, %v2529_v8  ;;  %2438 = vmatmul.msk.bf16.vlgmr.msra.gmra.mxu1 %vm741_vm1, %v2537_v9  ;;  %v1447_v8 = vld [vmem:[#allocation4 + $0xb8] sm:$0xff]  ;;  %v1223_v9 = vmul.f32 0.75, %v1159_v62 }
  0xa5   : > { %2446 = vmatmul.msk.bf16.vlgmr.msra.gmra.mxu2 %vm741_vm1, %v2545_v10  ;;  %2454 = vmatmul.msk.bf16.vlgmr.msra.gmra.mxu3 %vm741_vm1, %v2553_v11  ;;  %v3046_v10 = vmul.f32 0.75, %v1175_v63  ;;  %v1144_v11 = vld [vmem:[#allocation3 + $0xd8] sm:$0xff] }
  0xb4   : > { %2431 = vmatmul.msk.bf16.gmra.mxu0 %vm741_vm1, %v2530_v12  ;;  %2439 = vmatmul.msk.bf16.gmra.mxu1 %vm741_vm1, %v2538_v13  ;;  %v1160_v12 = vld [vmem:[#allocation3 + $0x138] sm:$0xff]  ;;  %v2786_v13 = vmov 0.0  }
  0xb5   : > { %2447 = vmatmul.msk.bf16.gmra.mxu2 %vm741_vm1, %v2546_v14  ;;  %2455 = vmatmul.msk.bf16.gmra.mxu3 %vm741_vm1, %v2554_v15 }
  0xc4   : > { %2432 = vmatmul.msk.bf16.gmra.mxu0 %vm741_vm1, %v2531_v16  ;;  %2440 = vmatmul.msk.bf16.gmra.mxu1 %vm741_vm1, %v2539_v17  ;;  %v3054_v16 = vmul.f32 0.97, %v1431_v4  ;;  %v1255_v17 = vmul.f32 0.75, %v1191_v5  ;;  %v1161_v4 = vld [vmem:[#allocation3 + $0x140] sm:$0xff] }
  0xc5   : > { %2448 = vmatmul.msk.bf16.gmra.mxu2 %vm741_vm1, %v2547_v18  ;;  %2456 = vmatmul.msk.bf16.gmra.mxu3 %vm741_vm1, %v2555_v19 }
  0xd4   : > { %2433 = vmatmul.msk.bf16.gmra.mxu0 %vm741_vm1, %v2532_v20  ;;  %2441 = vmatmul.msk.bf16.gmra.mxu1 %vm741_vm1, %v2540_v21 }
  0xd5   : > { %2449 = vmatmul.msk.bf16.gmra.mxu2 %vm741_vm1, %v2548_v22  ;;  %2457 = vmatmul.msk.bf16.gmra.mxu3 %vm741_vm1, %v2556_v23  ;;  %v3058_v22 = vmul.f32 0.97, %v1447_v8  ;;  %v1400_v23 = vld [vmem:[#allocation4 + $0x70] sm:$0xff] }
  0xd6   : > { %v1464_v40 = vmul.f32 0.97, %v1400_v23 }
  0xe4   : > { %2434 = vmatmul.msk.bf16.gmra.mxu0 %vm741_vm1, %v2533_v24  ;;  %2442 = vmatmul.msk.bf16.gmra.mxu1 %vm741_vm1, %v2541_v25  ;;  %v1416_v24 = vld [vmem:[#allocation4 + $0x1a8] sm:$0xff] }
  0xe5   : > { %2450 = vmatmul.msk.bf16.gmra.mxu2 %vm741_vm1, %v2549_v26  ;;  %2458 = vmatmul.msk.bf16.gmra.mxu3 %vm741_vm1, %v2557_v27  ;;  %v1480_v41 = vmul.f32 0.97, %v1416_v24  ;;  %v1193_v24 = vld [vmem:[#allocation3 + $0x1c8] sm:$0xff] }
  0xf4   : > { %2435 = vmatmul.msk.bf16.gmra.mxu0 %vm741_vm1, %v2534_v28  ;;  %2443 = vmatmul.msk.bf16.gmra.mxu1 %vm741_vm1, %v2542_v29  ;;  %v1208_v29 = vmul.f32 0.75, %v1144_v11 }
  0xf5   : > { %2451 = vmatmul.msk.bf16.gmra.mxu2 %vm741_vm1, %v2550_v30  ;;  %2459 = vmatmul.msk.bf16.gmra.mxu3 %vm741_vm1, %v2558_v31  ;;  %v1224_v30 = vmul.f32 0.75, %v1160_v12  ;;  %v1176_v31 = vld [vmem:[#allocation3 + $0x100] sm:$0xff] }
 0x104   : > { %2436 = vmatmul.msk.bf16.gmra.mxu0 %vm741_vm1, %v2535_v32  ;;  %2444 = vmatmul.msk.bf16.gmra.mxu1 %vm741_vm1, %v2543_v33  ;;  %v1192_v32 = vld [vmem:[#allocation3 + $0xa8] sm:$0xff] }
 0x105   : > { %2452 = vmatmul.msk.bf16.gmra.mxu2 %vm741_vm1, %v2551_v34  ;;  %2460 = vmatmul.msk.bf16.gmra.mxu3 %vm741_vm1, %v2559_v35 }
 0x114   : > { %2437 = vmatmul.msk.bf16.gmra.mxu0 %vm741_vm1, %v2536_v36  ;;  %2445 = vmatmul.msk.bf16.gmra.mxu1 %vm741_vm1, %v2544_v37  ;;  %v1432_v37 = vld [vmem:[#allocation4] sm:$0xff] }
 0x115   : > { %2453 = vmatmul.msk.bf16.gmra.mxu2 %vm741_vm1, %v2552_v38  ;;  %2461 = vmatmul.msk.bf16.gmra.mxu3 %vm741_vm1, %v2560_v39 }
 0x121   : > { %v851_v51 = vpop.f32.mrf.mxu0  ;;  %v891_v52 = vpop.f32.mrf.mxu1 }
 0x122   : > { %v1334_v55 = vadd.f32 %v1206_v44, %v851_v51  ;;  %v1350_v56 = vadd.f32 %v1222_v45, %v891_v52  ;;  %v3060_v44 = vmul.f32 0.75, %v1176_v31  ;;  %v3062_v45 = vmul.f32 0.75, %v1192_v32 }
 0x124   : > { %v1526_v0 = vadd.f32 %v1462_v46, %v1334_v55  ;;  %1782 = vst [vmem:[#allocation3 + $0xb0] sm:$0xff] %v1334_v55  ;;  %v1542_v1 = vadd.f32 %v1478_v47, %v1350_v56  ;;  %v3064_v46 = vmul.f32 0.97, %v1432_v37  ;;  %v1448_v47 = vld [vmem:[#allocation4 + $0x120] sm:$0xff] }
 0x125   : > { %1798 = vst [vmem:[#allocation3 + $0xe0] sm:$0xff] %v1350_v56 }
 0x126   : > { %vm1590_vm2 = vcmp.ge.f32.partialorder %v1526_v0, 1.25  ;;  %vm1606_vm3 = vcmp.ge.f32.partialorder %v1542_v1, 1.25 }
 0x127   : > { %v3049_v14 = vsel %vm1590_vm2, 1.0, %v2786_v13  ;;  %v3052_v15 = vsel %vm1606_vm3, 1.0, %v2786_v13 }
 0x128   : > { %v1846_v18 = vsub.f32 1.0, %v3049_v14  ;;  %v1862_v19 = vsub.f32 1.0, %v3052_v15  ;;  %v931_v20 = vpop.f32.mrf.mxu2  ;;  %v971_v21 = vpop.f32.mrf.mxu3 }
 0x129   : > { %v1366_v25 = vadd.f32 %v1238_v59, %v931_v20  ;;  %v1382_v26 = vadd.f32 %v1254_v61, %v971_v21  ;;  %v853_v27 = vpop.f32.mrf.mxu0  ;;  %v893_v28 = vpop.f32.mrf.mxu1  ;;  %v3077_v59 = vmul.f32 0.97, %v1448_v47  ;;  %v1225_v20 = vmul.f32 0.75, %v1161_v4  ;;  %v1177_v21 = vld [vmem:[#allocation3 + $0xc8] sm:$0xff] }
 0x12a   : > { %v1910_v33 = vmul.f32 %v1846_v18, %v1526_v0  ;;  %v1926_v34 = vmul.f32 %v1862_v19, %v1542_v1  ;;  %v1335_v35 = vadd.f32 %v1207_v3, %v853_v27  ;;  %v1351_v36 = vadd.f32 %v1223_v9, %v893_v28  ;;  %v1401_v3 = vld [vmem:[#allocation4 + $0x160] sm:$0xff]  ;;  %v1433_v28 = vld [vmem:[#allocation4 + $0x1c8] sm:$0xff] }
 0x12b   : > { %v1558_v38 = vadd.f32 %v1494_v60, %v1366_v25  ;;  %1814 = vst [vmem:[#allocation3 + $0x148] sm:$0xff] %v1366_v25  ;;  %v1574_v39 = vadd.f32 %v1510_v2, %v1382_v26  ;;  %v1145_v60 = vld [vmem:[#allocation3 + $0x18] sm:$0xff]  ;;  %v1417_v9 = vld [vmem:[#allocation4 + $0xa0] sm:$0xff]  ;;  %v1465_v19 = vmul.f32 0.97, %v1401_v3  ;;  %v1241_v27 = vmul.f32 0.75, %v1177_v21 }
 0x12c   : > { %1974 = vst [vmem:[#allocation4 + $0x68] sm:$0xff] %v1910_v33  ;;  %v1527_v42 = vadd.f32 %v1463_v6, %v1335_v35  ;;  %v1543_v43 = vadd.f32 %v1479_v7, %v1351_v36  ;;  %v1481_v23 = vmul.f32 0.97, %v1417_v9  ;;  %v1450_v21 = vld [vmem:[#allocation4 + $0xa8] sm:$0xff] }
 0x12d   : > { %1990 = vst [vmem:[#allocation4 + $0xe0] sm:$0xff] %v1926_v34  ;;  %vm1622_vm4 = vcmp.ge.f32.partialorder %v1558_v38, 1.25  ;;  %vm1638_vm5 = vcmp.ge.f32.partialorder %v1574_v39, 1.25  ;;  %v1257_v34 = vmul.f32 0.75, %v1193_v24 }
 0x12e   : > { %v3067_v48 = vsel %vm1622_vm4, 1.0, %v2786_v13  ;;  %v3070_v49 = vsel %vm1638_vm5, 1.0, %v2786_v13  ;;  %1830 = vst [vmem:[#allocation3 + $0xb8] sm:$0xff] %v1382_v26  ;;  %vm1591_vm6 = vcmp.ge.f32.partialorder %v1527_v42, 1.25  ;;  %vm1607_vm7 = vcmp.ge.f32.partialorder %v1543_v43, 1.25 }
 0x12f   : > { %v1878_v50 = vsub.f32 1.0, %v3067_v48  ;;  %v1894_v51 = vsub.f32 1.0, %v3070_v49  ;;  %v2463_v52 = vsel %vm1591_vm6, 1.0, %v2786_v13  ;;  %1783 = vst [vmem:[#allocation3 + $0x1b0] sm:$0xff] %v1335_v35  ;;  %v2479_v53 = vsel %vm1607_vm7, 1.0, %v2786_v13  ;;  %v1449_v35 = vld [vmem:[#allocation4 + $0x90] sm:$0xff] }
 0x130   : > { %v1847_v54 = vsub.f32 1.0, %v2463_v52  ;;  %v2565_v55 = vpack.c.bf16 %v2463_v52, %v3049_v14  ;;  %1799 = vst [vmem:[#allocation3 + $0x188] sm:$0xff] %v1351_v36  ;;  %v1863_v56 = vsub.f32 1.0, %v2479_v53  ;;  %v933_v57 = vpop.f32.mrf.mxu2  ;;  %v973_v58 = vpop.f32.mrf.mxu3  ;;  %v2589_v11 = vpack.c.bf16 %v2479_v53, %v3052_v15  ;;  %v1146_v36 = vld [vmem:[#allocation3 + $0x50] sm:$0xff]  ;;  %v1418_v52 = vld [vmem:[#allocation4 + $0x1c0] sm:$0xff] }
 0x131   : > { %v1942_v61 = vmul.f32 %v1878_v50, %v1558_v38  ;;  %v1958_v62 = vmul.f32 %v1894_v51, %v1574_v39  ;;  %v1367_v63 = vadd.f32 %v3046_v10, %v933_v57  ;;  %v1383_v0 = vadd.f32 %v1255_v17, %v973_v58  ;;  %v856_v1 = vpop.f32.mrf.mxu0  ;;  %v896_v2 = vpop.f32.mrf.mxu1  ;;  %v1402_v50 = vld [vmem:[#allocation4 + $0xd0] sm:$0xff]  ;;  %v1162_v51 = vld [vmem:[#allocation3 + $0x80] sm:$0xff] }
 0x132   : > { %v1911_v5 = vmul.f32 %v1847_v54, %v1527_v42  ;;  %2566 = vst [vmem:[%s2840_s25] sm:$0xff] %v2565_v55   ;;  %v1927_v6 = vmul.f32 %v1863_v56, %v1543_v43  ;;  %v3081_v7 = vadd.f32 %v1208_v29, %v856_v1  ;;  %v3083_v8 = vadd.f32 %v1224_v30, %v896_v2 }
 0x133   : > { %2006 = vst [vmem:[#allocation4 + $0x1d8] sm:$0xff] %v1942_v61  ;;  %v1559_v12 = vadd.f32 %v3054_v16, %v1367_v63  ;;  %v1575_v10 = vadd.f32 %v3058_v22, %v1383_v0  ;;  %v1209_v14 = vmul.f32 0.75, %v1145_v60  ;;  %v1497_v54 = vmul.f32 0.97, %v1433_v28  ;;  %v1178_v60 = vld [vmem:[#allocation3 + $0x40] sm:$0xff]  ;;  %v1194_v61 = vld [vmem:[#allocation3 + $0x170] sm:$0xff] }
 0x134   : > { %2022 = vst [vmem:[#allocation4 + $0x20] sm:$0xff] %v1958_v62  ;;  %v1528_v17 = vadd.f32 %v1464_v40, %v3081_v7  ;;  %v1544_v18 = vadd.f32 %v1480_v41, %v3083_v8  ;;  %v1513_v55 = vmul.f32 0.97, %v1449_v35  ;;  %v1210_v56 = vmul.f32 0.75, %v1146_v36  ;;  %v1163_v35 = vld [vmem:[#allocation3 + $0x1a8] sm:$0xff]  ;;  %v1419_v36 = vld [vmem:[#allocation4 + $0x78] sm:$0xff] }
 0x135   : > { %1975 = vst [vmem:[#allocation4 + $0x150] sm:$0xff] %v1911_v5  ;;  %vm1623_vm8 = vcmp.ge.f32.partialorder %v1559_v12, 1.25  ;;  %vm1639_vm9 = vcmp.ge.f32.partialorder %v1575_v10, 1.25  ;;  %v1482_v1 = vmul.f32 0.97, %v1418_v52 }
 0x136   : > { %1991 = vst [vmem:[#allocation4 + $0x10] sm:$0xff] %v1927_v6  ;;  %v2495_v15 = vsel %vm1623_vm8, 1.0, %v2786_v13  ;;  %v2511_v16 = vsel %vm1639_vm9, 1.0, %v2786_v13  ;;  %vm1592_vm10 = vcmp.ge.f32.partialorder %v1528_v17, 1.25  ;;  %vm1608_vm11 = vcmp.ge.f32.partialorder %v1544_v18, 1.25 }
 0x137   : > { %2667 = vst [vmem:[%s2840_s25 + $0x40] sm:$0xff] %v2589_v11   ;;  %v1879_v22 = vsub.f32 1.0, %v2495_v15  ;;  %v2613_v25 = vpack.c.bf16 %v2495_v15, %v3067_v48  ;;  %v1895_v26 = vsub.f32 1.0, %v2511_v16  ;;  %v2637_v29 = vpack.c.bf16 %v2511_v16, %v3070_v49 }
 0x138   : > { %1815 = vst [vmem:[#allocation3 + $0x1d0] sm:$0xff] %v1367_v63  ;;  %v3096_v30 = vsel %vm1592_vm10, 1.0, %v2786_v13  ;;  %v3099_v31 = vsel %vm1608_vm11, 1.0, %v2786_v13  ;;  %v936_v32 = vpop.f32.mrf.mxu2  ;;  %v976_v33 = vpop.f32.mrf.mxu3  ;;  %v1466_v63 = vmul.f32 0.97, %v1402_v50 }
 0x139   : > { %v1943_v37 = vmul.f32 %v1879_v22, %v1559_v12  ;;  %2675 = vst [vmem:[%s2840_s25 + $0x80] sm:$0xff] %v2613_v25   ;;  %v1959_v38 = vmul.f32 %v1895_v26, %v1575_v10  ;;  %v1848_v39 = vsub.f32 1.0, %v3096_v30  ;;  %v1864_v40 = vsub.f32 1.0, %v3099_v31  ;;  %v858_v41 = vpop.f32.mrf.mxu0  ;;  %v898_v42 = vpop.f32.mrf.mxu1  ;;  %v1403_v22 = vld [vmem:[#allocation4 + $0xd8] sm:$0xff] }
 0x13a   : > { %1831 = vst [vmem:[#allocation3 + $0x88] sm:$0xff] %v1383_v0  ;;  %v1368_v43 = vadd.f32 %v3060_v44, %v936_v32  ;;  %v1384_v47 = vadd.f32 %v3062_v45, %v976_v33  ;;  %v3106_v48 = vadd.f32 %v1209_v14, %v858_v41  ;;  %v3108_v49 = vadd.f32 %v1225_v20, %v898_v42  ;;  %v1179_v41 = vld [vmem:[#allocation3 + $0x1f8] sm:$0xff] }
 0x13b   : > { %2007 = vst [vmem:[#allocation4 + $0x28] sm:$0xff] %v1943_v37  ;;  %v1912_v53 = vmul.f32 %v1848_v39, %v1528_v17  ;;  %v1928_v62 = vmul.f32 %v1864_v40, %v1544_v18  ;;  %v1226_v0 = vmul.f32 0.75, %v1162_v51  ;;  %v1242_v12 = vmul.f32 0.75, %v1178_v60  ;;  %v1435_v51 = vld [vmem:[#allocation4 + $0x140] sm:$0xff] }
 0x13c   : > { %2023 = vst [vmem:[#allocation4 + $0xb8] sm:$0xff] %v1959_v38  ;;  %v1560_v57 = vadd.f32 %v3064_v46, %v1368_v43  ;;  %v1576_v44 = vadd.f32 %v3077_v59, %v1384_v47  ;;  %v1529_v45 = vadd.f32 %v1465_v19, %v3106_v48  ;;  %v1545_v58 = vadd.f32 %v1481_v23, %v3108_v49  ;;  %v1434_v46 = vld [vmem:[#allocation4 + $0x1e8] sm:$0xff] }
 0x13d   : > { %2683 = vst [vmem:[%s2840_s25 + $0xc0] sm:$0xff] %v2637_v29   ;;  %v3133_v19 = vmul.f32 0.97, %v1434_v46  ;;  %v1258_v20 = vmul.f32 0.75, %v1194_v61  ;;  %v1514_v33 = vmul.f32 0.97, %v1450_v21 }
 0x13e   : > { %1784 = vst [vmem:[#allocation3 + $0xd8] sm:$0xff] %v3081_v7  ;;  %vm1624_vm12 = vcmp.ge.f32.partialorder %v1560_v57, 1.25  ;;  %vm1640_vm13 = vcmp.ge.f32.partialorder %v1576_v44, 1.25  ;;  %vm1593_vm14 = vcmp.ge.f32.partialorder %v1529_v45, 1.25  ;;  %vm1609_vm15 = vcmp.ge.f32.partialorder %v1545_v58, 1.25 }
 0x13f   : > { %1976 = vst [vmem:[#allocation4 + $0x70] sm:$0xff] %v1912_v53  ;;  %v3117_v59 = vsel %vm1624_vm12, 1.0, %v2786_v13  ;;  %v3120_v2 = vsel %vm1640_vm13, 1.0, %v2786_v13  ;;  %v2465_v3 = vsel %vm1593_vm14, 1.0, %v2786_v13  ;;  %v3124_v4 = vsel %vm1609_vm15, 1.0, %v2786_v13 }
 0x140   : > { %1800 = vst [vmem:[#allocation3 + $0x138] sm:$0xff] %v3083_v8  ;;  %v1880_v5 = vsub.f32 1.0, %v3117_v59  ;;  %v1896_v6 = vsub.f32 1.0, %v3120_v2  ;;  %v1849_v7 = vsub.f32 1.0, %v2465_v3  ;;  %v938_v9 = vpop.f32.mrf.mxu2  ;;  %v978_v11 = vpop.f32.mrf.mxu3  ;;  %v1147_v8 = vld [vmem:[#allocation3 + $0x168] sm:$0xff]  ;;  %v1865_v15 = vsub.f32 1.0, %v3124_v4 }
 0x141   : > { %1992 = vst [vmem:[#allocation4 + $0x1a8] sm:$0xff] %v1928_v62  ;;  %v3129_v10 = vadd.f32 %v1241_v27, %v938_v9  ;;  %v3131_v14 = vadd.f32 %v1257_v34, %v978_v11  ;;  %v861_v17 = vpop.f32.mrf.mxu0  ;;  %v901_v18 = vpop.f32.mrf.mxu1  ;;  %v2568_v29 = vpack.c.bf16 %v2465_v3, %v3096_v30  ;;  %v1211_v34 = vmul.f32 0.75, %v1147_v8  ;;  %v1420_v8 = vld [vmem:[#allocation4 + $0x108] sm:$0xff] }
 0x142   : > { %1816 = vst [vmem:[#allocation3 + $0x100] sm:$0xff] %v1368_v43  ;;  %v1944_v23 = vmul.f32 %v1880_v5, %v1560_v57  ;;  %v1960_v24 = vmul.f32 %v1896_v6, %v1576_v44  ;;  %v3136_v16 = vadd.f32 %v1210_v56, %v861_v17  ;;  %v1913_v25 = vmul.f32 %v1849_v7, %v1529_v45  ;;  %v1451_v56 = vld [vmem:[#allocation4 + $0xc0] sm:$0xff] }
 0x143   : > { %1832 = vst [vmem:[#allocation3 + $0xa8] sm:$0xff] %v1384_v47  ;;  %v1561_v26 = vadd.f32 %v1497_v54, %v3129_v10  ;;  %v1577_v27 = vadd.f32 %v1513_v55, %v3131_v14  ;;  %v3140_v28 = vadd.f32 %v1226_v0, %v901_v18  ;;  %v1467_v38 = vmul.f32 0.97, %v1403_v22  ;;  %v1195_v55 = vld [vmem:[#allocation3 + $0x178] sm:$0xff] }
 0x144   : > { %2008 = vst [vmem:[#allocation4] sm:$0xff] %v1944_v23  ;;  %v1530_v32 = vadd.f32 %v1466_v63, %v3136_v16  ;;  %v1929_v39 = vmul.f32 %v1865_v15, %v1545_v58  ;;  %v2592_v42 = vpack.c.bf16 %v3124_v4, %v3099_v31  ;;  %v1227_v47 = vmul.f32 0.75, %v1163_v35  ;;  %v1164_v18 = vld [vmem:[#allocation3 + $0x1b8] sm:$0xff] }
 0x145   : > { %2024 = vst [vmem:[#allocation4 + $0x120] sm:$0xff] %v1960_v24  ;;  %vm1625_vm0 = vcmp.ge.f32.partialorder %v1561_v26, 1.25  ;;  %vm1641_vm1 = vcmp.ge.f32.partialorder %v1577_v27, 1.25  ;;  %v3145_v37 = vadd.f32 %v1482_v1, %v3140_v28  ;;  %v1483_v50 = vmul.f32 0.97, %v1419_v36  ;;  %v1148_v1 = vld [vmem:[#allocation3 + $0x130] sm:$0xff] }
 0x146   : > { %1785 = vst [vmem:[#allocation3 + $0x18] sm:$0xff] %v3106_v48  ;;  %v2497_v40 = vsel %vm1625_vm0, 1.0, %v2786_v13  ;;  %v3150_v30 = vsel %vm1641_vm1, 1.0, %v2786_v13  ;;  %vm1594_vm2 = vcmp.ge.f32.partialorder %v1530_v32, 1.25  ;;  %v1243_v60 = vmul.f32 0.75, %v1179_v41  ;;  %v1196_v41 = vld [vmem:[#allocation3 + $0x68] sm:$0xff] }
 0x147   : > { %1977 = vst [vmem:[#allocation4 + $0x160] sm:$0xff] %v1913_v25  ;;  %v1881_v43 = vsub.f32 1.0, %v2497_v40  ;;  %v1897_v52 = vsub.f32 1.0, %v3150_v30  ;;  %v3157_v48 = vsel %vm1594_vm2, 1.0, %v2786_v13  ;;  %vm1610_vm3 = vcmp.ge.f32.partialorder %v3145_v37, 1.25 }
 0x148   : > { %2660 = vst [vmem:[%s2840_s25 + $0x8] sm:$0xff] %v2568_v29   ;;  %v941_v53 = vpop.f32.mrf.mxu2  ;;  %v981_v54 = vpop.f32.mrf.mxu3  ;;  %v2616_v57 = vpack.c.bf16 %v2497_v40, %v3117_v59  ;;  %v1850_v44 = vsub.f32 1.0, %v3157_v48  ;;  %v3164_v61 = vsel %vm1610_vm3, 1.0, %v2786_v13  ;;  %v1499_v46 = vmul.f32 0.97, %v1435_v51 }
 0x149   : > { %1801 = vst [vmem:[#allocation3 + $0x140] sm:$0xff] %v3108_v49  ;;  %v1945_v31 = vmul.f32 %v1881_v43, %v1561_v26  ;;  %v863_v45 = vpop.f32.mrf.mxu0  ;;  %v903_v58 = vpop.f32.mrf.mxu1  ;;  %v3166_v62 = vadd.f32 %v1242_v12, %v941_v53  ;;  %v3168_v63 = vadd.f32 %v1258_v20, %v981_v54  ;;  %v1259_v59 = vmul.f32 0.75, %v1195_v55  ;;  %v1452_v53 = vld [vmem:[#allocation4 + $0x138] sm:$0xff] }
 0x14a   : > { %1993 = vst [vmem:[#allocation4 + $0xa0] sm:$0xff] %v1929_v39  ;;  %v3170_v0 = vadd.f32 %v1211_v34, %v863_v45  ;;  %v3173_v49 = vadd.f32 %v1227_v47, %v903_v58  ;;  %v1515_v3 = vmul.f32 0.97, %v1451_v56  ;;  %v1961_v4 = vmul.f32 %v1897_v52, %v1577_v27  ;;  %v1165_v47 = vld [vmem:[#allocation3 + $0x28] sm:$0xff]  ;;  %v1436_v52 = vld [vmem:[#allocation4 + $0x60] sm:$0xff] }
 0x14b   : > { %2668 = vst [vmem:[%s2840_s25 + $0x48] sm:$0xff] %v2592_v42   ;;  %v1562_v5 = vadd.f32 %v3133_v19, %v3166_v62  ;;  %v1578_v6 = vadd.f32 %v1514_v33, %v3168_v63  ;;  %v2640_v9 = vpack.c.bf16 %v3150_v30, %v3120_v2  ;;  %v1866_v11 = vsub.f32 1.0, %v3164_v61  ;;  %v1404_v19 = vld [vmem:[#allocation4 + $0x1e0] sm:$0xff] }
 0x14c   : > { %1817 = vst [vmem:[#allocation3 + $0xc8] sm:$0xff] %v3129_v10  ;;  %v1531_v7 = vadd.f32 %v1467_v38, %v3170_v0  ;;  %v3184_v12 = vadd.f32 %v1483_v50, %v3173_v49  ;;  %v1212_v17 = vmul.f32 0.75, %v1148_v1  ;;  %v1914_v10 = vmul.f32 %v1850_v44, %v1530_v32  ;;  %v1180_v30 = vld [vmem:[#allocation3 + $0x20] sm:$0xff] }
 0x14d   : > { %2009 = vst [vmem:[#allocation4 + $0x1c8] sm:$0xff] %v1945_v31  ;;  %vm1626_vm4 = vcmp.ge.f32.partialorder %v1562_v5, 1.25  ;;  %vm1642_vm5 = vcmp.ge.f32.partialorder %v1578_v6, 1.25  ;;  %v1930_v25 = vmul.f32 %v1866_v11, %v3145_v37  ;;  %v1468_v32 = vmul.f32 0.97, %v1404_v19  ;;  %v1405_v31 = vld [vmem:[#allocation4 + $0x30] sm:$0xff] }
 0x14e   : > { %2676 = vst [vmem:[%s2840_s25 + $0x88] sm:$0xff] %v2616_v57   ;;  %vm1595_vm6 = vcmp.ge.f32.partialorder %v1531_v7, 1.25  ;;  %v3189_v20 = vsel %vm1626_vm4, 1.0, %v2786_v13  ;;  %v3192_v2 = vsel %vm1642_vm5, 1.0, %v2786_v13  ;;  %vm1611_vm7 = vcmp.ge.f32.partialorder %v3184_v12, 1.25  ;;  %v1181_v11 = vld [vmem:[#allocation3 + $0x128] sm:$0xff] }
 0x14f   : > { %1833 = vst [vmem:[#allocation3 + $0x1c8] sm:$0xff] %v3131_v14  ;;  %v3195_v21 = vsel %vm1595_vm6, 1.0, %v2786_v13  ;;  %v1882_v23 = vsub.f32 1.0, %v3189_v20  ;;  %v1898_v24 = vsub.f32 1.0, %v3192_v2  ;;  %v1228_v14 = vmul.f32 0.75, %v1164_v18 }
 0x150   : > { %2025 = vst [vmem:[#allocation4 + $0x90] sm:$0xff] %v1961_v4  ;;  %v943_v15 = vpop.f32.mrf.mxu2  ;;  %v983_v22 = vpop.f32.mrf.mxu3  ;;  %v1851_v34 = vsub.f32 1.0, %v3195_v21  ;;  %v3211_v35 = vsel %vm1611_vm7, 1.0, %v2786_v13  ;;  %v1484_v36 = vmul.f32 0.97, %v1420_v8  ;;  %v1260_v55 = vmul.f32 0.75, %v1196_v41 }
 0x151   : > { %2684 = vst [vmem:[%s2840_s25 + $0xc8] sm:$0xff] %v2640_v9   ;;  %v3202_v26 = vadd.f32 %v1243_v60, %v943_v15  ;;  %v3204_v27 = vadd.f32 %v1259_v59, %v983_v22  ;;  %v866_v29 = vpop.f32.mrf.mxu0  ;;  %v906_v33 = vpop.f32.mrf.mxu1  ;;  %v1946_v38 = vmul.f32 %v1882_v23, %v1562_v5  ;;  %v1962_v42 = vmul.f32 %v1898_v24, %v1578_v6  ;;  %v1421_v60 = vld [vmem:[#allocation4 + $0x80] sm:$0xff]  ;;  %v1437_v24 = vld [vmem:[#allocation4 + $0x98] sm:$0xff] }
 0x152   : > { %1786 = vst [vmem:[#allocation3 + $0x50] sm:$0xff] %v3136_v16  ;;  %v3217_v40 = vadd.f32 %v1212_v17, %v866_v29  ;;  %v1149_v16 = vld [vmem:[#allocation3 + $0x48] sm:$0xff]  ;;  %v3220_v43 = vadd.f32 %v1228_v14, %v906_v33  ;;  %v1867_v50 = vsub.f32 1.0, %v3211_v35  ;;  %v1915_v57 = vmul.f32 %v1851_v34, %v1531_v7  ;;  %v1150_v29 = vld [vmem:[#allocation3 + $0x180] sm:$0xff] }
 0x153   : > { %1978 = vst [vmem:[#allocation4 + $0xd0] sm:$0xff] %v1914_v10  ;;  %v1563_v37 = vadd.f32 %v1499_v46, %v3202_v26  ;;  %v3215_v39 = vadd.f32 %v1515_v3, %v3204_v27  ;;  %v1213_v56 = vmul.f32 0.75, %v1149_v16  ;;  %v1229_v58 = vmul.f32 0.75, %v1165_v47 }
 0x154   : > { %1802 = vst [vmem:[#allocation3 + $0x80] sm:$0xff] %v3140_v28  ;;  %v3225_v51 = vadd.f32 %v1468_v32, %v3217_v40  ;;  %v1244_v28 = vmul.f32 0.75, %v1180_v30  ;;  %v3235_v45 = vadd.f32 %v1484_v36, %v3220_v43  ;;  %v1500_v46 = vmul.f32 0.97, %v1436_v52  ;;  %v1166_v32 = vld [vmem:[#allocation3 + $0x1e8] sm:$0xff] }
 0x155   : > { %1994 = vst [vmem:[#allocation4 + $0x1c0] sm:$0xff] %v1930_v25  ;;  %vm1627_vm8 = vcmp.ge.f32.partialorder %v1563_v37, 1.25  ;;  %vm1643_vm9 = vcmp.ge.f32.partialorder %v3215_v39, 1.25  ;;  %v1516_v3 = vmul.f32 0.97, %v1452_v53  ;;  %v1931_v4 = vmul.f32 %v1867_v50, %v3184_v12  ;;  %v1197_v12 = vld [vmem:[#allocation3 + $0x190] sm:$0xff] }
 0x156   : > { %1818 = vst [vmem:[#allocation3 + $0x40] sm:$0xff] %v3166_v62  ;;  %v3229_v54 = vsel %vm1627_vm8, 1.0, %v2786_v13  ;;  %v3232_v44 = vsel %vm1643_vm9, 1.0, %v2786_v13  ;;  %v2571_v62 = vpack.c.bf16 %v3195_v21, %v3157_v48  ;;  %vm1596_vm10 = vcmp.ge.f32.partialorder %v3225_v51, 1.25  ;;  %v1422_v50 = vld [vmem:[#allocation4 + $0x58] sm:$0xff] }
 0x157   : > { %2010 = vst [vmem:[#allocation4 + $0x1e8] sm:$0xff] %v1946_v38  ;;  %v2595_v5 = vpack.c.bf16 %v3211_v35, %v3164_v61  ;;  %v1883_v6 = vsub.f32 1.0, %v3229_v54  ;;  %v1899_v48 = vsub.f32 1.0, %v3232_v44  ;;  %v1485_v10 = vmul.f32 0.97, %v1421_v60  ;;  %v1406_v38 = vld [vmem:[#allocation4 + $0x148] sm:$0xff] }
 0x158   : > { %1834 = vst [vmem:[#allocation3 + $0x170] sm:$0xff] %v3168_v63  ;;  %v946_v1 = vpop.f32.mrf.mxu2  ;;  %v986_v59 = vpop.f32.mrf.mxu3  ;;  %v1469_v63 = vmul.f32 0.97, %v1405_v31  ;;  %v3254_v61 = vsel %vm1596_vm10, 1.0, %v2786_v13  ;;  %vm1612_vm11 = vcmp.ge.f32.partialorder %v3235_v45, 1.25  ;;  %v1245_v23 = vmul.f32 0.75, %v1181_v11 }
 0x159   : > { %2026 = vst [vmem:[#allocation4 + $0xa8] sm:$0xff] %v1962_v42  ;;  %v868_v7 = vpop.f32.mrf.mxu0  ;;  %v908_v9 = vpop.f32.mrf.mxu1  ;;  %v3247_v17 = vadd.f32 %v1244_v28, %v946_v1  ;;  %v3249_v18 = vadd.f32 %v1260_v55, %v986_v59  ;;  %v1947_v15 = vmul.f32 %v1883_v6, %v1563_v37  ;;  %v2619_v22 = vpack.c.bf16 %v3229_v54, %v3189_v20  ;;  %v1198_v60 = vld [vmem:[#allocation3 + $0x198] sm:$0xff] }
 0x15a   : > { %1787 = vst [vmem:[#allocation3 + $0x168] sm:$0xff] %v3170_v0  ;;  %v3257_v19 = vadd.f32 %v1213_v56, %v868_v7  ;;  %v3259_v21 = vadd.f32 %v1229_v58, %v908_v9  ;;  %v1261_v25 = vmul.f32 0.75, %v1197_v12  ;;  %v1852_v33 = vsub.f32 1.0, %v3254_v61  ;;  %v1438_v58 = vld [vmem:[#allocation4 + $0x1b8] sm:$0xff]  ;;  %v1454_v7 = vld [vmem:[#allocation4 + $0x1b0] sm:$0xff] }
 0x15b   : > { %1979 = vst [vmem:[#allocation4 + $0xd8] sm:$0xff] %v1915_v57  ;;  %v3263_v0 = vadd.f32 %v1500_v46, %v3247_v17  ;;  %v3266_v8 = vadd.f32 %v1516_v3, %v3249_v18  ;;  %v3278_v34 = vsel %vm1612_vm11, 1.0, %v2786_v13  ;;  %v1963_v20 = vmul.f32 %v1899_v48, %v3215_v39  ;;  %v1182_v57 = vld [vmem:[#allocation3 + $0x1a0] sm:$0xff]  ;;  %v1167_v11 = vld [vmem:[#allocation3 + $0xf8] sm:$0xff] }
 0x15c   : > { %2661 = vst [vmem:[%s2840_s25 + $0x10] sm:$0xff] %v2571_v62   ;;  %v3272_v14 = vadd.f32 %v1469_v63, %v3257_v19  ;;  %v3285_v35 = vadd.f32 %v1485_v10, %v3259_v21  ;;  %v1501_v36 = vmul.f32 0.97, %v1437_v24  ;;  %v1214_v42 = vmul.f32 0.75, %v1150_v29 }
 0x15d   : > { %1803 = vst [vmem:[#allocation3 + $0x1a8] sm:$0xff] %v3173_v49  ;;  %vm1628_vm12 = vcmp.ge.f32.partialorder %v3263_v0, 1.25  ;;  %vm1644_vm13 = vcmp.ge.f32.partialorder %v3266_v8, 1.25  ;;  %v1453_v49 = vld [vmem:[#allocation4 + $0x188] sm:$0xff]  ;;  %v1230_v47 = vmul.f32 0.75, %v1166_v32  ;;  %v2643_v39 = vpack.c.bf16 %v3232_v44, %v3192_v2 }
 0x15e   : > { %1995 = vst [vmem:[#allocation4 + $0x78] sm:$0xff] %v1931_v4  ;;  %v3289_v37 = vsel %vm1628_vm12, 1.0, %v2786_v13  ;;  %v3292_v30 = vsel %vm1644_vm13, 1.0, %v2786_v13  ;;  %v1868_v52 = vsub.f32 1.0, %v3278_v34  ;;  %vm1597_vm14 = vcmp.ge.f32.partialorder %v3272_v14, 1.25 }
 0x15f   : > { %2669 = vst [vmem:[%s2840_s25 + $0x50] sm:$0xff] %v2595_v5   ;;  %v1916_v28 = vmul.f32 %v1852_v33, %v3225_v51  ;;  %v1470_v31 = vmul.f32 0.97, %v1406_v38  ;;  %v1884_v2 = vsub.f32 1.0, %v3289_v37  ;;  %v1900_v44 = vsub.f32 1.0, %v3292_v30 }
 0x160   : > { %1819 = vst [vmem:[#allocation3 + $0x1f8] sm:$0xff] %v3202_v26  ;;  %v948_v41 = vpop.f32.mrf.mxu2  ;;  %v988_v16 = vpop.f32.mrf.mxu3  ;;  %v1517_v26 = vmul.f32 0.97, %v1453_v49  ;;  %vm1613_vm15 = vcmp.ge.f32.partialorder %v3285_v35, 1.25  ;;  %v1486_v62 = vmul.f32 0.97, %v1422_v50  ;;  %v1932_v3 = vmul.f32 %v1868_v52, %v3235_v45 }
 0x161   : > { %2011 = vst [vmem:[#allocation4 + $0x140] sm:$0xff] %v1947_v15  ;;  %v871_v53 = vpop.f32.mrf.mxu0  ;;  %v911_v54 = vpop.f32.mrf.mxu1  ;;  %v3300_v55 = vadd.f32 %v1245_v23, %v948_v41  ;;  %v3302_v56 = vadd.f32 %v1261_v25, %v988_v16  ;;  %v3311_v51 = vsel %vm1597_vm14, 1.0, %v2786_v13  ;;  %v1246_v5 = vmul.f32 0.75, %v1182_v57  ;;  %v1407_v25 = vld [vmem:[#allocation4 + $0x50] sm:$0xff]  ;;  %v1439_v57 = vld [vmem:[#allocation4 + $0x100] sm:$0xff] }
 0x162   : > { %2677 = vst [vmem:[%s2840_s25 + $0x90] sm:$0xff] %v2619_v22   ;;  %v3316_v46 = vadd.f32 %v1214_v42, %v871_v53  ;;  %v3318_v59 = vadd.f32 %v1230_v47, %v911_v54  ;;  %v1262_v6 = vmul.f32 0.75, %v1198_v60  ;;  %v3327_v63 = vsel %vm1613_vm15, 1.0, %v2786_v13 }
 0x163   : > { %1835 = vst [vmem:[#allocation3 + $0x178] sm:$0xff] %v3204_v27  ;;  %v3314_v1 = vadd.f32 %v1501_v36, %v3300_v55  ;;  %v1151_v27 = vld [vmem:[#allocation3 + $0x110] sm:$0xff]  ;;  %v3323_v4 = vadd.f32 %v1517_v26, %v3302_v56  ;;  %v1502_v9 = vmul.f32 0.97, %v1438_v58  ;;  %v1948_v48 = vmul.f32 %v1884_v2, %v3263_v0  ;;  %v1199_v26 = vld [vmem:[#allocation3 + $0x38] sm:$0xff] }
 0x164   : > { %2027 = vst [vmem:[#allocation4 + $0xc0] sm:$0xff] %v1963_v20  ;;  %v1853_v10 = vsub.f32 1.0, %v3311_v51  ;;  %v1215_v45 = vmul.f32 0.75, %v1151_v27  ;;  %v1964_v12 = vmul.f32 %v1900_v44, %v3266_v8  ;;  %v3335_v23 = vadd.f32 %v1470_v31, %v3316_v46  ;;  %v1423_v8 = vld [vmem:[#allocation4 + $0x48] sm:$0xff]  ;;  %v1152_v31 = vld [vmem:[#allocation3 + $0x118] sm:$0xff] }
 0x165   : > { %2685 = vst [vmem:[%s2840_s25 + $0xd0] sm:$0xff] %v2643_v39   ;;  %vm1629_vm0 = vcmp.ge.f32.partialorder %v3314_v1, 1.25  ;;  %v1518_v22 = vmul.f32 0.97, %v1454_v7  ;;  %vm1645_vm1 = vcmp.ge.f32.partialorder %v3323_v4, 1.25  ;;  %v1231_v32 = vmul.f32 0.75, %v1167_v11 }
 0x166   : > { %1788 = vst [vmem:[#allocation3 + $0x130] sm:$0xff] %v3217_v40  ;;  %v3338_v40 = vadd.f32 %v1486_v62, %v3318_v59  ;;  %v1869_v33 = vsub.f32 1.0, %v3327_v63  ;;  %v3350_v49 = vsel %vm1629_vm0, 1.0, %v2786_v13  ;;  %v1917_v36 = vmul.f32 %v1853_v10, %v3272_v14  ;;  %v1183_v14 = vld [vmem:[#allocation3 + $0x1f0] sm:$0xff]  ;;  %v1184_v10 = vld [vmem:[#allocation3 + $0xe8] sm:$0xff] }
 0x167   : > { %1980 = vst [vmem:[#allocation4 + $0x1e0] sm:$0xff] %v1916_v28  ;;  %v1471_v16 = vmul.f32 0.97, %v1407_v25  ;;  %v3364_v42 = vsel %vm1645_vm1, 1.0, %v2786_v13  ;;  %vm1598_vm2 = vcmp.ge.f32.partialorder %v3335_v23, 1.25  ;;  %v1885_v50 = vsub.f32 1.0, %v3350_v49 }
 0x168   : > { %1804 = vst [vmem:[#allocation3 + $0x1b8] sm:$0xff] %v3220_v43  ;;  %v951_v24 = vpop.f32.mrf.mxu2  ;;  %v991_v15 = vpop.f32.mrf.mxu3  ;;  %v1487_v47 = vmul.f32 0.97, %v1423_v8  ;;  %vm1614_vm3 = vcmp.ge.f32.partialorder %v3338_v40, 1.25  ;;  %v2598_v52 = vpack.c.bf16 %v3327_v63, %v3278_v34  ;;  %v3379_v53 = vsel %vm1598_vm2, 1.0, %v2786_v13  ;;  %v1408_v7 = vld [vmem:[#allocation4 + $0x1f0] sm:$0xff] }
 0x169   : > { %1996 = vst [vmem:[#allocation4 + $0x108] sm:$0xff] %v1932_v3  ;;  %v3341_v0 = vadd.f32 %v1246_v5, %v951_v24  ;;  %v3343_v29 = vadd.f32 %v1262_v6, %v991_v15  ;;  %v873_v43 = vpop.f32.mrf.mxu0  ;;  %v913_v20 = vpop.f32.mrf.mxu1  ;;  %v1247_v28 = vmul.f32 0.75, %v1183_v14  ;;  %v1949_v58 = vmul.f32 %v1885_v50, %v3314_v1  ;;  %v1168_v63 = vld [vmem:[#allocation3 + $0x160] sm:$0xff] }
 0x16a   : > { %1820 = vst [vmem:[#allocation3 + $0x20] sm:$0xff] %v3247_v17  ;;  %v3356_v41 = vadd.f32 %v1215_v45, %v873_v43  ;;  %v2574_v17 = vpack.c.bf16 %v3311_v51, %v3254_v61  ;;  %v3372_v39 = vadd.f32 %v1231_v32, %v913_v20  ;;  %v1933_v61 = vmul.f32 %v1869_v33, %v3285_v35  ;;  %v1424_v32 = vld [vmem:[#allocation4 + $0x40] sm:$0xff] }
 0x16b   : > { %2012 = vst [vmem:[#allocation4 + $0x60] sm:$0xff] %v1948_v48  ;;  %v3354_v38 = vadd.f32 %v1502_v9, %v3341_v0  ;;  %v3388_v35 = vsel %vm1614_vm3, 1.0, %v2786_v13  ;;  %v1263_v44 = vmul.f32 0.75, %v1199_v26  ;;  %v2622_v62 = vpack.c.bf16 %v3350_v49, %v3289_v37  ;;  %v1200_v33 = vld [vmem:[#allocation3 + $0xc0] sm:$0xff] }
 0x16c   : > { %1836 = vst [vmem:[#allocation3 + $0x68] sm:$0xff] %v3249_v18  ;;  %v3370_v18 = vadd.f32 %v1518_v22, %v3343_v29  ;;  %v3383_v54 = vadd.f32 %v1471_v16, %v3356_v41  ;;  %v3394_v60 = vadd.f32 %v1487_v47, %v3372_v39  ;;  %v1854_v51 = vsub.f32 1.0, %v3379_v53  ;;  %v1440_v16 = vld [vmem:[#allocation4 + $0xc8] sm:$0xff] }
 0x16d   : > { %2028 = vst [vmem:[#allocation4 + $0x138] sm:$0xff] %v1964_v12  ;;  %vm1630_vm4 = vcmp.ge.f32.partialorder %v3354_v38, 1.25  ;;  %v1216_v3 = vmul.f32 0.75, %v1152_v31  ;;  %v1503_v6 = vmul.f32 0.97, %v1439_v57  ;;  %v2646_v9 = vpack.c.bf16 %v3364_v42, %v3292_v30  ;;  %v1409_v57 = vld [vmem:[#allocation4 + $0x130] sm:$0xff] }
 0x16e   : > { %1789 = vst [vmem:[#allocation3 + $0x48] sm:$0xff] %v3257_v19  ;;  %v1901_v19 = vsub.f32 1.0, %v3364_v42  ;;  %vm1646_vm5 = vcmp.ge.f32.partialorder %v3370_v18, 1.25  ;;  %v3402_v27 = vsel %vm1630_vm4, 1.0, %v2786_v13  ;;  %vm1599_vm6 = vcmp.ge.f32.partialorder %v3383_v54, 1.25 }
 0x16f   : > { %1981 = vst [vmem:[#allocation4 + $0x30] sm:$0xff] %v1917_v36  ;;  %v1870_v11 = vsub.f32 1.0, %v3388_v35  ;;  %v3416_v48 = vsel %vm1646_vm5, 1.0, %v2786_v13  ;;  %v1886_v45 = vsub.f32 1.0, %v3402_v27  ;;  %vm1615_vm7 = vcmp.ge.f32.partialorder %v3394_v60, 1.25 }
 0x170   : > { %2662 = vst [vmem:[%s2840_s25 + $0x18] sm:$0xff] %v2574_v17   ;;  %v953_v34 = vpop.f32.mrf.mxu2  ;;  %v993_v2 = vpop.f32.mrf.mxu3  ;;  %v1965_v37 = vmul.f32 %v1901_v19, %v3323_v4  ;;  %v3426_v30 = vsel %vm1599_vm6, 1.0, %v2786_v13  ;;  %v1472_v15 = vmul.f32 0.97, %v1408_v7  ;;  %v1232_v22 = vmul.f32 0.75, %v1168_v63  ;;  %v1153_v17 = vld [vmem:[#allocation3 + $0x98] sm:$0xff] }
 0x171   : > { %1805 = vst [vmem:[#allocation3 + $0x28] sm:$0xff] %v3259_v21  ;;  %v1455_v21 = vld [vmem:[#allocation4 + $0x18] sm:$0xff]  ;;  %v876_v1 = vpop.f32.mrf.mxu0  ;;  %v3406_v5 = vadd.f32 %v1247_v28, %v953_v34  ;;  %v3420_v12 = vadd.f32 %v1263_v44, %v993_v2  ;;  %v916_v4 = vpop.f32.mrf.mxu1  ;;  %v1918_v25 = vmul.f32 %v1854_v51, %v3335_v23  ;;  %v1248_v8 = vmul.f32 0.75, %v1184_v10  ;;  %v1169_v19 = vld [vmem:[#allocation3 + $0x30] sm:$0xff]  ;;  %v1201_v10 = vld [vmem:[#allocation3 + $0x1c0] sm:$0xff] }
 0x172   : > { %1997 = vst [vmem:[#allocation4 + $0x80] sm:$0xff] %v1933_v61  ;;  %v3428_v24 = vadd.f32 %v1216_v3, %v876_v1  ;;  %v1934_v49 = vmul.f32 %v1870_v11, %v3338_v40  ;;  %v1902_v20 = vsub.f32 1.0, %v3416_v48  ;;  %v1950_v42 = vmul.f32 %v1886_v45, %v3354_v38  ;;  %v1456_v38 = vld [vmem:[#allocation4 + $0xf0] sm:$0xff]  ;;  %v1425_v3 = vld [vmem:[#allocation4 + $0x1a0] sm:$0xff]  ;;  %v1185_v7 = vld [vmem:[#allocation3 + $0x78] sm:$0xff] }
 0x173   : > { %2670 = vst [vmem:[%s2840_s25 + $0x58] sm:$0xff] %v2598_v52   ;;  %v3433_v43 = vadd.f32 %v1503_v6, %v3406_v5  ;;  %v3443_v23 = vsel %vm1615_vm7, 1.0, %v2786_v13  ;;  %v3452_v14 = vadd.f32 %v1232_v22, %v916_v4  ;;  %v1488_v50 = vmul.f32 0.97, %v1424_v32  ;;  %v1154_v22 = vld [vmem:[#allocation3 + $0x120] sm:$0xff] }
 0x174   : > { %1821 = vst [vmem:[#allocation3 + $0x128] sm:$0xff] %v3300_v55  ;;  %v1519_v55 = vmul.f32 0.97, %v1455_v21  ;;  %v3450_v40 = vadd.f32 %v1472_v15, %v3428_v24  ;;  %v1264_v61 = vmul.f32 0.75, %v1200_v33  ;;  %v1504_v26 = vmul.f32 0.97, %v1440_v16 }
 0x175   : > { %2013 = vst [vmem:[#allocation4 + $0x98] sm:$0xff] %v1949_v58  ;;  %vm1631_vm8 = vcmp.ge.f32.partialorder %v3433_v43, 1.25  ;;  %v1217_v31 = vmul.f32 0.75, %v1153_v17  ;;  %v1871_v2 = vsub.f32 1.0, %v3443_v23  ;;  %v1520_v44 = vmul.f32 0.97, %v1456_v38 }
 0x176   : > { %2678 = vst [vmem:[%s2840_s25 + $0x98] sm:$0xff] %v2622_v62   ;;  %v3446_v47 = vadd.f32 %v1519_v55, %v3420_v12  ;;  %v3466_v62 = vsel %vm1631_vm8, 1.0, %v2786_v13  ;;  %vm1600_vm10 = vcmp.ge.f32.partialorder %v3450_v40, 1.25  ;;  %v2577_v6 = vpack.c.bf16 %v3426_v30, %v3379_v53 }
 0x177   : > { %1837 = vst [vmem:[#allocation3 + $0x190] sm:$0xff] %v3302_v56  ;;  %v1855_v56 = vsub.f32 1.0, %v3426_v30  ;;  %v1935_v63 = vmul.f32 %v1871_v2, %v3394_v60  ;;  %v1441_v30 = vld [vmem:[#allocation4 + $0xf8] sm:$0xff]  ;;  %v1265_v15 = vmul.f32 0.75, %v1201_v10  ;;  %v2625_v32 = vpack.c.bf16 %v3466_v62, %v3402_v27 }
 0x178   : > { %2029 = vst [vmem:[#allocation4 + $0x188] sm:$0xff] %v1965_v37  ;;  %v956_v36 = vpop.f32.mrf.mxu2  ;;  %v996_v28 = vpop.f32.mrf.mxu3  ;;  %vm1647_vm9 = vcmp.ge.f32.partialorder %v3446_v47, 1.25  ;;  %v2601_v37 = vpack.c.bf16 %v3443_v23, %v3388_v35  ;;  %v1489_v35 = vmul.f32 0.97, %v1425_v3  ;;  %v1505_v16 = vmul.f32 0.97, %v1441_v30 }
 0x179   : > { %2686 = vst [vmem:[%s2840_s25 + $0xd8] sm:$0xff] %v2646_v9   ;;  %v3455_v52 = vadd.f32 %v1248_v8, %v956_v36  ;;  %v878_v34 = vpop.f32.mrf.mxu0  ;;  %v1919_v58 = vmul.f32 %v1855_v56, %v3383_v54  ;;  %v3472_v54 = vadd.f32 %v1488_v50, %v3452_v14  ;;  %v918_v1 = vpop.f32.mrf.mxu1  ;;  %v1887_v9 = vsub.f32 1.0, %v3466_v62  ;;  %v1442_v3 = vld [vmem:[#allocation4 + $0x178] sm:$0xff] }
 0x17a   : > { %1790 = vst [vmem:[#allocation3 + $0x180] sm:$0xff] %v3316_v46  ;;  %v1966_v46 = vmul.f32 %v1902_v20, %v3370_v18  ;;  %v1233_v18 = vmul.f32 0.75, %v1169_v19  ;;  %v3477_v21 = vadd.f32 %v1217_v31, %v878_v34  ;;  %v3489_v11 = vsel %vm1647_vm9, 1.0, %v2786_v13  ;;  %v1170_v20 = vld [vmem:[#allocation3 + $0x1e0] sm:$0xff] }
 0x17b   : > { %1982 = vst [vmem:[#allocation4 + $0x148] sm:$0xff] %v1918_v25  ;;  %v3475_v51 = vadd.f32 %v1504_v26, %v3455_v52  ;;  %vm1616_vm11 = vcmp.ge.f32.partialorder %v3472_v54, 1.25  ;;  %v1903_v4 = vsub.f32 1.0, %v3489_v11  ;;  %v1951_v25 = vmul.f32 %v1887_v9, %v3433_v43  ;;  %v1186_v26 = vld [vmem:[#allocation3 + $0x70] sm:$0xff] }
 0x17c   : > { %1806 = vst [vmem:[#allocation3 + $0x1e8] sm:$0xff] %v3318_v59  ;;  %v3469_v59 = vadd.f32 %v1264_v61, %v996_v28  ;;  %v3500_v60 = vadd.f32 %v1233_v18, %v918_v1  ;;  %v3517_v36 = vsel %vm1616_vm11, 1.0, %v2786_v13  ;;  %v1410_v61 = vld [vmem:[#allocation4 + $0x190] sm:$0xff]  ;;  %v1234_v38 = vmul.f32 0.75, %v1170_v20 }
 0x17d   : > { %1998 = vst [vmem:[#allocation4 + $0x58] sm:$0xff] %v1934_v49  ;;  %vm1632_vm12 = vcmp.ge.f32.partialorder %v3475_v51, 1.25  ;;  %v1457_v49 = vld [vmem:[#allocation4 + $0x128] sm:$0xff]  ;;  %v1967_v56 = vmul.f32 %v1903_v4, %v3446_v47  ;;  %v2649_v28 = vpack.c.bf16 %v3489_v11, %v3416_v48  ;;  %v1872_v19 = vsub.f32 1.0, %v3517_v36 }
 0x17e   : > { %1822 = vst [vmem:[#allocation3 + $0x1a0] sm:$0xff] %v3341_v0  ;;  %v1473_v0 = vmul.f32 0.97, %v1409_v57  ;;  %v3498_v53 = vadd.f32 %v1520_v44, %v3469_v59  ;;  %v3526_v27 = vadd.f32 %v1489_v35, %v3500_v60  ;;  %v1521_v50 = vmul.f32 0.97, %v1457_v49  ;;  %v1202_v44 = vld [vmem:[#allocation3 + $0x158] sm:$0xff] }
 0x17f   : > { %2014 = vst [vmem:[#allocation4 + $0x1b8] sm:$0xff] %v1950_v42  ;;  %v1218_v42 = vmul.f32 0.75, %v1154_v22  ;;  %v1474_v57 = vmul.f32 0.97, %v1410_v61  ;;  %v1250_v2 = vmul.f32 0.75, %v1186_v26  ;;  %v1266_v11 = vmul.f32 0.75, %v1202_v44 }
 0x180   : > { %1838 = vst [vmem:[#allocation3 + $0x198] sm:$0xff] %v3343_v29  ;;  %v3495_v29 = vsel %vm1600_vm10, 1.0, %v2786_v13  ;;  %v958_v45 = vpop.f32.mrf.mxu2  ;;  %v3505_v55 = vadd.f32 %v1473_v0, %v3477_v21  ;;  %v998_v33 = vpop.f32.mrf.mxu3  ;;  %vm1648_vm13 = vcmp.ge.f32.partialorder %v3498_v53, 1.25  ;;  %vm1617_vm15 = vcmp.ge.f32.partialorder %v3526_v27, 1.25  ;;  %v1411_v22 = vld [vmem:[#allocation4 + $0x8] sm:$0xff]  ;;  %v1187_v49 = vld [vmem:[#allocation3 + $0x90] sm:$0xff] }
 0x181   : > { %2030 = vst [vmem:[#allocation4 + $0x1b0] sm:$0xff] %v1966_v46  ;;  %v1856_v8 = vsub.f32 1.0, %v3495_v29  ;;  %v881_v17 = vpop.f32.mrf.mxu0  ;;  %v3534_v23 = vadd.f32 %v1265_v15, %v998_v33  ;;  %v1426_v46 = vld [vmem:[#allocation4 + $0x198] sm:$0xff]  ;;  %v3545_v47 = vsel %vm1648_vm13, 1.0, %v2786_v13  ;;  %v3573_v9 = vsel %vm1617_vm15, 1.0, %v2786_v13  ;;  %v1203_v61 = vld [vmem:[#allocation3 + $0x10] sm:$0xff] }
 0x182   : > { %1791 = vst [vmem:[#allocation3 + $0x110] sm:$0xff] %v3356_v41  ;;  %v1249_v41 = vmul.f32 0.75, %v1185_v7  ;;  %vm1601_vm14 = vcmp.ge.f32.partialorder %v3505_v55, 1.25  ;;  %v1490_v0 = vmul.f32 0.97, %v1426_v46  ;;  %v1155_v7 = vld [vmem:[#allocation3 + $0x150] sm:$0xff] }
 0x183   : > { %1983 = vst [vmem:[#allocation4 + $0x50] sm:$0xff] %v1919_v58  ;;  %v1920_v31 = vmul.f32 %v1856_v8, %v3450_v40  ;;  %v3550_v34 = vsel %vm1601_vm14, 1.0, %v2786_v13  ;;  %v3557_v40 = vadd.f32 %v1218_v42, %v881_v17  ;;  %v921_v58 = vpop.f32.mrf.mxu1  ;;  %v3560_v62 = vadd.f32 %v1521_v50, %v3534_v23  ;;  %v1427_v42 = vld [vmem:[#allocation4 + $0xe8] sm:$0xff] }
 0x184   : > { %2663 = vst [vmem:[%s2840_s25 + $0x20] sm:$0xff] %v2577_v6   ;;  %v3530_v43 = vadd.f32 %v1249_v41, %v958_v45  ;;  %v3562_v18 = vadd.f32 %v1234_v38, %v921_v58  ;;  %v1904_v6 = vsub.f32 1.0, %v3545_v47  ;;  %v1506_v35 = vmul.f32 0.97, %v1442_v3  ;;  %v1458_v45 = vld [vmem:[#allocation4 + $0x1f8] sm:$0xff]  ;;  %v1156_v3 = vld [vmem:[#allocation3 + $0x108] sm:$0xff] }
 0x185   : > { %1807 = vst [vmem:[#allocation3 + $0xf8] sm:$0xff] %v3372_v39  ;;  %v3522_v39 = vsel %vm1632_vm12, 1.0, %v2786_v13  ;;  %vm1649_vm1 = vcmp.ge.f32.partialorder %v3560_v62, 1.25  ;;  %v1219_v41 = vmul.f32 0.75, %v1155_v7  ;;  %v2580_v30 = vpack.c.bf16 %v3550_v34, %v3495_v29 }
 0x186   : > { %1999 = vst [vmem:[#allocation4 + $0x48] sm:$0xff] %v1935_v63  ;;  %v3555_v48 = vadd.f32 %v1505_v16, %v3530_v43  ;;  %v1968_v4 = vmul.f32 %v1904_v6, %v3498_v53  ;;  %v1522_v33 = vmul.f32 0.97, %v1458_v45  ;;  %v3602_v29 = vsel %vm1649_vm1, 1.0, %v2786_v13  ;;  %v1412_v45 = vld [vmem:[#allocation4 + $0x88] sm:$0xff] }
 0x187   : > { %2671 = vst [vmem:[%s2840_s25 + $0x60] sm:$0xff] %v2601_v37   ;;  %v1857_v37 = vsub.f32 1.0, %v3550_v34  ;;  %v1475_v16 = vmul.f32 0.97, %v1411_v22  ;;  %v1251_v50 = vmul.f32 0.75, %v1187_v49  ;;  %v1267_v34 = vmul.f32 0.75, %v1203_v61 }
 0x188   : > { %1823 = vst [vmem:[#allocation3 + $0x1f0] sm:$0xff] %v3406_v5  ;;  %v1888_v5 = vsub.f32 1.0, %v3522_v39  ;;  %v961_v1 = vpop.f32.mrf.mxu2  ;;  %vm1633_vm0 = vcmp.ge.f32.partialorder %v3555_v48, 1.25 }
 0x189   : > { %2015 = vst [vmem:[#allocation4 + $0x100] sm:$0xff] %v1951_v25  ;;  %v3579_v10 = vadd.f32 %v1250_v2, %v961_v1  ;;  %v883_v15 = vpop.f32.mrf.mxu0  ;;  %v1171_v25 = vld [vmem:[#allocation3] sm:$0xff]  ;;  %v1921_v53 = vmul.f32 %v1857_v37, %v3505_v55  ;;  %v1172_v37 = vld [vmem:[#allocation3 + $0xf0] sm:$0xff] }
 0x18a   : > { %2679 = vst [vmem:[%s2840_s25 + $0xa0] sm:$0xff] %v2625_v32   ;;  %v1952_v63 = vmul.f32 %v1888_v5, %v3475_v51  ;;  %v3584_v51 = vadd.f32 %v1490_v0, %v3562_v18  ;;  %v1873_v32 = vsub.f32 1.0, %v3573_v9  ;;  %v3610_v20 = vadd.f32 %v1219_v41, %v883_v15  ;;  %v1459_v0 = vld [vmem:[#allocation4 + $0x170] sm:$0xff]  ;;  %v1188_v41 = vld [vmem:[#allocation3 + $0x1d8] sm:$0xff] }
 0x18b   : > { %1839 = vst [vmem:[#allocation3 + $0x38] sm:$0xff] %v3420_v12  ;;  %v1936_v12 = vmul.f32 %v1872_v19, %v3472_v54  ;;  %v3577_v54 = vadd.f32 %v1474_v57, %v3557_v40  ;;  %v1235_v17 = vmul.f32 0.75, %v1171_v25  ;;  %v1905_v19 = vsub.f32 1.0, %v3602_v29 }
 0x18c   : > { %2031 = vst [vmem:[#allocation4 + $0x18] sm:$0xff] %v1967_v56  ;;  %vm1618_vm3 = vcmp.ge.f32.partialorder %v3584_v51, 1.25  ;;  %v923_v56 = vpop.f32.mrf.mxu1  ;;  %v1937_v38 = vmul.f32 %v1873_v32, %v3526_v27  ;;  %v1491_v27 = vmul.f32 0.97, %v1427_v42  ;;  %v1236_v15 = vmul.f32 0.75, %v1172_v37 }
 0x18d   : > { %2687 = vst [vmem:[%s2840_s25 + $0xe0] sm:$0xff] %v2649_v28   ;;  %vm1602_vm2 = vcmp.ge.f32.partialorder %v3577_v54, 1.25  ;;  %v3636_v5 = vadd.f32 %v1235_v17, %v923_v56  ;;  %v1252_v49 = vmul.f32 0.75, %v1188_v41  ;;  %v1157_v17 = vld [vmem:[#allocation3 + $0x60] sm:$0xff] }
 0x18e   : > { %1792 = vst [vmem:[#allocation3 + $0x118] sm:$0xff] %v3428_v24  ;;  %v1001_v24 = vpop.f32.mrf.mxu3  ;;  %v3624_v46 = vsel %vm1602_vm2, 1.0, %v2786_v13 }
 0x18f   : > { %1984 = vst [vmem:[#allocation4 + $0x1f0] sm:$0xff] %v1920_v31  ;;  %v3596_v8 = vadd.f32 %v1266_v11, %v1001_v24  ;;  %v1443_v31 = vld [vmem:[#allocation4 + $0x180] sm:$0xff] }
 0x190   : > { %1808 = vst [vmem:[#allocation3 + $0x160] sm:$0xff] %v3452_v14  ;;  %v3594_v14 = vsel %vm1633_vm0, 1.0, %v2786_v13  ;;  %v963_v28 = vpop.f32.mrf.mxu2  ;;  %v1507_v2 = vmul.f32 0.97, %v1443_v31 }
 0x191   : > { %2000 = vst [vmem:[#allocation4 + $0x40] sm:$0xff] %v1936_v12  ;;  %v1889_v55 = vsub.f32 1.0, %v3594_v14  ;;  %v3618_v26 = vadd.f32 %v1522_v33, %v3596_v8  ;;  %v3640_v58 = vadd.f32 %v1251_v50, %v963_v28  ;;  %v2628_v1 = vpack.c.bf16 %v3594_v14, %v3522_v39  ;;  %v1204_v14 = vld [vmem:[#allocation3 + $0x58] sm:$0xff] }
 0x192   : > { %1824 = vst [vmem:[#allocation3 + $0xe8] sm:$0xff] %v3455_v52  ;;  %v3606_v52 = vadd.f32 %v1506_v35, %v3579_v10  ;;  %v1969_v12 = vmul.f32 %v1905_v19, %v3560_v62  ;;  %v3657_v39 = vadd.f32 %v1491_v27, %v3636_v5  ;;  %v1523_v62 = vmul.f32 0.97, %v1459_v0 }
 0x193   : > { %2016 = vst [vmem:[#allocation4 + $0xc8] sm:$0xff] %v1952_v63  ;;  %v1953_v57 = vmul.f32 %v1889_v55, %v3555_v48  ;;  %vm1650_vm5 = vcmp.ge.f32.partialorder %v3618_v26, 1.25  ;;  %v886_v63 = vpop.f32.mrf.mxu0  ;;  %v1220_v35 = vmul.f32 0.75, %v1156_v3  ;;  %v1476_v33 = vmul.f32 0.97, %v1412_v45 }
 0x194   : > { %1840 = vst [vmem:[#allocation3 + $0xc0] sm:$0xff] %v3469_v59  ;;  %v2604_v59 = vpack.c.bf16 %v3573_v9, %v3517_v36  ;;  %vm1634_vm4 = vcmp.ge.f32.partialorder %v3606_v52, 1.25  ;;  %v3634_v36 = vadd.f32 %v1475_v16, %v3610_v20  ;;  %v2652_v9 = vpack.c.bf16 %v3602_v29, %v3545_v47  ;;  %v1444_v16 = vld [vmem:[#allocation4 + $0xb0] sm:$0xff] }
 0x195   : > { %2032 = vst [vmem:[#allocation4 + $0xf0] sm:$0xff] %v1968_v4  ;;  %v3652_v6 = vsel %vm1634_vm4, 1.0, %v2786_v13  ;;  %v3666_v11 = vsel %vm1650_vm5, 1.0, %v2786_v13  ;;  %vm1619_vm7 = vcmp.ge.f32.partialorder %v3657_v39, 1.25  ;;  %v1268_v50 = vmul.f32 0.75, %v1204_v14 }
 0x196   : > { %1793 = vst [vmem:[#allocation3 + $0x98] sm:$0xff] %v3477_v21  ;;  %v3629_v21 = vsel %vm1618_vm3, 1.0, %v2786_v13  ;;  %v1003_v44 = vpop.f32.mrf.mxu3  ;;  %vm1603_vm6 = vcmp.ge.f32.partialorder %v3634_v36, 1.25  ;;  %v1890_v24 = vsub.f32 1.0, %v3652_v6  ;;  %v1906_v25 = vsub.f32 1.0, %v3666_v11 }
 0x197   : > { %1985 = vst [vmem:[#allocation4 + $0x130] sm:$0xff] %v1921_v53  ;;  %v1874_v48 = vsub.f32 1.0, %v3629_v21  ;;  %v3659_v7 = vadd.f32 %v1267_v34, %v1003_v44  ;;  %v3678_v47 = vsel %vm1603_vm6, 1.0, %v2786_v13  ;;  %v2491_v42 = vsel %vm1619_vm7, 1.0, %v2786_v13  ;;  %v1413_v34 = vld [vmem:[#allocation4 + $0x38] sm:$0xff] }
 0x198   : > { %2664 = vst [vmem:[%s2840_s25 + $0x28] sm:$0xff] %v2580_v30   ;;  %v926_v30 = vpop.f32.mrf.mxu1  ;;  %v1859_v53 = vsub.f32 1.0, %v3678_v47  ;;  %v966_v29 = vpop.f32.mrf.mxu2  ;;  %v1508_v31 = vmul.f32 0.97, %v1444_v16  ;;  %v1221_v19 = vmul.f32 0.75, %v1157_v17  ;;  %v2607_v37 = vpack.c.bf16 %v2491_v42, %v3629_v21 }
 0x199   : > { %1809 = vst [vmem:[#allocation3 + $0x30] sm:$0xff] %v3500_v60  ;;  %v1858_v60 = vsub.f32 1.0, %v3624_v46  ;;  %v1938_v22 = vmul.f32 %v1874_v48, %v3584_v51  ;;  %v3684_v32 = vadd.f32 %v1523_v62, %v3659_v7  ;;  %v1954_v51 = vmul.f32 %v1890_v24, %v3606_v52  ;;  %v1205_v24 = vld [vmem:[#allocation3 + $0xa0] sm:$0xff] }
 0x19a   : > { %2001 = vst [vmem:[#allocation4 + $0x1a0] sm:$0xff] %v1937_v38  ;;  %v3696_v55 = vadd.f32 %v1236_v15, %v926_v30  ;;  %v1460_v38 = vld [vmem:[#allocation4 + $0x1d0] sm:$0xff]  ;;  %v3709_v28 = vadd.f32 %v1252_v49, %v966_v29 }
 0x19b   : > { %2672 = vst [vmem:[%s2840_s25 + $0x68] sm:$0xff] %v2604_v59   ;;  %v1922_v4 = vmul.f32 %v1858_v60, %v3577_v54  ;;  %v3688_v54 = vadd.f32 %v1220_v35, %v886_v63  ;;  %vm1651_vm9 = vcmp.ge.f32.partialorder %v3684_v32, 1.25  ;;  %v888_v27 = vpop.f32.mrf.mxu0  ;;  %v1524_v0 = vmul.f32 0.97, %v1460_v38  ;;  %v1189_v60 = vld [vmem:[#allocation3 + $0xd0] sm:$0xff]  ;;  %v1429_v63 = vld [vmem:[#allocation4 + $0x158] sm:$0xff] }
 0x19c   : > { %1825 = vst [vmem:[#allocation3 + $0x78] sm:$0xff] %v3530_v43  ;;  %v3669_v43 = vadd.f32 %v1507_v2, %v3640_v58  ;;  %v3727_v48 = vadd.f32 %v1221_v19, %v888_v27  ;;  %v1253_v35 = vmul.f32 0.75, %v1189_v60 }
 0x19d   : > { %2017 = vst [vmem:[#allocation4 + $0xf8] sm:$0xff] %v1953_v57  ;;  %v3707_v59 = vadd.f32 %v1476_v33, %v3688_v54  ;;  %v1923_v57 = vmul.f32 %v1859_v53, %v3634_v36  ;;  %v1572_v36 = vadd.f32 %v1508_v31, %v3709_v28  ;;  %v1461_v33 = vld [vmem:[#allocation4 + $0x118] sm:$0xff] }
 0x19e   : > { %2680 = vst [vmem:[%s2840_s25 + $0xa8] sm:$0xff] %v2628_v1   ;;  %vm1635_vm8 = vcmp.ge.f32.partialorder %v3669_v43, 1.25  ;;  %v1006_v61 = vpop.f32.mrf.mxu3  ;;  %v2583_v1 = vpack.c.bf16 %v3678_v47, %v3624_v46  ;;  %v1445_v47 = vld [vmem:[#allocation4 + $0x110] sm:$0xff] }
 0x19f   : > { %1841 = vst [vmem:[#allocation3 + $0x1c0] sm:$0xff] %v3534_v23  ;;  %v1428_v23 = vld [vmem:[#allocation4 + $0x168] sm:$0xff]  ;;  %v3703_v52 = vsel %vm1635_vm8, 1.0, %v2786_v13  ;;  %v3716_v44 = vadd.f32 %v1268_v50, %v1006_v61  ;;  %vm1604_vm10 = vcmp.ge.f32.partialorder %v3707_v59, 1.25  ;;  %vm1636_vm12 = vcmp.ge.f32.partialorder %v1572_v36, 1.25 }
 0x1a0   : > { %2033 = vst [vmem:[#allocation4 + $0x128] sm:$0xff] %v1969_v12  ;;  %v1492_v56 = vmul.f32 0.97, %v1428_v23  ;;  %v1891_v3 = vsub.f32 1.0, %v3703_v52  ;;  %v928_v62 = vpop.f32.mrf.mxu1  ;;  %v3738_v41 = vsel %vm1604_vm10, 1.0, %v2786_v13  ;;  %v2631_v15 = vpack.c.bf16 %v3703_v52, %v3652_v6 }
 0x1a1   : > { %2688 = vst [vmem:[%s2840_s25 + $0xe8] sm:$0xff] %v2652_v9   ;;  %v1588_v9 = vadd.f32 %v1524_v0, %v3716_v44  ;;  %v1860_v23 = vsub.f32 1.0, %v3738_v41  ;;  %v1509_v14 = vmul.f32 0.97, %v1445_v47  ;;  %v2508_v6 = vsel %vm1636_vm12, 1.0, %v2786_v13 }
 0x1a2   : > { %1794 = vst [vmem:[#allocation3 + $0x120] sm:$0xff] %v3557_v40  ;;  %v1970_v40 = vmul.f32 %v1906_v25, %v3618_v26  ;;  %v1875_v26 = vsub.f32 1.0, %v2491_v42  ;;  %v3714_v2 = vadd.f32 %v1492_v56, %v3696_v55  ;;  %v1955_v21 = vmul.f32 %v1891_v3, %v3669_v43 }
 0x1a3   : > { %1986 = vst [vmem:[#allocation4 + $0x190] sm:$0xff] %v1922_v4  ;;  %v968_v4 = vpop.f32.mrf.mxu2  ;;  %v1269_v25 = vmul.f32 0.75, %v1205_v24  ;;  %vm1652_vm13 = vcmp.ge.f32.partialorder %v1588_v9, 1.25  ;;  %v1525_v42 = vmul.f32 0.97, %v1461_v33 }
 0x1a4   : > { %1810 = vst [vmem:[#allocation3 + $0x1e0] sm:$0xff] %v3562_v18  ;;  %v1173_v18 = vld [vmem:[#allocation3 + $0x8] sm:$0xff]  ;;  %v1939_v46 = vmul.f32 %v1875_v26, %v3657_v39  ;;  %vm1620_vm11 = vcmp.ge.f32.partialorder %v3714_v2, 1.25  ;;  %v1493_v39 = vmul.f32 0.97, %v1429_v63  ;;  %v2524_v16 = vsel %vm1652_vm13, 1.0, %v2786_v13 }
 0x1a5   : > { %2002 = vst [vmem:[#allocation4 + $0x198] sm:$0xff] %v1938_v22  ;;  %v1237_v12 = vmul.f32 0.75, %v1173_v18  ;;  %v2492_v22 = vsel %vm1620_vm11, 1.0, %v2786_v13 }
 0x1a6   : > { %1826 = vst [vmem:[#allocation3 + $0x70] sm:$0xff] %v3579_v10  ;;  %v2523_v10 = vsel %vm1651_vm9, 1.0, %v2786_v13  ;;  %v1008_v43 = vpop.f32.mrf.mxu3  ;;  %v1876_v29 = vsub.f32 1.0, %v2492_v22 }
 0x1a7   : > { %2018 = vst [vmem:[#allocation4 + $0x178] sm:$0xff] %v1954_v51  ;;  %v1907_v45 = vsub.f32 1.0, %v2523_v10  ;;  %v2655_v53 = vpack.c.bf16 %v2523_v10, %v3666_v11  ;;  %v1397_v17 = vadd.f32 %v1269_v25, %v1008_v43 }
 0x1a8   : > { %1842 = vst [vmem:[#allocation3 + $0x158] sm:$0xff] %v3596_v8  ;;  %v1477_v8 = vmul.f32 0.97, %v1413_v34  ;;  %v1940_v11 = vmul.f32 %v1876_v29, %v3714_v2 }
 0x1a9   : > { %2034 = vst [vmem:[#allocation4 + $0x1f8] sm:$0xff] %v1970_v40  ;;  %v1971_v49 = vmul.f32 %v1907_v45, %v3684_v32  ;;  %v1892_v32 = vsub.f32 1.0, %v2508_v6  ;;  %v1908_v40 = vsub.f32 1.0, %v2524_v16  ;;  %v1589_v52 = vadd.f32 %v1525_v42, %v1397_v17 }
 0x1aa   : > { %1795 = vst [vmem:[#allocation3 + $0x150] sm:$0xff] %v3610_v20  ;;  %v3740_v20 = vadd.f32 %v1237_v12, %v928_v62  ;;  %v1541_v30 = vadd.f32 %v1477_v8, %v3727_v48 }
 0x1ab   : > { %1987 = vst [vmem:[#allocation4 + $0x8] sm:$0xff] %v1923_v57  ;;  %v1956_v61 = vmul.f32 %v1892_v32, %v1572_v36  ;;  %vm1653_vm1 = vcmp.ge.f32.partialorder %v1589_v52, 1.25 }
 0x1ac   : > { %2665 = vst [vmem:[%s2840_s25 + $0x30] sm:$0xff] %v2583_v1   ;;  %v1557_v51 = vadd.f32 %v1493_v39, %v3740_v20  ;;  %vm1605_vm14 = vcmp.ge.f32.partialorder %v1541_v30, 1.25 }
 0x1ad   : > { %1811 = vst [vmem:[#allocation3] sm:$0xff] %v3636_v5  ;;  %v1381_v5 = vadd.f32 %v1253_v35, %v968_v4  ;;  %v2477_v50 = vsel %vm1605_vm14, 1.0, %v2786_v13 }
 0x1ae   : > { %2003 = vst [vmem:[#allocation4 + $0xe8] sm:$0xff] %v1939_v46  ;;  %vm1621_vm15 = vcmp.ge.f32.partialorder %v1557_v51, 1.25  ;;  %v1861_v38 = vsub.f32 1.0, %v2477_v50  ;;  %v2586_v18 = vpack.c.bf16 %v2477_v50, %v3738_v41 }
 0x1af   : > { %2673 = vst [vmem:[%s2840_s25 + $0x70] sm:$0xff] %v2607_v37   ;;  %v1573_v56 = vadd.f32 %v1509_v14, %v1381_v5 }
 0x1b0   : > { %1827 = vst [vmem:[#allocation3 + $0x90] sm:$0xff] %v3640_v58  ;;  %v1924_v58 = vmul.f32 %v1860_v23, %v3707_v59  ;;  %v1972_v59 = vmul.f32 %v1908_v40, %v1588_v9 }
 0x1b1   : > { %2019 = vst [vmem:[#allocation4 + $0x180] sm:$0xff] %v1955_v21  ;;  %vm1637_vm0 = vcmp.ge.f32.partialorder %v1573_v56, 1.25 }
 0x1b2   : > { %2681 = vst [vmem:[%s2840_s25 + $0xb0] sm:$0xff] %v2631_v15   ;;  %v2509_v19 = vsel %vm1637_vm0, 1.0, %v2786_v13 }
 0x1b3   : > { %1843 = vst [vmem:[#allocation3 + $0x10] sm:$0xff] %v3659_v7  ;;  %v2493_v7 = vsel %vm1621_vm15, 1.0, %v2786_v13  ;;  %v1893_v26 = vsub.f32 1.0, %v2509_v19  ;;  %v2634_v2 = vpack.c.bf16 %v2509_v19, %v2508_v6 }
 0x1b4   : > { %2035 = vst [vmem:[#allocation4 + $0x170] sm:$0xff] %v1971_v49  ;;  %v1877_v31 = vsub.f32 1.0, %v2493_v7 }
 0x1b5   : > { %2689 = vst [vmem:[%s2840_s25 + $0xf0] sm:$0xff] %v2655_v53   ;;  %v1957_v57 = vmul.f32 %v1893_v26, %v1573_v56 }
 0x1b6   : > { %1796 = vst [vmem:[#allocation3 + $0x108] sm:$0xff] %v3688_v54  ;;  %v1925_v54 = vmul.f32 %v1861_v38, %v1541_v30  ;;  %v1941_v27 = vmul.f32 %v1877_v31, %v1557_v51 }
 0x1b7   : > { %1988 = vst [vmem:[#allocation4 + $0x88] sm:$0xff] %v1924_v58 }
 0x1b8   : > { %1812 = vst [vmem:[#allocation3 + $0xf0] sm:$0xff] %v3696_v55  ;;  %v2525_v55 = vsel %vm1653_vm1, 1.0, %v2786_v13 }
 0x1b9   : > { %2004 = vst [vmem:[#allocation4 + $0x168] sm:$0xff] %v1940_v11  ;;  %v1909_v34 = vsub.f32 1.0, %v2525_v55  ;;  %v2658_v0 = vpack.c.bf16 %v2525_v55, %v2524_v16 }
 0x1ba   : > { %1828 = vst [vmem:[#allocation3 + $0x1d8] sm:$0xff] %v3709_v28  ;;  %v2610_v28 = vpack.c.bf16 %v2493_v7, %v2492_v22 }
 0x1bb   : > { %2020 = vst [vmem:[#allocation4 + $0xb0] sm:$0xff] %v1956_v61 }
 0x1bc   : > { %1844 = vst [vmem:[#allocation3 + $0x58] sm:$0xff] %v3716_v44  ;;  %v1973_v44 = vmul.f32 %v1909_v34, %v1589_v52 }
 0x1bd   : > { %2036 = vst [vmem:[#allocation4 + $0x1d0] sm:$0xff] %v1972_v59 }
 0x1be   : > { %1797 = vst [vmem:[#allocation3 + $0x60] sm:$0xff] %v3727_v48 }
 0x1bf   : > { %1989 = vst [vmem:[#allocation4 + $0x38] sm:$0xff] %v1925_v54 }
 0x1c0   : > { %2666 = vst [vmem:[%s2840_s25 + $0x38] sm:$0xff] %v2586_v18  }
 0x1c1   : > { %1813 = vst [vmem:[#allocation3 + $0x8] sm:$0xff] %v3740_v20 }
 0x1c2   : > { %2005 = vst [vmem:[#allocation4 + $0x158] sm:$0xff] %v1941_v27 }
 0x1c3   : > { %2674 = vst [vmem:[%s2840_s25 + $0x78] sm:$0xff] %v2610_v28  }
 0x1c4   : > { %1829 = vst [vmem:[#allocation3 + $0xd0] sm:$0xff] %v1381_v5 }
 0x1c5   : > { %2021 = vst [vmem:[#allocation4 + $0x110] sm:$0xff] %v1957_v57 }
 0x1c6   : > { %2682 = vst [vmem:[%s2840_s25 + $0xb8] sm:$0xff] %v2634_v2  }
 0x1c7   : > { %1845 = vst [vmem:[#allocation3 + $0xa0] sm:$0xff] %v1397_v17 }
 0x1c8   : > { %2037 = vst [vmem:[#allocation4 + $0x118] sm:$0xff] %v1973_v44 }
 0x1c9   : > { %2690 = vst [vmem:[%s2840_s25 + $0xf8] sm:$0xff] %v2658_v0  }
 0x1ca PF: > { %s12_s13 = sadd.s32 1, %s2783_s13   ;;  %s3796_s9 = smov %s2775_s11 }
 0x1cb   : > { %p9_p8 = scmp.ge.s32.totalorder %s12_s13, 34   ;;  %s3797_s10 = smov %s2779_s12 }
 0x1cc   : > { %s3798_s11 = smov %s3801_s14  ;;  %s3799_s12 = smov %s3805_s15 }
 0x1cd   :  { %11 = sbr.rel (!%p9_p8) target bundleno = 3 (0x3), region = 73 }

// kernel: network_forward.10
= control target key start
LH: loop header
LB: loop body
LE: loop exit
PB: predicated region body
PF: predicated region fallthrough
CT: control target
= control target key end

     0   :  { %s405_s6 = smov 0   ;;  %s407_s7 = smov 0   ;;  %s459_s0 = inlined_call_operand.vmem [shape: bf16[8,64,128], index: 0, kind: input, shape index: {}]   ;;  %s460_s1 = inlined_call_operand.vmem [shape: bf16[8,64,128], index: 1, kind: output, shape index: {}]  }
   0x1   :  { %s409_s8 = smov 0   ;;  %s411_s9 = smov 0  }
   0x2   :  { %s413_s10 = smov 0  }
   0x3 LB: > { %s20_s11 = sadd.s32 1, %s383_s8  ;;  %s23_s12 = sadd.s32 1, %s387_s9  ;;  %s391_s10 = sphi %s413_s10, %s11_s10   ;;  %s387_s9 = sphi %s411_s9, %s464_s9   ;;  %s383_s8 = sphi %s409_s8, %s463_s8   ;;  %s379_s7 = sphi %s407_s7, %s462_s7   ;;  %s375_s6 = sphi %s405_s6, %s461_s6  }
   0x4   : > { %p21_p0 = scmp.ge.s32.totalorder %s20_s11, 8  ;;  %p292_p1 = scmp.ge.s32.totalorder %s391_s10, 1 }
   0x5   : > { %p108_p2 = scmp.lt.s32.totalorder %s391_s10, 33 }
   0x6   : > { %s466_s11 = smov (%p21_p0, %s20_s11), 0  ;;  %s468_s12 = smov (!%p21_p0, %s23_s12), %s387_s9 }
   0x7   : > { %p109_p3 = pnand %p292_p1, %p108_p2  ;;  %p25_p4 = scmp.ge.s32.totalorder %s468_s12, 4 }
   0x8   : > { %s293_s13 = sshll.u32 (!%p109_p3), %s379_s7, 1  ;;  %p137_p5 = scmp.lt.s32.totalorder (!%p109_p3), %s375_s6, 7 }
   0x9   : > { %s470_s12 = smov (%p25_p4, %s468_s12), 0  ;;  %112 = sbr.rel (%p109_p3) target bundleno = 43 (0x2b), region = 24 }
   0xa   : > { %p139_p6 = scmp.lt.s32.totalorder (!%p109_p3), %s293_s13, 7  ;;  %p299_p7 = scmp.ne.s32.totalorder (!%p109_p3), %s375_s6, 0 }
   0xe   : > { %s138_s14 = scalar_select %p137_p5, %s375_s6, 7 }
   0xf   : > { %s472_s13 = smov (!%p139_p6, %s293_s13), 7  ;;  %159 = sbr.rel (%p299_p7) target bundleno = 25 (0x19), region = 28 }
  0x10   : > { %s294_s15 = sshll.u32 %s138_s14, 3 }
  0x11   : > { %s142_s16 = sadd.s32 %s294_s15, %s472_s13 }
  0x12   : > { %s295_s17 = sshll.u32 %s142_s16, 2 }
  0x13   : > { %s144_s20 = scalar_lea.vmem %s459_s0, %s295_s17  ;;  %s441_s23 = scalar_lea.vmem %s460_s1, %s295_s17 }
  0x14   : > { %v393_v0 = vmov 0.0  }
  0x15   : > { %160 = vst [vmem:[#allocation2] sm:$0xff] %v393_v0 }
  0x16   : > { %161 = vst [vmem:[#allocation2 + $0x8] sm:$0xff] %v393_v0 }
  0x17   : > { %162 = vst [vmem:[#allocation3 + $0x8] sm:$0xff] %v393_v0 }
  0x18   : > { %163 = vst [vmem:[#allocation3] sm:$0xff] %v393_v0 }
  0x19 PF: > { %v305_v1 = vld [vmem:[%s144_s20] sm:$0xff]   ;;  %v394_v16 = vmov 0.0  }
  0x1a   : > { %v306_v4 = vunpack.c.l.bf16 %v305_v1  ;;  %v307_v6 = vunpack.c.h.bf16 %v305_v1 }
  0x1c   : > { %v168_v2 = vld [vmem:[#allocation2] sm:$0xff] }
  0x1d   : > { %v169_v3 = vld [vmem:[#allocation2 + $0x8] sm:$0xff]  ;;  %v170_v5 = vmul.f32 0.75, %v168_v2 }
  0x1e   : > { %v171_v7 = vmul.f32 0.75, %v169_v3  ;;  %v174_v8 = vld [vmem:[#allocation3 + $0x8] sm:$0xff] }
  0x1f   : > { %v175_v9 = vld [vmem:[#allocation3] sm:$0xff]  ;;  %v176_v10 = vmul.f32 0.97, %v174_v8  ;;  %v172_v12 = vadd.f32 %v306_v4, %v170_v5 }
  0x20   : > { %v177_v11 = vmul.f32 0.97, %v175_v9  ;;  %v173_v13 = vadd.f32 %v307_v6, %v171_v7 }
  0x21   : > { %186 = vst [vmem:[#allocation2] sm:$0xff] %v172_v12  ;;  %v178_v14 = vadd.f32 %v176_v10, %v172_v12 }
  0x22   : > { %v179_v15 = vadd.f32 %v177_v11, %v173_v13  ;;  %187 = vst [vmem:[#allocation2 + $0x8] sm:$0xff] %v173_v13 }
  0x23   : > { %vm180_vm0 = vcmp.ge.f32.partialorder %v178_v14, 1.25 }
  0x24   : > { %vm181_vm1 = vcmp.ge.f32.partialorder %v179_v15, 1.25  ;;  %v300_v17 = vsel %vm180_vm0, 1.0, %v394_v16 }
  0x25   : > { %v301_v18 = vsel %vm181_vm1, 1.0, %v394_v16  ;;  %v188_v19 = vsub.f32 1.0, %v300_v17 }
  0x26   : > { %v189_v20 = vsub.f32 1.0, %v301_v18  ;;  %v309_v21 = vpack.c.bf16 %v301_v18, %v300_v17 }
  0x27   : > { %v190_v22 = vmul.f32 %v188_v19, %v178_v14 }
  0x28   : > { %v191_v23 = vmul.f32 %v189_v20, %v179_v15  ;;  %310 = vst [vmem:[%s441_s23] sm:$0xff] %v309_v21  }
  0x29   : > { %192 = vst [vmem:[#allocation3 + $0x8] sm:$0xff] %v190_v22 }
  0x2a   : > { %193 = vst [vmem:[#allocation3] sm:$0xff] %v191_v23 }
  0x2b PF: > { %s11_s10 = sadd.s32 1, %s391_s10   ;;  %s461_s6 = smov %s383_s8 }
  0x2c   : > { %p8_p8 = scmp.ge.s32.totalorder %s11_s10, 34   ;;  %s462_s7 = smov %s387_s9 }
  0x2d   : > { %s463_s8 = smov %s466_s11  ;;  %s464_s9 = smov %s470_s12 }
  0x2e   :  { %10 = sbr.rel (!%p8_p8) target bundleno = 3 (0x3), region = 58 }

// kernel: network_forward.11
= control target key start
LH: loop header
LB: loop body
LE: loop exit
PB: predicated region body
PF: predicated region fallthrough
CT: control target
= control target key end

     0   :  { %s1978_s9 = smov 0   ;;  %s1980_s10 = smov 0   ;;  %s2314_s0 = inlined_call_operand.vmem [shape: bf16[8,512,144], index: 0, kind: input, shape index: {}]   ;;  %s2315_s1 = inlined_call_operand.vmem [shape: bf16[144,128], index: 1, kind: input, shape index: {}]   ;;  %s2316_s2 = inlined_call_operand.vmem [shape: bf16[8,512,128], index: 2, kind: output, shape index: {}]  }
   0x1   :  { %s1982_s11 = smov 0   ;;  %s1984_s12 = smov 0  }
   0x2   :  { %s1986_s13 = smov 0  }
   0x3 LB: > { %s27_s14 = sadd.s32 1, %s1951_s11  ;;  %s31_s15 = sadd.s32 1, %s1955_s12  ;;  %s1959_s13 = sphi %s1986_s13, %s12_s13   ;;  %s1955_s12 = sphi %s1984_s12, %s2320_s12   ;;  %s1951_s11 = sphi %s1982_s11, %s2319_s11   ;;  %s1947_s10 = sphi %s1980_s10, %s2318_s10   ;;  %s1943_s9 = sphi %s1978_s9, %s2317_s9  }
   0x4   : > { %p29_p0 = scmp.ge.s32.totalorder %s27_s14, 8  ;;  %p1542_p1 = scmp.ge.s32.totalorder %s1959_s13, 1 }
   0x5   : > { %p159_p2 = scmp.lt.s32.totalorder %s1959_s13, 17 }
   0x6   : > { %s2322_s14 = smov (%p29_p0, %s27_s14), 0  ;;  %s2324_s15 = smov (!%p29_p0, %s31_s15), %s1955_s12 }
   0x7   : > { %p160_p3 = pnand %p1542_p1, %p159_p2  ;;  %p33_p4 = scmp.ge.s32.totalorder %s2324_s15, 2 }
   0x8   : > { %s1543_s16 = sshll.u32 (!%p160_p3), %s1947_s10, 5  ;;  %p201_p5 = scmp.lt.s32.totalorder (!%p160_p3), %s1943_s9, 7 }
   0x9   : > { %s2326_s15 = smov (%p33_p4, %s2324_s15), 0  ;;  %163 = sbr.rel (%p160_p3) target bundleno = 377 (0x179), region = 28 }
   0xa   : > { %p203_p6 = scmp.lt.s32.totalorder (!%p160_p3), %s1543_s16, 63  ;;  %p232_p7 = scmp.eq.s32.totalorder (!%p160_p3), %s1943_s9, 0 }
   0xe   : > { %s2328_s9 = smov (!%p201_p5, %s1943_s9), 7  ;;  %s2330_s16 = smov (!%p203_p6, %s1543_s16), 63  ;;  %v1961_v0 = vmov (%p232_p7), 0.0  }
   0xf   : > { %s1545_s17 = sshll.u32 %s2328_s9, 7  ;;  %s1548_s18 = sshll.u32 %s2328_s9, 6  ;;  %238 = vst [vmem:[#allocation3 + $0xb0] sm:$0xff] (%p232_p7), %v1961_v0 }
  0x10   : > { %s1544_s19 = sshll.u32 %s2330_s16, 1  ;;  %s227_s20 = sadd.s32 %s1548_s18, %s2330_s16  ;;  %239 = vst [vmem:[#allocation3] sm:$0xff] (%p232_p7), %v1961_v0 }
  0x11   : > { %s210_s21 = sadd.s32 %s1545_s17, %s1544_s19  ;;  %s1549_s22 = sshll.u32 %s227_s20, 2  ;;  %240 = vst [vmem:[#allocation3 + $0xd8] sm:$0xff] (%p232_p7), %v1961_v0 }
  0x12   : > { %s1546_s23 = sshll.u32 %s210_s21, 2  ;;  %s2016_s26 = scalar_lea.vmem %s2316_s2, %s1549_s22  ;;  %241 = vst [vmem:[#allocation3 + $0x18] sm:$0xff] (%p232_p7), %v1961_v0 }
  0x13   : > { %s2021_s29 = scalar_lea.vmem %s2314_s0, %s1546_s23  ;;  %237 = sbr.rel (!%p232_p7) target bundleno = 79 (0x4f), region = 32  ;;  %242 = vst [vmem:[#allocation3 + $0x50] sm:$0xff] (%p232_p7), %v1961_v0 }
  0x14   : > { %243 = vst [vmem:[#allocation3 + $0x68] sm:$0xff] (%p232_p7), %v1961_v0 }
  0x15   : > { %244 = vst [vmem:[#allocation3 + $0x30] sm:$0xff] (%p232_p7), %v1961_v0 }
  0x16   : > { %245 = vst [vmem:[#allocation3 + $0x48] sm:$0xff] (%p232_p7), %v1961_v0 }
  0x17   : > { %246 = vst [vmem:[#allocation3 + $0x80] sm:$0xff] (%p232_p7), %v1961_v0 }
  0x18   : > { %247 = vst [vmem:[#allocation3 + $0x88] sm:$0xff] %v1961_v0 }
  0x19   : > { %248 = vst [vmem:[#allocation3 + $0xe8] sm:$0xff] %v1961_v0 }
  0x1a   : > { %249 = vst [vmem:[#allocation3 + $0xb8] sm:$0xff] %v1961_v0 }
  0x1b   : > { %250 = vst [vmem:[#allocation3 + $0x60] sm:$0xff] %v1961_v0 }
  0x1c   : > { %251 = vst [vmem:[#allocation3 + $0xf0] sm:$0xff] %v1961_v0 }
  0x1d   : > { %252 = vst [vmem:[#allocation3 + $0x8] sm:$0xff] %v1961_v0 }
  0x1e   : > { %253 = vst [vmem:[#allocation3 + $0x78] sm:$0xff] %v1961_v0 }
  0x1f   : > { %254 = vst [vmem:[#allocation3 + $0x38] sm:$0xff] %v1961_v0 }
  0x20   : > { %255 = vst [vmem:[#allocation3 + $0x58] sm:$0xff] %v1961_v0 }
  0x21   : > { %256 = vst [vmem:[#allocation3 + $0x40] sm:$0xff] %v1961_v0 }
  0x22   : > { %257 = vst [vmem:[#allocation3 + $0xc8] sm:$0xff] %v1961_v0 }
  0x23   : > { %258 = vst [vmem:[#allocation3 + $0xe0] sm:$0xff] %v1961_v0 }
  0x24   : > { %259 = vst [vmem:[#allocation3 + $0x90] sm:$0xff] %v1961_v0 }
  0x25   : > { %260 = vst [vmem:[#allocation3 + $0x70] sm:$0xff] %v1961_v0 }
  0x26   : > { %261 = vst [vmem:[#allocation3 + $0xc0] sm:$0xff] %v1961_v0 }
  0x27   : > { %262 = vst [vmem:[#allocation3 + $0xa8] sm:$0xff] %v1961_v0 }
  0x28   : > { %263 = vst [vmem:[#allocation3 + $0xd0] sm:$0xff] %v1961_v0 }
  0x29   : > { %264 = vst [vmem:[#allocation3 + $0x10] sm:$0xff] %v1961_v0 }
  0x2a   : > { %265 = vst [vmem:[#allocation3 + $0x28] sm:$0xff] %v1961_v0 }
  0x2b   : > { %266 = vst [vmem:[#allocation3 + $0xa0] sm:$0xff] %v1961_v0 }
  0x2c   : > { %267 = vst [vmem:[#allocation3 + $0xf8] sm:$0xff] %v1961_v0 }
  0x2d   : > { %268 = vst [vmem:[#allocation3 + $0x20] sm:$0xff] %v1961_v0 }
  0x2e   : > { %269 = vst [vmem:[#allocation3 + $0x98] sm:$0xff] %v1961_v0 }
  0x2f   : > { %270 = vst [vmem:[#allocation4 + $0x80] sm:$0xff] %v1961_v0 }
  0x30   : > { %271 = vst [vmem:[#allocation4 + $0xc8] sm:$0xff] %v1961_v0 }
  0x31   : > { %272 = vst [vmem:[#allocation4 + $0xe8] sm:$0xff] %v1961_v0 }
  0x32   : > { %273 = vst [vmem:[#allocation4 + $0x78] sm:$0xff] %v1961_v0 }
  0x33   : > { %274 = vst [vmem:[#allocation4 + $0x8] sm:$0xff] %v1961_v0 }
  0x34   : > { %275 = vst [vmem:[#allocation4 + $0x90] sm:$0xff] %v1961_v0 }
  0x35   : > { %276 = vst [vmem:[#allocation4 + $0x58] sm:$0xff] %v1961_v0 }
  0x36   : > { %277 = vst [vmem:[#allocation4 + $0xa8] sm:$0xff] %v1961_v0 }
  0x37   : > { %278 = vst [vmem:[#allocation4 + $0xd0] sm:$0xff] %v1961_v0 }
  0x38   : > { %279 = vst [vmem:[#allocation4 + $0xb0] sm:$0xff] %v1961_v0 }
  0x39   : > { %280 = vst [vmem:[#allocation4 + $0x38] sm:$0xff] %v1961_v0 }
  0x3a   : > { %281 = vst [vmem:[#allocation4 + $0x40] sm:$0xff] %v1961_v0 }
  0x3b   : > { %282 = vst [vmem:[#allocation4 + $0xe0] sm:$0xff] %v1961_v0 }
  0x3c   : > { %283 = vst [vmem:[#allocation4 + $0x60] sm:$0xff] %v1961_v0 }
  0x3d   : > { %284 = vst [vmem:[#allocation4 + $0x18] sm:$0xff] %v1961_v0 }
  0x3e   : > { %285 = vst [vmem:[#allocation4 + $0x68] sm:$0xff] %v1961_v0 }
  0x3f   : > { %286 = vst [vmem:[#allocation4 + $0x10] sm:$0xff] %v1961_v0 }
  0x40   : > { %287 = vst [vmem:[#allocation4 + $0x70] sm:$0xff] %v1961_v0 }
  0x41   : > { %288 = vst [vmem:[#allocation4 + $0x50] sm:$0xff] %v1961_v0 }
  0x42   : > { %289 = vst [vmem:[#allocation4 + $0xa0] sm:$0xff] %v1961_v0 }
  0x43   : > { %290 = vst [vmem:[#allocation4 + $0xd8] sm:$0xff] %v1961_v0 }
  0x44   : > { %291 = vst [vmem:[#allocation4 + $0x30] sm:$0xff] %v1961_v0 }
  0x45   : > { %292 = vst [vmem:[#allocation4 + $0x20] sm:$0xff] %v1961_v0 }
  0x46   : > { %293 = vst [vmem:[#allocation4 + $0xf0] sm:$0xff] %v1961_v0 }
  0x47   : > { %294 = vst [vmem:[#allocation4 + $0x88] sm:$0xff] %v1961_v0 }
  0x48   : > { %295 = vst [vmem:[#allocation4 + $0x48] sm:$0xff] %v1961_v0 }
  0x49   : > { %296 = vst [vmem:[#allocation4 + $0xf8] sm:$0xff] %v1961_v0 }
  0x4a   : > { %297 = vst [vmem:[#allocation4 + $0xc0] sm:$0xff] %v1961_v0 }
  0x4b   : > { %298 = vst [vmem:[#allocation4 + $0xb8] sm:$0xff] %v1961_v0 }
  0x4c   : > { %299 = vst [vmem:[#allocation4] sm:$0xff] %v1961_v0 }
  0x4d   : > { %300 = vst [vmem:[#allocation4 + $0x28] sm:$0xff] %v1961_v0 }
  0x4e   : > { %301 = vst [vmem:[#allocation4 + $0x98] sm:$0xff] %v1961_v0 }
  0x4f PF: > { %v1805_v1 = vld [vmem:[%s2315_s1 + $0x38] sm:$0xff]  ;;  %v1806_v2 = vld [vmem:[%s2315_s1 + $0x40] sm:$0xff]  ;;  %v1555_v4 = vld [vmem:[%s2021_s29 + $0x8] sm:$0xf0]  ;;  %vm617_vm0 = vcmask 130048  }
  0x50   : > { %v1766_v3 = vld [vmem:[%s2021_s29 + $0x4] sm:$0xf]  ;;  %666 = vmatpush.bf16.msra.mxu0 %v1805_v1  ;;  %1870 = vmatpush.bf16.msra.mxu2 %v1805_v1  ;;  %v1804_v6 = vld [vmem:[%s2315_s1 + $0x30] sm:$0xff]  ;;  %v1803_v7 = vld [vmem:[%s2315_s1 + $0x28] sm:$0xff] }
  0x51   : > { %v1558_v5 = vor.u32 %v1766_v3, %v1555_v4  ;;  %762 = vmatpush.bf16.msra.mxu1 %v1806_v2  ;;  %1878 = vmatpush.bf16.msra.mxu3 %v1806_v2  ;;  %v1784_v8 = vld [vmem:[%s2021_s29 + $0x94] sm:$0xf]  ;;  %v1627_v9 = vld [vmem:[%s2021_s29 + $0x98] sm:$0xf0]  ;;  %v1802_v11 = vld [vmem:[%s2315_s1 + $0x20] sm:$0xff] }
  0x52   : > { %v1630_v10 = vor.u32 %v1784_v8, %v1627_v9  ;;  %v1801_v12 = vld [vmem:[%s2315_s1 + $0x18] sm:$0xff]  ;;  %v1768_v13 = vld [vmem:[%s2021_s29 + $0x14] sm:$0xf]  ;;  %v1799_v17 = vld [vmem:[%s2315_s1 + $0x8] sm:$0xff] }
  0x53   : > { %v1563_v14 = vld [vmem:[%s2021_s29 + $0x18] sm:$0xf0]  ;;  %v1800_v16 = vld [vmem:[%s2315_s1 + $0x10] sm:$0xff]  ;;  %v1786_v18 = vld [vmem:[%s2021_s29 + $0xa4] sm:$0xf] }
  0x54   : > { %1715 = vmatmul.msk.bf16.vlgmr.msra.gmra.mxu1 %vm617_vm0, %v1558_v5  ;;  %667 = vmatpush.bf16.msra.mxu0 %v1804_v6  ;;  %v1566_v15 = vor.u32 %v1768_v13, %v1563_v14  ;;  %v1635_v19 = vld [vmem:[%s2021_s29 + $0xa8] sm:$0xf0]  ;;  %v1798_v21 = vld [vmem:[%s2315_s1] sm:$0xff]  ;;  %v1767_v23 = vld [vmem:[%s2021_s29 + $0x4] sm:$0xf0] }
  0x55   : > { %1871 = vmatpush.bf16.msra.mxu2 %v1804_v6  ;;  %1724 = vmatmul.msk.bf16.vlgmr.msra.gmra.mxu3 %vm617_vm0, %v1630_v10  ;;  %v1638_v20 = vor.u32 %v1786_v18, %v1635_v19  ;;  %v1553_v22 = vld [vmem:[%s2021_s29] sm:$0xf]  ;;  %v1783_v25 = vld [vmem:[%s2021_s29 + $0x84] sm:$0xf0]  ;;  %v1770_v28 = vld [vmem:[%s2021_s29 + $0x24] sm:$0xf] }
  0x56   : > { %v1617_v24 = vld [vmem:[%s2021_s29 + $0x80] sm:$0xf]  ;;  %v1554_v26 = vor.u32 %v1767_v23, %v1553_v22  ;;  %v1571_v29 = vld [vmem:[%s2021_s29 + $0x28] sm:$0xf0]  ;;  %v1788_v31 = vld [vmem:[%s2021_s29 + $0xb4] sm:$0xf] }
  0x57   : > { %v1618_v27 = vor.u32 %v1783_v25, %v1617_v24  ;;  %v1574_v30 = vor.u32 %v1770_v28, %v1571_v29  ;;  %v1643_v32 = vld [vmem:[%s2021_s29 + $0xb8] sm:$0xf0]  ;;  %v1561_v34 = vld [vmem:[%s2021_s29 + $0x10] sm:$0xf]  ;;  %v1769_v35 = vld [vmem:[%s2021_s29 + $0x14] sm:$0xf0] }
  0x58   : > { %668 = vmatpush.bf16.msra.mxu0 %v1803_v7  ;;  %v1646_v33 = vor.u32 %v1788_v31, %v1643_v32  ;;  %v1625_v36 = vld [vmem:[%s2021_s29 + $0x90] sm:$0xf]  ;;  %v1785_v37 = vld [vmem:[%s2021_s29 + $0x94] sm:$0xf0]  ;;  %v1562_v38 = vor.u32 %v1769_v35, %v1561_v34  ;;  %v1772_v40 = vld [vmem:[%s2021_s29 + $0x34] sm:$0xf] }
  0x59   : > { %1872 = vmatpush.bf16.msra.mxu2 %v1803_v7  ;;  %v1626_v39 = vor.u32 %v1785_v37, %v1625_v36  ;;  %v1579_v41 = vld [vmem:[%s2021_s29 + $0x38] sm:$0xf0]  ;;  %v1790_v43 = vld [vmem:[%s2021_s29 + $0xc4] sm:$0xf]  ;;  %v1651_v44 = vld [vmem:[%s2021_s29 + $0xc8] sm:$0xf0] }
  0x5a   : > { %v1582_v42 = vor.u32 %v1772_v40, %v1579_v41  ;;  %v1654_v45 = vor.u32 %v1790_v43, %v1651_v44  ;;  %v1569_v46 = vld [vmem:[%s2021_s29 + $0x20] sm:$0xf]  ;;  %v1771_v47 = vld [vmem:[%s2021_s29 + $0x24] sm:$0xf0]  ;;  %v1774_v52 = vld [vmem:[%s2021_s29 + $0x44] sm:$0xf] }
  0x5b   : > { %v1633_v48 = vld [vmem:[%s2021_s29 + $0xa0] sm:$0xf]  ;;  %v1787_v49 = vld [vmem:[%s2021_s29 + $0xa4] sm:$0xf0]  ;;  %v1570_v50 = vor.u32 %v1771_v47, %v1569_v46  ;;  %v1587_v53 = vld [vmem:[%s2021_s29 + $0x48] sm:$0xf0] }
  0x5c   : > { %669 = vmatpush.bf16.msra.mxu0 %v1802_v11  ;;  %v1634_v51 = vor.u32 %v1787_v49, %v1633_v48  ;;  %v1590_v54 = vor.u32 %v1774_v52, %v1587_v53  ;;  %v1792_v55 = vld [vmem:[%s2021_s29 + $0xd4] sm:$0xf]  ;;  %v1659_v56 = vld [vmem:[%s2021_s29 + $0xd8] sm:$0xf0]  ;;  %v1577_v58 = vld [vmem:[%s2021_s29 + $0x30] sm:$0xf] }
  0x5d   : > { %1873 = vmatpush.bf16.msra.mxu2 %v1802_v11  ;;  %v1662_v57 = vor.u32 %v1792_v55, %v1659_v56  ;;  %v1773_v59 = vld [vmem:[%s2021_s29 + $0x34] sm:$0xf0]  ;;  %v1641_v60 = vld [vmem:[%s2021_s29 + $0xb0] sm:$0xf]  ;;  %v1776_v0 = vld [vmem:[%s2021_s29 + $0x54] sm:$0xf] }
  0x5e   : > { %v1789_v61 = vld [vmem:[%s2021_s29 + $0xb4] sm:$0xf0]  ;;  %v1578_v62 = vor.u32 %v1773_v59, %v1577_v58  ;;  %v1595_v1 = vld [vmem:[%s2021_s29 + $0x58] sm:$0xf0]  ;;  %v1794_v3 = vld [vmem:[%s2021_s29 + $0xe4] sm:$0xf] }
  0x5f   : > { %v1642_v63 = vor.u32 %v1789_v61, %v1641_v60  ;;  %v1598_v2 = vor.u32 %v1776_v0, %v1595_v1  ;;  %v1667_v4 = vld [vmem:[%s2021_s29 + $0xe8] sm:$0xf0]  ;;  %v1585_v6 = vld [vmem:[%s2021_s29 + $0x40] sm:$0xf]  ;;  %v1775_v7 = vld [vmem:[%s2021_s29 + $0x44] sm:$0xf0] }
  0x60   : > { %670 = vmatpush.bf16.msra.mxu0 %v1801_v12  ;;  %v1670_v5 = vor.u32 %v1794_v3, %v1667_v4  ;;  %v1649_v8 = vld [vmem:[%s2021_s29 + $0xc0] sm:$0xf]  ;;  %v1791_v9 = vld [vmem:[%s2021_s29 + $0xc4] sm:$0xf0]  ;;  %v1586_v10 = vor.u32 %v1775_v7, %v1585_v6  ;;  %v1603_v13 = vld [vmem:[%s2021_s29 + $0x68] sm:$0xf0] }
  0x61   : > { %1874 = vmatpush.bf16.msra.mxu2 %v1801_v12  ;;  %v1650_v11 = vor.u32 %v1791_v9, %v1649_v8  ;;  %v1778_v12 = vld [vmem:[%s2021_s29 + $0x64] sm:$0xf]  ;;  %v1593_v18 = vld [vmem:[%s2021_s29 + $0x50] sm:$0xf]  ;;  %v1777_v19 = vld [vmem:[%s2021_s29 + $0x54] sm:$0xf0] }
  0x62   : > { %v1606_v14 = vor.u32 %v1778_v12, %v1603_v13  ;;  %v1594_v22 = vor.u32 %v1777_v19, %v1593_v18  ;;  %v1780_v24 = vld [vmem:[%s2021_s29 + $0x74] sm:$0xf]  ;;  %v1611_v25 = vld [vmem:[%s2021_s29 + $0x78] sm:$0xf0]  ;;  %v1779_v28 = vld [vmem:[%s2021_s29 + $0x64] sm:$0xf0] }
  0x63   : > { %v1665_v29 = vld [vmem:[%s2021_s29 + $0xe0] sm:$0xf]  ;;  %v1619_v34 = vld [vmem:[%s2021_s29 + $0x88] sm:$0xf0]  ;;  %v1609_v37 = vld [vmem:[%s2021_s29 + $0x70] sm:$0xf] }
  0x64   : > { %1716 = vmatmul.msk.bf16.gmra.mxu1 %vm617_vm0, %v1566_v15  ;;  %671 = vmatpush.bf16.msra.mxu0 %v1800_v16  ;;  %v1796_v15 = vld [vmem:[%s2021_s29 + $0xf4] sm:$0xf]  ;;  %v1673_v40 = vld [vmem:[%s2021_s29 + $0xf0] sm:$0xf]  ;;  %v1797_v41 = vld [vmem:[%s2021_s29 + $0xf4] sm:$0xf0] }
  0x65   : > { %1875 = vmatpush.bf16.msra.mxu2 %v1800_v16  ;;  %1725 = vmatmul.msk.bf16.gmra.mxu3 %vm617_vm0, %v1638_v20  ;;  %v1675_v16 = vld [vmem:[%s2021_s29 + $0xf8] sm:$0xf0]  ;;  %v1657_v20 = vld [vmem:[%s2021_s29 + $0xd0] sm:$0xf]  ;;  %v1674_v43 = vor.u32 %v1797_v41, %v1673_v40  ;;  %v1039_v48 = vld [vmem:[#allocation4 + $0x80] sm:$0xff]  ;;  %v1962_v61 = vmov 0.0  }
  0x66   : > { %v1071_v52 = vmul.f32 0.97, %v1039_v48  ;;  %v1041_v8 = vld [vmem:[#allocation4 + $0xe8] sm:$0xff] }
  0x67   : > { %v1043_v48 = vld [vmem:[#allocation4 + $0x8] sm:$0xff] }
  0x68   : > { %672 = vmatpush.bf16.msra.mxu0 %v1799_v17 }
  0x69   : > { %1876 = vmatpush.bf16.msra.mxu2 %v1799_v17  ;;  %v1678_v17 = vor.u32 %v1796_v15, %v1675_v16  ;;  %v1073_v16 = vmul.f32 0.97, %v1041_v8  ;;  %v916_v8 = vld [vmem:[#allocation3 + $0x68] sm:$0xff] }
  0x6c   : > { %673 = vmatpush.bf16.msra.mxu0 %v1798_v21 }
  0x6d   : > { %1877 = vmatpush.bf16.msra.mxu2 %v1798_v21  ;;  %v1793_v21 = vld [vmem:[%s2021_s29 + $0xd4] sm:$0xf0] }
  0x6e   : > { %v1658_v23 = vor.u32 %v1793_v21, %v1657_v20  ;;  %v929_v20 = vld [vmem:[#allocation3 + $0x40] sm:$0xff]  ;;  %v914_v21 = vld [vmem:[#allocation3 + $0x18] sm:$0xff] }
  0x6f   : > { %674 = vmatmul.bf16.vlgmr.msra.gmra.mxu0 %v1554_v26  ;;  %v1614_v26 = vor.u32 %v1780_v24, %v1611_v25  ;;  %v1057_v24 = vld [vmem:[#allocation4 + $0x50] sm:$0xff]  ;;  %v961_v25 = vmul.f32 0.75, %v929_v20 }
  0x70   : > { %714 = vmatmul.bf16.vlgmr.msra.gmra.mxu2 %v1618_v27  ;;  %v1601_v27 = vld [vmem:[%s2021_s29 + $0x60] sm:$0xf] }
  0x71   : > { %v1602_v31 = vor.u32 %v1779_v28, %v1601_v27  ;;  %v946_v28 = vmul.f32 0.75, %v914_v21 }
  0x74   : > { %1717 = vmatmul.msk.bf16.gmra.mxu1 %vm617_vm0, %v1574_v30  ;;  %v1795_v30 = vld [vmem:[%s2021_s29 + $0xe4] sm:$0xf0] }
  0x75   : > { %1726 = vmatmul.msk.bf16.gmra.mxu3 %vm617_vm0, %v1646_v33  ;;  %v1666_v32 = vor.u32 %v1795_v30, %v1665_v29  ;;  %v1782_v33 = vld [vmem:[%s2021_s29 + $0x84] sm:$0xf] }
  0x76   : > { %v1622_v35 = vor.u32 %v1782_v33, %v1619_v34 }
  0x7f   : > { %679 = vmatmul.bf16.gmra.mxu0 %v1562_v38  ;;  %v1781_v38 = vld [vmem:[%s2021_s29 + $0x74] sm:$0xf0] }
  0x80   : > { %719 = vmatmul.bf16.gmra.mxu2 %v1626_v39 }
  0x84   : > { %1718 = vmatmul.msk.bf16.gmra.mxu1 %vm617_vm0, %v1582_v42  ;;  %v1610_v42 = vor.u32 %v1781_v38, %v1609_v37 }
  0x85   : > { %1727 = vmatmul.msk.bf16.gmra.mxu3 %vm617_vm0, %v1654_v45  ;;  %v911_v45 = vld [vmem:[#allocation3 + $0xb0] sm:$0xff] }
  0x86   : > { %v943_v49 = vmul.f32 0.75, %v911_v45  ;;  %v1058_v45 = vld [vmem:[#allocation4 + $0xa0] sm:$0xff] }
  0x8f   : > { %684 = vmatmul.bf16.gmra.mxu0 %v1570_v50 }
  0x90   : > { %724 = vmatmul.bf16.gmra.mxu2 %v1634_v51 }
  0x94   : > { %1719 = vmatmul.msk.bf16.gmra.mxu1 %vm617_vm0, %v1590_v54  ;;  %v912_v54 = vld [vmem:[#allocation3] sm:$0xff] }
  0x95   : > { %1728 = vmatmul.msk.bf16.gmra.mxu3 %vm617_vm0, %v1662_v57  ;;  %v1040_v57 = vld [vmem:[#allocation4 + $0xc8] sm:$0xff]  ;;  %v944_v59 = vmul.f32 0.75, %v912_v54  ;;  %v1090_v54 = vmul.f32 0.97, %v1058_v45 }
  0x9f   : > { %689 = vmatmul.bf16.gmra.mxu0 %v1578_v62 }
  0xa0   : > { %729 = vmatmul.bf16.gmra.mxu2 %v1642_v63 }
  0xa4   : > { %1720 = vmatmul.msk.bf16.gmra.mxu1 %vm617_vm0, %v1598_v2  ;;  %v1072_v2 = vmul.f32 0.97, %v1040_v57 }
  0xa5   : > { %1729 = vmatmul.msk.bf16.gmra.mxu3 %vm617_vm0, %v1670_v5  ;;  %v913_v5 = vld [vmem:[#allocation3 + $0xd8] sm:$0xff] }
  0xaf   : > { %694 = vmatmul.bf16.gmra.mxu0 %v1586_v10  ;;  %v945_v10 = vmul.f32 0.75, %v913_v5 }
  0xb0   : > { %734 = vmatmul.bf16.gmra.mxu2 %v1650_v11 }
  0xb4   : > { %1721 = vmatmul.msk.bf16.gmra.mxu1 %vm617_vm0, %v1606_v14 }
  0xb5   : > { %1730 = vmatmul.msk.bf16.gmra.mxu3 %vm617_vm0, %v1678_v17 }
  0xbf   : > { %699 = vmatmul.bf16.gmra.mxu0 %v1594_v22 }
  0xc0   : > { %739 = vmatmul.bf16.gmra.mxu2 %v1658_v23 }
  0xc4   : > { %1722 = vmatmul.msk.bf16.gmra.mxu1 %vm617_vm0, %v1614_v26  ;;  %v1042_v26 = vld [vmem:[#allocation4 + $0x78] sm:$0xff] }
  0xcf   : > { %704 = vmatmul.bf16.gmra.mxu0 %v1602_v31  ;;  %v1089_v31 = vmul.f32 0.97, %v1057_v24 }
  0xd0   : > { %744 = vmatmul.bf16.gmra.mxu2 %v1666_v32 }
  0xd1   : > { %v764_v36 = vpop.f32.mrf.mxu1 }
  0xd4   : > { %1723 = vmatmul.msk.bf16.gmra.mxu1 %vm617_vm0, %v1622_v35  ;;  %v1074_v35 = vmul.f32 0.97, %v1042_v26 }
  0xd8   : > { %v809_v47 = vpop.f32.mrf.mxu3 }
  0xd9   : > { %v766_v39 = vpop.f32.mrf.mxu1 }
  0xdf   : > { %709 = vmatmul.bf16.gmra.mxu0 %v1610_v42  ;;  %v915_v42 = vld [vmem:[#allocation3 + $0x50] sm:$0xff] }
  0xe0   : > { %749 = vmatmul.bf16.gmra.mxu2 %v1674_v43  ;;  %v2198_v60 = vpop.f32.mrf.mxu3 }
  0xe1   : > { %v769_v44 = vpop.f32.mrf.mxu1 }
  0xe8   : > { %v2206_v17 = vpop.f32.mrf.mxu3 }
  0xe9   : > { %v771_v46 = vpop.f32.mrf.mxu1 }
  0xec   : > { %v675_v50 = vpop.f32.mrf.mxu0 }
  0xed   : > { %v765_v51 = vadd.f32 %v764_v36, %v675_v50  ;;  %v947_v50 = vmul.f32 0.75, %v915_v42 }
  0xef   : > { %v1007_v53 = vadd.f32 %v943_v49, %v765_v51 }
  0xf0   : > { %v2212_v40 = vpop.f32.mrf.mxu3 }
  0xf1   : > { %v1103_v55 = vadd.f32 %v1071_v52, %v1007_v53  ;;  %1231 = vst [vmem:[#allocation3 + $0xb0] sm:$0xff] %v1007_v53  ;;  %v2194_v56 = vpop.f32.mrf.mxu1 }
  0xf3   : > { %vm1135_vm1 = vcmp.ge.f32.partialorder %v1103_v55, 1.25  ;;  %v2196_v58 = vpop.f32.mrf.mxu2 }
  0xf4   : > { %v1731_v62 = vsel %vm1135_vm1, 1.0, %v1962_v61  ;;  %v677_v63 = vpop.f32.mrf.mxu0 }
  0xf5   : > { %v1263_v0 = vsub.f32 1.0, %v1731_v62  ;;  %v767_v1 = vadd.f32 %v766_v39, %v677_v63  ;;  %v930_v39 = vld [vmem:[#allocation3 + $0xc8] sm:$0xff]  ;;  %v1075_v63 = vmul.f32 0.97, %v1043_v48 }
  0xf7   : > { %v1295_v3 = vmul.f32 %v1263_v0, %v1103_v55  ;;  %v1008_v4 = vadd.f32 %v944_v59, %v767_v1 }
  0xf9   : > { %1327 = vst [vmem:[#allocation4 + $0x80] sm:$0xff] %v1295_v3  ;;  %v1104_v6 = vadd.f32 %v1072_v2, %v1008_v4  ;;  %v2201_v7 = vpop.f32.mrf.mxu1 }
  0xfa   : > { %1232 = vst [vmem:[#allocation3] sm:$0xff] %v1008_v4  ;;  %v931_v4 = vld [vmem:[#allocation3 + $0xe0] sm:$0xff] }
  0xfb   : > { %vm1136_vm2 = vcmp.ge.f32.partialorder %v1104_v6, 1.25  ;;  %v2203_v9 = vpop.f32.mrf.mxu2 }
  0xfc   : > { %v1732_v11 = vsel %vm1136_vm2, 1.0, %v1962_v61  ;;  %v680_v12 = vpop.f32.mrf.mxu0 }
  0xfd   : > { %v1264_v13 = vsub.f32 1.0, %v1732_v11  ;;  %v1808_v14 = vpack.c.bf16 %v1732_v11, %v1731_v62  ;;  %v770_v15 = vadd.f32 %v769_v44, %v680_v12  ;;  %v2223_v11 = vpop.f32.mrf.mxu3  ;;  %v1044_v12 = vld [vmem:[#allocation4 + $0x90] sm:$0xff] }
  0xfe   : > { %v1076_v26 = vmul.f32 0.97, %v1044_v12 }
  0xff   : > { %v1296_v18 = vmul.f32 %v1264_v13, %v1104_v6  ;;  %1809 = vst [vmem:[%s2016_s26] sm:$0xff] %v1808_v14   ;;  %v1009_v19 = vadd.f32 %v945_v10, %v770_v15  ;;  %v1059_v6 = vld [vmem:[#allocation4 + $0xd8] sm:$0xff] }
 0x100   : > { %v1091_v15 = vmul.f32 0.97, %v1059_v6 }
 0x101   : > { %1328 = vst [vmem:[#allocation4 + $0xc8] sm:$0xff] %v1296_v18  ;;  %v1105_v22 = vadd.f32 %v1073_v16, %v1009_v19  ;;  %v2209_v23 = vpop.f32.mrf.mxu1  ;;  %v948_v16 = vmul.f32 0.75, %v916_v8 }
 0x102   : > { %1233 = vst [vmem:[#allocation3 + $0xd8] sm:$0xff] %v1009_v19 }
 0x103   : > { %vm1137_vm3 = vcmp.ge.f32.partialorder %v1105_v22, 1.25  ;;  %v720_v27 = vpop.f32.mrf.mxu2 }
 0x104   : > { %v1733_v29 = vsel %vm1137_vm3, 1.0, %v1962_v61  ;;  %v810_v30 = vadd.f32 %v809_v47, %v720_v27  ;;  %v682_v32 = vpop.f32.mrf.mxu0  ;;  %v962_v47 = vmul.f32 0.75, %v930_v39 }
 0x105   : > { %v1265_v33 = vsub.f32 1.0, %v1733_v29  ;;  %v772_v34 = vadd.f32 %v771_v46, %v682_v32 }
 0x106   : > { %v1025_v36 = vadd.f32 %v961_v25, %v810_v30 }
 0x107   : > { %v1297_v37 = vmul.f32 %v1265_v33, %v1105_v22  ;;  %v1010_v38 = vadd.f32 %v946_v28, %v772_v34  ;;  %v917_v33 = vld [vmem:[#allocation3 + $0x30] sm:$0xff] }
 0x108   : > { %v1121_v41 = vadd.f32 %v1089_v31, %v1025_v36  ;;  %1249 = vst [vmem:[#allocation3 + $0x40] sm:$0xff] %v1025_v36  ;;  %v932_v31 = vld [vmem:[#allocation3 + $0x90] sm:$0xff]  ;;  %v949_v39 = vmul.f32 0.75, %v917_v33 }
 0x109   : > { %1329 = vst [vmem:[#allocation4 + $0xe8] sm:$0xff] %v1297_v37  ;;  %v1106_v43 = vadd.f32 %v1074_v35, %v1010_v38  ;;  %v2214_v44 = vpop.f32.mrf.mxu1  ;;  %v1060_v36 = vld [vmem:[#allocation4 + $0x30] sm:$0xff]  ;;  %v1045_v37 = vld [vmem:[#allocation4 + $0x58] sm:$0xff] }
 0x10a   : > { %vm1153_vm4 = vcmp.ge.f32.partialorder %v1121_v41, 1.25  ;;  %1234 = vst [vmem:[#allocation3 + $0x18] sm:$0xff] %v1010_v38 }
 0x10b   : > { %v1749_v46 = vsel %vm1153_vm4, 1.0, %v1962_v61  ;;  %vm1138_vm5 = vcmp.ge.f32.partialorder %v1106_v43, 1.25  ;;  %v722_v49 = vpop.f32.mrf.mxu2 }
 0x10c   : > { %v1281_v51 = vsub.f32 1.0, %v1749_v46  ;;  %v1734_v52 = vsel %vm1138_vm5, 1.0, %v1962_v61  ;;  %v812_v53 = vadd.f32 %v2198_v60, %v722_v49  ;;  %v685_v55 = vpop.f32.mrf.mxu0 }
 0x10d   : > { %v1266_v57 = vsub.f32 1.0, %v1734_v52  ;;  %v1811_v59 = vpack.c.bf16 %v1734_v52, %v1733_v29  ;;  %v775_v62 = vadd.f32 %v2194_v56, %v685_v55  ;;  %v963_v56 = vmul.f32 0.75, %v931_v4 }
 0x10e   : > { %v1313_v0 = vmul.f32 %v1281_v51, %v1121_v41  ;;  %v1026_v1 = vadd.f32 %v962_v47, %v812_v53  ;;  %v2233_v41 = vpop.f32.mrf.mxu3  ;;  %v1092_v47 = vmul.f32 0.97, %v1060_v36  ;;  %v1077_v51 = vmul.f32 0.97, %v1045_v37 }
 0x10f   : > { %v1298_v2 = vmul.f32 %v1266_v57, %v1106_v43  ;;  %1855 = vst [vmem:[%s2016_s26 + $0x8] sm:$0xff] %v1811_v59   ;;  %v1011_v3 = vadd.f32 %v947_v50, %v775_v62  ;;  %v933_v57 = vld [vmem:[#allocation3 + $0x70] sm:$0xff]  ;;  %v1061_v62 = vld [vmem:[#allocation4 + $0x20] sm:$0xff] }
 0x110   : > { %1345 = vst [vmem:[#allocation4 + $0x50] sm:$0xff] %v1313_v0  ;;  %v1122_v5 = vadd.f32 %v1090_v54, %v1026_v1  ;;  %v1093_v4 = vmul.f32 0.97, %v1061_v62 }
 0x111   : > { %1330 = vst [vmem:[#allocation4 + $0x78] sm:$0xff] %v1298_v2  ;;  %v1107_v10 = vadd.f32 %v1075_v63, %v1011_v3  ;;  %v2221_v60 = vpop.f32.mrf.mxu1  ;;  %v918_v63 = vld [vmem:[#allocation3 + $0x48] sm:$0xff] }
 0x112   : > { %vm1154_vm6 = vcmp.ge.f32.partialorder %v1122_v5, 1.25  ;;  %1250 = vst [vmem:[#allocation3 + $0xc8] sm:$0xff] %v1026_v1  ;;  %v965_v1 = vmul.f32 0.75, %v933_v57  ;;  %v1046_v2 = vld [vmem:[#allocation4 + $0xa8] sm:$0xff] }
 0x113   : > { %v1750_v13 = vsel %vm1154_vm6, 1.0, %v1962_v61  ;;  %vm1139_vm7 = vcmp.ge.f32.partialorder %v1107_v10, 1.25  ;;  %1235 = vst [vmem:[#allocation3 + $0x50] sm:$0xff] %v1011_v3  ;;  %v725_v14 = vpop.f32.mrf.mxu2 }
 0x114   : > { %v1282_v18 = vsub.f32 1.0, %v1750_v13  ;;  %v1835_v19 = vpack.c.bf16 %v1750_v13, %v1749_v46  ;;  %v1735_v20 = vsel %vm1139_vm7, 1.0, %v1962_v61  ;;  %v815_v21 = vadd.f32 %v2206_v17, %v725_v14  ;;  %v687_v22 = vpop.f32.mrf.mxu0 }
 0x115   : > { %v1267_v24 = vsub.f32 1.0, %v1735_v20  ;;  %v777_v25 = vadd.f32 %v2201_v7, %v687_v22  ;;  %v964_v17 = vmul.f32 0.75, %v932_v31  ;;  %v934_v22 = vld [vmem:[#allocation3 + $0xc0] sm:$0xff] }
 0x116   : > { %v1314_v27 = vmul.f32 %v1282_v18, %v1122_v5  ;;  %1863 = vst [vmem:[%s2016_s26 + $0x48] sm:$0xff] %v1835_v19   ;;  %v1027_v28 = vadd.f32 %v963_v56, %v815_v21  ;;  %v950_v5 = vmul.f32 0.75, %v918_v63 }
 0x117   : > { %v1299_v29 = vmul.f32 %v1267_v24, %v1107_v10  ;;  %v1012_v30 = vadd.f32 %v948_v16, %v777_v25  ;;  %v824_v16 = vpop.f32.mrf.mxu3  ;;  %v919_v25 = vld [vmem:[#allocation3 + $0x80] sm:$0xff] }
 0x118   : > { %1346 = vst [vmem:[#allocation4 + $0xa0] sm:$0xff] %v1314_v27  ;;  %v1123_v32 = vadd.f32 %v1091_v15, %v1027_v28  ;;  %v1078_v15 = vmul.f32 0.97, %v1046_v2  ;;  %v951_v31 = vmul.f32 0.75, %v919_v25 }
 0x119   : > { %1331 = vst [vmem:[#allocation4 + $0x8] sm:$0xff] %v1299_v29  ;;  %v1108_v34 = vadd.f32 %v1076_v26, %v1012_v30  ;;  %v2230_v35 = vpop.f32.mrf.mxu1 }
 0x11a   : > { %vm1155_vm8 = vcmp.ge.f32.partialorder %v1123_v32, 1.25  ;;  %1251 = vst [vmem:[#allocation3 + $0xe0] sm:$0xff] %v1027_v28  ;;  %v966_v28 = vmul.f32 0.75, %v934_v22 }
 0x11b   : > { %v1751_v7 = vsel %vm1155_vm8, 1.0, %v1962_v61  ;;  %vm1140_vm9 = vcmp.ge.f32.partialorder %v1108_v34, 1.25  ;;  %1236 = vst [vmem:[#allocation3 + $0x68] sm:$0xff] %v1012_v30  ;;  %v727_v38 = vpop.f32.mrf.mxu2 }
 0x11c   : > { %v1283_v42 = vsub.f32 1.0, %v1751_v7  ;;  %v1736_v43 = vsel %vm1140_vm9, 1.0, %v1962_v61  ;;  %v817_v45 = vadd.f32 %v2212_v40, %v727_v38  ;;  %v690_v48 = vpop.f32.mrf.mxu0 }
 0x11d   : > { %v1268_v46 = vsub.f32 1.0, %v1736_v43  ;;  %v1814_v49 = vpack.c.bf16 %v1736_v43, %v1735_v20  ;;  %v780_v50 = vadd.f32 %v2209_v23, %v690_v48  ;;  %v935_v48 = vld [vmem:[#allocation3 + $0xa8] sm:$0xff] }
 0x11e   : > { %v1315_v52 = vmul.f32 %v1283_v42, %v1123_v32  ;;  %v1028_v53 = vadd.f32 %v964_v17, %v817_v45 }
 0x11f   : > { %v1300_v54 = vmul.f32 %v1268_v46, %v1108_v34  ;;  %1856 = vst [vmem:[%s2016_s26 + $0x10] sm:$0xff] %v1814_v49   ;;  %v1013_v55 = vadd.f32 %v949_v39, %v780_v50  ;;  %v826_v46 = vpop.f32.mrf.mxu3  ;;  %v1063_v50 = vld [vmem:[#allocation4 + $0x88] sm:$0xff] }
 0x120   : > { %1347 = vst [vmem:[#allocation4 + $0xd8] sm:$0xff] %v1315_v52  ;;  %v1124_v59 = vadd.f32 %v1092_v47, %v1028_v53  ;;  %v1095_v57 = vmul.f32 0.97, %v1063_v50 }
 0x121   : > { %1332 = vst [vmem:[#allocation4 + $0x90] sm:$0xff] %v1300_v54  ;;  %v1109_v0 = vadd.f32 %v1077_v51, %v1013_v55  ;;  %v2239_v40 = vpop.f32.mrf.mxu1  ;;  %v920_v51 = vld [vmem:[#allocation3 + $0x88] sm:$0xff] }
 0x122   : > { %vm1156_vm10 = vcmp.ge.f32.partialorder %v1124_v59, 1.25  ;;  %1252 = vst [vmem:[#allocation3 + $0x90] sm:$0xff] %v1028_v53  ;;  %v967_v53 = vmul.f32 0.75, %v935_v48 }
 0x123   : > { %v1752_v23 = vsel %vm1156_vm10, 1.0, %v1962_v61  ;;  %vm1141_vm11 = vcmp.ge.f32.partialorder %v1109_v0, 1.25  ;;  %1237 = vst [vmem:[#allocation3 + $0x30] sm:$0xff] %v1013_v55  ;;  %v730_v3 = vpop.f32.mrf.mxu2 }
 0x124   : > { %v1284_v6 = vsub.f32 1.0, %v1752_v23  ;;  %v1838_v8 = vpack.c.bf16 %v1752_v23, %v1751_v7  ;;  %v1737_v10 = vsel %vm1141_vm11, 1.0, %v1962_v61  ;;  %v820_v56 = vadd.f32 %v2223_v11, %v730_v3  ;;  %v692_v12 = vpop.f32.mrf.mxu0  ;;  %v1062_v11 = vld [vmem:[#allocation4 + $0xf0] sm:$0xff] }
 0x125   : > { %v1269_v13 = vsub.f32 1.0, %v1737_v10  ;;  %v782_v14 = vadd.f32 %v2214_v44, %v692_v12  ;;  %v1047_v44 = vld [vmem:[#allocation4 + $0xd0] sm:$0xff]  ;;  %v1094_v36 = vmul.f32 0.97, %v1062_v11 }
 0x126   : > { %v1316_v18 = vmul.f32 %v1284_v6, %v1124_v59  ;;  %1864 = vst [vmem:[%s2016_s26 + $0x50] sm:$0xff] %v1838_v8   ;;  %v1029_v19 = vadd.f32 %v965_v1, %v820_v56  ;;  %v1079_v39 = vmul.f32 0.97, %v1047_v44  ;;  %v952_v59 = vmul.f32 0.75, %v920_v51  ;;  %v936_v56 = vld [vmem:[#allocation3 + $0xd0] sm:$0xff] }
 0x127   : > { %v1301_v20 = vmul.f32 %v1269_v13, %v1109_v0  ;;  %v1014_v21 = vadd.f32 %v950_v5, %v782_v14  ;;  %v921_v13 = vld [vmem:[#allocation3 + $0xe8] sm:$0xff] }
 0x128   : > { %1348 = vst [vmem:[#allocation4 + $0x30] sm:$0xff] %v1316_v18  ;;  %v1125_v24 = vadd.f32 %v1093_v4, %v1029_v19  ;;  %v1064_v18 = vld [vmem:[#allocation4 + $0x48] sm:$0xff]  ;;  %v953_v22 = vmul.f32 0.75, %v921_v13 }
 0x129   : > { %1333 = vst [vmem:[#allocation4 + $0x58] sm:$0xff] %v1301_v20  ;;  %v1110_v26 = vadd.f32 %v1078_v15, %v1014_v21  ;;  %v2246_v27 = vpop.f32.mrf.mxu1  ;;  %v1096_v11 = vmul.f32 0.97, %v1064_v18 }
 0x12a   : > { %vm1157_vm12 = vcmp.ge.f32.partialorder %v1125_v24, 1.25  ;;  %1253 = vst [vmem:[#allocation3 + $0x70] sm:$0xff] %v1029_v19  ;;  %v968_v19 = vmul.f32 0.75, %v936_v56 }
 0x12b   : > { %v1753_v29 = vsel %vm1157_vm12, 1.0, %v1962_v61  ;;  %vm1142_vm13 = vcmp.ge.f32.partialorder %v1110_v26, 1.25  ;;  %1238 = vst [vmem:[#allocation3 + $0x48] sm:$0xff] %v1014_v21  ;;  %v732_v30 = vpop.f32.mrf.mxu2 }
 0x12c   : > { %v1285_v32 = vsub.f32 1.0, %v1753_v29  ;;  %v1738_v33 = vsel %vm1142_vm13, 1.0, %v1962_v61  ;;  %v822_v34 = vadd.f32 %v2233_v41, %v732_v30  ;;  %v695_v17 = vpop.f32.mrf.mxu0 }
 0x12d   : > { %v1270_v37 = vsub.f32 1.0, %v1738_v33  ;;  %v1817_v7 = vpack.c.bf16 %v1738_v33, %v1737_v10  ;;  %v785_v38 = vadd.f32 %v2221_v60, %v695_v17  ;;  %v1048_v60 = vld [vmem:[#allocation4 + $0xb0] sm:$0xff] }
 0x12e   : > { %v1317_v42 = vmul.f32 %v1285_v32, %v1125_v24  ;;  %v1030_v43 = vadd.f32 %v966_v28, %v822_v34  ;;  %v1080_v4 = vmul.f32 0.97, %v1048_v60  ;;  %v937_v17 = vld [vmem:[#allocation3 + $0x10] sm:$0xff] }
 0x12f   : > { %v1302_v45 = vmul.f32 %v1270_v37, %v1110_v26  ;;  %1857 = vst [vmem:[%s2016_s26 + $0x18] sm:$0xff] %v1817_v7   ;;  %v1015_v47 = vadd.f32 %v951_v31, %v785_v38  ;;  %v1065_v7 = vld [vmem:[#allocation4 + $0xf8] sm:$0xff] }
 0x130   : > { %1349 = vst [vmem:[#allocation4 + $0x20] sm:$0xff] %v1317_v42  ;;  %v1126_v49 = vadd.f32 %v1094_v36, %v1030_v43  ;;  %v922_v38 = vld [vmem:[#allocation3 + $0xb8] sm:$0xff]  ;;  %v1097_v48 = vmul.f32 0.97, %v1065_v7  ;;  %v1052_v7 = vld [vmem:[#allocation4 + $0x60] sm:$0xff] }
 0x131   : > { %1334 = vst [vmem:[#allocation4 + $0xa8] sm:$0xff] %v1302_v45  ;;  %v1111_v41 = vadd.f32 %v1079_v39, %v1015_v47  ;;  %v2253_v52 = vpop.f32.mrf.mxu1  ;;  %v1050_v45 = vld [vmem:[#allocation4 + $0x40] sm:$0xff] }
 0x132   : > { %vm1158_vm14 = vcmp.ge.f32.partialorder %v1126_v49, 1.25  ;;  %1254 = vst [vmem:[#allocation3 + $0xc0] sm:$0xff] %v1030_v43  ;;  %v969_v43 = vmul.f32 0.75, %v937_v17 }
 0x133   : > { %v1754_v54 = vsel %vm1158_vm14, 1.0, %v1962_v61  ;;  %vm1143_vm15 = vcmp.ge.f32.partialorder %v1111_v41, 1.25  ;;  %1239 = vst [vmem:[#allocation3 + $0x80] sm:$0xff] %v1015_v47  ;;  %v735_v55 = vpop.f32.mrf.mxu2 }
 0x134   : > { %v1286_v62 = vsub.f32 1.0, %v1754_v54  ;;  %v1841_v63 = vpack.c.bf16 %v1754_v54, %v1753_v29  ;;  %v1739_v0 = vsel %vm1143_vm15, 1.0, %v1962_v61  ;;  %v825_v1 = vadd.f32 %v824_v16, %v735_v55  ;;  %v697_v2 = vpop.f32.mrf.mxu0  ;;  %v829_v16 = vpop.f32.mrf.mxu3 }
 0x135   : > { %v1271_v23 = vsub.f32 1.0, %v1739_v0  ;;  %v787_v3 = vadd.f32 %v2230_v35, %v697_v2  ;;  %v1049_v35 = vld [vmem:[#allocation4 + $0x38] sm:$0xff] }
 0x136   : > { %v1318_v5 = vmul.f32 %v1286_v62, %v1126_v49  ;;  %1865 = vst [vmem:[%s2016_s26 + $0x58] sm:$0xff] %v1841_v63   ;;  %v1031_v6 = vadd.f32 %v967_v53, %v825_v1  ;;  %v1081_v31 = vmul.f32 0.97, %v1049_v35  ;;  %v954_v49 = vmul.f32 0.75, %v922_v38  ;;  %v938_v1 = vld [vmem:[#allocation3 + $0x28] sm:$0xff] }
 0x137   : > { %v1303_v8 = vmul.f32 %v1271_v23, %v1111_v41  ;;  %v1016_v10 = vadd.f32 %v952_v59, %v787_v3  ;;  %v923_v23 = vld [vmem:[#allocation3 + $0x60] sm:$0xff] }
 0x138   : > { %1350 = vst [vmem:[#allocation4 + $0xf0] sm:$0xff] %v1318_v5  ;;  %v1127_v12 = vadd.f32 %v1095_v57, %v1031_v6  ;;  %v1082_v57 = vmul.f32 0.97, %v1050_v45  ;;  %v1066_v5 = vld [vmem:[#allocation4 + $0xc0] sm:$0xff]  ;;  %v955_v56 = vmul.f32 0.75, %v923_v23  ;;  %v925_v23 = vld [vmem:[#allocation3 + $0x8] sm:$0xff] }
 0x139   : > { %1335 = vst [vmem:[#allocation4 + $0xd0] sm:$0xff] %v1303_v8  ;;  %v1112_v14 = vadd.f32 %v1080_v4, %v1016_v10  ;;  %v2259_v15 = vpop.f32.mrf.mxu1  ;;  %v1051_v8 = vld [vmem:[#allocation4 + $0xe0] sm:$0xff]  ;;  %v1098_v18 = vmul.f32 0.97, %v1066_v5 }
 0x13a   : > { %vm1159_vm0 = vcmp.ge.f32.partialorder %v1127_v12, 1.25  ;;  %1255 = vst [vmem:[#allocation3 + $0xa8] sm:$0xff] %v1031_v6  ;;  %v970_v6 = vmul.f32 0.75, %v938_v1 }
 0x13b   : > { %v1755_v20 = vsel %vm1159_vm0, 1.0, %v1962_v61  ;;  %vm1144_vm1 = vcmp.ge.f32.partialorder %v1112_v14, 1.25  ;;  %1240 = vst [vmem:[#allocation3 + $0x88] sm:$0xff] %v1016_v10  ;;  %v737_v21 = vpop.f32.mrf.mxu2 }
 0x13c   : > { %v1287_v24 = vsub.f32 1.0, %v1755_v20  ;;  %v1740_v25 = vsel %vm1144_vm1, 1.0, %v1962_v61  ;;  %v827_v26 = vadd.f32 %v826_v46, %v737_v21  ;;  %v700_v28 = vpop.f32.mrf.mxu0  ;;  %v831_v46 = vpop.f32.mrf.mxu3 }
 0x13d   : > { %v1272_v44 = vsub.f32 1.0, %v1740_v25  ;;  %v1820_v29 = vpack.c.bf16 %v1740_v25, %v1739_v0  ;;  %v790_v30 = vadd.f32 %v2239_v40, %v700_v28 }
 0x13e   : > { %v1319_v32 = vmul.f32 %v1287_v24, %v1127_v12  ;;  %v1032_v33 = vadd.f32 %v968_v19, %v827_v26  ;;  %v927_v24 = vld [vmem:[#allocation3 + $0x38] sm:$0xff] }
 0x13f   : > { %v1304_v34 = vmul.f32 %v1272_v44, %v1112_v14  ;;  %1858 = vst [vmem:[%s2016_s26 + $0x20] sm:$0xff] %v1820_v29   ;;  %v1017_v36 = vadd.f32 %v953_v22, %v790_v30  ;;  %v1083_v22 = vmul.f32 0.97, %v1051_v8  ;;  %v1055_v44 = vld [vmem:[#allocation4 + $0x10] sm:$0xff]  ;;  %v939_v29 = vld [vmem:[#allocation3 + $0xa0] sm:$0xff] }
 0x140   : > { %1351 = vst [vmem:[#allocation4 + $0x88] sm:$0xff] %v1319_v32  ;;  %v1128_v37 = vadd.f32 %v1096_v11, %v1032_v33  ;;  %v1067_v32 = vld [vmem:[#allocation4 + $0xb8] sm:$0xff]  ;;  %v1087_v17 = vmul.f32 0.97, %v1055_v44  ;;  %v941_v44 = vld [vmem:[#allocation3 + $0x20] sm:$0xff] }
 0x141   : > { %1336 = vst [vmem:[#allocation4 + $0xb0] sm:$0xff] %v1304_v34  ;;  %v1113_v39 = vadd.f32 %v1081_v31, %v1017_v36  ;;  %v2265_v42 = vpop.f32.mrf.mxu1  ;;  %v959_v31 = vmul.f32 0.75, %v927_v24 }
 0x142   : > { %vm1160_vm2 = vcmp.ge.f32.partialorder %v1128_v37, 1.25  ;;  %1256 = vst [vmem:[#allocation3 + $0xd0] sm:$0xff] %v1032_v33  ;;  %v924_v33 = vld [vmem:[#allocation3 + $0xf0] sm:$0xff] }
 0x143   : > { %v1756_v40 = vsel %vm1160_vm2, 1.0, %v1962_v61  ;;  %vm1145_vm3 = vcmp.ge.f32.partialorder %v1113_v39, 1.25  ;;  %1241 = vst [vmem:[#allocation3 + $0xe8] sm:$0xff] %v1017_v36  ;;  %v740_v47 = vpop.f32.mrf.mxu2  ;;  %v956_v45 = vmul.f32 0.75, %v924_v33 }
 0x144   : > { %v1288_v50 = vsub.f32 1.0, %v1756_v40  ;;  %v1844_v51 = vpack.c.bf16 %v1756_v40, %v1755_v20  ;;  %v1741_v41 = vsel %vm1145_vm3, 1.0, %v1962_v61  ;;  %v830_v53 = vadd.f32 %v829_v16, %v740_v47  ;;  %v702_v60 = vpop.f32.mrf.mxu0  ;;  %v834_v20 = vpop.f32.mrf.mxu3 }
 0x145   : > { %v1273_v54 = vsub.f32 1.0, %v1741_v41  ;;  %v792_v55 = vadd.f32 %v2246_v27, %v702_v60 }
 0x146   : > { %v1320_v59 = vmul.f32 %v1288_v50, %v1128_v37  ;;  %1866 = vst [vmem:[%s2016_s26 + $0x60] sm:$0xff] %v1844_v51   ;;  %v1033_v62 = vadd.f32 %v969_v43, %v830_v53  ;;  %v971_v37 = vmul.f32 0.75, %v939_v29  ;;  %v1099_v43 = vmul.f32 0.97, %v1067_v32  ;;  %v928_v53 = vld [vmem:[#allocation3 + $0x58] sm:$0xff]  ;;  %v1069_v32 = vld [vmem:[#allocation4 + $0x28] sm:$0xff] }
 0x147   : > { %v1305_v63 = vmul.f32 %v1273_v54, %v1113_v39  ;;  %v1018_v0 = vadd.f32 %v954_v49, %v792_v55  ;;  %v960_v1 = vmul.f32 0.75, %v928_v53 }
 0x148   : > { %1352 = vst [vmem:[#allocation4 + $0x48] sm:$0xff] %v1320_v59  ;;  %v1129_v2 = vadd.f32 %v1097_v48, %v1033_v62 }
 0x149   : > { %1337 = vst [vmem:[#allocation4 + $0x38] sm:$0xff] %v1305_v63  ;;  %v1114_v3 = vadd.f32 %v1082_v57, %v1018_v0  ;;  %v2271_v4 = vpop.f32.mrf.mxu1  ;;  %v1056_v63 = vld [vmem:[#allocation4 + $0x70] sm:$0xff] }
 0x14a   : > { %vm1161_vm4 = vcmp.ge.f32.partialorder %v1129_v2, 1.25  ;;  %1257 = vst [vmem:[#allocation3 + $0x10] sm:$0xff] %v1033_v62 }
 0x14b   : > { %v1757_v27 = vsel %vm1161_vm4, 1.0, %v1962_v61  ;;  %vm1146_vm5 = vcmp.ge.f32.partialorder %v1114_v3, 1.25  ;;  %1242 = vst [vmem:[#allocation3 + $0xb8] sm:$0xff] %v1018_v0  ;;  %v742_v10 = vpop.f32.mrf.mxu2  ;;  %v1068_v0 = vld [vmem:[#allocation4] sm:$0xff] }
 0x14c   : > { %v1289_v12 = vsub.f32 1.0, %v1757_v27  ;;  %v1742_v13 = vsel %vm1146_vm5, 1.0, %v1962_v61  ;;  %v832_v14 = vadd.f32 %v831_v46, %v742_v10  ;;  %v705_v16 = vpop.f32.mrf.mxu0  ;;  %v836_v59 = vpop.f32.mrf.mxu3  ;;  %v1088_v10 = vmul.f32 0.97, %v1056_v63 }
 0x14d   : > { %v1274_v19 = vsub.f32 1.0, %v1742_v13  ;;  %v1823_v35 = vpack.c.bf16 %v1742_v13, %v1741_v41  ;;  %v795_v21 = vadd.f32 %v2253_v52, %v705_v16  ;;  %v1084_v41 = vmul.f32 0.97, %v1052_v7 }
 0x14e   : > { %v1321_v25 = vmul.f32 %v1289_v12, %v1129_v2  ;;  %v1034_v26 = vadd.f32 %v970_v6, %v832_v14  ;;  %v940_v2 = vld [vmem:[#allocation3 + $0xf8] sm:$0xff]  ;;  %v957_v14 = vmul.f32 0.75, %v925_v23  ;;  %v973_v7 = vmul.f32 0.75, %v941_v44 }
 0x14f   : > { %v1306_v11 = vmul.f32 %v1274_v19, %v1114_v3  ;;  %1859 = vst [vmem:[%s2016_s26 + $0x28] sm:$0xff] %v1823_v35   ;;  %v1019_v28 = vadd.f32 %v955_v56, %v795_v21  ;;  %v1100_v56 = vmul.f32 0.97, %v1068_v0  ;;  %v972_v13 = vmul.f32 0.75, %v940_v2 }
 0x150   : > { %1353 = vst [vmem:[#allocation4 + $0xf8] sm:$0xff] %v1321_v25  ;;  %v1130_v30 = vadd.f32 %v1098_v18, %v1034_v26  ;;  %v1053_v18 = vld [vmem:[#allocation4 + $0x18] sm:$0xff] }
 0x151   : > { %1338 = vst [vmem:[#allocation4 + $0x40] sm:$0xff] %v1306_v11  ;;  %v1115_v34 = vadd.f32 %v1083_v22, %v1019_v28  ;;  %v804_v36 = vpop.f32.mrf.mxu1 }
 0x152   : > { %vm1162_vm6 = vcmp.ge.f32.partialorder %v1130_v30, 1.25  ;;  %1258 = vst [vmem:[#allocation3 + $0x28] sm:$0xff] %v1034_v26  ;;  %v805_v52 = vadd.f32 %v804_v36, %v2196_v58  ;;  %v1054_v36 = vld [vmem:[#allocation4 + $0x68] sm:$0xff] }
 0x153   : > { %v1758_v38 = vsel %vm1162_vm6, 1.0, %v1962_v61  ;;  %vm1147_vm7 = vcmp.ge.f32.partialorder %v1115_v34, 1.25  ;;  %1243 = vst [vmem:[#allocation3 + $0x60] sm:$0xff] %v1019_v28  ;;  %v745_v39 = vpop.f32.mrf.mxu2  ;;  %v1085_v28 = vmul.f32 0.97, %v1053_v18 }
 0x154   : > { %v1290_v40 = vsub.f32 1.0, %v1758_v38  ;;  %v1847_v47 = vpack.c.bf16 %v1758_v38, %v1757_v27  ;;  %v1743_v48 = vsel %vm1147_vm7, 1.0, %v1962_v61  ;;  %v1023_v46 = vadd.f32 %v959_v31, %v805_v52  ;;  %v707_v49 = vpop.f32.mrf.mxu0 }
 0x155   : > { %v1275_v50 = vsub.f32 1.0, %v1743_v48  ;;  %v835_v51 = vadd.f32 %v834_v20, %v745_v39  ;;  %v797_v58 = vadd.f32 %v2259_v15, %v707_v49 }
 0x156   : > { %v1322_v60 = vmul.f32 %v1290_v40, %v1130_v30  ;;  %1867 = vst [vmem:[%s2016_s26 + $0x68] sm:$0xff] %v1847_v47   ;;  %v1119_v54 = vadd.f32 %v1087_v17, %v1023_v46  ;;  %v1086_v47 = vmul.f32 0.97, %v1054_v36 }
 0x157   : > { %v1307_v55 = vmul.f32 %v1275_v50, %v1115_v34  ;;  %1247 = vst [vmem:[#allocation3 + $0x38] sm:$0xff] %v1023_v46  ;;  %v1035_v57 = vadd.f32 %v971_v37, %v835_v51  ;;  %v1020_v62 = vadd.f32 %v956_v45, %v797_v58  ;;  %v926_v34 = vld [vmem:[#allocation3 + $0x78] sm:$0xff]  ;;  %v839_v37 = vpop.f32.mrf.mxu3 }
 0x158   : > { %1354 = vst [vmem:[#allocation4 + $0xc0] sm:$0xff] %v1322_v60  ;;  %vm1151_vm8 = vcmp.ge.f32.partialorder %v1119_v54, 1.25  ;;  %v958_v40 = vmul.f32 0.75, %v926_v34 }
 0x159   : > { %1339 = vst [vmem:[#allocation4 + $0xe0] sm:$0xff] %v1307_v55  ;;  %v1747_v15 = vsel %vm1151_vm8, 1.0, %v1962_v61  ;;  %v1131_v3 = vadd.f32 %v1099_v43, %v1035_v57  ;;  %v1116_v5 = vadd.f32 %v1084_v41, %v1020_v62  ;;  %v806_v6 = vpop.f32.mrf.mxu1  ;;  %v1101_v43 = vmul.f32 0.97, %v1069_v32 }
 0x15a   : > { %v1279_v8 = vsub.f32 1.0, %v1747_v15  ;;  %1259 = vst [vmem:[#allocation3 + $0xa0] sm:$0xff] %v1035_v57  ;;  %v807_v27 = vadd.f32 %v806_v6, %v2203_v9 }
 0x15b   : > { %vm1163_vm9 = vcmp.ge.f32.partialorder %v1131_v3, 1.25  ;;  %vm1148_vm10 = vcmp.ge.f32.partialorder %v1116_v5, 1.25  ;;  %1244 = vst [vmem:[#allocation3 + $0xf0] sm:$0xff] %v1020_v62  ;;  %v747_v12 = vpop.f32.mrf.mxu2 }
 0x15c   : > { %v1311_v16 = vmul.f32 %v1279_v8, %v1119_v54  ;;  %v1759_v19 = vsel %vm1163_vm9, 1.0, %v1962_v61  ;;  %v1744_v35 = vsel %vm1148_vm10, 1.0, %v1962_v61  ;;  %v1024_v20 = vadd.f32 %v960_v1, %v807_v27  ;;  %v710_v21 = vpop.f32.mrf.mxu0  ;;  %v1070_v1 = vld [vmem:[#allocation4 + $0x98] sm:$0xff] }
 0x15d   : > { %v1291_v22 = vsub.f32 1.0, %v1759_v19  ;;  %v1276_v24 = vsub.f32 1.0, %v1744_v35  ;;  %v1826_v9 = vpack.c.bf16 %v1744_v35, %v1743_v48  ;;  %v837_v25 = vadd.f32 %v836_v59, %v747_v12  ;;  %v942_v59 = vld [vmem:[#allocation3 + $0x98] sm:$0xff] }
 0x15e   : > { %1343 = vst [vmem:[#allocation4 + $0x10] sm:$0xff] %v1311_v16  ;;  %v1120_v26 = vadd.f32 %v1088_v10, %v1024_v20  ;;  %v800_v11 = vadd.f32 %v2265_v42, %v710_v21  ;;  %v974_v2 = vmul.f32 0.75, %v942_v59  ;;  %v1102_v8 = vmul.f32 0.97, %v1070_v1 }
 0x15f   : > { %v1323_v29 = vmul.f32 %v1291_v22, %v1131_v3  ;;  %v1308_v30 = vmul.f32 %v1276_v24, %v1116_v5  ;;  %1860 = vst [vmem:[%s2016_s26 + $0x30] sm:$0xff] %v1826_v9   ;;  %v1036_v31 = vadd.f32 %v972_v13, %v837_v25 }
 0x160   : > { %vm1152_vm11 = vcmp.ge.f32.partialorder %v1120_v26, 1.25  ;;  %1248 = vst [vmem:[#allocation3 + $0x58] sm:$0xff] %v1024_v20  ;;  %v1021_v33 = vadd.f32 %v957_v14, %v800_v11 }
 0x161   : > { %1355 = vst [vmem:[#allocation4 + $0xb8] sm:$0xff] %v1323_v29  ;;  %v1748_v52 = vsel %vm1152_vm11, 1.0, %v1962_v61  ;;  %v1132_v17 = vadd.f32 %v1100_v56, %v1036_v31 }
 0x162   : > { %1340 = vst [vmem:[#allocation4 + $0x60] sm:$0xff] %v1308_v30  ;;  %v1280_v42 = vsub.f32 1.0, %v1748_v52  ;;  %v1832_v38 = vpack.c.bf16 %v1748_v52, %v1747_v15  ;;  %v1117_v39 = vadd.f32 %v1085_v28, %v1021_v33 }
 0x163   : > { %vm1164_vm12 = vcmp.ge.f32.partialorder %v1132_v17, 1.25  ;;  %1260 = vst [vmem:[#allocation3 + $0xf8] sm:$0xff] %v1036_v31  ;;  %v750_v45 = vpop.f32.mrf.mxu2 }
 0x164   : > { %v1312_v48 = vmul.f32 %v1280_v42, %v1120_v26  ;;  %1862 = vst [vmem:[%s2016_s26 + $0x40] sm:$0xff] %v1832_v38   ;;  %v1760_v46 = vsel %vm1164_vm12, 1.0, %v1962_v61  ;;  %vm1149_vm13 = vcmp.ge.f32.partialorder %v1117_v39, 1.25  ;;  %v840_v49 = vadd.f32 %v839_v37, %v750_v45  ;;  %v712_v50 = vpop.f32.mrf.mxu0 }
 0x165   : > { %v1292_v51 = vsub.f32 1.0, %v1760_v46  ;;  %v1850_v58 = vpack.c.bf16 %v1760_v46, %v1759_v19  ;;  %v1745_v41 = vsel %vm1149_vm13, 1.0, %v1962_v61  ;;  %1245 = vst [vmem:[#allocation3 + $0x8] sm:$0xff] %v1021_v33  ;;  %v802_v53 = vadd.f32 %v2271_v4, %v712_v50  ;;  %v841_v4 = vpop.f32.mrf.mxu3 }
 0x166   : > { %1344 = vst [vmem:[#allocation4 + $0x70] sm:$0xff] %v1312_v48  ;;  %v1277_v60 = vsub.f32 1.0, %v1745_v41  ;;  %v1037_v54 = vadd.f32 %v973_v7, %v840_v49 }
 0x167   : > { %v1324_v55 = vmul.f32 %v1292_v51, %v1132_v17  ;;  %1868 = vst [vmem:[%s2016_s26 + $0x70] sm:$0xff] %v1850_v58   ;;  %v1022_v57 = vadd.f32 %v958_v40, %v802_v53 }
 0x168   : > { %v1309_v62 = vmul.f32 %v1277_v60, %v1117_v39  ;;  %v1133_v63 = vadd.f32 %v1101_v43, %v1037_v54  ;;  %1261 = vst [vmem:[#allocation3 + $0x20] sm:$0xff] %v1037_v54 }
 0x169   : > { %1356 = vst [vmem:[#allocation4] sm:$0xff] %v1324_v55  ;;  %v1118_v0 = vadd.f32 %v1086_v47, %v1022_v57 }
 0x16a   : > { %1341 = vst [vmem:[#allocation4 + $0x18] sm:$0xff] %v1309_v62  ;;  %vm1165_vm14 = vcmp.ge.f32.partialorder %v1133_v63, 1.25 }
 0x16b   : > { %v1761_v23 = vsel %vm1165_vm14, 1.0, %v1962_v61  ;;  %vm1150_vm15 = vcmp.ge.f32.partialorder %v1118_v0, 1.25  ;;  %1246 = vst [vmem:[#allocation3 + $0x78] sm:$0xff] %v1022_v57  ;;  %v752_v15 = vpop.f32.mrf.mxu2 }
 0x16c   : > { %v1293_v3 = vsub.f32 1.0, %v1761_v23  ;;  %v1746_v5 = vsel %vm1150_vm15, 1.0, %v1962_v61  ;;  %v842_v6 = vadd.f32 %v841_v4, %v752_v15 }
 0x16d   : > { %v1278_v27 = vsub.f32 1.0, %v1746_v5  ;;  %v1829_v10 = vpack.c.bf16 %v1746_v5, %v1745_v41 }
 0x16e   : > { %v1325_v56 = vmul.f32 %v1293_v3, %v1133_v63  ;;  %v1038_v12 = vadd.f32 %v974_v2, %v842_v6 }
 0x16f   : > { %v1310_v13 = vmul.f32 %v1278_v27, %v1118_v0  ;;  %1861 = vst [vmem:[%s2016_s26 + $0x38] sm:$0xff] %v1829_v10  }
 0x170   : > { %1357 = vst [vmem:[#allocation4 + $0x28] sm:$0xff] %v1325_v56  ;;  %v1134_v14 = vadd.f32 %v1102_v8, %v1038_v12 }
 0x171   : > { %1342 = vst [vmem:[#allocation4 + $0x68] sm:$0xff] %v1310_v13 }
 0x172   : > { %vm1166_vm0 = vcmp.ge.f32.partialorder %v1134_v14, 1.25  ;;  %1262 = vst [vmem:[#allocation3 + $0x98] sm:$0xff] %v1038_v12 }
 0x173   : > { %v1762_v18 = vsel %vm1166_vm0, 1.0, %v1962_v61 }
 0x174   : > { %v1294_v16 = vsub.f32 1.0, %v1762_v18  ;;  %v1853_v19 = vpack.c.bf16 %v1762_v18, %v1761_v23 }
 0x176   : > { %v1326_v35 = vmul.f32 %v1294_v16, %v1134_v14  ;;  %1869 = vst [vmem:[%s2016_s26 + $0x78] sm:$0xff] %v1853_v19  }
 0x178   : > { %1358 = vst [vmem:[#allocation4 + $0x98] sm:$0xff] %v1326_v35 }
 0x179 PF: > { %s12_s13 = sadd.s32 1, %s1959_s13   ;;  %s2317_s9 = smov %s1951_s11 }
 0x17a   : > { %p9_p8 = scmp.ge.s32.totalorder %s12_s13, 18   ;;  %s2318_s10 = smov %s1955_s12 }
 0x17b   : > { %s2319_s11 = smov %s2322_s14  ;;  %s2320_s12 = smov %s2326_s15 }
 0x17c   :  { %11 = sbr.rel (!%p9_p8) target bundleno = 3 (0x3), region = 73 }

// kernel: network_forward.12
= control target key start
LH: loop header
LB: loop body
LE: loop exit
PB: predicated region body
PF: predicated region fallthrough
CT: control target
= control target key end

     0   :  { %s405_s6 = smov 0   ;;  %s407_s7 = smov 0   ;;  %s459_s0 = inlined_call_operand.vmem [shape: bf16[8,32,128], index: 0, kind: input, shape index: {}]   ;;  %s460_s1 = inlined_call_operand.vmem [shape: bf16[8,32,128], index: 1, kind: output, shape index: {}]  }
   0x1   :  { %s409_s8 = smov 0   ;;  %s411_s9 = smov 0  }
   0x2   :  { %s413_s10 = smov 0  }
   0x3 LB: > { %s20_s11 = sadd.s32 1, %s383_s8  ;;  %s23_s12 = sadd.s32 1, %s387_s9  ;;  %s391_s10 = sphi %s413_s10, %s11_s10   ;;  %s387_s9 = sphi %s411_s9, %s464_s9   ;;  %s383_s8 = sphi %s409_s8, %s463_s8   ;;  %s379_s7 = sphi %s407_s7, %s462_s7   ;;  %s375_s6 = sphi %s405_s6, %s461_s6  }
   0x4   : > { %p21_p0 = scmp.ge.s32.totalorder %s20_s11, 8  ;;  %p292_p1 = scmp.ge.s32.totalorder %s391_s10, 1 }
   0x5   : > { %p108_p2 = scmp.lt.s32.totalorder %s391_s10, 17 }
   0x6   : > { %s466_s11 = smov (%p21_p0, %s20_s11), 0  ;;  %s468_s12 = smov (!%p21_p0, %s23_s12), %s387_s9 }
   0x7   : > { %p109_p3 = pnand %p292_p1, %p108_p2  ;;  %p25_p4 = scmp.ge.s32.totalorder %s468_s12, 2 }
   0x8   : > { %s293_s13 = sshll.u32 (!%p109_p3), %s379_s7, 1  ;;  %p137_p5 = scmp.lt.s32.totalorder (!%p109_p3), %s375_s6, 7 }
   0x9   : > { %s470_s12 = smov (%p25_p4, %s468_s12), 0  ;;  %112 = sbr.rel (%p109_p3) target bundleno = 43 (0x2b), region = 24 }
   0xa   : > { %p139_p6 = scmp.lt.s32.totalorder (!%p109_p3), %s293_s13, 3  ;;  %p299_p7 = scmp.ne.s32.totalorder (!%p109_p3), %s375_s6, 0 }
   0xe   : > { %s138_s14 = scalar_select %p137_p5, %s375_s6, 7 }
   0xf   : > { %s472_s13 = smov (!%p139_p6, %s293_s13), 3  ;;  %159 = sbr.rel (%p299_p7) target bundleno = 25 (0x19), region = 28 }
  0x10   : > { %s294_s15 = sshll.u32 %s138_s14, 2 }
  0x11   : > { %s142_s16 = sadd.s32 %s294_s15, %s472_s13 }
  0x12   : > { %s295_s17 = sshll.u32 %s142_s16, 2 }
  0x13   : > { %s144_s20 = scalar_lea.vmem %s459_s0, %s295_s17  ;;  %s441_s23 = scalar_lea.vmem %s460_s1, %s295_s17 }
  0x14   : > { %v393_v0 = vmov 0.0  }
  0x15   : > { %160 = vst [vmem:[#allocation2] sm:$0xff] %v393_v0 }
  0x16   : > { %161 = vst [vmem:[#allocation2 + $0x8] sm:$0xff] %v393_v0 }
  0x17   : > { %162 = vst [vmem:[#allocation3 + $0x8] sm:$0xff] %v393_v0 }
  0x18   : > { %163 = vst [vmem:[#allocation3] sm:$0xff] %v393_v0 }
  0x19 PF: > { %v305_v1 = vld [vmem:[%s144_s20] sm:$0xff]   ;;  %v394_v16 = vmov 0.0  }
  0x1a   : > { %v306_v4 = vunpack.c.l.bf16 %v305_v1  ;;  %v307_v6 = vunpack.c.h.bf16 %v305_v1 }
  0x1c   : > { %v168_v2 = vld [vmem:[#allocation2] sm:$0xff] }
  0x1d   : > { %v169_v3 = vld [vmem:[#allocation2 + $0x8] sm:$0xff]  ;;  %v170_v5 = vmul.f32 0.75, %v168_v2 }
  0x1e   : > { %v171_v7 = vmul.f32 0.75, %v169_v3  ;;  %v174_v8 = vld [vmem:[#allocation3 + $0x8] sm:$0xff] }
  0x1f   : > { %v175_v9 = vld [vmem:[#allocation3] sm:$0xff]  ;;  %v176_v10 = vmul.f32 0.97, %v174_v8  ;;  %v172_v12 = vadd.f32 %v306_v4, %v170_v5 }
  0x20   : > { %v177_v11 = vmul.f32 0.97, %v175_v9  ;;  %v173_v13 = vadd.f32 %v307_v6, %v171_v7 }
  0x21   : > { %186 = vst [vmem:[#allocation2] sm:$0xff] %v172_v12  ;;  %v178_v14 = vadd.f32 %v176_v10, %v172_v12 }
  0x22   : > { %v179_v15 = vadd.f32 %v177_v11, %v173_v13  ;;  %187 = vst [vmem:[#allocation2 + $0x8] sm:$0xff] %v173_v13 }
  0x23   : > { %vm180_vm0 = vcmp.ge.f32.partialorder %v178_v14, 1.25 }
  0x24   : > { %vm181_vm1 = vcmp.ge.f32.partialorder %v179_v15, 1.25  ;;  %v300_v17 = vsel %vm180_vm0, 1.0, %v394_v16 }
  0x25   : > { %v301_v18 = vsel %vm181_vm1, 1.0, %v394_v16  ;;  %v188_v19 = vsub.f32 1.0, %v300_v17 }
  0x26   : > { %v189_v20 = vsub.f32 1.0, %v301_v18  ;;  %v309_v21 = vpack.c.bf16 %v301_v18, %v300_v17 }
  0x27   : > { %v190_v22 = vmul.f32 %v188_v19, %v178_v14 }
  0x28   : > { %v191_v23 = vmul.f32 %v189_v20, %v179_v15  ;;  %310 = vst [vmem:[%s441_s23] sm:$0xff] %v309_v21  }
  0x29   : > { %192 = vst [vmem:[#allocation3 + $0x8] sm:$0xff] %v190_v22 }
  0x2a   : > { %193 = vst [vmem:[#allocation3] sm:$0xff] %v191_v23 }
  0x2b PF: > { %s11_s10 = sadd.s32 1, %s391_s10   ;;  %s461_s6 = smov %s383_s8 }
  0x2c   : > { %p8_p8 = scmp.ge.s32.totalorder %s11_s10, 18   ;;  %s462_s7 = smov %s387_s9 }
  0x2d   : > { %s463_s8 = smov %s466_s11  ;;  %s464_s9 = smov %s470_s12 }
  0x2e   :  { %10 = sbr.rel (!%p8_p8) target bundleno = 3 (0x3), region = 58 }

// kernel: network_forward.13
= control target key start
LH: loop header
LB: loop body
LE: loop exit
PB: predicated region body
PF: predicated region fallthrough
CT: control target
= control target key end

     0   :  { %s1163_s9 = smov 0   ;;  %s1165_s10 = smov 0   ;;  %s1323_s0 = inlined_call_operand.vmem [shape: bf16[8,128,288], index: 0, kind: input, shape index: {}]   ;;  %s1324_s1 = inlined_call_operand.vmem [shape: bf16[288,128], index: 1, kind: input, shape index: {}]   ;;  %s1325_s2 = inlined_call_operand.vmem [shape: bf16[8,128,128], index: 2, kind: output, shape index: {}]  }
   0x1   :  { %s1167_s11 = smov 0   ;;  %s1169_s12 = smov 0  }
   0x2   :  { %s1171_s13 = smov 0  }
   0x3 LB: > { %s27_s14 = sadd.s32 1, %s1136_s11  ;;  %s31_s15 = sadd.s32 1, %s1140_s12  ;;  %s1144_s13 = sphi %s1171_s13, %s12_s13   ;;  %s1140_s12 = sphi %s1169_s12, %s1329_s12   ;;  %s1136_s11 = sphi %s1167_s11, %s1328_s11   ;;  %s1132_s10 = sphi %s1165_s10, %s1327_s10   ;;  %s1128_s9 = sphi %s1163_s9, %s1326_s9  }
   0x4   : > { %p29_p0 = scmp.ge.s32.totalorder %s27_s14, 8  ;;  %p859_p1 = scmp.ge.s32.totalorder %s1144_s13, 1 }
   0x5   : > { %p159_p2 = scmp.lt.s32.totalorder %s1144_s13, 17 }
   0x6   : > { %s1331_s14 = smov (%p29_p0, %s27_s14), 0  ;;  %s1333_s15 = smov (!%p29_p0, %s31_s15), %s1140_s12 }
   0x7   : > { %p160_p3 = pnand %p859_p1, %p159_p2  ;;  %p33_p4 = scmp.ge.s32.totalorder %s1333_s15, 2 }
   0x8   : > { %s860_s16 = sshll.u32 (!%p160_p3), %s1132_s10, 3  ;;  %p201_p5 = scmp.lt.s32.totalorder (!%p160_p3), %s1128_s9, 7 }
   0x9   : > { %s1335_s15 = smov (%p33_p4, %s1333_s15), 0  ;;  %163 = sbr.rel (%p160_p3) target bundleno = 250 (0xfa), region = 28 }
   0xa   : > { %p203_p6 = scmp.lt.s32.totalorder (!%p160_p3), %s860_s16, 15  ;;  %p232_p7 = scmp.eq.s32.totalorder (!%p160_p3), %s1128_s9, 0 }
   0xe   : > { %s1337_s9 = smov (!%p201_p5, %s1128_s9), 7  ;;  %s1339_s16 = smov (!%p203_p6, %s860_s16), 15  ;;  %v1146_v0 = vmov (%p232_p7), 0.0  }
   0xf   : > { %s1063_s17 = smul.u32 48, %s1337_s9  ;;  %s863_s18 = sshll.u32 %s1337_s9, 4  ;;  %238 = vst [vmem:[#allocation3 + $0x30] sm:$0xff] (%p232_p7), %v1146_v0 }
  0x10   : > { %s1062_s19 = smul.u32 3, %s1339_s16  ;;  %s227_s20 = sadd.s32 %s863_s18, %s1339_s16  ;;  %239 = vst [vmem:[#allocation3] sm:$0xff] (%p232_p7), %v1146_v0 }
  0x11   : > { %s864_s21 = sshll.u32 %s227_s20, 2  ;;  %237 = sbr.rel (!%p232_p7) target bundleno = 31 (0x1f), region = 32  ;;  %240 = vst [vmem:[#allocation3 + $0x18] sm:$0xff] (%p232_p7), %v1146_v0 }
  0x12   : > { %s210_s22 = sadd.s32 %s1063_s17, %s1062_s19  ;;  %s1201_s25 = scalar_lea.vmem %s1325_s2, %s864_s21  ;;  %241 = vst [vmem:[#allocation3 + $0x10] sm:$0xff] (%p232_p7), %v1146_v0 }
  0x13   : > { %s861_s26 = sshll.u32 %s210_s22, 2  ;;  %242 = vst [vmem:[#allocation3 + $0x8] sm:$0xff] (%p232_p7), %v1146_v0 }
  0x14   : > { %s1206_s29 = scalar_lea.vmem %s1323_s0, %s861_s26  ;;  %243 = vst [vmem:[#allocation3 + $0x20] sm:$0xff] (%p232_p7), %v1146_v0 }
  0x15   : > { %244 = vst [vmem:[#allocation3 + $0x28] sm:$0xff] (%p232_p7), %v1146_v0 }
  0x16   : > { %245 = vst [vmem:[#allocation3 + $0x38] sm:$0xff] %v1146_v0 }
  0x17   : > { %246 = vst [vmem:[#allocation4] sm:$0xff] %v1146_v0 }
  0x18   : > { %247 = vst [vmem:[#allocation4 + $0x18] sm:$0xff] %v1146_v0 }
  0x19   : > { %248 = vst [vmem:[#allocation4 + $0x10] sm:$0xff] %v1146_v0 }
  0x1a   : > { %249 = vst [vmem:[#allocation4 + $0x20] sm:$0xff] %v1146_v0 }
  0x1b   : > { %250 = vst [vmem:[#allocation4 + $0x28] sm:$0xff] %v1146_v0 }
  0x1c   : > { %251 = vst [vmem:[#allocation4 + $0x8] sm:$0xff] %v1146_v0 }
  0x1d   : > { %252 = vst [vmem:[#allocation4 + $0x30] sm:$0xff] %v1146_v0 }
  0x1e   : > { %253 = vst [vmem:[#allocation4 + $0x38] sm:$0xff] %v1146_v0 }
  0x1f PF: > { %v1020_v1 = vld [vmem:[%s1324_s1 + $0x38] sm:$0xff]  ;;  %v1030_v3 = vld [vmem:[%s1324_s1 + $0x88] sm:$0xff]  ;;  %v1019_v4 = vld [vmem:[%s1324_s1 + $0x30] sm:$0xff]  ;;  %vm493_vm0 = vcmask 261120  }
  0x20   : > { %v1028_v2 = vld [vmem:[%s1324_s1 + $0x78] sm:$0xff]  ;;  %506 = vmatpush.bf16.msra.mxu0 %v1020_v1  ;;  %1046 = vmatpush.bf16.msra.mxu3 %v1020_v1  ;;  %v1027_v5 = vld [vmem:[%s1324_s1 + $0x70] sm:$0xff]  ;;  %v1029_v6 = vld [vmem:[%s1324_s1 + $0x80] sm:$0xff] }
  0x21   : > { %1054 = vmatpush.bf16.msra.mxu1 %v1028_v2  ;;  %570 = vmatpush.bf16.msra.mxu2 %v1030_v3  ;;  %v876_v7 = vld [vmem:[%s1206_s29 + $0x8] sm:$0xf]  ;;  %v1003_v8 = vld [vmem:[%s1206_s29 + $0x10] sm:$0xf0]  ;;  %v1017_v12 = vld [vmem:[%s1324_s1 + $0x20] sm:$0xff] }
  0x22   : > { %v1018_v9 = vld [vmem:[%s1324_s1 + $0x28] sm:$0xff]  ;;  %v877_v11 = vor.u32 %v1003_v8, %v876_v7  ;;  %v1025_v13 = vld [vmem:[%s1324_s1 + $0x60] sm:$0xff]  ;;  %v1016_v14 = vld [vmem:[%s1324_s1 + $0x18] sm:$0xff] }
  0x23   : > { %v1026_v10 = vld [vmem:[%s1324_s1 + $0x68] sm:$0xff]  ;;  %v1024_v15 = vld [vmem:[%s1324_s1 + $0x58] sm:$0xff]  ;;  %v1015_v16 = vld [vmem:[%s1324_s1 + $0x10] sm:$0xff] }
  0x24   : > { %507 = vmatpush.bf16.msra.mxu0 %v1019_v4  ;;  %1047 = vmatpush.bf16.msra.mxu3 %v1019_v4  ;;  %v1023_v17 = vld [vmem:[%s1324_s1 + $0x50] sm:$0xff]  ;;  %v888_v18 = vld [vmem:[%s1206_s29 + $0x20] sm:$0xf]  ;;  %v1006_v19 = vld [vmem:[%s1206_s29 + $0x28] sm:$0xf0] }
  0x25   : > { %1055 = vmatpush.bf16.msra.mxu1 %v1027_v5  ;;  %571 = vmatpush.bf16.msra.mxu2 %v1029_v6  ;;  %v1014_v20 = vld [vmem:[%s1324_s1 + $0x8] sm:$0xff]  ;;  %v889_v22 = vor.u32 %v1006_v19, %v888_v18  ;;  %v1013_v23 = vld [vmem:[%s1324_s1] sm:$0xff]  ;;  %v880_v24 = vld [vmem:[%s1206_s29 + $0x18] sm:$0xf] }
  0x26   : > { %v1022_v21 = vld [vmem:[%s1324_s1 + $0x48] sm:$0xff]  ;;  %v1005_v25 = vld [vmem:[%s1206_s29 + $0x20] sm:$0xf0]  ;;  %v868_v26 = vld [vmem:[%s1206_s29] sm:$0xf] }
  0x27   : > { %v1002_v27 = vld [vmem:[%s1206_s29 + $0x8] sm:$0xf0]  ;;  %v1021_v28 = vld [vmem:[%s1324_s1 + $0x40] sm:$0xff]  ;;  %v1004_v29 = vld [vmem:[%s1206_s29 + $0x1c] sm:$0xf]  ;;  %v881_v31 = vor.u32 %v1005_v25, %v880_v24 }
  0x28   : > { %508 = vmatpush.bf16.msra.mxu0 %v1018_v9  ;;  %1048 = vmatpush.bf16.msra.mxu3 %v1018_v9  ;;  %v882_v30 = vld [vmem:[%s1206_s29 + $0x24] sm:$0xf0]  ;;  %v869_v32 = vor.u32 %v1002_v27, %v868_v26  ;;  %v900_v34 = vld [vmem:[%s1206_s29 + $0x38] sm:$0xf]  ;;  %v1009_v35 = vld [vmem:[%s1206_s29 + $0x40] sm:$0xf0] }
  0x29   : > { %1056 = vmatpush.bf16.msra.mxu1 %v1026_v10  ;;  %986 = vmatmul.msk.bf16.vlgmr.msra.gmra.mxu2 %vm493_vm0, %v877_v11  ;;  %v885_v33 = vor.u32 %v1004_v29, %v882_v30  ;;  %v901_v36 = vor.u32 %v1009_v35, %v900_v34  ;;  %v892_v37 = vld [vmem:[%s1206_s29 + $0x30] sm:$0xf]  ;;  %v1008_v38 = vld [vmem:[%s1206_s29 + $0x38] sm:$0xf0]  ;;  %v1007_v39 = vld [vmem:[%s1206_s29 + $0x34] sm:$0xf] }
  0x2a   : > { %v894_v40 = vld [vmem:[%s1206_s29 + $0x3c] sm:$0xf0]  ;;  %v893_v41 = vor.u32 %v1008_v38, %v892_v37  ;;  %v912_v43 = vld [vmem:[%s1206_s29 + $0x50] sm:$0xf]  ;;  %v1012_v44 = vld [vmem:[%s1206_s29 + $0x58] sm:$0xf0] }
  0x2b   : > { %v897_v42 = vor.u32 %v1007_v39, %v894_v40  ;;  %v913_v45 = vor.u32 %v1012_v44, %v912_v43  ;;  %v1001_v46 = vld [vmem:[%s1206_s29 + $0x4] sm:$0xf]  ;;  %v870_v47 = vld [vmem:[%s1206_s29 + $0xc] sm:$0xf0]  ;;  %v904_v49 = vld [vmem:[%s1206_s29 + $0x48] sm:$0xf] }
  0x2c   : > { %509 = vmatpush.bf16.msra.mxu0 %v1017_v12  ;;  %1049 = vmatpush.bf16.msra.mxu3 %v1017_v12  ;;  %v873_v48 = vor.u32 %v1001_v46, %v870_v47  ;;  %v1011_v50 = vld [vmem:[%s1206_s29 + $0x50] sm:$0xf0]  ;;  %v1010_v51 = vld [vmem:[%s1206_s29 + $0x4c] sm:$0xf]  ;;  %v906_v52 = vld [vmem:[%s1206_s29 + $0x54] sm:$0xf0] }
  0x2d   : > { %1057 = vmatpush.bf16.msra.mxu1 %v1025_v13  ;;  %v905_v53 = vor.u32 %v1011_v50, %v904_v49  ;;  %v909_v54 = vor.u32 %v1010_v51, %v906_v52  ;;  %v614_v59 = vld [vmem:[#allocation3 + $0x18] sm:$0xff]  ;;  %v646_v61 = vld [vmem:[#allocation4 + $0x10] sm:$0xff]  ;;  %v647_v9 = vld [vmem:[#allocation4 + $0x20] sm:$0xff]  ;;  %v1147_v12 = vmov 0.0  }
  0x2e   : > { %v622_v63 = vmul.f32 0.75, %v614_v59  ;;  %v615_v6 = vld [vmem:[#allocation3 + $0x10] sm:$0xff]  ;;  %v648_v25 = vld [vmem:[#allocation4 + $0x28] sm:$0xff]  ;;  %v617_v38 = vld [vmem:[#allocation3 + $0x20] sm:$0xff] }
  0x2f   : > { %v623_v11 = vmul.f32 0.75, %v615_v6  ;;  %v625_v47 = vmul.f32 0.75, %v617_v38  ;;  %v613_v59 = vld [vmem:[#allocation3] sm:$0xff] }
  0x30   : > { %510 = vmatpush.bf16.msra.mxu0 %v1016_v14  ;;  %1050 = vmatpush.bf16.msra.mxu3 %v1016_v14 }
  0x31   : > { %1058 = vmatpush.bf16.msra.mxu1 %v1024_v15 }
  0x34   : > { %511 = vmatpush.bf16.msra.mxu0 %v1015_v16  ;;  %1051 = vmatpush.bf16.msra.mxu3 %v1015_v16  ;;  %v655_v16 = vmul.f32 0.97, %v647_v9 }
  0x35   : > { %1059 = vmatpush.bf16.msra.mxu1 %v1023_v17 }
  0x38   : > { %512 = vmatpush.bf16.msra.mxu0 %v1014_v20  ;;  %1052 = vmatpush.bf16.msra.mxu3 %v1014_v20 }
  0x39   : > { %1060 = vmatpush.bf16.msra.mxu1 %v1022_v21  ;;  %987 = vmatmul.msk.bf16.gmra.mxu2 %vm493_vm0, %v889_v22  ;;  %v616_v22 = vld [vmem:[#allocation3 + $0x8] sm:$0xff] }
  0x3a   : > { %v624_v27 = vmul.f32 0.75, %v616_v22 }
  0x3c   : > { %513 = vmatpush.bf16.msra.mxu0 %v1013_v23  ;;  %1053 = vmatpush.bf16.msra.mxu3 %v1013_v23 }
  0x3d   : > { %1061 = vmatpush.bf16.msra.mxu1 %v1021_v28 }
  0x3f   : > { %519 = vmatmul.bf16.vlgmr.msra.gmra.mxu3 %v881_v31  ;;  %514 = vmatmul.bf16.vlgmr.msra.gmra.mxu0 %v869_v32  ;;  %v656_v32 = vmul.f32 0.97, %v648_v25 }
  0x40   : > { %535 = vmatpush.bf16.msrb.mxu0 %v1028_v2  ;;  %548 = vmatmul.bf16.vlgmr.msra.gmra.mxu1 %v885_v33  ;;  %v654_v2 = vmul.f32 0.97, %v646_v61 }
  0x44   : > { %536 = vmatpush.bf16.msrb.mxu0 %v1027_v5 }
  0x48   : > { %537 = vmatpush.bf16.msrb.mxu0 %v1026_v10 }
  0x49   : > { %988 = vmatmul.msk.bf16.gmra.mxu2 %vm493_vm0, %v901_v36  ;;  %v612_v36 = vld [vmem:[#allocation3 + $0x30] sm:$0xff] }
  0x4a   : > { %v620_v43 = vmul.f32 0.75, %v612_v36 }
  0x4c   : > { %538 = vmatpush.bf16.msrb.mxu0 %v1025_v13 }
  0x4f   : > { %524 = vmatmul.bf16.gmra.mxu3 %v893_v41  ;;  %v644_v41 = vld [vmem:[#allocation4] sm:$0xff] }
  0x50   : > { %539 = vmatpush.bf16.msrb.mxu0 %v1024_v15  ;;  %553 = vmatmul.bf16.gmra.mxu1 %v897_v42  ;;  %v652_v50 = vmul.f32 0.97, %v644_v41 }
  0x54   : > { %540 = vmatpush.bf16.msrb.mxu0 %v1023_v17 }
  0x58   : > { %541 = vmatpush.bf16.msrb.mxu0 %v1022_v21 }
  0x59   : > { %989 = vmatmul.msk.bf16.gmra.mxu2 %vm493_vm0, %v913_v45  ;;  %v649_v45 = vld [vmem:[#allocation4 + $0x8] sm:$0xff] }
  0x5c   : > { %542 = vmatpush.bf16.msrb.mxu0 %v1021_v28 }
  0x5f   : > { %543 = vmatmul.bf16.vlgmr.msrb.gmra.mxu0 %v873_v48  ;;  %529 = vmatmul.bf16.gmra.mxu3 %v905_v53  ;;  %v657_v53 = vmul.f32 0.97, %v649_v45 }
  0x60   : > { %558 = vmatmul.bf16.gmra.mxu1 %v909_v54 }
  0xac   : > { %v1290_v55 = vpop.f32.mrf.mxu2 }
  0xb4   : > { %v1292_v56 = vpop.f32.mrf.mxu2 }
  0xbc   : > { %v578_v57 = vpop.f32.mrf.mxu2  ;;  %v515_v4 = vpop.f32.mrf.mxu0 }
  0xbd   : > { %v549_v58 = vpop.f32.mrf.mxu1 }
  0xc2   : > { %v520_v60 = vpop.f32.mrf.mxu3 }
  0xc3   : > { %v550_v62 = vadd.f32 %v549_v58, %v520_v60 }
  0xc4   : > { %v580_v0 = vpop.f32.mrf.mxu2  ;;  %v517_v21 = vpop.f32.mrf.mxu0 }
  0xc5   : > { %v579_v1 = vadd.f32 %v578_v57, %v550_v62  ;;  %v551_v3 = vpop.f32.mrf.mxu1  ;;  %v618_v62 = vld [vmem:[#allocation3 + $0x28] sm:$0xff] }
  0xc7   : > { %v638_v5 = vadd.f32 %v622_v63, %v579_v1  ;;  %v645_v1 = vld [vmem:[#allocation4 + $0x18] sm:$0xff] }
  0xc9   : > { %v662_v7 = vadd.f32 %v654_v2, %v638_v5  ;;  %694 = vst [vmem:[#allocation3 + $0x18] sm:$0xff] %v638_v5  ;;  %v650_v5 = vld [vmem:[#allocation4 + $0x30] sm:$0xff] }
  0xca   : > { %v522_v8 = vpop.f32.mrf.mxu3 }
  0xcb   : > { %vm670_vm1 = vcmp.ge.f32.partialorder %v662_v7, 1.25  ;;  %v552_v10 = vadd.f32 %v551_v3, %v522_v8  ;;  %v621_v3 = vmul.f32 0.75, %v613_v59  ;;  %v626_v8 = vmul.f32 0.75, %v618_v62 }
  0xcc   : > { %v992_v13 = vsel %vm670_vm1, 1.0, %v1147_v12  ;;  %v583_v18 = vpop.f32.mrf.mxu2 }
  0xcd   : > { %v702_v14 = vsub.f32 1.0, %v992_v13  ;;  %v581_v15 = vadd.f32 %v580_v0, %v552_v10  ;;  %v554_v17 = vpop.f32.mrf.mxu1 }
  0xcf   : > { %v710_v19 = vmul.f32 %v702_v14, %v662_v7  ;;  %v639_v20 = vadd.f32 %v623_v11, %v581_v15 }
  0xd1   : > { %718 = vst [vmem:[#allocation4 + $0x10] sm:$0xff] %v710_v19  ;;  %v663_v23 = vadd.f32 %v655_v16, %v639_v20 }
  0xd2   : > { %695 = vst [vmem:[#allocation3 + $0x10] sm:$0xff] %v639_v20  ;;  %v525_v24 = vpop.f32.mrf.mxu3 }
  0xd3   : > { %vm671_vm2 = vcmp.ge.f32.partialorder %v663_v23, 1.25  ;;  %v555_v26 = vadd.f32 %v554_v17, %v525_v24  ;;  %v658_v17 = vmul.f32 0.97, %v650_v5 }
  0xd4   : > { %v993_v28 = vsel %vm671_vm2, 1.0, %v1147_v12  ;;  %v585_v37 = vpop.f32.mrf.mxu2 }
  0xd5   : > { %v703_v29 = vsub.f32 1.0, %v993_v28  ;;  %v1035_v30 = vpack.c.bf16 %v993_v28, %v992_v13  ;;  %v584_v31 = vadd.f32 %v583_v18, %v555_v26  ;;  %v556_v33 = vpop.f32.mrf.mxu1  ;;  %v653_v13 = vmul.f32 0.97, %v645_v1  ;;  %v651_v26 = vld [vmem:[#allocation4 + $0x38] sm:$0xff] }
  0xd6   : > { %v659_v36 = vmul.f32 0.97, %v651_v26 }
  0xd7   : > { %v711_v34 = vmul.f32 %v703_v29, %v663_v23  ;;  %1043 = vst [vmem:[%s1201_s25 + $0x8] sm:$0xff] %v1035_v30   ;;  %v640_v35 = vadd.f32 %v624_v27, %v584_v31  ;;  %v619_v23 = vld [vmem:[#allocation3 + $0x38] sm:$0xff] }
  0xd8   : > { %v627_v29 = vmul.f32 0.75, %v619_v23 }
  0xd9   : > { %719 = vst [vmem:[#allocation4 + $0x20] sm:$0xff] %v711_v34  ;;  %v664_v39 = vadd.f32 %v656_v32, %v640_v35 }
  0xda   : > { %696 = vst [vmem:[#allocation3 + $0x8] sm:$0xff] %v640_v35  ;;  %v527_v44 = vpop.f32.mrf.mxu3 }
  0xdb   : > { %vm672_vm3 = vcmp.ge.f32.partialorder %v664_v39, 1.25  ;;  %v557_v46 = vadd.f32 %v556_v33, %v527_v44 }
  0xdc   : > { %v544_v40 = vpop.f32.mrf.mxu0  ;;  %v994_v48 = vsel %vm672_vm3, 1.0, %v1147_v12  ;;  %v588_v2 = vpop.f32.mrf.mxu2 }
  0xdd   : > { %v545_v42 = vadd.f32 %v544_v40, %v515_v4  ;;  %v704_v51 = vsub.f32 1.0, %v994_v48  ;;  %v586_v52 = vadd.f32 %v585_v37, %v557_v46  ;;  %v559_v61 = vpop.f32.mrf.mxu1 }
  0xdf   : > { %v574_v49 = vadd.f32 %v1290_v55, %v545_v42  ;;  %v712_v57 = vmul.f32 %v704_v51, %v664_v39  ;;  %v641_v58 = vadd.f32 %v625_v47, %v586_v52 }
  0xe1   : > { %v636_v54 = vadd.f32 %v620_v43, %v574_v49  ;;  %720 = vst [vmem:[#allocation4 + $0x28] sm:$0xff] %v712_v57  ;;  %v665_v63 = vadd.f32 %v657_v53, %v641_v58 }
  0xe2   : > { %697 = vst [vmem:[#allocation3 + $0x20] sm:$0xff] %v641_v58  ;;  %v530_v4 = vpop.f32.mrf.mxu3 }
  0xe3   : > { %v660_v60 = vadd.f32 %v652_v50, %v636_v54  ;;  %692 = vst [vmem:[#allocation3 + $0x30] sm:$0xff] %v636_v54  ;;  %vm673_vm5 = vcmp.ge.f32.partialorder %v665_v63, 1.25  ;;  %v560_v7 = vadd.f32 %v559_v61, %v530_v4 }
  0xe4   : > { %v546_v0 = vpop.f32.mrf.mxu0  ;;  %v995_v10 = vsel %vm673_vm5, 1.0, %v1147_v12  ;;  %v590_v33 = vpop.f32.mrf.mxu2 }
  0xe5   : > { %vm668_vm4 = vcmp.ge.f32.partialorder %v660_v60, 1.25  ;;  %v547_v55 = vadd.f32 %v546_v0, %v517_v21  ;;  %v705_v14 = vsub.f32 1.0, %v995_v10  ;;  %v1038_v15 = vpack.c.bf16 %v995_v10, %v994_v48  ;;  %v561_v25 = vpop.f32.mrf.mxu1 }
  0xe6   : > { %v990_v6 = vsel %vm668_vm4, 1.0, %v1147_v12  ;;  %v589_v16 = vadd.f32 %v588_v2, %v560_v7 }
  0xe7   : > { %v700_v9 = vsub.f32 1.0, %v990_v6  ;;  %v576_v11 = vadd.f32 %v1292_v56, %v547_v55  ;;  %v713_v20 = vmul.f32 %v705_v14, %v665_v63  ;;  %1044 = vst [vmem:[%s1201_s25 + $0x10] sm:$0xff] %v1038_v15  }
  0xe8   : > { %v642_v21 = vadd.f32 %v626_v8, %v589_v16 }
  0xe9   : > { %v708_v18 = vmul.f32 %v700_v9, %v660_v60  ;;  %v637_v19 = vadd.f32 %v621_v3, %v576_v11  ;;  %721 = vst [vmem:[#allocation4 + $0x8] sm:$0xff] %v713_v20 }
  0xea   : > { %v666_v24 = vadd.f32 %v658_v17, %v642_v21  ;;  %v532_v56 = vpop.f32.mrf.mxu3  ;;  %698 = vst [vmem:[#allocation3 + $0x28] sm:$0xff] %v642_v21 }
  0xeb   : > { %716 = vst [vmem:[#allocation4] sm:$0xff] %v708_v18  ;;  %v661_v22 = vadd.f32 %v653_v13, %v637_v19  ;;  %v562_v28 = vadd.f32 %v561_v25, %v532_v56 }
  0xec   : > { %693 = vst [vmem:[#allocation3] sm:$0xff] %v637_v19  ;;  %vm674_vm7 = vcmp.ge.f32.partialorder %v666_v24, 1.25 }
  0xed   : > { %vm669_vm6 = vcmp.ge.f32.partialorder %v661_v22, 1.25  ;;  %v996_v32 = vsel %vm674_vm7, 1.0, %v1147_v12  ;;  %v591_v35 = vadd.f32 %v590_v33, %v562_v28 }
  0xee   : > { %v991_v27 = vsel %vm669_vm6, 1.0, %v1147_v12  ;;  %v706_v34 = vsub.f32 1.0, %v996_v32 }
  0xef   : > { %v701_v30 = vsub.f32 1.0, %v991_v27  ;;  %v1032_v31 = vpack.c.bf16 %v991_v27, %v990_v6  ;;  %v643_v39 = vadd.f32 %v627_v29, %v591_v35 }
  0xf0   : > { %v714_v38 = vmul.f32 %v706_v34, %v666_v24 }
  0xf1   : > { %v709_v37 = vmul.f32 %v701_v30, %v661_v22  ;;  %1033 = vst [vmem:[%s1201_s25] sm:$0xff] %v1032_v31   ;;  %v667_v40 = vadd.f32 %v659_v36, %v643_v39 }
  0xf2   : > { %722 = vst [vmem:[#allocation4 + $0x30] sm:$0xff] %v714_v38 }
  0xf3   : > { %717 = vst [vmem:[#allocation4 + $0x18] sm:$0xff] %v709_v37  ;;  %vm675_vm8 = vcmp.ge.f32.partialorder %v667_v40, 1.25 }
  0xf4   : > { %699 = vst [vmem:[#allocation3 + $0x38] sm:$0xff] %v643_v39  ;;  %v997_v41 = vsel %vm675_vm8, 1.0, %v1147_v12 }
  0xf5   : > { %v707_v42 = vsub.f32 1.0, %v997_v41  ;;  %v1041_v43 = vpack.c.bf16 %v997_v41, %v996_v32 }
  0xf7   : > { %v715_v44 = vmul.f32 %v707_v42, %v667_v40  ;;  %1045 = vst [vmem:[%s1201_s25 + $0x18] sm:$0xff] %v1041_v43  }
  0xf9   : > { %723 = vst [vmem:[#allocation4 + $0x38] sm:$0xff] %v715_v44 }
  0xfa PF: > { %s12_s13 = sadd.s32 1, %s1144_s13   ;;  %s1326_s9 = smov %s1136_s11 }
  0xfb   : > { %p9_p8 = scmp.ge.s32.totalorder %s12_s13, 18   ;;  %s1327_s10 = smov %s1140_s12 }
  0xfc   : > { %s1328_s11 = smov %s1331_s14  ;;  %s1329_s12 = smov %s1335_s15 }
  0xfd   :  { %11 = sbr.rel (!%p9_p8) target bundleno = 3 (0x3), region = 73 }

// kernel: network_forward.14
= control target key start
LH: loop header
LB: loop body
LE: loop exit
PB: predicated region body
PF: predicated region fallthrough
CT: control target
= control target key end

     0   :  { %s2194_s9 = smov 0   ;;  %s2196_s10 = smov 0   ;;  %s2550_s0 = inlined_call_operand.vmem [shape: bf16[8,8,4096], index: 0, kind: input, shape index: {}]   ;;  %s2551_s1 = inlined_call_operand.vmem [shape: bf16[4096,512], index: 1, kind: input, shape index: {}]   ;;  %s2552_s2 = inlined_call_operand.vmem [shape: bf16[8,8,512], index: 2, kind: output, shape index: {}]  }
   0x1   :  { %s2198_s11 = smov 0   ;;  %s2200_s12 = smov 0  }
   0x2   :  { %s2202_s13 = smov 0  }
   0x3 LB: > { %s24_s14 = sadd.s32 1, %s2166_s11  ;;  %s27_s15 = sadd.s32 1, %s2170_s12  ;;  %s2174_s13 = sphi %s2202_s13, %s12_s13   ;;  %s2170_s12 = sphi %s2200_s12, %s2556_s12   ;;  %s2166_s11 = sphi %s2198_s11, %s2555_s11   ;;  %s2162_s10 = sphi %s2196_s10, %s2554_s10   ;;  %s2158_s9 = sphi %s2194_s9, %s2553_s9  }
   0x4   : > { %p25_p0 = scmp.ge.s32.totalorder %s24_s14, 8  ;;  %p1434_p1 = scmp.ge.s32.totalorder %s2174_s13, 1 }
   0x5   : > { %p158_p2 = scmp.lt.s32.totalorder %s2174_s13, 65 }
   0x6   : > { %s2558_s14 = smov (%p25_p0, %s24_s14), 0  ;;  %s2560_s15 = smov (!%p25_p0, %s27_s15), %s2170_s12 }
   0x7   : > { %p159_p3 = pnand %p1434_p1, %p158_p2  ;;  %p29_p4 = scmp.ge.s32.totalorder %s2560_s15, 8 }
   0x8   : > { %s1435_s16 = sshll.u32 (!%p159_p3), %s2158_s9, 2  ;;  %p199_p5 = scmp.lt.s32.totalorder (!%p159_p3), %s2162_s10, 7 }
   0x9   : > { %s2562_s15 = smov (%p29_p4, %s2560_s15), 0  ;;  %162 = sbr.rel (%p159_p3) target bundleno = 339 (0x153), region = 28 }
   0xa   : > { %p203_p6 = scmp.lt.s32.totalorder (!%p159_p3), %s1435_s16, 31  ;;  %s1438_s17 = sshll.u32 (!%p159_p3), %s2158_s9, 6 }
   0xb   : > { %p213_p7 = scmp.lt.s32.totalorder (!%p159_p3), %s1438_s17, 511  ;;  %p228_p8 = scmp.eq.s32.totalorder (!%p159_p3), %s2162_s10, 0 }
   0xc   : > { %p229_p9 = scmp.eq.s32.totalorder (!%p159_p3), %s2158_s9, 0 }
   0xe   : > { %s200_s18 = scalar_select %p199_p5, %s2162_s10, 7 }
   0xf   : > { %s2564_s16 = smov (!%p203_p6, %s1435_s16), 31  ;;  %s2566_s17 = smov (!%p213_p7, %s1438_s17), 511 }
  0x10   : > { %s1436_s19 = sshll.u32 %s200_s18, 5  ;;  %s1964_s21 = sshll.u32 %s200_s18, 4 }
  0x11   : > { %s208_s20 = sadd.s32 %s1436_s19, %s2564_s16  ;;  %s2235_s25 = scalar_lea.vmem %s2552_s2, %s1964_s21 }
  0x12   : > { %s1437_s22 = sshll.u32 %s208_s20, 2  ;;  %s1963_s29 = sshll.u32 %s2566_s17, 4 }
  0x13   : > { %s2240_s28 = scalar_lea.vmem %s2550_s0, %s1437_s22  ;;  %s2247_s4 = scalar_lea.vmem %s2551_s1, %s1963_s29 }
  0x14   : > { %p230_p10 = pnand %p229_p9, %p228_p8 }
  0x16   : > { %233 = sbr.rel (%p230_p10) target bundleno = 36 (0x24), region = 32 }
  0x1b   : > { %v2176_v0 = vmov 0.0  }
  0x1c   : > { %234 = vst [vmem:[#allocation3] sm:$0xff] %v2176_v0 }
  0x1d   : > { %235 = vst [vmem:[#allocation3 + $0x18] sm:$0xff] %v2176_v0 }
  0x1e   : > { %236 = vst [vmem:[#allocation3 + $0x8] sm:$0xff] %v2176_v0 }
  0x1f   : > { %237 = vst [vmem:[#allocation3 + $0x10] sm:$0xff] %v2176_v0 }
  0x20   : > { %238 = vst [vmem:[#allocation4] sm:$0xff] %v2176_v0 }
  0x21   : > { %239 = vst [vmem:[#allocation4 + $0x8] sm:$0xff] %v2176_v0 }
  0x22   : > { %240 = vst [vmem:[#allocation4 + $0x10] sm:$0xff] %v2176_v0 }
  0x23   : > { %241 = vst [vmem:[#allocation4 + $0x18] sm:$0xff] %v2176_v0 }
  0x24 PF: > { %p1443_p11 = scmp.ne.s32.totalorder %s2158_s9, 0 }
  0x26   : > { %244 = sbr.rel (%p1443_p11) target bundleno = 48 (0x30), region = 36 }
  0x2b   : > { %v2177_v1 = vmov 0.0  }
  0x2c   : > { %245 = vst [vmem:[#allocation2 + $0x10] sm:$0xff] %v2177_v1 }
  0x2d   : > { %246 = vst [vmem:[#allocation2] sm:$0xff] %v2177_v1 }
  0x2e   : > { %247 = vst [vmem:[#allocation2 + $0x18] sm:$0xff] %v2177_v1 }
  0x2f   : > { %248 = vst [vmem:[#allocation2 + $0x8] sm:$0xff] %v2177_v1 }
  0x30 PF: > { %v1558_v2 = vld [vmem:[%s2247_s4 + $0xe0] sm:$0xf]  ;;  %v1995_v3 = vld [vmem:[%s2247_s4 + $0xec] sm:$0xf0]  ;;  %p1956_p12 = scmp.ne.s32.totalorder %s2158_s9, 7 }
  0x31   : > { %v1686_v4 = vld [vmem:[%s2247_s4 + $0x1e0] sm:$0xf]  ;;  %v1559_v5 = vor.u32 %v1995_v3, %v1558_v2  ;;  %v2027_v6 = vld [vmem:[%s2247_s4 + $0x1ec] sm:$0xf0] }
  0x32   : > { %v1814_v7 = vld [vmem:[%s2247_s4 + $0x2e0] sm:$0xf]  ;;  %v2059_v8 = vld [vmem:[%s2247_s4 + $0x2ec] sm:$0xf0]  ;;  %v1687_v9 = vor.u32 %v2027_v6, %v1686_v4 }
  0x33   : > { %v1815_v10 = vor.u32 %v2059_v8, %v1814_v7  ;;  %v1942_v11 = vld [vmem:[%s2247_s4 + $0x3e0] sm:$0xf]  ;;  %v2091_v12 = vld [vmem:[%s2247_s4 + $0x3ec] sm:$0xf0]  ;;  %1037 = vmatpush.bf16.msra.mxu0 %v1559_v5 }
  0x34   : > { %v1542_v13 = vld [vmem:[%s2247_s4 + $0xc0] sm:$0xf]  ;;  %v1943_v14 = vor.u32 %v2091_v12, %v1942_v11  ;;  %v1991_v15 = vld [vmem:[%s2247_s4 + $0xcc] sm:$0xf0]  ;;  %1050 = vmatpush.bf16.msra.mxu1 %v1687_v9 }
  0x35   : > { %v1670_v16 = vld [vmem:[%s2247_s4 + $0x1c0] sm:$0xf]  ;;  %v2023_v17 = vld [vmem:[%s2247_s4 + $0x1cc] sm:$0xf0]  ;;  %1063 = vmatpush.bf16.msra.mxu2 %v1815_v10  ;;  %v1543_v18 = vor.u32 %v1991_v15, %v1542_v13 }
  0x36   : > { %v1671_v19 = vor.u32 %v2023_v17, %v1670_v16  ;;  %v1798_v20 = vld [vmem:[%s2247_s4 + $0x2c0] sm:$0xf]  ;;  %v2055_v21 = vld [vmem:[%s2247_s4 + $0x2cc] sm:$0xf0]  ;;  %1076 = vmatpush.bf16.msra.mxu3 %v1943_v14 }
  0x37   : > { %v1926_v22 = vld [vmem:[%s2247_s4 + $0x3c0] sm:$0xf]  ;;  %v1799_v23 = vor.u32 %v2055_v21, %v1798_v20  ;;  %v2087_v24 = vld [vmem:[%s2247_s4 + $0x3cc] sm:$0xf0]  ;;  %1038 = vmatpush.bf16.msra.mxu0 %v1543_v18 }
  0x38   : > { %v1526_v25 = vld [vmem:[%s2247_s4 + $0xa0] sm:$0xf]  ;;  %v1987_v26 = vld [vmem:[%s2247_s4 + $0xac] sm:$0xf0]  ;;  %v1927_v27 = vor.u32 %v2087_v24, %v1926_v22  ;;  %1051 = vmatpush.bf16.msra.mxu1 %v1671_v19 }
  0x39   : > { %v1654_v28 = vld [vmem:[%s2247_s4 + $0x1a0] sm:$0xf]  ;;  %v2019_v29 = vld [vmem:[%s2247_s4 + $0x1ac] sm:$0xf0]  ;;  %v1527_v31 = vor.u32 %v1987_v26, %v1526_v25  ;;  %1064 = vmatpush.bf16.msra.mxu2 %v1799_v23 }
  0x3a   : > { %v1782_v30 = vld [vmem:[%s2247_s4 + $0x2a0] sm:$0xf]  ;;  %v2051_v32 = vld [vmem:[%s2247_s4 + $0x2ac] sm:$0xf0]  ;;  %v1655_v35 = vor.u32 %v2019_v29, %v1654_v28  ;;  %1077 = vmatpush.bf16.msra.mxu3 %v1927_v27 }
  0x3b   : > { %v1910_v33 = vld [vmem:[%s2247_s4 + $0x3a0] sm:$0xf]  ;;  %v2083_v34 = vld [vmem:[%s2247_s4 + $0x3ac] sm:$0xf0]  ;;  %v1783_v36 = vor.u32 %v2051_v32, %v1782_v30  ;;  %1039 = vmatpush.bf16.msra.mxu0 %v1527_v31  ;;  %v1993_v30 = vld [vmem:[%s2247_s4 + $0xe4] sm:$0xf] }
  0x3c   : > { %v1510_v37 = vld [vmem:[%s2247_s4 + $0x80] sm:$0xf]  ;;  %v1983_v38 = vld [vmem:[%s2247_s4 + $0x8c] sm:$0xf0]  ;;  %v1911_v40 = vor.u32 %v2083_v34, %v1910_v33  ;;  %1052 = vmatpush.bf16.msra.mxu1 %v1655_v35  ;;  %v1560_v31 = vld [vmem:[%s2247_s4 + $0xf0] sm:$0xf0] }
  0x3d   : > { %v1638_v39 = vld [vmem:[%s2247_s4 + $0x180] sm:$0xf]  ;;  %v2015_v41 = vld [vmem:[%s2247_s4 + $0x18c] sm:$0xf0]  ;;  %v1511_v46 = vor.u32 %v1983_v38, %v1510_v37  ;;  %1065 = vmatpush.bf16.msra.mxu2 %v1783_v36  ;;  %v2025_v32 = vld [vmem:[%s2247_s4 + $0x1e4] sm:$0xf] }
  0x3e   : > { %v1766_v42 = vld [vmem:[%s2247_s4 + $0x280] sm:$0xf]  ;;  %v2047_v43 = vld [vmem:[%s2247_s4 + $0x28c] sm:$0xf0]  ;;  %v1639_v47 = vor.u32 %v2015_v41, %v1638_v39  ;;  %1078 = vmatpush.bf16.msra.mxu3 %v1911_v40  ;;  %v1688_v34 = vld [vmem:[%s2247_s4 + $0x1f0] sm:$0xf0] }
  0x3f   : > { %v1894_v44 = vld [vmem:[%s2247_s4 + $0x380] sm:$0xf]  ;;  %v2079_v45 = vld [vmem:[%s2247_s4 + $0x38c] sm:$0xf0]  ;;  %v1767_v48 = vor.u32 %v2047_v43, %v1766_v42  ;;  %1040 = vmatpush.bf16.msra.mxu0 %v1511_v46  ;;  %v2057_v35 = vld [vmem:[%s2247_s4 + $0x2e4] sm:$0xf]  ;;  %v1563_v42 = vor.u32 %v1993_v30, %v1560_v31  ;;  %v1691_v43 = vor.u32 %v2025_v32, %v1688_v34 }
  0x40   : > { %v1494_v49 = vld [vmem:[%s2247_s4 + $0x60] sm:$0xf]  ;;  %v1979_v50 = vld [vmem:[%s2247_s4 + $0x6c] sm:$0xf0]  ;;  %v1895_v52 = vor.u32 %v2079_v45, %v1894_v44  ;;  %1053 = vmatpush.bf16.msra.mxu1 %v1639_v47  ;;  %v1816_v36 = vld [vmem:[%s2247_s4 + $0x2f0] sm:$0xf0] }
  0x41   : > { %v1622_v51 = vld [vmem:[%s2247_s4 + $0x160] sm:$0xf]  ;;  %v2011_v53 = vld [vmem:[%s2247_s4 + $0x16c] sm:$0xf0]  ;;  %v1495_v58 = vor.u32 %v1979_v50, %v1494_v49  ;;  %1066 = vmatpush.bf16.msra.mxu2 %v1767_v48  ;;  %v2089_v39 = vld [vmem:[%s2247_s4 + $0x3e4] sm:$0xf]  ;;  %v1819_v44 = vor.u32 %v2057_v35, %v1816_v36 }
  0x42   : > { %v1750_v54 = vld [vmem:[%s2247_s4 + $0x260] sm:$0xf]  ;;  %v2043_v55 = vld [vmem:[%s2247_s4 + $0x26c] sm:$0xf0]  ;;  %v1623_v59 = vor.u32 %v2011_v53, %v1622_v51  ;;  %1079 = vmatpush.bf16.msra.mxu3 %v1895_v52  ;;  %v1944_v40 = vld [vmem:[%s2247_s4 + $0x3f0] sm:$0xf0] }
  0x43   : > { %v1878_v56 = vld [vmem:[%s2247_s4 + $0x360] sm:$0xf]  ;;  %v2075_v57 = vld [vmem:[%s2247_s4 + $0x36c] sm:$0xf0]  ;;  %v1751_v60 = vor.u32 %v2043_v55, %v1750_v54  ;;  %1041 = vmatpush.bf16.msra.mxu0 %v1495_v58  ;;  %v1989_v45 = vld [vmem:[%s2247_s4 + $0xc4] sm:$0xf]  ;;  %v1947_v48 = vor.u32 %v2089_v39, %v1944_v40 }
  0x44   : > { %v1478_v61 = vld [vmem:[%s2247_s4 + $0x40] sm:$0xf]  ;;  %v1975_v62 = vld [vmem:[%s2247_s4 + $0x4c] sm:$0xf0]  ;;  %v1879_v0 = vor.u32 %v2075_v57, %v1878_v56  ;;  %1054 = vmatpush.bf16.msra.mxu1 %v1623_v59  ;;  %v1544_v46 = vld [vmem:[%s2247_s4 + $0xd0] sm:$0xf0] }
  0x45   : > { %v1606_v63 = vld [vmem:[%s2247_s4 + $0x140] sm:$0xf]  ;;  %v2007_v1 = vld [vmem:[%s2247_s4 + $0x14c] sm:$0xf0]  ;;  %v1479_v6 = vor.u32 %v1975_v62, %v1478_v61  ;;  %1067 = vmatpush.bf16.msra.mxu2 %v1751_v60  ;;  %v2021_v47 = vld [vmem:[%s2247_s4 + $0x1c4] sm:$0xf]  ;;  %v1547_v54 = vor.u32 %v1989_v45, %v1544_v46 }
  0x46   : > { %v1734_v2 = vld [vmem:[%s2247_s4 + $0x240] sm:$0xf]  ;;  %v2039_v3 = vld [vmem:[%s2247_s4 + $0x24c] sm:$0xf0]  ;;  %v1607_v7 = vor.u32 %v2007_v1, %v1606_v63  ;;  %1080 = vmatpush.bf16.msra.mxu3 %v1879_v0  ;;  %v1672_v49 = vld [vmem:[%s2247_s4 + $0x1d0] sm:$0xf0] }
  0x47   : > { %v1862_v4 = vld [vmem:[%s2247_s4 + $0x340] sm:$0xf]  ;;  %v2071_v5 = vld [vmem:[%s2247_s4 + $0x34c] sm:$0xf0]  ;;  %v1735_v8 = vor.u32 %v2039_v3, %v1734_v2  ;;  %1042 = vmatpush.bf16.msra.mxu0 %v1479_v6  ;;  %v2053_v50 = vld [vmem:[%s2247_s4 + $0x2c4] sm:$0xf]  ;;  %v1675_v55 = vor.u32 %v2021_v47, %v1672_v49 }
  0x48   : > { %v1462_v9 = vld [vmem:[%s2247_s4 + $0x20] sm:$0xf]  ;;  %v1971_v10 = vld [vmem:[%s2247_s4 + $0x2c] sm:$0xf0]  ;;  %v1863_v12 = vor.u32 %v2071_v5, %v1862_v4  ;;  %1055 = vmatpush.bf16.msra.mxu1 %v1607_v7  ;;  %v1800_v51 = vld [vmem:[%s2247_s4 + $0x2d0] sm:$0xf0] }
  0x49   : > { %v1590_v11 = vld [vmem:[%s2247_s4 + $0x120] sm:$0xf]  ;;  %v2003_v13 = vld [vmem:[%s2247_s4 + $0x12c] sm:$0xf0]  ;;  %v1463_v18 = vor.u32 %v1971_v10, %v1462_v9  ;;  %1068 = vmatpush.bf16.msra.mxu2 %v1735_v8  ;;  %v2085_v52 = vld [vmem:[%s2247_s4 + $0x3c4] sm:$0xf]  ;;  %v1803_v56 = vor.u32 %v2053_v50, %v1800_v51 }
  0x4a   : > { %v1718_v14 = vld [vmem:[%s2247_s4 + $0x220] sm:$0xf]  ;;  %v2035_v15 = vld [vmem:[%s2247_s4 + $0x22c] sm:$0xf0]  ;;  %v1591_v21 = vor.u32 %v2003_v13, %v1590_v11  ;;  %1081 = vmatpush.bf16.msra.mxu3 %v1863_v12  ;;  %v1928_v53 = vld [vmem:[%s2247_s4 + $0x3d0] sm:$0xf0] }
  0x4b   : > { %v1846_v16 = vld [vmem:[%s2247_s4 + $0x320] sm:$0xf]  ;;  %v2067_v17 = vld [vmem:[%s2247_s4 + $0x32c] sm:$0xf0]  ;;  %v1719_v22 = vor.u32 %v2035_v15, %v1718_v14  ;;  %1043 = vmatpush.bf16.msra.mxu0 %v1463_v18  ;;  %v1985_v57 = vld [vmem:[%s2247_s4 + $0xa4] sm:$0xf]  ;;  %v1931_v60 = vor.u32 %v2085_v52, %v1928_v53 }
  0x4c   : > { %v1446_v19 = vld [vmem:[%s2247_s4] sm:$0xf]  ;;  %v1967_v20 = vld [vmem:[%s2247_s4 + $0xc] sm:$0xf0]  ;;  %v1847_v26 = vor.u32 %v2067_v17, %v1846_v16  ;;  %1056 = vmatpush.bf16.msra.mxu1 %v1591_v21  ;;  %v1528_v58 = vld [vmem:[%s2247_s4 + $0xb0] sm:$0xf0] }
  0x4d   : > { %v1574_v23 = vld [vmem:[%s2247_s4 + $0x100] sm:$0xf]  ;;  %v1999_v24 = vld [vmem:[%s2247_s4 + $0x10c] sm:$0xf0]  ;;  %v1447_v33 = vor.u32 %v1967_v20, %v1446_v19  ;;  %1069 = vmatpush.bf16.msra.mxu2 %v1719_v22  ;;  %v2017_v59 = vld [vmem:[%s2247_s4 + $0x1a4] sm:$0xf]  ;;  %v1531_v2 = vor.u32 %v1985_v57, %v1528_v58 }
  0x4e   : > { %v1702_v25 = vld [vmem:[%s2247_s4 + $0x200] sm:$0xf]  ;;  %v2031_v27 = vld [vmem:[%s2247_s4 + $0x20c] sm:$0xf0]  ;;  %v1575_v37 = vor.u32 %v1999_v24, %v1574_v23  ;;  %1082 = vmatpush.bf16.msra.mxu3 %v1847_v26  ;;  %v1656_v61 = vld [vmem:[%s2247_s4 + $0x1b0] sm:$0xf0] }
  0x4f   : > { %v1830_v28 = vld [vmem:[%s2247_s4 + $0x300] sm:$0xf]  ;;  %v2063_v29 = vld [vmem:[%s2247_s4 + $0x30c] sm:$0xf0]  ;;  %v1703_v38 = vor.u32 %v2031_v27, %v1702_v25  ;;  %1044 = vmatpush.bf16.msra.mxu0 %v1447_v33  ;;  %v2049_v62 = vld [vmem:[%s2247_s4 + $0x2a4] sm:$0xf]  ;;  %v1659_v4 = vor.u32 %v2017_v59, %v1656_v61 }
  0x50   : > { %v1831_v41 = vor.u32 %v2063_v29, %v1830_v28  ;;  %1057 = vmatpush.bf16.msra.mxu1 %v1575_v37  ;;  %v1784_v63 = vld [vmem:[%s2247_s4 + $0x2b0] sm:$0xf0]  ;;  %v2081_v0 = vld [vmem:[%s2247_s4 + $0x3a4] sm:$0xf]  ;;  %v254_v3 = vld [vmem:[%s2240_s28 + $0x8] sm:$0xff] }
  0x51   : > { %1070 = vmatpush.bf16.msra.mxu2 %v1703_v38  ;;  %v1912_v1 = vld [vmem:[%s2247_s4 + $0x3b0] sm:$0xf0]  ;;  %v1787_v5 = vor.u32 %v2049_v62, %v1784_v63  ;;  %v1981_v6 = vld [vmem:[%s2247_s4 + $0x84] sm:$0xf]  ;;  %v387_v9 = vunpack.c.l.b16 %v254_v3  ;;  %v388_v10 = vunpack.c.h.b16 %v254_v3 }
  0x52   : > { %1083 = vmatpush.bf16.msra.mxu3 %v1831_v41  ;;  %v1512_v7 = vld [vmem:[%s2247_s4 + $0x90] sm:$0xf0]  ;;  %v2013_v8 = vld [vmem:[%s2247_s4 + $0x184] sm:$0xf]  ;;  %v1915_v11 = vor.u32 %v2081_v0, %v1912_v1 }
  0x53   : > { %1089 = vmatpush.bf16.msrb.mxu0 %v1563_v42  ;;  %v1640_v12 = vld [vmem:[%s2247_s4 + $0x190] sm:$0xf0]  ;;  %v2045_v13 = vld [vmem:[%s2247_s4 + $0x284] sm:$0xf]  ;;  %v2347_v17 = vpack.c.b16 %v387_v9, %v387_v9  ;;  %v2349_v18 = vpack.c.b16 %v388_v10, %v388_v10  ;;  %v1515_v20 = vor.u32 %v1981_v6, %v1512_v7  ;;  %v1996_v9 = vld [vmem:[%s2247_s4 + $0xf4] sm:$0xf0] }
  0x54   : > { %1102 = vmatpush.bf16.msrb.mxu1 %v1691_v43  ;;  %v1768_v14 = vld [vmem:[%s2247_s4 + $0x290] sm:$0xf0]  ;;  %v2077_v15 = vld [vmem:[%s2247_s4 + $0x384] sm:$0xf]  ;;  %v1643_v23 = vor.u32 %v2013_v8, %v1640_v12  ;;  %v1566_v8 = vld [vmem:[%s2247_s4 + $0xe8] sm:$0xf] }
  0x55   : > { %1115 = vmatpush.bf16.msrb.mxu2 %v1819_v44  ;;  %v1896_v16 = vld [vmem:[%s2247_s4 + $0x390] sm:$0xf0]  ;;  %v253_v19 = vld [vmem:[%s2240_s28] sm:$0xff]  ;;  %v1771_v24 = vor.u32 %v2045_v13, %v1768_v14  ;;  %1084 = vmatmul.bf16.vlgmr.msra.gmra.mxu3 %v2349_v18  ;;  %v1694_v10 = vld [vmem:[%s2247_s4 + $0x1e8] sm:$0xf] }
  0x56   : > { %1128 = vmatpush.bf16.msrb.mxu3 %v1947_v48  ;;  %v385_v21 = vunpack.c.l.b16 %v253_v19  ;;  %v386_v22 = vunpack.c.h.b16 %v253_v19  ;;  %v1977_v25 = vld [vmem:[%s2247_s4 + $0x64] sm:$0xf]  ;;  %v1496_v26 = vld [vmem:[%s2247_s4 + $0x70] sm:$0xf0]  ;;  %v1899_v28 = vor.u32 %v2077_v15, %v1896_v16  ;;  %1071 = vmatmul.bf16.vlgmr.msra.gmra.mxu2 %v2347_v17  ;;  %v2028_v12 = vld [vmem:[%s2247_s4 + $0x1f4] sm:$0xf0] }
  0x57   : > { %1090 = vmatpush.bf16.msrb.mxu0 %v1547_v54  ;;  %v2009_v27 = vld [vmem:[%s2247_s4 + $0x164] sm:$0xf]  ;;  %v1624_v29 = vld [vmem:[%s2247_s4 + $0x170] sm:$0xf0]  ;;  %v1499_v36 = vor.u32 %v1977_v25, %v1496_v26  ;;  %v1822_v13 = vld [vmem:[%s2247_s4 + $0x2e8] sm:$0xf] }
  0x58   : > { %1103 = vmatpush.bf16.msrb.mxu1 %v1675_v55  ;;  %v2041_v30 = vld [vmem:[%s2247_s4 + $0x264] sm:$0xf]  ;;  %v1752_v31 = vld [vmem:[%s2247_s4 + $0x270] sm:$0xf0]  ;;  %v2359_v32 = vpack.c.b16 %v385_v21, %v385_v21  ;;  %v2361_v33 = vpack.c.b16 %v386_v22, %v386_v22  ;;  %v1627_v37 = vor.u32 %v2009_v27, %v1624_v29  ;;  %v2060_v14 = vld [vmem:[%s2247_s4 + $0x2f4] sm:$0xf0]  ;;  %v1567_v22 = vor.u32 %v1996_v9, %v1566_v8 }
  0x59   : > { %1116 = vmatpush.bf16.msrb.mxu2 %v1803_v56  ;;  %v2073_v34 = vld [vmem:[%s2247_s4 + $0x364] sm:$0xf]  ;;  %v1880_v35 = vld [vmem:[%s2247_s4 + $0x370] sm:$0xf0]  ;;  %v1755_v38 = vor.u32 %v2041_v30, %v1752_v31  ;;  %v1950_v19 = vld [vmem:[%s2247_s4 + $0x3e8] sm:$0xf] }
  0x5a   : > { %1129 = vmatpush.bf16.msrb.mxu3 %v1931_v60  ;;  %1058 = vmatmul.bf16.vlgmr.msra.gmra.mxu1 %v2361_v33  ;;  %v1973_v39 = vld [vmem:[%s2247_s4 + $0x44] sm:$0xf]  ;;  %v1480_v40 = vld [vmem:[%s2247_s4 + $0x50] sm:$0xf0]  ;;  %v1883_v42 = vor.u32 %v2073_v34, %v1880_v35  ;;  %v1550_v25 = vld [vmem:[%s2247_s4 + $0xc8] sm:$0xf] }
  0x5b   : > { %1091 = vmatpush.bf16.msrb.mxu0 %v1531_v2  ;;  %v2005_v41 = vld [vmem:[%s2247_s4 + $0x144] sm:$0xf]  ;;  %v1608_v43 = vld [vmem:[%s2247_s4 + $0x150] sm:$0xf0]  ;;  %v1483_v48 = vor.u32 %v1973_v39, %v1480_v40  ;;  %v1992_v26 = vld [vmem:[%s2247_s4 + $0xd4] sm:$0xf0] }
  0x5c   : > { %1104 = vmatpush.bf16.msrb.mxu1 %v1659_v4  ;;  %v2037_v44 = vld [vmem:[%s2247_s4 + $0x244] sm:$0xf]  ;;  %v1736_v45 = vld [vmem:[%s2247_s4 + $0x250] sm:$0xf0]  ;;  %1045 = vmatmul.bf16.vlgmr.msra.gmra.mxu0 %v2359_v32  ;;  %v1611_v49 = vor.u32 %v2005_v41, %v1608_v43  ;;  %v1678_v27 = vld [vmem:[%s2247_s4 + $0x1c8] sm:$0xf] }
  0x5d   : > { %1117 = vmatpush.bf16.msrb.mxu2 %v1787_v5  ;;  %v2069_v46 = vld [vmem:[%s2247_s4 + $0x344] sm:$0xf]  ;;  %v1864_v47 = vld [vmem:[%s2247_s4 + $0x350] sm:$0xf0]  ;;  %v1739_v50 = vor.u32 %v2037_v44, %v1736_v45  ;;  %v2024_v29 = vld [vmem:[%s2247_s4 + $0x1d4] sm:$0xf0] }
  0x5e   : > { %1130 = vmatpush.bf16.msrb.mxu3 %v1915_v11  ;;  %v1969_v51 = vld [vmem:[%s2247_s4 + $0x24] sm:$0xf]  ;;  %v1464_v52 = vld [vmem:[%s2247_s4 + $0x30] sm:$0xf0]  ;;  %v1867_v54 = vor.u32 %v2069_v46, %v1864_v47  ;;  %v1806_v30 = vld [vmem:[%s2247_s4 + $0x2c8] sm:$0xf] }
  0x5f   : > { %1092 = vmatpush.bf16.msrb.mxu0 %v1515_v20  ;;  %v2001_v53 = vld [vmem:[%s2247_s4 + $0x124] sm:$0xf]  ;;  %v1592_v55 = vld [vmem:[%s2247_s4 + $0x130] sm:$0xf0]  ;;  %v1467_v60 = vor.u32 %v1969_v51, %v1464_v52  ;;  %v2092_v20 = vld [vmem:[%s2247_s4 + $0x3f4] sm:$0xf0] }
  0x60   : > { %1105 = vmatpush.bf16.msrb.mxu1 %v1643_v23  ;;  %v2033_v56 = vld [vmem:[%s2247_s4 + $0x224] sm:$0xf]  ;;  %v1720_v57 = vld [vmem:[%s2247_s4 + $0x230] sm:$0xf0]  ;;  %v1595_v63 = vor.u32 %v2001_v53, %v1592_v55  ;;  %v1695_v23 = vor.u32 %v2028_v12, %v1694_v10  ;;  %v2056_v31 = vld [vmem:[%s2247_s4 + $0x2d4] sm:$0xf0] }
  0x61   : > { %1118 = vmatpush.bf16.msrb.mxu2 %v1771_v24  ;;  %v2065_v58 = vld [vmem:[%s2247_s4 + $0x324] sm:$0xf]  ;;  %v1848_v59 = vld [vmem:[%s2247_s4 + $0x330] sm:$0xf0]  ;;  %v1723_v0 = vor.u32 %v2033_v56, %v1720_v57  ;;  %v1823_v24 = vor.u32 %v2060_v14, %v1822_v13  ;;  %v1934_v34 = vld [vmem:[%s2247_s4 + $0x3c8] sm:$0xf] }
  0x62   : > { %1131 = vmatpush.bf16.msrb.mxu3 %v1899_v28  ;;  %v1965_v61 = vld [vmem:[%s2247_s4 + $0x4] sm:$0xf]  ;;  %v1448_v62 = vld [vmem:[%s2247_s4 + $0x10] sm:$0xf0]  ;;  %v1851_v4 = vor.u32 %v2065_v58, %v1848_v59  ;;  %v1951_v28 = vor.u32 %v2092_v20, %v1950_v19  ;;  %v2088_v35 = vld [vmem:[%s2247_s4 + $0x3d4] sm:$0xf0] }
  0x63   : > { %1093 = vmatpush.bf16.msrb.mxu0 %v1499_v36  ;;  %v1997_v1 = vld [vmem:[%s2247_s4 + $0x104] sm:$0xf]  ;;  %v1576_v2 = vld [vmem:[%s2247_s4 + $0x110] sm:$0xf0]  ;;  %v1451_v11 = vor.u32 %v1965_v61, %v1448_v62  ;;  %v1551_v36 = vor.u32 %v1992_v26, %v1550_v25  ;;  %v1534_v39 = vld [vmem:[%s2247_s4 + $0xa8] sm:$0xf] }
  0x64   : > { %1106 = vmatpush.bf16.msrb.mxu1 %v1627_v37  ;;  %v2029_v3 = vld [vmem:[%s2247_s4 + $0x204] sm:$0xf]  ;;  %v1704_v5 = vld [vmem:[%s2247_s4 + $0x210] sm:$0xf0]  ;;  %v1579_v15 = vor.u32 %v1997_v1, %v1576_v2  ;;  %v1679_v37 = vor.u32 %v2024_v29, %v1678_v27  ;;  %v1988_v40 = vld [vmem:[%s2247_s4 + $0xb4] sm:$0xf0] }
  0x65   : > { %1119 = vmatpush.bf16.msrb.mxu2 %v1755_v38  ;;  %v2061_v6 = vld [vmem:[%s2247_s4 + $0x304] sm:$0xf]  ;;  %v1832_v7 = vld [vmem:[%s2247_s4 + $0x310] sm:$0xf0]  ;;  %v1707_v16 = vor.u32 %v2029_v3, %v1704_v5  ;;  %v1807_v38 = vor.u32 %v2056_v31, %v1806_v30  ;;  %v1662_v41 = vld [vmem:[%s2247_s4 + $0x1a8] sm:$0xf] }
  0x66   : > { %1132 = vmatpush.bf16.msrb.mxu3 %v1883_v42  ;;  %v1835_v21 = vor.u32 %v2061_v6, %v1832_v7  ;;  %v1935_v42 = vor.u32 %v2088_v35, %v1934_v34  ;;  %v2020_v43 = vld [vmem:[%s2247_s4 + $0x1b4] sm:$0xf0]  ;;  %v1790_v44 = vld [vmem:[%s2247_s4 + $0x2a8] sm:$0xf] }
  0x67   : > { %1094 = vmatpush.bf16.msrb.mxu0 %v1483_v48  ;;  %v2052_v45 = vld [vmem:[%s2247_s4 + $0x2b4] sm:$0xf0]  ;;  %v1918_v46 = vld [vmem:[%s2247_s4 + $0x3a8] sm:$0xf]  ;;  %v1535_v48 = vor.u32 %v1988_v40, %v1534_v39 }
  0x68   : > { %1107 = vmatpush.bf16.msrb.mxu1 %v1611_v49  ;;  %v2084_v47 = vld [vmem:[%s2247_s4 + $0x3b4] sm:$0xf0]  ;;  %v1663_v49 = vor.u32 %v2020_v43, %v1662_v41  ;;  %v1518_v51 = vld [vmem:[%s2247_s4 + $0x88] sm:$0xf] }
  0x69   : > { %1120 = vmatpush.bf16.msrb.mxu2 %v1739_v50  ;;  %v1791_v50 = vor.u32 %v2052_v45, %v1790_v44  ;;  %v1984_v52 = vld [vmem:[%s2247_s4 + $0x94] sm:$0xf0]  ;;  %v1646_v53 = vld [vmem:[%s2247_s4 + $0x188] sm:$0xf] }
  0x6a   : > { %1133 = vmatpush.bf16.msrb.mxu3 %v1867_v54  ;;  %v1919_v54 = vor.u32 %v2084_v47, %v1918_v46  ;;  %v2016_v55 = vld [vmem:[%s2247_s4 + $0x194] sm:$0xf0]  ;;  %v1774_v56 = vld [vmem:[%s2247_s4 + $0x288] sm:$0xf] }
  0x6b   : > { %1095 = vmatpush.bf16.msrb.mxu0 %v1467_v60  ;;  %v2048_v57 = vld [vmem:[%s2247_s4 + $0x294] sm:$0xf0]  ;;  %v1902_v58 = vld [vmem:[%s2247_s4 + $0x388] sm:$0xf]  ;;  %v1519_v60 = vor.u32 %v1984_v52, %v1518_v51  ;;  %v1647_v61 = vor.u32 %v2016_v55, %v1646_v53  ;;  %v1696_v52 = vld [vmem:[%s2247_s4 + $0x1f8] sm:$0xf0] }
  0x6c   : > { %1108 = vmatpush.bf16.msrb.mxu1 %v1595_v63  ;;  %v2080_v59 = vld [vmem:[%s2247_s4 + $0x394] sm:$0xf0]  ;;  %v1775_v62 = vor.u32 %v2048_v57, %v1774_v56  ;;  %v1502_v63 = vld [vmem:[%s2247_s4 + $0x68] sm:$0xf]  ;;  %v2058_v53 = vld [vmem:[%s2247_s4 + $0x2ec] sm:$0xf] }
  0x6d   : > { %1121 = vmatpush.bf16.msrb.mxu2 %v1723_v0  ;;  %v1980_v0 = vld [vmem:[%s2247_s4 + $0x74] sm:$0xf0]  ;;  %v1630_v1 = vld [vmem:[%s2247_s4 + $0x168] sm:$0xf]  ;;  %v1903_v2 = vor.u32 %v2080_v59, %v1902_v58  ;;  %v2090_v57 = vld [vmem:[%s2247_s4 + $0x3ec] sm:$0xf] }
  0x6e   : > { %1134 = vmatpush.bf16.msrb.mxu3 %v1851_v4  ;;  %v2012_v3 = vld [vmem:[%s2247_s4 + $0x174] sm:$0xf0]  ;;  %v1758_v4 = vld [vmem:[%s2247_s4 + $0x268] sm:$0xf]  ;;  %v1503_v8 = vor.u32 %v1980_v0, %v1502_v63  ;;  %v1952_v58 = vld [vmem:[%s2247_s4 + $0x3f8] sm:$0xf0] }
  0x6f   : > { %1096 = vmatpush.bf16.msrb.mxu0 %v1451_v11  ;;  %v2044_v5 = vld [vmem:[%s2247_s4 + $0x274] sm:$0xf0]  ;;  %v1886_v6 = vld [vmem:[%s2247_s4 + $0x368] sm:$0xf]  ;;  %v1631_v9 = vor.u32 %v2012_v3, %v1630_v1  ;;  %v1990_v63 = vld [vmem:[%s2247_s4 + $0xcc] sm:$0xf] }
  0x70   : > { %1109 = vmatpush.bf16.msrb.mxu1 %v1579_v15  ;;  %v2076_v7 = vld [vmem:[%s2247_s4 + $0x374] sm:$0xf0]  ;;  %v1759_v10 = vor.u32 %v2044_v5, %v1758_v4  ;;  %v1486_v11 = vld [vmem:[%s2247_s4 + $0x48] sm:$0xf]  ;;  %v1552_v0 = vld [vmem:[%s2247_s4 + $0xd8] sm:$0xf0] }
  0x71   : > { %1122 = vmatpush.bf16.msrb.mxu2 %v1707_v16  ;;  %v1976_v12 = vld [vmem:[%s2247_s4 + $0x54] sm:$0xf0]  ;;  %v1614_v13 = vld [vmem:[%s2247_s4 + $0x148] sm:$0xf]  ;;  %v1887_v14 = vor.u32 %v2076_v7, %v1886_v6  ;;  %v2022_v1 = vld [vmem:[%s2247_s4 + $0x1cc] sm:$0xf] }
  0x72   : > { %1135 = vmatpush.bf16.msrb.mxu3 %v1835_v21  ;;  %1097 = vmatmul.bf16.vlgmr.msrb.gmra.mxu0 %v2359_v32  ;;  %v2008_v15 = vld [vmem:[%s2247_s4 + $0x154] sm:$0xf0]  ;;  %v1742_v16 = vld [vmem:[%s2247_s4 + $0x248] sm:$0xf]  ;;  %v1680_v3 = vld [vmem:[%s2247_s4 + $0x1d8] sm:$0xf0] }
  0x73   : > { %1141 = vmatpush.bf16.msra.mxu0 %v1567_v22  ;;  %1110 = vmatmul.bf16.vlgmr.msrb.gmra.mxu1 %v2361_v33  ;;  %v2040_v19 = vld [vmem:[%s2247_s4 + $0x254] sm:$0xf0]  ;;  %v1870_v20 = vld [vmem:[%s2247_s4 + $0x348] sm:$0xf]  ;;  %v1487_v22 = vor.u32 %v1976_v12, %v1486_v11  ;;  %v2054_v4 = vld [vmem:[%s2247_s4 + $0x2cc] sm:$0xf] }
  0x74   : > { %1154 = vmatpush.bf16.msra.mxu1 %v1695_v23  ;;  %1123 = vmatmul.bf16.vlgmr.msrb.gmra.mxu2 %v2347_v17  ;;  %v2072_v21 = vld [vmem:[%s2247_s4 + $0x354] sm:$0xf0]  ;;  %v1615_v23 = vor.u32 %v2008_v15, %v1614_v13  ;;  %v1470_v25 = vld [vmem:[%s2247_s4 + $0x28] sm:$0xf]  ;;  %v1808_v5 = vld [vmem:[%s2247_s4 + $0x2d8] sm:$0xf0] }
  0x75   : > { %1167 = vmatpush.bf16.msra.mxu2 %v1823_v24  ;;  %1136 = vmatmul.bf16.vlgmr.msrb.gmra.mxu3 %v2349_v18  ;;  %v1743_v24 = vor.u32 %v2040_v19, %v1742_v16  ;;  %v1972_v26 = vld [vmem:[%s2247_s4 + $0x34] sm:$0xf0]  ;;  %v1598_v27 = vld [vmem:[%s2247_s4 + $0x128] sm:$0xf]  ;;  %v2086_v6 = vld [vmem:[%s2247_s4 + $0x3cc] sm:$0xf] }
  0x76   : > { %1180 = vmatpush.bf16.msra.mxu3 %v1951_v28  ;;  %v1871_v28 = vor.u32 %v2072_v21, %v1870_v20  ;;  %v2004_v29 = vld [vmem:[%s2247_s4 + $0x134] sm:$0xf0]  ;;  %v1726_v30 = vld [vmem:[%s2247_s4 + $0x228] sm:$0xf]  ;;  %v1936_v7 = vld [vmem:[%s2247_s4 + $0x3d8] sm:$0xf0] }
  0x77   : > { %1142 = vmatpush.bf16.msra.mxu0 %v1551_v36  ;;  %v2036_v31 = vld [vmem:[%s2247_s4 + $0x234] sm:$0xf0]  ;;  %v1854_v34 = vld [vmem:[%s2247_s4 + $0x328] sm:$0xf]  ;;  %v1471_v36 = vor.u32 %v1972_v26, %v1470_v25  ;;  %v1599_v39 = vor.u32 %v2004_v29, %v1598_v27  ;;  %v1986_v11 = vld [vmem:[%s2247_s4 + $0xac] sm:$0xf] }
  0x78   : > { %1155 = vmatpush.bf16.msra.mxu1 %v1679_v37  ;;  %v2068_v35 = vld [vmem:[%s2247_s4 + $0x334] sm:$0xf0]  ;;  %v1454_v37 = vld [vmem:[%s2247_s4 + $0x8] sm:$0xf]  ;;  %v1727_v40 = vor.u32 %v2036_v31, %v1726_v30  ;;  %v1536_v12 = vld [vmem:[%s2247_s4 + $0xb8] sm:$0xf0] }
  0x79   : > { %1168 = vmatpush.bf16.msra.mxu2 %v1807_v38  ;;  %v1968_v38 = vld [vmem:[%s2247_s4 + $0x14] sm:$0xf0]  ;;  %v1582_v41 = vld [vmem:[%s2247_s4 + $0x108] sm:$0xf]  ;;  %v1855_v44 = vor.u32 %v2068_v35, %v1854_v34  ;;  %v2018_v13 = vld [vmem:[%s2247_s4 + $0x1ac] sm:$0xf] }
  0x7a   : > { %1181 = vmatpush.bf16.msra.mxu3 %v1935_v42  ;;  %v2000_v42 = vld [vmem:[%s2247_s4 + $0x114] sm:$0xf0]  ;;  %v1710_v43 = vld [vmem:[%s2247_s4 + $0x208] sm:$0xf]  ;;  %v1455_v51 = vor.u32 %v1968_v38, %v1454_v37  ;;  %v1664_v15 = vld [vmem:[%s2247_s4 + $0x1b8] sm:$0xf0] }
  0x7b   : > { %1143 = vmatpush.bf16.msra.mxu0 %v1535_v48  ;;  %v2032_v45 = vld [vmem:[%s2247_s4 + $0x214] sm:$0xf0]  ;;  %v1838_v46 = vld [vmem:[%s2247_s4 + $0x308] sm:$0xf]  ;;  %v1994_v48 = vld [vmem:[%s2247_s4 + $0xec] sm:$0xf]  ;;  %v1583_v55 = vor.u32 %v2000_v42, %v1582_v41 }
  0x7c   : > { %1156 = vmatpush.bf16.msra.mxu1 %v1663_v49  ;;  %v2064_v47 = vld [vmem:[%s2247_s4 + $0x314] sm:$0xf0]  ;;  %v1568_v49 = vld [vmem:[%s2247_s4 + $0xf8] sm:$0xf0]  ;;  %v1711_v56 = vor.u32 %v2032_v45, %v1710_v43  ;;  %v2050_v16 = vld [vmem:[%s2247_s4 + $0x2ac] sm:$0xf] }
  0x7d   : > { %1169 = vmatpush.bf16.msra.mxu2 %v1791_v50  ;;  %v2026_v50 = vld [vmem:[%s2247_s4 + $0x1ec] sm:$0xf]  ;;  %v1839_v59 = vor.u32 %v2064_v47, %v1838_v46  ;;  %v1792_v19 = vld [vmem:[%s2247_s4 + $0x2b8] sm:$0xf0] }
  0x7e   : > { %1182 = vmatpush.bf16.msra.mxu3 %v1919_v54  ;;  %v1824_v54 = vld [vmem:[%s2247_s4 + $0x2f8] sm:$0xf0]  ;;  %v2082_v20 = vld [vmem:[%s2247_s4 + $0x3ac] sm:$0xf] }
  0x7f   : > { %1144 = vmatpush.bf16.msra.mxu0 %v1519_v60  ;;  %v1571_v60 = vor.u32 %v1994_v48, %v1568_v49  ;;  %v1920_v21 = vld [vmem:[%s2247_s4 + $0x3b8] sm:$0xf0]  ;;  %v1982_v25 = vld [vmem:[%s2247_s4 + $0x8c] sm:$0xf] }
  0x80   : > { %1157 = vmatpush.bf16.msra.mxu1 %v1647_v61  ;;  %v1699_v61 = vor.u32 %v2026_v50, %v1696_v52  ;;  %v1520_v26 = vld [vmem:[%s2247_s4 + $0x98] sm:$0xf0]  ;;  %v2014_v27 = vld [vmem:[%s2247_s4 + $0x18c] sm:$0xf] }
  0x81   : > { %1170 = vmatpush.bf16.msra.mxu2 %v1775_v62  ;;  %v1827_v62 = vor.u32 %v2058_v53, %v1824_v54  ;;  %v1648_v29 = vld [vmem:[%s2247_s4 + $0x198] sm:$0xf0]  ;;  %v2046_v30 = vld [vmem:[%s2247_s4 + $0x28c] sm:$0xf] }
  0x82   : > { %1183 = vmatpush.bf16.msra.mxu3 %v1903_v2  ;;  %v1955_v2 = vor.u32 %v2090_v57, %v1952_v58  ;;  %v1776_v31 = vld [vmem:[%s2247_s4 + $0x298] sm:$0xf0]  ;;  %v2078_v34 = vld [vmem:[%s2247_s4 + $0x38c] sm:$0xf]  ;;  %v1651_v37 = vor.u32 %v2014_v27, %v1648_v29 }
  0x83   : > { %1145 = vmatpush.bf16.msra.mxu0 %v1503_v8  ;;  %v1555_v8 = vor.u32 %v1990_v63, %v1552_v0  ;;  %v1904_v35 = vld [vmem:[%s2247_s4 + $0x398] sm:$0xf0]  ;;  %v1779_v38 = vor.u32 %v2046_v30, %v1776_v31  ;;  %v2010_v41 = vld [vmem:[%s2247_s4 + $0x16c] sm:$0xf] }
  0x84   : > { %1158 = vmatpush.bf16.msra.mxu1 %v1631_v9  ;;  %v1683_v9 = vor.u32 %v2022_v1, %v1680_v3  ;;  %v1907_v42 = vor.u32 %v2078_v34, %v1904_v35  ;;  %v1632_v43 = vld [vmem:[%s2247_s4 + $0x178] sm:$0xf0]  ;;  %v2074_v46 = vld [vmem:[%s2247_s4 + $0x36c] sm:$0xf]  ;;  %v249_v34 = vld [vmem:[#allocation2 + $0x10] sm:$0xff] }
  0x85   : > { %1171 = vmatpush.bf16.msra.mxu2 %v1759_v10  ;;  %v1811_v10 = vor.u32 %v2054_v4, %v1808_v5  ;;  %v1760_v45 = vld [vmem:[%s2247_s4 + $0x278] sm:$0xf0]  ;;  %v1635_v49 = vor.u32 %v2010_v41, %v1632_v43  ;;  %v2006_v53 = vld [vmem:[%s2247_s4 + $0x14c] sm:$0xf]  ;;  %v250_v43 = vld [vmem:[#allocation2] sm:$0xff] }
  0x86   : > { %1184 = vmatpush.bf16.msra.mxu3 %v1887_v14  ;;  %v1939_v14 = vor.u32 %v2086_v6, %v1936_v7  ;;  %v1888_v47 = vld [vmem:[%s2247_s4 + $0x378] sm:$0xf0]  ;;  %v2070_v58 = vld [vmem:[%s2247_s4 + $0x34c] sm:$0xf] }
  0x87   : > { %1146 = vmatpush.bf16.msra.mxu0 %v1487_v22  ;;  %v1539_v22 = vor.u32 %v1986_v11, %v1536_v12  ;;  %v1488_v52 = vld [vmem:[%s2247_s4 + $0x58] sm:$0xf0]  ;;  %v1891_v54 = vor.u32 %v2074_v46, %v1888_v47  ;;  %v1970_v63 = vld [vmem:[%s2247_s4 + $0x2c] sm:$0xf] }
  0x88   : > { %1159 = vmatpush.bf16.msra.mxu1 %v1615_v23  ;;  %v1667_v23 = vor.u32 %v2018_v13, %v1664_v15  ;;  %v1744_v57 = vld [vmem:[%s2247_s4 + $0x258] sm:$0xf0]  ;;  %v2002_v1 = vld [vmem:[%s2247_s4 + $0x12c] sm:$0xf] }
  0x89   : > { %1172 = vmatpush.bf16.msra.mxu2 %v1743_v24  ;;  %v1795_v24 = vor.u32 %v2050_v16, %v1792_v19  ;;  %v1472_v0 = vld [vmem:[%s2247_s4 + $0x38] sm:$0xf0]  ;;  %v2034_v4 = vld [vmem:[%s2247_s4 + $0x22c] sm:$0xf] }
  0x8a   : > { %1185 = vmatpush.bf16.msra.mxu3 %v1871_v28  ;;  %v1923_v28 = vor.u32 %v2082_v20, %v1920_v21  ;;  %v1600_v3 = vld [vmem:[%s2247_s4 + $0x138] sm:$0xf0]  ;;  %v2066_v6 = vld [vmem:[%s2247_s4 + $0x32c] sm:$0xf] }
  0x8b   : > { %1147 = vmatpush.bf16.msra.mxu0 %v1471_v36  ;;  %v1523_v36 = vor.u32 %v1982_v25, %v1520_v26  ;;  %v1728_v5 = vld [vmem:[%s2247_s4 + $0x238] sm:$0xf0]  ;;  %v1966_v11 = vld [vmem:[%s2247_s4 + $0xc] sm:$0xf] }
  0x8c   : > { %1160 = vmatpush.bf16.msra.mxu1 %v1599_v39  ;;  %v1978_v39 = vld [vmem:[%s2247_s4 + $0x6c] sm:$0xf]  ;;  %v1856_v7 = vld [vmem:[%s2247_s4 + $0x338] sm:$0xf0] }
  0x8d   : > { %1173 = vmatpush.bf16.msra.mxu2 %v1727_v40  ;;  %v1504_v40 = vld [vmem:[%s2247_s4 + $0x78] sm:$0xf0]  ;;  %v1998_v13 = vld [vmem:[%s2247_s4 + $0x10c] sm:$0xf] }
  0x8e   : > { %1186 = vmatpush.bf16.msra.mxu3 %v1855_v44  ;;  %v2042_v44 = vld [vmem:[%s2247_s4 + $0x26c] sm:$0xf]  ;;  %v1507_v48 = vor.u32 %v1978_v39, %v1504_v40  ;;  %v1456_v12 = vld [vmem:[%s2247_s4 + $0x18] sm:$0xf0] }
  0x8f   : > { %1148 = vmatpush.bf16.msra.mxu0 %v1455_v51  ;;  %v1763_v50 = vor.u32 %v2042_v44, %v1760_v45  ;;  %v1974_v51 = vld [vmem:[%s2247_s4 + $0x4c] sm:$0xf]  ;;  %v1584_v15 = vld [vmem:[%s2247_s4 + $0x118] sm:$0xf0] }
  0x90   : > { %1161 = vmatpush.bf16.msra.mxu1 %v1583_v55  ;;  %v1616_v55 = vld [vmem:[%s2247_s4 + $0x158] sm:$0xf0]  ;;  %v2030_v16 = vld [vmem:[%s2247_s4 + $0x20c] sm:$0xf] }
  0x91   : > { %1174 = vmatpush.bf16.msra.mxu2 %v1711_v56  ;;  %v2038_v56 = vld [vmem:[%s2247_s4 + $0x24c] sm:$0xf]  ;;  %v1712_v19 = vld [vmem:[%s2247_s4 + $0x218] sm:$0xf0] }
  0x92   : > { %1187 = vmatpush.bf16.msra.mxu3 %v1839_v59  ;;  %1149 = vmatmul.bf16.vlgmr.msra.gmra.mxu0 %v2359_v32  ;;  %v1872_v59 = vld [vmem:[%s2247_s4 + $0x358] sm:$0xf0]  ;;  %v2062_v20 = vld [vmem:[%s2247_s4 + $0x30c] sm:$0xf] }
  0x93   : > { %1193 = vmatpush.bf16.msrb.mxu0 %v1571_v60  ;;  %1162 = vmatmul.bf16.vlgmr.msra.gmra.mxu1 %v2361_v33  ;;  %v1491_v60 = vor.u32 %v1974_v51, %v1488_v52  ;;  %v1840_v21 = vld [vmem:[%s2247_s4 + $0x318] sm:$0xf0] }
  0x94   : > { %1206 = vmatpush.bf16.msrb.mxu1 %v1699_v61  ;;  %1175 = vmatmul.bf16.vlgmr.msra.gmra.mxu2 %v2347_v17  ;;  %v1619_v61 = vor.u32 %v2006_v53, %v1616_v55  ;;  %v1843_v25 = vor.u32 %v2062_v20, %v1840_v21 }
  0x95   : > { %1219 = vmatpush.bf16.msrb.mxu2 %v1827_v62  ;;  %1188 = vmatmul.bf16.vlgmr.msra.gmra.mxu3 %v2349_v18  ;;  %v1747_v62 = vor.u32 %v2038_v56, %v1744_v57  ;;  %v251_v56 = vld [vmem:[#allocation2 + $0x18] sm:$0xff] }
  0x96   : > { %1232 = vmatpush.bf16.msrb.mxu3 %v1955_v2  ;;  %v1875_v2 = vor.u32 %v2070_v58, %v1872_v59 }
  0x97   : > { %1194 = vmatpush.bf16.msrb.mxu0 %v1555_v8  ;;  %v1475_v8 = vor.u32 %v1970_v63, %v1472_v0 }
  0x98   : > { %1207 = vmatpush.bf16.msrb.mxu1 %v1683_v9  ;;  %v1603_v9 = vor.u32 %v2002_v1, %v1600_v3 }
  0x99   : > { %1220 = vmatpush.bf16.msrb.mxu2 %v1811_v10  ;;  %v1731_v10 = vor.u32 %v2034_v4, %v1728_v5 }
  0x9a   : > { %1233 = vmatpush.bf16.msrb.mxu3 %v1939_v14  ;;  %v1859_v14 = vor.u32 %v2066_v6, %v1856_v7  ;;  %v252_v6 = vld [vmem:[#allocation2 + $0x8] sm:$0xff] }
  0x9b   : > { %1195 = vmatpush.bf16.msrb.mxu0 %v1539_v22  ;;  %v1459_v22 = vor.u32 %v1966_v11, %v1456_v12 }
  0x9c   : > { %1208 = vmatpush.bf16.msrb.mxu1 %v1667_v23  ;;  %v1587_v23 = vor.u32 %v1998_v13, %v1584_v15 }
  0x9d   : > { %1221 = vmatpush.bf16.msrb.mxu2 %v1795_v24  ;;  %v1715_v24 = vor.u32 %v2030_v16, %v1712_v19 }
  0x9e   : > { %1234 = vmatpush.bf16.msrb.mxu3 %v1923_v28 }
  0x9f   : > { %1196 = vmatpush.bf16.msrb.mxu0 %v1523_v36 }
  0xa0   : > { %1209 = vmatpush.bf16.msrb.mxu1 %v1651_v37 }
  0xa1   : > { %1222 = vmatpush.bf16.msrb.mxu2 %v1779_v38 }
  0xa2   : > { %1235 = vmatpush.bf16.msrb.mxu3 %v1907_v42 }
  0xa3   : > { %1197 = vmatpush.bf16.msrb.mxu0 %v1507_v48 }
  0xa4   : > { %1210 = vmatpush.bf16.msrb.mxu1 %v1635_v49 }
  0xa5   : > { %1223 = vmatpush.bf16.msrb.mxu2 %v1763_v50 }
  0xa6   : > { %1236 = vmatpush.bf16.msrb.mxu3 %v1891_v54 }
  0xa7   : > { %1198 = vmatpush.bf16.msrb.mxu0 %v1491_v60 }
  0xa8   : > { %1211 = vmatpush.bf16.msrb.mxu1 %v1619_v61 }
  0xa9   : > { %1224 = vmatpush.bf16.msrb.mxu2 %v1747_v62 }
  0xaa   : > { %1237 = vmatpush.bf16.msrb.mxu3 %v1875_v2 }
  0xab   : > { %1199 = vmatpush.bf16.msrb.mxu0 %v1475_v8 }
  0xac   : > { %1212 = vmatpush.bf16.msrb.mxu1 %v1603_v9 }
  0xad   : > { %1225 = vmatpush.bf16.msrb.mxu2 %v1731_v10 }
  0xae   : > { %1238 = vmatpush.bf16.msrb.mxu3 %v1859_v14 }
  0xaf   : > { %1200 = vmatpush.bf16.msrb.mxu0 %v1459_v22 }
  0xb0   : > { %1213 = vmatpush.bf16.msrb.mxu1 %v1587_v23 }
  0xb1   : > { %1226 = vmatpush.bf16.msrb.mxu2 %v1715_v24 }
  0xb2   : > { %1239 = vmatpush.bf16.msrb.mxu3 %v1843_v25  ;;  %1201 = vmatmul.bf16.vlgmr.msrb.gmra.mxu0 %v2359_v32 }
  0xb3   : > { %1214 = vmatmul.bf16.vlgmr.msrb.gmra.mxu1 %v2361_v33 }
  0xb4   : > { %1227 = vmatmul.bf16.vlgmr.msrb.gmra.mxu2 %v2347_v17 }
  0xb5   : > { %1240 = vmatmul.bf16.vlgmr.msrb.gmra.mxu3 %v2349_v18 }
  0xd7   : > { %v1059_v26 = vpop.f32.mrf.mxu1 }
  0xd8   : > { %v1085_v31 = vpop.f32.mrf.mxu3 }
  0xd9   : > { %v1046_v27 = vpop.f32.mrf.mxu0  ;;  %v1072_v29 = vpop.f32.mrf.mxu2 }
  0xda   : > { %v1060_v28 = vadd.f32 %v1059_v26, %v1046_v27 }
  0xdc   : > { %v1073_v30 = vadd.f32 %v1072_v29, %v1060_v28 }
  0xde   : > { %v1086_v35 = vadd.f32 %v1085_v31, %v1073_v30 }
  0xdf   : > { %v1061_v36 = vpop.f32.mrf.mxu1 }
  0xe0   : > { %v1245_v37 = vadd.f32 %v1086_v35, %v249_v34  ;;  %v1087_v32 = vpop.f32.mrf.mxu3 }
  0xe1   : > { %v1048_v38 = vpop.f32.mrf.mxu0  ;;  %v1074_v39 = vpop.f32.mrf.mxu2 }
  0xe2   : > { %1249 = vst [vmem:[#allocation2 + $0x10] sm:$0xff] %v1245_v37 }
  0xef   : > { %v1098_v40 = vpop.f32.mrf.mxu0 }
  0xf0   : > { %v1111_v33 = vpop.f32.mrf.mxu1 }
  0xf1   : > { %v1112_v41 = vadd.f32 %v1111_v33, %v1098_v40 }
  0xf7   : > { %v1124_v17 = vpop.f32.mrf.mxu2  ;;  %v1100_v45 = vpop.f32.mrf.mxu0 }
  0xf8   : > { %v1125_v42 = vadd.f32 %v1124_v17, %v1112_v41  ;;  %v1137_v18 = vpop.f32.mrf.mxu3  ;;  %v1113_v46 = vpop.f32.mrf.mxu1 }
  0xfa   : > { %v1138_v44 = vadd.f32 %v1137_v18, %v1125_v42 }
  0xfc   : > { %v1246_v47 = vadd.f32 %v1138_v44, %v250_v43 }
  0xfe   : > { %1250 = vst [vmem:[#allocation2] sm:$0xff] %v1246_v47 }
  0xff   : > { %v1126_v48 = vpop.f32.mrf.mxu2 }
 0x100   : > { %v1139_v49 = vpop.f32.mrf.mxu3 }
 0x10f   : > { %v1150_v50 = vpop.f32.mrf.mxu0 }
 0x110   : > { %v1163_v51 = vpop.f32.mrf.mxu1 }
 0x111   : > { %v1164_v52 = vadd.f32 %v1163_v51, %v1150_v50 }
 0x117   : > { %v1176_v53 = vpop.f32.mrf.mxu2  ;;  %v1152_v58 = vpop.f32.mrf.mxu0 }
 0x118   : > { %v1177_v54 = vadd.f32 %v1176_v53, %v1164_v52  ;;  %v1189_v55 = vpop.f32.mrf.mxu3  ;;  %v1165_v59 = vpop.f32.mrf.mxu1 }
 0x11a   : > { %v1190_v57 = vadd.f32 %v1189_v55, %v1177_v54 }
 0x11c   : > { %v1247_v60 = vadd.f32 %v1190_v57, %v251_v56 }
 0x11e   : > { %1251 = vst [vmem:[#allocation2 + $0x18] sm:$0xff] %v1247_v60 }
 0x11f   : > { %v1178_v61 = vpop.f32.mrf.mxu2 }
 0x120   : > { %v1191_v62 = vpop.f32.mrf.mxu3 }
 0x12f   : > { %v1202_v63 = vpop.f32.mrf.mxu0 }
 0x130   : > { %v1215_v0 = vpop.f32.mrf.mxu1 }
 0x131   : > { %v1216_v1 = vadd.f32 %v1215_v0, %v1202_v63 }
 0x137   : > { %v1228_v2 = vpop.f32.mrf.mxu2  ;;  %v1204_v5 = vpop.f32.mrf.mxu0 }
 0x138   : > { %v1229_v3 = vadd.f32 %v1228_v2, %v1216_v1  ;;  %v1241_v4 = vpop.f32.mrf.mxu3  ;;  %v1217_v7 = vpop.f32.mrf.mxu1 }
 0x13a   : > { %v1242_v8 = vadd.f32 %v1241_v4, %v1229_v3 }
 0x13c   : > { %v1248_v9 = vadd.f32 %v1242_v8, %v252_v6  ;;  %1256 = sbr.rel (%p1956_p12) target bundleno = 339 (0x153), region = 40 }
 0x13e   : > { %1252 = vst [vmem:[#allocation2 + $0x8] sm:$0xff] %v1248_v9 }
 0x13f   : > { %v1230_v10 = vpop.f32.mrf.mxu2 }
 0x140   : > { %v1243_v11 = vpop.f32.mrf.mxu3 }
 0x141   : > { %v1257_v12 = vld [vmem:[#allocation3] sm:$0xff]  ;;  %v1265_v13 = vld [vmem:[#allocation2 + $0x10] sm:$0xff]  ;;  %v1258_v14 = vld [vmem:[#allocation3 + $0x18] sm:$0xff]  ;;  %v2178_v17 = vmov 0.0  }
 0x142   : > { %v1261_v15 = vmul.f32 0.75, %v1257_v12  ;;  %v1262_v16 = vmul.f32 0.75, %v1258_v14  ;;  %v1266_v19 = vld [vmem:[#allocation2] sm:$0xff]  ;;  %v1259_v20 = vld [vmem:[#allocation3 + $0x8] sm:$0xff]  ;;  %v1267_v21 = vld [vmem:[#allocation2 + $0x18] sm:$0xff] }
 0x143   : > { %v1263_v22 = vmul.f32 0.75, %v1259_v20  ;;  %v1260_v23 = vld [vmem:[#allocation3 + $0x10] sm:$0xff]  ;;  %v1273_v25 = vld [vmem:[#allocation4] sm:$0xff]  ;;  %v1274_v30 = vld [vmem:[#allocation4 + $0x8] sm:$0xff] }
 0x144   : > { %v1269_v26 = vadd.f32 %v1265_v13, %v1261_v15  ;;  %v1270_v27 = vadd.f32 %v1266_v19, %v1262_v16  ;;  %v1264_v28 = vmul.f32 0.75, %v1260_v23  ;;  %v1277_v29 = vmul.f32 0.97, %v1273_v25  ;;  %v1275_v31 = vld [vmem:[#allocation4 + $0x10] sm:$0xff]  ;;  %v1276_v34 = vld [vmem:[#allocation4 + $0x18] sm:$0xff] }
 0x145   : > { %v1268_v24 = vld [vmem:[#allocation2 + $0x8] sm:$0xff]  ;;  %v1271_v35 = vadd.f32 %v1267_v21, %v1263_v22  ;;  %v1278_v36 = vmul.f32 0.97, %v1274_v30  ;;  %v1279_v37 = vmul.f32 0.97, %v1275_v31 }
 0x146   : > { %v1280_v38 = vmul.f32 0.97, %v1276_v34  ;;  %1297 = vst [vmem:[#allocation3] sm:$0xff] %v1269_v26  ;;  %v1272_v39 = vadd.f32 %v1268_v24, %v1264_v28  ;;  %v1281_v32 = vadd.f32 %v1277_v29, %v1269_v26 }
 0x147   : > { %1298 = vst [vmem:[#allocation3 + $0x18] sm:$0xff] %v1270_v27  ;;  %v1282_v40 = vadd.f32 %v1278_v36, %v1270_v27  ;;  %v1283_v33 = vadd.f32 %v1279_v37, %v1271_v35 }
 0x148   : > { %1299 = vst [vmem:[#allocation3 + $0x8] sm:$0xff] %v1271_v35  ;;  %vm1285_vm0 = vcmp.ge.f32.partialorder %v1281_v32, 1.25  ;;  %v1284_v41 = vadd.f32 %v1280_v38, %v1272_v39 }
 0x149   : > { %1300 = vst [vmem:[#allocation3 + $0x10] sm:$0xff] %v1272_v39  ;;  %v1957_v42 = vsel %vm1285_vm0, 1.0, %v2178_v17  ;;  %vm1286_vm1 = vcmp.ge.f32.partialorder %v1282_v40, 1.25  ;;  %vm1287_vm2 = vcmp.ge.f32.partialorder %v1283_v33, 1.25 }
 0x14a   : > { %v1301_v18 = vsub.f32 1.0, %v1957_v42  ;;  %v1958_v43 = vsel %vm1286_vm1, 1.0, %v2178_v17  ;;  %v1959_v44 = vsel %vm1287_vm2, 1.0, %v2178_v17  ;;  %vm1288_vm3 = vcmp.ge.f32.partialorder %v1284_v41, 1.25 }
 0x14b   : > { %v1302_v45 = vsub.f32 1.0, %v1958_v43  ;;  %v1303_v46 = vsub.f32 1.0, %v1959_v44  ;;  %v1960_v47 = vsel %vm1288_vm3, 1.0, %v2178_v17  ;;  %v1313_v48 = vpack.c.bf16 %v1958_v43, %v1957_v42 }
 0x14c   : > { %v1305_v49 = vmul.f32 %v1301_v18, %v1281_v32  ;;  %v1304_v50 = vsub.f32 1.0, %v1960_v47  ;;  %v1314_v54 = vpack.c.bf16 %v1960_v47, %v1959_v44 }
 0x14d   : > { %v1306_v51 = vmul.f32 %v1302_v45, %v1282_v40  ;;  %v1307_v52 = vmul.f32 %v1303_v46, %v1283_v33  ;;  %1315 = vst [vmem:[%s2235_s25] sm:$0xff] %v1313_v48 }
 0x14e   : > { %1309 = vst [vmem:[#allocation4] sm:$0xff] %v1305_v49  ;;  %v1308_v53 = vmul.f32 %v1304_v50, %v1284_v41 }
 0x14f   : > { %1310 = vst [vmem:[#allocation4 + $0x8] sm:$0xff] %v1306_v51 }
 0x150   : > { %1311 = vst [vmem:[#allocation4 + $0x10] sm:$0xff] %v1307_v52 }
 0x151   : > { %1312 = vst [vmem:[#allocation4 + $0x18] sm:$0xff] %v1308_v53 }
 0x152   : > { %1316 = vst [vmem:[%s2235_s25 + $0x8] sm:$0xff] %v1314_v54 }
 0x153 PF: > { %s12_s13 = sadd.s32 1, %s2174_s13   ;;  %s2553_s9 = smov %s2166_s11 }
 0x154   : > { %p9_p13 = scmp.ge.s32.totalorder %s12_s13, 66   ;;  %s2554_s10 = smov %s2170_s12 }
 0x155   : > { %s2555_s11 = smov %s2558_s14  ;;  %s2556_s12 = smov %s2562_s15 }
 0x156   :  { %11 = sbr.rel (!%p9_p13) target bundleno = 3 (0x3), region = 73 }

// kernel: network_forward.15
= control target key start
LH: loop header
LB: loop body
LE: loop exit
PB: predicated region body
PF: predicated region fallthrough
CT: control target
= control target key end

     0   :  { %s923_s9 = smov 0   ;;  %s925_s10 = smov 0   ;;  %s1059_s0 = inlined_call_operand.vmem [shape: bf16[8,8,512], index: 0, kind: input, shape index: {}]   ;;  %s1060_s1 = inlined_call_operand.vmem [shape: bf16[512,128], index: 1, kind: input, shape index: {}]   ;;  %s1061_s2 = inlined_call_operand.vmem [shape: bf16[8,8,128], index: 2, kind: output, shape index: {}]  }
   0x1   :  { %s927_s11 = smov 0  }
   0x2 LB: > { %s27_s12 = sadd.s32 1, %s900_s10  ;;  %p686_p0 = scmp.ge.s32.totalorder %s904_s11, 1  ;;  %s904_s11 = sphi %s927_s11, %s12_s11   ;;  %s900_s10 = sphi %s925_s10, %s1063_s10   ;;  %s896_s9 = sphi %s923_s9, %s1062_s9  }
   0x3   : > { %p29_p1 = scmp.ge.s32.totalorder %s27_s12, 8  ;;  %p157_p2 = scmp.lt.s32.totalorder %s904_s11, 9 }
   0x5   : > { %s1065_s12 = smov (%p29_p1, %s27_s12), 0  ;;  %p158_p3 = pnand %p686_p0, %p157_p2 }
   0x6   : > { %p195_p4 = scmp.lt.s32.totalorder (!%p158_p3), %s896_s9, 7  ;;  %p221_p5 = scmp.eq.s32.totalorder (!%p158_p3), %s896_s9, 0 }
   0x7   : > { %161 = sbr.rel (%p158_p3) target bundleno = 198 (0xc6), region = 28 }
   0xc   : > { %s1067_s9 = smov (!%p195_p4, %s896_s9), 7  ;;  %226 = sbr.rel (!%p221_p5) target bundleno = 17 (0x11), region = 32  ;;  %v906_v0 = vmov (%p221_p5), 0.0  }
   0xd   : > { %s822_s13 = sshll.u32 %s1067_s9, 4  ;;  %s689_s14 = sshll.u32 %s1067_s9, 2  ;;  %227 = vst [vmem:[#allocation3] sm:$0xff] (%p221_p5), %v906_v0 }
   0xe   : > { %s944_s17 = scalar_lea.vmem %s1059_s0, %s822_s13  ;;  %s949_s20 = scalar_lea.vmem %s1061_s2, %s689_s14  ;;  %228 = vst [vmem:[#allocation4] sm:$0xff] (%p221_p5), %v906_v0 }
  0x11 PF: > { %v831_v1 = vld [vmem:[%s1060_s1 + $0x38] sm:$0xff]  ;;  %v830_v5 = vld [vmem:[%s1060_s1 + $0x30] sm:$0xff]  ;;  %v829_v9 = vld [vmem:[%s1060_s1 + $0x28] sm:$0xff]  ;;  %v907_v60 = vmov 0.0  }
  0x12   : > { %v839_v2 = vld [vmem:[%s1060_s1 + $0x78] sm:$0xff]  ;;  %506 = vmatpush.bf16.msra.mxu0 %v831_v1  ;;  %v838_v6 = vld [vmem:[%s1060_s1 + $0x70] sm:$0xff]  ;;  %v837_v10 = vld [vmem:[%s1060_s1 + $0x68] sm:$0xff] }
  0x13   : > { %v847_v3 = vld [vmem:[%s1060_s1 + $0xb8] sm:$0xff]  ;;  %519 = vmatpush.bf16.msra.mxu1 %v839_v2  ;;  %v846_v7 = vld [vmem:[%s1060_s1 + $0xb0] sm:$0xff]  ;;  %v845_v11 = vld [vmem:[%s1060_s1 + $0xa8] sm:$0xff] }
  0x14   : > { %v855_v4 = vld [vmem:[%s1060_s1 + $0xf8] sm:$0xff]  ;;  %532 = vmatpush.bf16.msra.mxu2 %v847_v3  ;;  %v854_v8 = vld [vmem:[%s1060_s1 + $0xf0] sm:$0xff]  ;;  %v853_v12 = vld [vmem:[%s1060_s1 + $0xe8] sm:$0xff] }
  0x15   : > { %545 = vmatpush.bf16.msra.mxu3 %v855_v4  ;;  %v828_v13 = vld [vmem:[%s1060_s1 + $0x20] sm:$0xff]  ;;  %v827_v17 = vld [vmem:[%s1060_s1 + $0x18] sm:$0xff]  ;;  %v826_v21 = vld [vmem:[%s1060_s1 + $0x10] sm:$0xff] }
  0x16   : > { %507 = vmatpush.bf16.msra.mxu0 %v830_v5  ;;  %v836_v14 = vld [vmem:[%s1060_s1 + $0x60] sm:$0xff]  ;;  %v835_v18 = vld [vmem:[%s1060_s1 + $0x58] sm:$0xff]  ;;  %v834_v22 = vld [vmem:[%s1060_s1 + $0x50] sm:$0xff] }
  0x17   : > { %520 = vmatpush.bf16.msra.mxu1 %v838_v6  ;;  %v844_v15 = vld [vmem:[%s1060_s1 + $0xa0] sm:$0xff]  ;;  %v843_v19 = vld [vmem:[%s1060_s1 + $0x98] sm:$0xff]  ;;  %v842_v23 = vld [vmem:[%s1060_s1 + $0x90] sm:$0xff] }
  0x18   : > { %533 = vmatpush.bf16.msra.mxu2 %v846_v7  ;;  %v852_v16 = vld [vmem:[%s1060_s1 + $0xe0] sm:$0xff]  ;;  %v851_v20 = vld [vmem:[%s1060_s1 + $0xd8] sm:$0xff]  ;;  %v850_v24 = vld [vmem:[%s1060_s1 + $0xd0] sm:$0xff] }
  0x19   : > { %546 = vmatpush.bf16.msra.mxu3 %v854_v8  ;;  %v825_v25 = vld [vmem:[%s1060_s1 + $0x8] sm:$0xff]  ;;  %v234_v27 = vld [vmem:[%s944_s17] sm:$0xff] }
  0x1a   : > { %508 = vmatpush.bf16.msra.mxu0 %v829_v9  ;;  %v833_v26 = vld [vmem:[%s1060_s1 + $0x48] sm:$0xff]  ;;  %v302_v31 = vunpack.c.l.b16 %v234_v27  ;;  %v303_v32 = vunpack.c.h.b16 %v234_v27  ;;  %v824_v33 = vld [vmem:[%s1060_s1] sm:$0xff] }
  0x1b   : > { %521 = vmatpush.bf16.msra.mxu1 %v837_v10  ;;  %v841_v28 = vld [vmem:[%s1060_s1 + $0x88] sm:$0xff]  ;;  %v832_v34 = vld [vmem:[%s1060_s1 + $0x40] sm:$0xff] }
  0x1c   : > { %534 = vmatpush.bf16.msra.mxu2 %v845_v11  ;;  %v849_v29 = vld [vmem:[%s1060_s1 + $0xc8] sm:$0xff]  ;;  %v840_v37 = vld [vmem:[%s1060_s1 + $0x80] sm:$0xff]  ;;  %v306_v39 = vpack.c.b16 %v302_v31, %v302_v31  ;;  %v307_v40 = vpack.c.b16 %v303_v32, %v303_v32 }
  0x1d   : > { %547 = vmatpush.bf16.msra.mxu3 %v853_v12  ;;  %v235_v30 = vld [vmem:[%s944_s17 + $0x8] sm:$0xff]  ;;  %v848_v38 = vld [vmem:[%s1060_s1 + $0xc0] sm:$0xff] }
  0x1e   : > { %509 = vmatpush.bf16.msra.mxu0 %v828_v13  ;;  %v304_v35 = vunpack.c.l.b16 %v235_v30  ;;  %v305_v36 = vunpack.c.h.b16 %v235_v30  ;;  %v563_v46 = vld [vmem:[#allocation3] sm:$0xff]  ;;  %v567_v49 = vld [vmem:[#allocation4] sm:$0xff] }
  0x1f   : > { %522 = vmatpush.bf16.msra.mxu1 %v836_v14  ;;  %v564_v51 = vmul.f32 0.75, %v563_v46  ;;  %v568_v55 = vmul.f32 0.97, %v567_v49 }
  0x20   : > { %535 = vmatpush.bf16.msra.mxu2 %v844_v15  ;;  %v308_v41 = vpack.c.b16 %v304_v35, %v304_v35  ;;  %v309_v42 = vpack.c.b16 %v305_v36, %v305_v36 }
  0x21   : > { %548 = vmatpush.bf16.msra.mxu3 %v852_v16 }
  0x22   : > { %510 = vmatpush.bf16.msra.mxu0 %v827_v17 }
  0x23   : > { %523 = vmatpush.bf16.msra.mxu1 %v835_v18 }
  0x24   : > { %536 = vmatpush.bf16.msra.mxu2 %v843_v19 }
  0x25   : > { %549 = vmatpush.bf16.msra.mxu3 %v851_v20 }
  0x26   : > { %511 = vmatpush.bf16.msra.mxu0 %v826_v21 }
  0x27   : > { %524 = vmatpush.bf16.msra.mxu1 %v834_v22 }
  0x28   : > { %537 = vmatpush.bf16.msra.mxu2 %v842_v23 }
  0x29   : > { %550 = vmatpush.bf16.msra.mxu3 %v850_v24 }
  0x2a   : > { %512 = vmatpush.bf16.msra.mxu0 %v825_v25 }
  0x2b   : > { %525 = vmatpush.bf16.msra.mxu1 %v833_v26 }
  0x2c   : > { %538 = vmatpush.bf16.msra.mxu2 %v841_v28 }
  0x2d   : > { %551 = vmatpush.bf16.msra.mxu3 %v849_v29 }
  0x2e   : > { %513 = vmatpush.bf16.msra.mxu0 %v824_v33 }
  0x2f   : > { %526 = vmatpush.bf16.msra.mxu1 %v832_v34 }
  0x30   : > { %539 = vmatpush.bf16.msra.mxu2 %v840_v37 }
  0x31   : > { %552 = vmatpush.bf16.msra.mxu3 %v848_v38  ;;  %514 = vmatmul.bf16.vlgmr.msra.gmra.mxu0 %v306_v39 }
  0x32   : > { %527 = vmatmul.bf16.vlgmr.msra.gmra.mxu1 %v307_v40 }
  0x33   : > { %540 = vmatmul.bf16.vlgmr.msra.gmra.mxu2 %v308_v41 }
  0x34   : > { %553 = vmatmul.bf16.vlgmr.msra.gmra.mxu3 %v309_v42 }
  0xae   : > { %v515_v43 = vpop.f32.mrf.mxu0 }
  0xaf   : > { %v528_v44 = vpop.f32.mrf.mxu1 }
  0xb0   : > { %v529_v45 = vadd.f32 %v528_v44, %v515_v43 }
  0xb6   : > { %v541_v47 = vpop.f32.mrf.mxu2  ;;  %v517_v52 = vpop.f32.mrf.mxu0 }
  0xb7   : > { %v554_v48 = vpop.f32.mrf.mxu3  ;;  %v542_v50 = vadd.f32 %v541_v47, %v529_v45  ;;  %v530_v53 = vpop.f32.mrf.mxu1 }
  0xb9   : > { %v555_v54 = vadd.f32 %v554_v48, %v542_v50 }
  0xbb   : > { %v566_v56 = vadd.f32 %v564_v51, %v555_v54 }
  0xbd   : > { %v569_v57 = vadd.f32 %v568_v55, %v566_v56  ;;  %573 = vst [vmem:[#allocation3] sm:$0xff] %v566_v56 }
  0xbe   : > { %v543_v58 = vpop.f32.mrf.mxu2 }
  0xbf   : > { %v556_v59 = vpop.f32.mrf.mxu3  ;;  %vm570_vm0 = vcmp.ge.f32.partialorder %v569_v57, 1.25 }
  0xc0   : > { %v819_v61 = vsel %vm570_vm0, 1.0, %v907_v60 }
  0xc1   : > { %v574_v62 = vsub.f32 1.0, %v819_v61  ;;  %v577_v63 = vpack.c.bf16 %v819_v61, %v819_v61 }
  0xc3   : > { %v575_v0 = vmul.f32 %v574_v62, %v569_v57  ;;  %578 = vst [vmem:[%s949_s20] sm:$0xf] %v577_v63 }
  0xc5   : > { %576 = vst [vmem:[#allocation4] sm:$0xff] %v575_v0 }
  0xc6 PF: > { %s12_s11 = sadd.s32 1, %s904_s11   ;;  %s1062_s9 = smov %s900_s10 }
  0xc7   : > { %p9_p6 = scmp.ge.s32.totalorder %s12_s11, 10   ;;  %s1063_s10 = smov %s1065_s12 }
  0xc9   :  { %11 = sbr.rel (!%p9_p6) target bundleno = 2 (0x2), region = 73 }

</bundles_post_ra>
